<compile_context>
chip_gen: v7x
topology: tpu7x:2x2x1
jax: 0.10.0
libtpu: 0.0.40
codegen_flags: <defaults>
</compile_context>

<pallas_src>
import jax
import jax.numpy as jnp
from jax.experimental import pallas as pl
from jax.experimental.pallas import tpu as pltpu

LANE = 128
MM_BLOCK_M = 256     # M tile for matmuls (>=2 tiles at M=512 -> both v7x TCs on parallel calls)
EW_BLOCK_R = 512     # row tile for elementwise kernels


def _round_up(x, m):
    return (x + m - 1) // m * m


def _pad_rows(x, rows_p):
    rows = x.shape[0]
    if rows_p == rows:
        return x
    return jnp.zeros((rows_p,) + x.shape[1:], x.dtype).at[:rows].set(x)


# ---------------------------------------------------------------------------
# Pallas kernels
# ---------------------------------------------------------------------------
def _matmul_bias_kernel(a_ref, b_ref, bias_ref, o_ref):
    # bf16 x bf16 -> f32 accumulation on the MXU; bias broadcast-added.
    o_ref[...] = jnp.dot(a_ref[...], b_ref[...],
                         preferred_element_type=jnp.float32) + bias_ref[...]


def _matmul_stats_kernel(a_ref, b_ref, o_ref, sum_ref, sq_ref):
    # Conv matmul with fused per-output-channel sum / sum-of-squares for the
    # following train-mode BatchNorm (accumulated across the M grid axis).
    i = pl.program_id(0)
    y = jnp.dot(a_ref[...], b_ref[...], preferred_element_type=jnp.float32)
    o_ref[...] = y

    @pl.when(i == 0)
    def _():
        sum_ref[...] = jnp.zeros_like(sum_ref)
        sq_ref[...] = jnp.zeros_like(sq_ref)

    sum_ref[...] += jnp.sum(y, axis=0, keepdims=True)
    sq_ref[...] += jnp.sum(y * y, axis=0, keepdims=True)


def _affine_relu_kernel(x_ref, s_ref, t_ref, o_ref):
    o_ref[...] = jnp.maximum(x_ref[...] * s_ref[...] + t_ref[...], 0.0)


def _max4_kernel(a_ref, b_ref, c_ref, d_ref, o_ref):
    o_ref[...] = jnp.maximum(jnp.maximum(a_ref[...], b_ref[...]),
                             jnp.maximum(c_ref[...], d_ref[...]))


# ---------------------------------------------------------------------------
# Pallas wrappers
# ---------------------------------------------------------------------------
def pallas_matmul_bias(a, b, bias, block_m=MM_BLOCK_M):
    """Y = A @ B + bias.  A:(M,K) bf16, B:(K,N) bf16, bias:(N,) -> Y:(M,N) f32.

    Full-extent K/N blocks (no zero padding of the contraction / channel dims).
    """
    M, K = a.shape
    N = b.shape[1]
    bm = M if M <= block_m else block_m
    Mp = _round_up(M, bm)
    ap = _pad_rows(a, Mp)
    bias2 = bias.reshape(1, N).astype(jnp.float32)

    y = pl.pallas_call(
        _matmul_bias_kernel,
        out_shape=jax.ShapeDtypeStruct((Mp, N), jnp.float32),
        grid_spec=pltpu.PrefetchScalarGridSpec(
            num_scalar_prefetch=0,
            grid=(Mp // bm,),
            in_specs=[
                pl.BlockSpec((bm, K), lambda i: (i, 0)),
                pl.BlockSpec((K, N), lambda i: (0, 0)),
                pl.BlockSpec((1, N), lambda i: (0, 0)),
            ],
            out_specs=pl.BlockSpec((bm, N), lambda i: (i, 0)),
        ),
        compiler_params=pltpu.CompilerParams(
            dimension_semantics=("parallel",)),
    )(ap, b, bias2)
    return y[:M]


def pallas_matmul_stats(a, b, block_m=MM_BLOCK_M):
    """Y = A @ B (bias omitted: cancelled by train-mode BN) plus fused
    per-channel sum / sum-of-squares accumulated across the M grid axis."""
    M, K = a.shape
    N = b.shape[1]
    bm = M if M <= block_m else block_m
    Mp = _round_up(M, bm)
    ap = _pad_rows(a, Mp)      # zero rows contribute 0 to both statistics

    y, s, ss = pl.pallas_call(
        _matmul_stats_kernel,
        out_shape=(jax.ShapeDtypeStruct((Mp, N), jnp.float32),
                   jax.ShapeDtypeStruct((1, N), jnp.float32),
                   jax.ShapeDtypeStruct((1, N), jnp.float32)),
        grid_spec=pltpu.PrefetchScalarGridSpec(
            num_scalar_prefetch=0,
            grid=(Mp // bm,),
            in_specs=[
                pl.BlockSpec((bm, K), lambda i: (i, 0)),
                pl.BlockSpec((K, N), lambda i: (0, 0)),
            ],
            out_specs=(pl.BlockSpec((bm, N), lambda i: (i, 0)),
                       pl.BlockSpec((1, N), lambda i: (0, 0)),
                       pl.BlockSpec((1, N), lambda i: (0, 0))),
        ),
        compiler_params=pltpu.CompilerParams(
            dimension_semantics=("arbitrary",)),   # stats accumulate across M tiles
    )(ap, b)
    return y[:M], s[0], ss[0]


def pallas_affine_relu(y2, scale, shift):
    """relu(y2 * scale + shift) with per-channel scale/shift, lane-dense layout."""
    M, C = y2.shape
    y2 = y2.astype(jnp.float32)
    scale = scale.astype(jnp.float32)
    shift = shift.astype(jnp.float32)

    if C % LANE == 0:                       # already lane-dense
        xr, sr, tr, mode = y2, scale, shift, "direct"
    elif LANE % C == 0 and (M * C) % LANE == 0:
        reps = LANE // C                    # channels cycle along the lane dim
        xr = y2.reshape((M * C) // LANE, LANE)
        sr = jnp.tile(scale, reps)
        tr = jnp.tile(shift, reps)
        mode = "packed"
    else:                                   # fallback: pad channels
        Cp = _round_up(C, LANE)
        xr = jnp.zeros((M, Cp), jnp.float32).at[:, :C].set(y2)
        sr = jnp.zeros((Cp,), jnp.float32).at[:C].set(scale)
        tr = jnp.zeros((Cp,), jnp.float32).at[:C].set(shift)
        mode = "padded"

    R, L = xr.shape
    br = R if R <= EW_BLOCK_R else EW_BLOCK_R
    Rp = _round_up(R, br)
    xr = _pad_rows(xr, Rp)

    out = pl.pallas_call(
        _affine_relu_kernel,
        out_shape=jax.ShapeDtypeStruct((Rp, L), jnp.float32),
        grid_spec=pltpu.PrefetchScalarGridSpec(
            num_scalar_prefetch=0,
            grid=(Rp // br,),
            in_specs=[
                pl.BlockSpec((br, L), lambda i: (i, 0)),
                pl.BlockSpec((1, L), lambda i: (0, 0)),
                pl.BlockSpec((1, L), lambda i: (0, 0)),
            ],
            out_specs=pl.BlockSpec((br, L), lambda i: (i, 0)),
        ),
        compiler_params=pltpu.CompilerParams(
            dimension_semantics=("parallel",)),
    )(xr, sr.reshape(1, L), tr.reshape(1, L))

    out = out[:R]
    if mode == "packed":
        return out.reshape(M, C)
    if mode == "padded":
        return out[:, :C]
    return out


def pallas_max4(a, b, c, d):
    """Elementwise max of four (M, C) arrays, lane-dense layout."""
    M, C = a.shape
    ops = [x.astype(jnp.float32) for x in (a, b, c, d)]

    if (M * C) % LANE == 0:
        R, L = (M * C) // LANE, LANE
        ops = [x.reshape(R, L) for x in ops]
        mode = "packed"
    elif C % LANE == 0:
        R, L, mode = M, C, "direct"
    else:
        Cp = _round_up(C, LANE)
        R, L = M, Cp
        ops = [jnp.zeros((M, Cp), jnp.float32).at[:, :C].set(x) for x in ops]
        mode = "padded"

    br = R if R <= EW_BLOCK_R else EW_BLOCK_R
    Rp = _round_up(R, br)
    ops = [_pad_rows(x, Rp) for x in ops]

    out = pl.pallas_call(
        _max4_kernel,
        out_shape=jax.ShapeDtypeStruct((Rp, L), jnp.float32),
        grid_spec=pltpu.PrefetchScalarGridSpec(
            num_scalar_prefetch=0,
            grid=(Rp // br,),
            in_specs=[pl.BlockSpec((br, L), lambda i: (i, 0))] * 4,
            out_specs=pl.BlockSpec((br, L), lambda i: (i, 0)),
        ),
        compiler_params=pltpu.CompilerParams(
            dimension_semantics=("parallel",)),
    )(*ops)

    out = out[:R]
    if mode == "packed":
        return out.reshape(M, C)
    if mode == "padded":
        return out[:, :C]
    return out


# ---------------------------------------------------------------------------
# Layer glue (NHWC)
# ---------------------------------------------------------------------------
def conv3x3_bn_relu(x, wt, gamma, beta, eps=1e-5):
    """3x3 conv (pad 1, stride 1, bias dropped: cancelled by train-mode BN)
    + BatchNorm (batch statistics) + ReLU."""
    N, H, W, C = x.shape
    Cout = wt.shape[1]
    xb = x.astype(jnp.bfloat16)
    xp = jnp.pad(xb, ((0, 0), (1, 1), (1, 1), (0, 0)))
    # TODO(synk): fuse the 9 conv taps in-kernel (halo blocks) to avoid the 9x
    # bf16 im2col intermediate; kept as XLA glue here for lowering robustness.
    patches = jnp.stack(
        [xp[:, kh:kh + H, kw:kw + W, :] for kh in range(3) for kw in range(3)],
        axis=3)                                           # (N,H,W,9,Cin) bf16
    a = patches.reshape(N * H * W, 9 * C)

    y, s, ss = pallas_matmul_stats(a, wt)                 # conv + fused BN stats
    count = float(N * H * W)
    mean = s / count
    var = jnp.maximum(ss / count - mean * mean, 0.0)      # clamp: avoid cancellation
    inv = jax.lax.rsqrt(var + eps)
    scale = gamma * inv
    shift = beta - mean * scale

    out = pallas_affine_relu(y, scale, shift)
    return out.reshape(N, H, W, Cout)


def double_conv_block(x, p):
    x = conv3x3_bn_relu(x, p["wt1"], p["g1"], p["be1"])
    x = conv3x3_bn_relu(x, p["wt2"], p["g2"], p["be2"])
    return x


def conv1x1(x, wt, bias):
    N, H, W, C = x.shape
    Cout = wt.shape[1]
    a = x.reshape(-1, C).astype(jnp.bfloat16)
    return pallas_matmul_bias(a, wt, bias).reshape(N, H, W, Cout)


def convT2x2(x, wt, bias4):
    # wt: (Cin, 4*Cout) bf16, columns ordered (kh, kw, cout); bias4: (4*Cout,)
    N, H, W, C = x.shape
    Cout = wt.shape[1] // 4
    a = x.reshape(-1, C).astype(jnp.bfloat16)
    out = pallas_matmul_bias(a, wt, bias4)                 # (N*H*W, 4*Cout)
    out = out.reshape(N, H, W, 2, 2, Cout)
    out = jnp.transpose(out, (0, 1, 3, 2, 4, 5)).reshape(N, 2 * H, 2 * W, Cout)
    return out


def maxpool2(x):
    N, H, W, C = x.shape
    xr = x.reshape(N, H // 2, 2, W // 2, 2, C)             # one free reshape; no pad copies
    a = xr[:, :, 0, :, 0, :].reshape(-1, C)
    b = xr[:, :, 0, :, 1, :].reshape(-1, C)
    c = xr[:, :, 1, :, 0, :].reshape(-1, C)
    d = xr[:, :, 1, :, 1, :].reshape(-1, C)
    return pallas_max4(a, b, c, d).reshape(N, H // 2, W // 2, C)


# ---------------------------------------------------------------------------
# Parameter init (weights pre-transposed / pre-cast to matmul layout once)
# ---------------------------------------------------------------------------
def _prep_conv3x3(w):
    cout, cin = w.shape[0], w.shape[1]
    return jnp.transpose(w, (2, 3, 1, 0)).reshape(9 * cin, cout).astype(jnp.bfloat16)


def _conv3x3_block_params(key, cin, cout):
    k1, k2 = jax.random.split(key)
    b1 = 1.0 / (cin * 9) ** 0.5
    b2 = 1.0 / (cout * 9) ** 0.5
    w1 = jax.random.uniform(k1, (cout, cin, 3, 3), jnp.float32, -b1, b1)
    w2 = jax.random.uniform(k2, (cout, cout, 3, 3), jnp.float32, -b2, b2)
    # conv biases before train-mode BatchNorm are exactly cancelled -> omitted
    return dict(wt1=_prep_conv3x3(w1), g1=jnp.ones(cout, jnp.float32),
                be1=jnp.zeros(cout, jnp.float32),
                wt2=_prep_conv3x3(w2), g2=jnp.ones(cout, jnp.float32),
                be2=jnp.zeros(cout, jnp.float32))


def _convT_params(key, cin, cout):
    k1, k2 = jax.random.split(key)
    bound = 1.0 / (cout * 4) ** 0.5
    w = jax.random.uniform(k1, (cin, cout, 2, 2), jnp.float32, -bound, bound)
    b = jax.random.uniform(k2, (cout,), jnp.float32, -bound, bound)
    wt = jnp.transpose(w, (0, 2, 3, 1)).reshape(cin, 4 * cout).astype(jnp.bfloat16)
    return wt, jnp.tile(b, 4)


def _conv1x1_params(key, cin, cout):
    k1, k2 = jax.random.split(key)
    bound = 1.0 / cin ** 0.5
    w = jax.random.uniform(k1, (cout, cin), jnp.float32, -bound, bound)
    b = jax.random.uniform(k2, (cout,), jnp.float32, -bound, bound)
    return jnp.transpose(w, (1, 0)).astype(jnp.bfloat16), b


def init_runet_params(key, in_features=3, out_features=2, features=8):
    ks = jax.random.split(key, 14)
    f = features
    P = {}
    P["e1"] = _conv3x3_block_params(ks[0], in_features, f)
    P["e2"] = _conv3x3_block_params(ks[1], f, 2 * f)
    P["e3"] = _conv3x3_block_params(ks[2], 2 * f, 4 * f)
    P["e4"] = _conv3x3_block_params(ks[3], 4 * f, 8 * f)
    P["bott"] = _conv3x3_block_params(ks[4], 8 * f, 16 * f)
    P["u4"] = _convT_params(ks[5], 16 * f, 8 * f)
    P["d4"] = _conv3x3_block_params(ks[6], 16 * f, 8 * f)
    P["u3"] = _convT_params(ks[7], 8 * f, 4 * f)
    P["d3"] = _conv3x3_block_params(ks[8], 8 * f, 4 * f)
    P["u2"] = _convT_params(ks[9], 4 * f, 2 * f)
    P["d2"] = _conv3x3_block_params(ks[10], 4 * f, 2 * f)
    P["u1"] = _convT_params(ks[11], 2 * f, f)
    P["d1"] = _conv3x3_block_params(ks[12], 2 * f, f)
    P["out"] = _conv1x1_params(ks[13], f, out_features)
    return P


# ---------------------------------------------------------------------------
# Runet forward (NCHW in / NCHW out, matching the PyTorch reference)
# ---------------------------------------------------------------------------
@jax.jit
def runet_forward(params, x_nchw):
    x = jnp.transpose(x_nchw.astype(jnp.float32), (0, 2, 3, 1))   # -> NHWC

    enc1 = double_conv_block(x, params["e1"])
    enc2 = double_conv_block(maxpool2(enc1), params["e2"])
    enc3 = double_conv_block(maxpool2(enc2), params["e3"])
    enc4 = double_conv_block(maxpool2(enc3), params["e4"])
    bott = double_conv_block(maxpool2(enc4), params["bott"])

    d4 = convT2x2(bott, *params["u4"])
    d4 = double_conv_block(jnp.concatenate([d4, enc4], axis=-1), params["d4"])

    d3 = convT2x2(d4, *params["u3"])
    d3 = double_conv_block(jnp.concatenate([d3, enc3], axis=-1), params["d3"])

    d2 = convT2x2(d3, *params["u2"])
    d2 = double_conv_block(jnp.concatenate([d2, enc2], axis=-1), params["d2"])

    d1 = convT2x2(d2, *params["u1"])
    d1 = double_conv_block(jnp.concatenate([d1, enc1], axis=-1), params["d1"])

    out = conv1x1(d1, *params["out"])
    return jnp.transpose(out, (0, 3, 1, 2))                       # -> NCHW


if __name__ == "__main__":
    key = jax.random.PRNGKey(0)
    kp, kx = jax.random.split(key)

    in_features, out_features, features = 3, 2, 8   # small init_features for test
    params = init_runet_params(kp, in_features, out_features, features)

    x = jax.random.normal(kx, (2, in_features, 16, 16), jnp.float32)  # NCHW

    y = runet_forward(params, x)
    y = jax.block_until_ready(y)
    assert y.shape == (2, out_features, 16, 16), y.shape
    assert bool(jnp.all(jnp.isfinite(y)))
    print("KERNEL_OK")
</pallas_src>

<mosaic_0001>
module attributes {stable_mosaic.version = 11 : i64} {
  func.func @_matmul_stats_kernel(%arg0: i32, %arg1: memref<256x27xbf16, #tpu.memory_space<vmem>>, %arg2: memref<27x8xbf16, #tpu.memory_space<vmem>>, %arg3: memref<256x8xf32, #tpu.memory_space<vmem>>, %arg4: memref<1x8xf32, #tpu.memory_space<vmem>>, %arg5: memref<1x8xf32, #tpu.memory_space<vmem>>) attributes {dimension_semantics = [#tpu.dimension_semantics<arbitrary>], iteration_bounds = array<i64: 2>, scalar_prefetch = 0 : i64, scratch_operands = 0 : i64, tpu.core_type = #tpu.core_type<tc>, window_params = [{transform_indices = @transform_0, window_bounds = array<i64: 256, 27>}, {pipeline_mode = #tpu.pipeline_mode<synchronous>, transform_indices = @transform_1, window_bounds = array<i64: 27, 8>}, {transform_indices = @transform_2, window_bounds = array<i64: 256, 8>}, {pipeline_mode = #tpu.pipeline_mode<synchronous>, transform_indices = @transform_3, window_bounds = array<i64: 1, 8>}, {pipeline_mode = #tpu.pipeline_mode<synchronous>, transform_indices = @transform_4, window_bounds = array<i64: 1, 8>}]} {
    %c0 = arith.constant 0 : index
    %c0_0 = arith.constant 0 : index
    %0 = vector.load %arg1[%c0, %c0_0] : memref<256x27xbf16, #tpu.memory_space<vmem>>, vector<256x27xbf16>
    %c0_1 = arith.constant 0 : index
    %c0_2 = arith.constant 0 : index
    %1 = vector.load %arg2[%c0_1, %c0_2] : memref<27x8xbf16, #tpu.memory_space<vmem>>, vector<27x8xbf16>
    %cst = arith.constant dense<0.000000e+00> : vector<256x8xf32>
    %2 = tpu.matmul %0, %1, %cst {dimension_numbers = #tpu.dot_dimension_numbers<[1], [0], [0], [1], [0, 0, 1, 1], [], []>} : vector<256x27xbf16>, vector<27x8xbf16>, vector<256x8xf32> -> vector<256x8xf32>
    %c0_3 = arith.constant 0 : index
    %c0_4 = arith.constant 0 : index
    %3 = vector.load %arg3[%c0_3, %c0_4] : memref<256x8xf32, #tpu.memory_space<vmem>>, vector<256x8xf32>
    tpu.vector_store %arg3[%c0_3, %c0_4], %2 {strides = array<i32>} : memref<256x8xf32, #tpu.memory_space<vmem>>, vector<256x8xf32>,
    %c0_i32 = arith.constant 0 : i32
    %4 = arith.cmpi eq, %arg0, %c0_i32 : i32
    %5 = arith.extui %4 : i1 to i32
    %c0_i32_5 = arith.constant 0 : i32
    %6 = arith.cmpi ne, %5, %c0_i32_5 : i32
    scf.if %6 {
      %cst_16 = arith.constant 0.000000e+00 : f32
      %18 = vector.broadcast %cst_16 : f32 to vector<1x8xf32>
      %c0_17 = arith.constant 0 : index
      %c0_18 = arith.constant 0 : index
      %19 = vector.load %arg4[%c0_17, %c0_18] : memref<1x8xf32, #tpu.memory_space<vmem>>, vector<1x8xf32>
      tpu.vector_store %arg4[%c0_17, %c0_18], %18 {strides = array<i32>} : memref<1x8xf32, #tpu.memory_space<vmem>>, vector<1x8xf32>,
      %cst_19 = arith.constant 0.000000e+00 : f32
      %20 = vector.broadcast %cst_19 : f32 to vector<1x8xf32>
      %c0_20 = arith.constant 0 : index
      %c0_21 = arith.constant 0 : index
      %21 = vector.load %arg5[%c0_20, %c0_21] : memref<1x8xf32, #tpu.memory_space<vmem>>, vector<1x8xf32>
      tpu.vector_store %arg5[%c0_20, %c0_21], %20 {strides = array<i32>} : memref<1x8xf32, #tpu.memory_space<vmem>>, vector<1x8xf32>,
    } else {
    }
    %c0_6 = arith.constant 0 : index
    %c0_7 = arith.constant 0 : index
    %7 = vector.load %arg4[%c0_6, %c0_7] : memref<1x8xf32, #tpu.memory_space<vmem>>, vector<1x8xf32>
    %cst_8 = arith.constant dense<0.000000e+00> : vector<8xf32>
    %8 = vector.multi_reduction <add>, %2, %cst_8 [0] : vector<256x8xf32> to vector<8xf32>
    %9 = vector.shape_cast %8 : vector<8xf32> to vector<1x8xf32>
    %10 = arith.addf %7, %9 : vector<1x8xf32>
    %c0_9 = arith.constant 0 : index
    %c0_10 = arith.constant 0 : index
    %11 = vector.load %arg4[%c0_9, %c0_10] : memref<1x8xf32, #tpu.memory_space<vmem>>, vector<1x8xf32>
    tpu.vector_store %arg4[%c0_9, %c0_10], %10 {strides = array<i32>} : memref<1x8xf32, #tpu.memory_space<vmem>>, vector<1x8xf32>,
    %c0_11 = arith.constant 0 : index
    %c0_12 = arith.constant 0 : index
    %12 = vector.load %arg5[%c0_11, %c0_12] : memref<1x8xf32, #tpu.memory_space<vmem>>, vector<1x8xf32>
    %13 = arith.mulf %2, %2 : vector<256x8xf32>
    %cst_13 = arith.constant dense<0.000000e+00> : vector<8xf32>
    %14 = vector.multi_reduction <add>, %13, %cst_13 [0] : vector<256x8xf32> to vector<8xf32>
    %15 = vector.shape_cast %14 : vector<8xf32> to vector<1x8xf32>
    %16 = arith.addf %12, %15 : vector<1x8xf32>
    %c0_14 = arith.constant 0 : index
    %c0_15 = arith.constant 0 : index
    %17 = vector.load %arg5[%c0_14, %c0_15] : memref<1x8xf32, #tpu.memory_space<vmem>>, vector<1x8xf32>
    tpu.vector_store %arg5[%c0_14, %c0_15], %16 {strides = array<i32>} : memref<1x8xf32, #tpu.memory_space<vmem>>, vector<1x8xf32>,
    return
  }
  func.func @transform_0(%arg0: i32) -> (i32, i32) {
    %c0_i32 = arith.constant 0 : i32
    %c0_i32_0 = arith.constant 0 : i32
    return %arg0, %c0_i32 : i32, i32
  }
  func.func @transform_1(%arg0: i32) -> (i32, i32) {
    %c0_i32 = arith.constant 0 : i32
    %c0_i32_0 = arith.constant 0 : i32
    %c0_i32_1 = arith.constant 0 : i32
    return %c0_i32, %c0_i32_0 : i32, i32
  }
  func.func @transform_2(%arg0: i32) -> (i32, i32) {
    %c0_i32 = arith.constant 0 : i32
    %c0_i32_0 = arith.constant 0 : i32
    return %arg0, %c0_i32 : i32, i32
  }
  func.func @transform_3(%arg0: i32) -> (i32, i32) {
    %c0_i32 = arith.constant 0 : i32
    %c0_i32_0 = arith.constant 0 : i32
    %c0_i32_1 = arith.constant 0 : i32
    return %c0_i32, %c0_i32_0 : i32, i32
  }
  func.func @transform_4(%arg0: i32) -> (i32, i32) {
    %c0_i32 = arith.constant 0 : i32
    %c0_i32_0 = arith.constant 0 : i32
    %c0_i32_1 = arith.constant 0 : i32
    return %c0_i32, %c0_i32_0 : i32, i32
  }
}

module attributes {stable_mosaic.version = 11 : i64} {
  func.func @_affine_relu_kernel(%arg0: i32, %arg1: memref<32x128xf32, #tpu.memory_space<vmem>>, %arg2: memref<1x128xf32, #tpu.memory_space<vmem>>, %arg3: memref<1x128xf32, #tpu.memory_space<vmem>>, %arg4: memref<32x128xf32, #tpu.memory_space<vmem>>) attributes {dimension_semantics = [#tpu.dimension_semantics<parallel>], iteration_bounds = array<i64: 1>, scalar_prefetch = 0 : i64, scratch_operands = 0 : i64, tpu.core_type = #tpu.core_type<tc>, window_params = [{transform_indices = @transform_0, window_bounds = array<i64: 32, 128>}, {pipeline_mode = #tpu.pipeline_mode<synchronous>, transform_indices = @transform_1, window_bounds = array<i64: 1, 128>}, {pipeline_mode = #tpu.pipeline_mode<synchronous>, transform_indices = @transform_2, window_bounds = array<i64: 1, 128>}, {transform_indices = @transform_3, window_bounds = array<i64: 32, 128>}]} {
    %c0 = arith.constant 0 : index
    %c0_0 = arith.constant 0 : index
    %0 = vector.load %arg1[%c0, %c0_0] : memref<32x128xf32, #tpu.memory_space<vmem>>, vector<32x128xf32>
    %c0_1 = arith.constant 0 : index
    %c0_2 = arith.constant 0 : index
    %1 = vector.load %arg2[%c0_1, %c0_2] : memref<1x128xf32, #tpu.memory_space<vmem>>, vector<1x128xf32>
    %2 = vector.broadcast %1 : vector<1x128xf32> to vector<32x128xf32>
    %3 = arith.mulf %0, %2 : vector<32x128xf32>
    %c0_3 = arith.constant 0 : index
    %c0_4 = arith.constant 0 : index
    %4 = vector.load %arg3[%c0_3, %c0_4] : memref<1x128xf32, #tpu.memory_space<vmem>>, vector<1x128xf32>
    %5 = vector.broadcast %4 : vector<1x128xf32> to vector<32x128xf32>
    %6 = arith.addf %3, %5 : vector<32x128xf32>
    %cst = arith.constant 0.000000e+00 : f32
    %7 = vector.broadcast %cst : f32 to vector<32x128xf32>
    %8 = arith.maximumf %6, %7 : vector<32x128xf32>
    %c0_5 = arith.constant 0 : index
    %c0_6 = arith.constant 0 : index
    %9 = vector.load %arg4[%c0_5, %c0_6] : memref<32x128xf32, #tpu.memory_space<vmem>>, vector<32x128xf32>
    tpu.vector_store %arg4[%c0_5, %c0_6], %8 {strides = array<i32>} : memref<32x128xf32, #tpu.memory_space<vmem>>, vector<32x128xf32>,
    return
  }
  func.func @transform_0(%arg0: i32) -> (i32, i32) {
    %c0_i32 = arith.constant 0 : i32
    %c0_i32_0 = arith.constant 0 : i32
    return %arg0, %c0_i32 : i32, i32
  }
  func.func @transform_1(%arg0: i32) -> (i32, i32) {
    %c0_i32 = arith.constant 0 : i32
    %c0_i32_0 = arith.constant 0 : i32
    %c0_i32_1 = arith.constant 0 : i32
    return %c0_i32, %c0_i32_0 : i32, i32
  }
  func.func @transform_2(%arg0: i32) -> (i32, i32) {
    %c0_i32 = arith.constant 0 : i32
    %c0_i32_0 = arith.constant 0 : i32
    %c0_i32_1 = arith.constant 0 : i32
    return %c0_i32, %c0_i32_0 : i32, i32
  }
  func.func @transform_3(%arg0: i32) -> (i32, i32) {
    %c0_i32 = arith.constant 0 : i32
    %c0_i32_0 = arith.constant 0 : i32
    return %arg0, %c0_i32 : i32, i32
  }
}

module attributes {stable_mosaic.version = 11 : i64} {
  func.func @_matmul_stats_kernel(%arg0: i32, %arg1: memref<256x72xbf16, #tpu.memory_space<vmem>>, %arg2: memref<72x8xbf16, #tpu.memory_space<vmem>>, %arg3: memref<256x8xf32, #tpu.memory_space<vmem>>, %arg4: memref<1x8xf32, #tpu.memory_space<vmem>>, %arg5: memref<1x8xf32, #tpu.memory_space<vmem>>) attributes {dimension_semantics = [#tpu.dimension_semantics<arbitrary>], iteration_bounds = array<i64: 2>, scalar_prefetch = 0 : i64, scratch_operands = 0 : i64, tpu.core_type = #tpu.core_type<tc>, window_params = [{transform_indices = @transform_0, window_bounds = array<i64: 256, 72>}, {pipeline_mode = #tpu.pipeline_mode<synchronous>, transform_indices = @transform_1, window_bounds = array<i64: 72, 8>}, {transform_indices = @transform_2, window_bounds = array<i64: 256, 8>}, {pipeline_mode = #tpu.pipeline_mode<synchronous>, transform_indices = @transform_3, window_bounds = array<i64: 1, 8>}, {pipeline_mode = #tpu.pipeline_mode<synchronous>, transform_indices = @transform_4, window_bounds = array<i64: 1, 8>}]} {
    %c0 = arith.constant 0 : index
    %c0_0 = arith.constant 0 : index
    %0 = vector.load %arg1[%c0, %c0_0] : memref<256x72xbf16, #tpu.memory_space<vmem>>, vector<256x72xbf16>
    %c0_1 = arith.constant 0 : index
    %c0_2 = arith.constant 0 : index
    %1 = vector.load %arg2[%c0_1, %c0_2] : memref<72x8xbf16, #tpu.memory_space<vmem>>, vector<72x8xbf16>
    %cst = arith.constant dense<0.000000e+00> : vector<256x8xf32>
    %2 = tpu.matmul %0, %1, %cst {dimension_numbers = #tpu.dot_dimension_numbers<[1], [0], [0], [1], [0, 0, 1, 1], [], []>} : vector<256x72xbf16>, vector<72x8xbf16>, vector<256x8xf32> -> vector<256x8xf32>
    %c0_3 = arith.constant 0 : index
    %c0_4 = arith.constant 0 : index
    %3 = vector.load %arg3[%c0_3, %c0_4] : memref<256x8xf32, #tpu.memory_space<vmem>>, vector<256x8xf32>
    tpu.vector_store %arg3[%c0_3, %c0_4], %2 {strides = array<i32>} : memref<256x8xf32, #tpu.memory_space<vmem>>, vector<256x8xf32>,
    %c0_i32 = arith.constant 0 : i32
    %4 = arith.cmpi eq, %arg0, %c0_i32 : i32
    %5 = arith.extui %4 : i1 to i32
    %c0_i32_5 = arith.constant 0 : i32
    %6 = arith.cmpi ne, %5, %c0_i32_5 : i32
    scf.if %6 {
      %cst_16 = arith.constant 0.000000e+00 : f32
      %18 = vector.broadcast %cst_16 : f32 to vector<1x8xf32>
      %c0_17 = arith.constant 0 : index
      %c0_18 = arith.constant 0 : index
      %19 = vector.load %arg4[%c0_17, %c0_18] : memref<1x8xf32, #tpu.memory_space<vmem>>, vector<1x8xf32>
      tpu.vector_store %arg4[%c0_17, %c0_18], %18 {strides = array<i32>} : memref<1x8xf32, #tpu.memory_space<vmem>>, vector<1x8xf32>,
      %cst_19 = arith.constant 0.000000e+00 : f32
      %20 = vector.broadcast %cst_19 : f32 to vector<1x8xf32>
      %c0_20 = arith.constant 0 : index
      %c0_21 = arith.constant 0 : index
      %21 = vector.load %arg5[%c0_20, %c0_21] : memref<1x8xf32, #tpu.memory_space<vmem>>, vector<1x8xf32>
      tpu.vector_store %arg5[%c0_20, %c0_21], %20 {strides = array<i32>} : memref<1x8xf32, #tpu.memory_space<vmem>>, vector<1x8xf32>,
    } else {
    }
    %c0_6 = arith.constant 0 : index
    %c0_7 = arith.constant 0 : index
    %7 = vector.load %arg4[%c0_6, %c0_7] : memref<1x8xf32, #tpu.memory_space<vmem>>, vector<1x8xf32>
    %cst_8 = arith.constant dense<0.000000e+00> : vector<8xf32>
    %8 = vector.multi_reduction <add>, %2, %cst_8 [0] : vector<256x8xf32> to vector<8xf32>
    %9 = vector.shape_cast %8 : vector<8xf32> to vector<1x8xf32>
    %10 = arith.addf %7, %9 : vector<1x8xf32>
    %c0_9 = arith.constant 0 : index
    %c0_10 = arith.constant 0 : index
    %11 = vector.load %arg4[%c0_9, %c0_10] : memref<1x8xf32, #tpu.memory_space<vmem>>, vector<1x8xf32>
    tpu.vector_store %arg4[%c0_9, %c0_10], %10 {strides = array<i32>} : memref<1x8xf32, #tpu.memory_space<vmem>>, vector<1x8xf32>,
    %c0_11 = arith.constant 0 : index
    %c0_12 = arith.constant 0 : index
    %12 = vector.load %arg5[%c0_11, %c0_12] : memref<1x8xf32, #tpu.memory_space<vmem>>, vector<1x8xf32>
    %13 = arith.mulf %2, %2 : vector<256x8xf32>
    %cst_13 = arith.constant dense<0.000000e+00> : vector<8xf32>
    %14 = vector.multi_reduction <add>, %13, %cst_13 [0] : vector<256x8xf32> to vector<8xf32>
    %15 = vector.shape_cast %14 : vector<8xf32> to vector<1x8xf32>
    %16 = arith.addf %12, %15 : vector<1x8xf32>
    %c0_14 = arith.constant 0 : index
    %c0_15 = arith.constant 0 : index
    %17 = vector.load %arg5[%c0_14, %c0_15] : memref<1x8xf32, #tpu.memory_space<vmem>>, vector<1x8xf32>
    tpu.vector_store %arg5[%c0_14, %c0_15], %16 {strides = array<i32>} : memref<1x8xf32, #tpu.memory_space<vmem>>, vector<1x8xf32>,
    return
  }
  func.func @transform_0(%arg0: i32) -> (i32, i32) {
    %c0_i32 = arith.constant 0 : i32
    %c0_i32_0 = arith.constant 0 : i32
    return %arg0, %c0_i32 : i32, i32
  }
  func.func @transform_1(%arg0: i32) -> (i32, i32) {
    %c0_i32 = arith.constant 0 : i32
    %c0_i32_0 = arith.constant 0 : i32
    %c0_i32_1 = arith.constant 0 : i32
    return %c0_i32, %c0_i32_0 : i32, i32
  }
  func.func @transform_2(%arg0: i32) -> (i32, i32) {
    %c0_i32 = arith.constant 0 : i32
    %c0_i32_0 = arith.constant 0 : i32
    return %arg0, %c0_i32 : i32, i32
  }
  func.func @transform_3(%arg0: i32) -> (i32, i32) {
    %c0_i32 = arith.constant 0 : i32
    %c0_i32_0 = arith.constant 0 : i32
    %c0_i32_1 = arith.constant 0 : i32
    return %c0_i32, %c0_i32_0 : i32, i32
  }
  func.func @transform_4(%arg0: i32) -> (i32, i32) {
    %c0_i32 = arith.constant 0 : i32
    %c0_i32_0 = arith.constant 0 : i32
    %c0_i32_1 = arith.constant 0 : i32
    return %c0_i32, %c0_i32_0 : i32, i32
  }
}

module attributes {stable_mosaic.version = 11 : i64} {
  func.func @_max4_kernel(%arg0: i32, %arg1: memref<8x128xf32, #tpu.memory_space<vmem>>, %arg2: memref<8x128xf32, #tpu.memory_space<vmem>>, %arg3: memref<8x128xf32, #tpu.memory_space<vmem>>, %arg4: memref<8x128xf32, #tpu.memory_space<vmem>>, %arg5: memref<8x128xf32, #tpu.memory_space<vmem>>) attributes {dimension_semantics = [#tpu.dimension_semantics<parallel>], iteration_bounds = array<i64: 1>, scalar_prefetch = 0 : i64, scratch_operands = 0 : i64, tpu.core_type = #tpu.core_type<tc>, window_params = [{transform_indices = @transform_0, window_bounds = array<i64: 8, 128>}, {transform_indices = @transform_1, window_bounds = array<i64: 8, 128>}, {transform_indices = @transform_2, window_bounds = array<i64: 8, 128>}, {transform_indices = @transform_3, window_bounds = array<i64: 8, 128>}, {transform_indices = @transform_4, window_bounds = array<i64: 8, 128>}]} {
    %c0 = arith.constant 0 : index
    %c0_0 = arith.constant 0 : index
    %0 = vector.load %arg1[%c0, %c0_0] : memref<8x128xf32, #tpu.memory_space<vmem>>, vector<8x128xf32>
    %c0_1 = arith.constant 0 : index
    %c0_2 = arith.constant 0 : index
    %1 = vector.load %arg2[%c0_1, %c0_2] : memref<8x128xf32, #tpu.memory_space<vmem>>, vector<8x128xf32>
    %2 = arith.maximumf %0, %1 : vector<8x128xf32>
    %c0_3 = arith.constant 0 : index
    %c0_4 = arith.constant 0 : index
    %3 = vector.load %arg3[%c0_3, %c0_4] : memref<8x128xf32, #tpu.memory_space<vmem>>, vector<8x128xf32>
    %c0_5 = arith.constant 0 : index
    %c0_6 = arith.constant 0 : index
    %4 = vector.load %arg4[%c0_5, %c0_6] : memref<8x128xf32, #tpu.memory_space<vmem>>, vector<8x128xf32>
    %5 = arith.maximumf %3, %4 : vector<8x128xf32>
    %6 = arith.maximumf %2, %5 : vector<8x128xf32>
    %c0_7 = arith.constant 0 : index
    %c0_8 = arith.constant 0 : index
    %7 = vector.load %arg5[%c0_7, %c0_8] : memref<8x128xf32, #tpu.memory_space<vmem>>, vector<8x128xf32>
    tpu.vector_store %arg5[%c0_7, %c0_8], %6 {strides = array<i32>} : memref<8x128xf32, #tpu.memory_space<vmem>>, vector<8x128xf32>,
    return
  }
  func.func @transform_0(%arg0: i32) -> (i32, i32) {
    %c0_i32 = arith.constant 0 : i32
    %c0_i32_0 = arith.constant 0 : i32
    return %arg0, %c0_i32 : i32, i32
  }
  func.func @transform_1(%arg0: i32) -> (i32, i32) {
    %c0_i32 = arith.constant 0 : i32
    %c0_i32_0 = arith.constant 0 : i32
    return %arg0, %c0_i32 : i32, i32
  }
  func.func @transform_2(%arg0: i32) -> (i32, i32) {
    %c0_i32 = arith.constant 0 : i32
    %c0_i32_0 = arith.constant 0 : i32
    return %arg0, %c0_i32 : i32, i32
  }
  func.func @transform_3(%arg0: i32) -> (i32, i32) {
    %c0_i32 = arith.constant 0 : i32
    %c0_i32_0 = arith.constant 0 : i32
    return %arg0, %c0_i32 : i32, i32
  }
  func.func @transform_4(%arg0: i32) -> (i32, i32) {
    %c0_i32 = arith.constant 0 : i32
    %c0_i32_0 = arith.constant 0 : i32
    return %arg0, %c0_i32 : i32, i32
  }
}

module attributes {stable_mosaic.version = 11 : i64} {
  func.func @_matmul_stats_kernel(%arg0: i32, %arg1: memref<128x72xbf16, #tpu.memory_space<vmem>>, %arg2: memref<72x16xbf16, #tpu.memory_space<vmem>>, %arg3: memref<128x16xf32, #tpu.memory_space<vmem>>, %arg4: memref<1x16xf32, #tpu.memory_space<vmem>>, %arg5: memref<1x16xf32, #tpu.memory_space<vmem>>) attributes {dimension_semantics = [#tpu.dimension_semantics<arbitrary>], iteration_bounds = array<i64: 1>, scalar_prefetch = 0 : i64, scratch_operands = 0 : i64, tpu.core_type = #tpu.core_type<tc>, window_params = [{transform_indices = @transform_0, window_bounds = array<i64: 128, 72>}, {pipeline_mode = #tpu.pipeline_mode<synchronous>, transform_indices = @transform_1, window_bounds = array<i64: 72, 16>}, {transform_indices = @transform_2, window_bounds = array<i64: 128, 16>}, {pipeline_mode = #tpu.pipeline_mode<synchronous>, transform_indices = @transform_3, window_bounds = array<i64: 1, 16>}, {pipeline_mode = #tpu.pipeline_mode<synchronous>, transform_indices = @transform_4, window_bounds = array<i64: 1, 16>}]} {
    %c0 = arith.constant 0 : index
    %c0_0 = arith.constant 0 : index
    %0 = vector.load %arg1[%c0, %c0_0] : memref<128x72xbf16, #tpu.memory_space<vmem>>, vector<128x72xbf16>
    %c0_1 = arith.constant 0 : index
    %c0_2 = arith.constant 0 : index
    %1 = vector.load %arg2[%c0_1, %c0_2] : memref<72x16xbf16, #tpu.memory_space<vmem>>, vector<72x16xbf16>
    %cst = arith.constant dense<0.000000e+00> : vector<128x16xf32>
    %2 = tpu.matmul %0, %1, %cst {dimension_numbers = #tpu.dot_dimension_numbers<[1], [0], [0], [1], [0, 0, 1, 1], [], []>} : vector<128x72xbf16>, vector<72x16xbf16>, vector<128x16xf32> -> vector<128x16xf32>
    %c0_3 = arith.constant 0 : index
    %c0_4 = arith.constant 0 : index
    %3 = vector.load %arg3[%c0_3, %c0_4] : memref<128x16xf32, #tpu.memory_space<vmem>>, vector<128x16xf32>
    tpu.vector_store %arg3[%c0_3, %c0_4], %2 {strides = array<i32>} : memref<128x16xf32, #tpu.memory_space<vmem>>, vector<128x16xf32>,
    %c0_i32 = arith.constant 0 : i32
    %4 = arith.cmpi eq, %arg0, %c0_i32 : i32
    %5 = arith.extui %4 : i1 to i32
    %c0_i32_5 = arith.constant 0 : i32
    %6 = arith.cmpi ne, %5, %c0_i32_5 : i32
    scf.if %6 {
      %cst_16 = arith.constant 0.000000e+00 : f32
      %18 = vector.broadcast %cst_16 : f32 to vector<1x16xf32>
      %c0_17 = arith.constant 0 : index
      %c0_18 = arith.constant 0 : index
      %19 = vector.load %arg4[%c0_17, %c0_18] : memref<1x16xf32, #tpu.memory_space<vmem>>, vector<1x16xf32>
      tpu.vector_store %arg4[%c0_17, %c0_18], %18 {strides = array<i32>} : memref<1x16xf32, #tpu.memory_space<vmem>>, vector<1x16xf32>,
      %cst_19 = arith.constant 0.000000e+00 : f32
      %20 = vector.broadcast %cst_19 : f32 to vector<1x16xf32>
      %c0_20 = arith.constant 0 : index
      %c0_21 = arith.constant 0 : index
      %21 = vector.load %arg5[%c0_20, %c0_21] : memref<1x16xf32, #tpu.memory_space<vmem>>, vector<1x16xf32>
      tpu.vector_store %arg5[%c0_20, %c0_21], %20 {strides = array<i32>} : memref<1x16xf32, #tpu.memory_space<vmem>>, vector<1x16xf32>,
    } else {
    }
    %c0_6 = arith.constant 0 : index
    %c0_7 = arith.constant 0 : index
    %7 = vector.load %arg4[%c0_6, %c0_7] : memref<1x16xf32, #tpu.memory_space<vmem>>, vector<1x16xf32>
    %cst_8 = arith.constant dense<0.000000e+00> : vector<16xf32>
    %8 = vector.multi_reduction <add>, %2, %cst_8 [0] : vector<128x16xf32> to vector<16xf32>
    %9 = vector.shape_cast %8 : vector<16xf32> to vector<1x16xf32>
    %10 = arith.addf %7, %9 : vector<1x16xf32>
    %c0_9 = arith.constant 0 : index
    %c0_10 = arith.constant 0 : index
    %11 = vector.load %arg4[%c0_9, %c0_10] : memref<1x16xf32, #tpu.memory_space<vmem>>, vector<1x16xf32>
    tpu.vector_store %arg4[%c0_9, %c0_10], %10 {strides = array<i32>} : memref<1x16xf32, #tpu.memory_space<vmem>>, vector<1x16xf32>,
    %c0_11 = arith.constant 0 : index
    %c0_12 = arith.constant 0 : index
    %12 = vector.load %arg5[%c0_11, %c0_12] : memref<1x16xf32, #tpu.memory_space<vmem>>, vector<1x16xf32>
    %13 = arith.mulf %2, %2 : vector<128x16xf32>
    %cst_13 = arith.constant dense<0.000000e+00> : vector<16xf32>
    %14 = vector.multi_reduction <add>, %13, %cst_13 [0] : vector<128x16xf32> to vector<16xf32>
    %15 = vector.shape_cast %14 : vector<16xf32> to vector<1x16xf32>
    %16 = arith.addf %12, %15 : vector<1x16xf32>
    %c0_14 = arith.constant 0 : index
    %c0_15 = arith.constant 0 : index
    %17 = vector.load %arg5[%c0_14, %c0_15] : memref<1x16xf32, #tpu.memory_space<vmem>>, vector<1x16xf32>
    tpu.vector_store %arg5[%c0_14, %c0_15], %16 {strides = array<i32>} : memref<1x16xf32, #tpu.memory_space<vmem>>, vector<1x16xf32>,
    return
  }
  func.func @transform_0(%arg0: i32) -> (i32, i32) {
    %c0_i32 = arith.constant 0 : i32
    %c0_i32_0 = arith.constant 0 : i32
    return %arg0, %c0_i32 : i32, i32
  }
  func.func @transform_1(%arg0: i32) -> (i32, i32) {
    %c0_i32 = arith.constant 0 : i32
    %c0_i32_0 = arith.constant 0 : i32
    %c0_i32_1 = arith.constant 0 : i32
    return %c0_i32, %c0_i32_0 : i32, i32
  }
  func.func @transform_2(%arg0: i32) -> (i32, i32) {
    %c0_i32 = arith.constant 0 : i32
    %c0_i32_0 = arith.constant 0 : i32
    return %arg0, %c0_i32 : i32, i32
  }
  func.func @transform_3(%arg0: i32) -> (i32, i32) {
    %c0_i32 = arith.constant 0 : i32
    %c0_i32_0 = arith.constant 0 : i32
    %c0_i32_1 = arith.constant 0 : i32
    return %c0_i32, %c0_i32_0 : i32, i32
  }
  func.func @transform_4(%arg0: i32) -> (i32, i32) {
    %c0_i32 = arith.constant 0 : i32
    %c0_i32_0 = arith.constant 0 : i32
    %c0_i32_1 = arith.constant 0 : i32
    return %c0_i32, %c0_i32_0 : i32, i32
  }
}

module attributes {stable_mosaic.version = 11 : i64} {
  func.func @_affine_relu_kernel(%arg0: i32, %arg1: memref<16x128xf32, #tpu.memory_space<vmem>>, %arg2: memref<1x128xf32, #tpu.memory_space<vmem>>, %arg3: memref<1x128xf32, #tpu.memory_space<vmem>>, %arg4: memref<16x128xf32, #tpu.memory_space<vmem>>) attributes {dimension_semantics = [#tpu.dimension_semantics<parallel>], iteration_bounds = array<i64: 1>, scalar_prefetch = 0 : i64, scratch_operands = 0 : i64, tpu.core_type = #tpu.core_type<tc>, window_params = [{transform_indices = @transform_0, window_bounds = array<i64: 16, 128>}, {pipeline_mode = #tpu.pipeline_mode<synchronous>, transform_indices = @transform_1, window_bounds = array<i64: 1, 128>}, {pipeline_mode = #tpu.pipeline_mode<synchronous>, transform_indices = @transform_2, window_bounds = array<i64: 1, 128>}, {transform_indices = @transform_3, window_bounds = array<i64: 16, 128>}]} {
    %c0 = arith.constant 0 : index
    %c0_0 = arith.constant 0 : index
    %0 = vector.load %arg1[%c0, %c0_0] : memref<16x128xf32, #tpu.memory_space<vmem>>, vector<16x128xf32>
    %c0_1 = arith.constant 0 : index
    %c0_2 = arith.constant 0 : index
    %1 = vector.load %arg2[%c0_1, %c0_2] : memref<1x128xf32, #tpu.memory_space<vmem>>, vector<1x128xf32>
    %2 = vector.broadcast %1 : vector<1x128xf32> to vector<16x128xf32>
    %3 = arith.mulf %0, %2 : vector<16x128xf32>
    %c0_3 = arith.constant 0 : index
    %c0_4 = arith.constant 0 : index
    %4 = vector.load %arg3[%c0_3, %c0_4] : memref<1x128xf32, #tpu.memory_space<vmem>>, vector<1x128xf32>
    %5 = vector.broadcast %4 : vector<1x128xf32> to vector<16x128xf32>
    %6 = arith.addf %3, %5 : vector<16x128xf32>
    %cst = arith.constant 0.000000e+00 : f32
    %7 = vector.broadcast %cst : f32 to vector<16x128xf32>
    %8 = arith.maximumf %6, %7 : vector<16x128xf32>
    %c0_5 = arith.constant 0 : index
    %c0_6 = arith.constant 0 : index
    %9 = vector.load %arg4[%c0_5, %c0_6] : memref<16x128xf32, #tpu.memory_space<vmem>>, vector<16x128xf32>
    tpu.vector_store %arg4[%c0_5, %c0_6], %8 {strides = array<i32>} : memref<16x128xf32, #tpu.memory_space<vmem>>, vector<16x128xf32>,
    return
  }
  func.func @transform_0(%arg0: i32) -> (i32, i32) {
    %c0_i32 = arith.constant 0 : i32
    %c0_i32_0 = arith.constant 0 : i32
    return %arg0, %c0_i32 : i32, i32
  }
  func.func @transform_1(%arg0: i32) -> (i32, i32) {
    %c0_i32 = arith.constant 0 : i32
    %c0_i32_0 = arith.constant 0 : i32
    %c0_i32_1 = arith.constant 0 : i32
    return %c0_i32, %c0_i32_0 : i32, i32
  }
  func.func @transform_2(%arg0: i32) -> (i32, i32) {
    %c0_i32 = arith.constant 0 : i32
    %c0_i32_0 = arith.constant 0 : i32
    %c0_i32_1 = arith.constant 0 : i32
    return %c0_i32, %c0_i32_0 : i32, i32
  }
  func.func @transform_3(%arg0: i32) -> (i32, i32) {
    %c0_i32 = arith.constant 0 : i32
    %c0_i32_0 = arith.constant 0 : i32
    return %arg0, %c0_i32 : i32, i32
  }
}

module attributes {stable_mosaic.version = 11 : i64} {
  func.func @_matmul_stats_kernel(%arg0: i32, %arg1: memref<128x144xbf16, #tpu.memory_space<vmem>>, %arg2: memref<144x16xbf16, #tpu.memory_space<vmem>>, %arg3: memref<128x16xf32, #tpu.memory_space<vmem>>, %arg4: memref<1x16xf32, #tpu.memory_space<vmem>>, %arg5: memref<1x16xf32, #tpu.memory_space<vmem>>) attributes {dimension_semantics = [#tpu.dimension_semantics<arbitrary>], iteration_bounds = array<i64: 1>, scalar_prefetch = 0 : i64, scratch_operands = 0 : i64, tpu.core_type = #tpu.core_type<tc>, window_params = [{transform_indices = @transform_0, window_bounds = array<i64: 128, 144>}, {pipeline_mode = #tpu.pipeline_mode<synchronous>, transform_indices = @transform_1, window_bounds = array<i64: 144, 16>}, {transform_indices = @transform_2, window_bounds = array<i64: 128, 16>}, {pipeline_mode = #tpu.pipeline_mode<synchronous>, transform_indices = @transform_3, window_bounds = array<i64: 1, 16>}, {pipeline_mode = #tpu.pipeline_mode<synchronous>, transform_indices = @transform_4, window_bounds = array<i64: 1, 16>}]} {
    %c0 = arith.constant 0 : index
    %c0_0 = arith.constant 0 : index
    %0 = vector.load %arg1[%c0, %c0_0] : memref<128x144xbf16, #tpu.memory_space<vmem>>, vector<128x144xbf16>
    %c0_1 = arith.constant 0 : index
    %c0_2 = arith.constant 0 : index
    %1 = vector.load %arg2[%c0_1, %c0_2] : memref<144x16xbf16, #tpu.memory_space<vmem>>, vector<144x16xbf16>
    %cst = arith.constant dense<0.000000e+00> : vector<128x16xf32>
    %2 = tpu.matmul %0, %1, %cst {dimension_numbers = #tpu.dot_dimension_numbers<[1], [0], [0], [1], [0, 0, 1, 1], [], []>} : vector<128x144xbf16>, vector<144x16xbf16>, vector<128x16xf32> -> vector<128x16xf32>
    %c0_3 = arith.constant 0 : index
    %c0_4 = arith.constant 0 : index
    %3 = vector.load %arg3[%c0_3, %c0_4] : memref<128x16xf32, #tpu.memory_space<vmem>>, vector<128x16xf32>
    tpu.vector_store %arg3[%c0_3, %c0_4], %2 {strides = array<i32>} : memref<128x16xf32, #tpu.memory_space<vmem>>, vector<128x16xf32>,
    %c0_i32 = arith.constant 0 : i32
    %4 = arith.cmpi eq, %arg0, %c0_i32 : i32
    %5 = arith.extui %4 : i1 to i32
    %c0_i32_5 = arith.constant 0 : i32
    %6 = arith.cmpi ne, %5, %c0_i32_5 : i32
    scf.if %6 {
      %cst_16 = arith.constant 0.000000e+00 : f32
      %18 = vector.broadcast %cst_16 : f32 to vector<1x16xf32>
      %c0_17 = arith.constant 0 : index
      %c0_18 = arith.constant 0 : index
      %19 = vector.load %arg4[%c0_17, %c0_18] : memref<1x16xf32, #tpu.memory_space<vmem>>, vector<1x16xf32>
      tpu.vector_store %arg4[%c0_17, %c0_18], %18 {strides = array<i32>} : memref<1x16xf32, #tpu.memory_space<vmem>>, vector<1x16xf32>,
      %cst_19 = arith.constant 0.000000e+00 : f32
      %20 = vector.broadcast %cst_19 : f32 to vector<1x16xf32>
      %c0_20 = arith.constant 0 : index
      %c0_21 = arith.constant 0 : index
      %21 = vector.load %arg5[%c0_20, %c0_21] : memref<1x16xf32, #tpu.memory_space<vmem>>, vector<1x16xf32>
      tpu.vector_store %arg5[%c0_20, %c0_21], %20 {strides = array<i32>} : memref<1x16xf32, #tpu.memory_space<vmem>>, vector<1x16xf32>,
    } else {
    }
    %c0_6 = arith.constant 0 : index
    %c0_7 = arith.constant 0 : index
    %7 = vector.load %arg4[%c0_6, %c0_7] : memref<1x16xf32, #tpu.memory_space<vmem>>, vector<1x16xf32>
    %cst_8 = arith.constant dense<0.000000e+00> : vector<16xf32>
    %8 = vector.multi_reduction <add>, %2, %cst_8 [0] : vector<128x16xf32> to vector<16xf32>
    %9 = vector.shape_cast %8 : vector<16xf32> to vector<1x16xf32>
    %10 = arith.addf %7, %9 : vector<1x16xf32>
    %c0_9 = arith.constant 0 : index
    %c0_10 = arith.constant 0 : index
    %11 = vector.load %arg4[%c0_9, %c0_10] : memref<1x16xf32, #tpu.memory_space<vmem>>, vector<1x16xf32>
    tpu.vector_store %arg4[%c0_9, %c0_10], %10 {strides = array<i32>} : memref<1x16xf32, #tpu.memory_space<vmem>>, vector<1x16xf32>,
    %c0_11 = arith.constant 0 : index
    %c0_12 = arith.constant 0 : index
    %12 = vector.load %arg5[%c0_11, %c0_12] : memref<1x16xf32, #tpu.memory_space<vmem>>, vector<1x16xf32>
    %13 = arith.mulf %2, %2 : vector<128x16xf32>
    %cst_13 = arith.constant dense<0.000000e+00> : vector<16xf32>
    %14 = vector.multi_reduction <add>, %13, %cst_13 [0] : vector<128x16xf32> to vector<16xf32>
    %15 = vector.shape_cast %14 : vector<16xf32> to vector<1x16xf32>
    %16 = arith.addf %12, %15 : vector<1x16xf32>
    %c0_14 = arith.constant 0 : index
    %c0_15 = arith.constant 0 : index
    %17 = vector.load %arg5[%c0_14, %c0_15] : memref<1x16xf32, #tpu.memory_space<vmem>>, vector<1x16xf32>
    tpu.vector_store %arg5[%c0_14, %c0_15], %16 {strides = array<i32>} : memref<1x16xf32, #tpu.memory_space<vmem>>, vector<1x16xf32>,
    return
  }
  func.func @transform_0(%arg0: i32) -> (i32, i32) {
    %c0_i32 = arith.constant 0 : i32
    %c0_i32_0 = arith.constant 0 : i32
    return %arg0, %c0_i32 : i32, i32
  }
  func.func @transform_1(%arg0: i32) -> (i32, i32) {
    %c0_i32 = arith.constant 0 : i32
    %c0_i32_0 = arith.constant 0 : i32
    %c0_i32_1 = arith.constant 0 : i32
    return %c0_i32, %c0_i32_0 : i32, i32
  }
  func.func @transform_2(%arg0: i32) -> (i32, i32) {
    %c0_i32 = arith.constant 0 : i32
    %c0_i32_0 = arith.constant 0 : i32
    return %arg0, %c0_i32 : i32, i32
  }
  func.func @transform_3(%arg0: i32) -> (i32, i32) {
    %c0_i32 = arith.constant 0 : i32
    %c0_i32_0 = arith.constant 0 : i32
    %c0_i32_1 = arith.constant 0 : i32
    return %c0_i32, %c0_i32_0 : i32, i32
  }
  func.func @transform_4(%arg0: i32) -> (i32, i32) {
    %c0_i32 = arith.constant 0 : i32
    %c0_i32_0 = arith.constant 0 : i32
    %c0_i32_1 = arith.constant 0 : i32
    return %c0_i32, %c0_i32_0 : i32, i32
  }
}

module attributes {stable_mosaic.version = 11 : i64} {
  func.func @_max4_kernel(%arg0: i32, %arg1: memref<4x128xf32, #tpu.memory_space<vmem>>, %arg2: memref<4x128xf32, #tpu.memory_space<vmem>>, %arg3: memref<4x128xf32, #tpu.memory_space<vmem>>, %arg4: memref<4x128xf32, #tpu.memory_space<vmem>>, %arg5: memref<4x128xf32, #tpu.memory_space<vmem>>) attributes {dimension_semantics = [#tpu.dimension_semantics<parallel>], iteration_bounds = array<i64: 1>, scalar_prefetch = 0 : i64, scratch_operands = 0 : i64, tpu.core_type = #tpu.core_type<tc>, window_params = [{transform_indices = @transform_0, window_bounds = array<i64: 4, 128>}, {transform_indices = @transform_1, window_bounds = array<i64: 4, 128>}, {transform_indices = @transform_2, window_bounds = array<i64: 4, 128>}, {transform_indices = @transform_3, window_bounds = array<i64: 4, 128>}, {transform_indices = @transform_4, window_bounds = array<i64: 4, 128>}]} {
    %c0 = arith.constant 0 : index
    %c0_0 = arith.constant 0 : index
    %0 = vector.load %arg1[%c0, %c0_0] : memref<4x128xf32, #tpu.memory_space<vmem>>, vector<4x128xf32>
    %c0_1 = arith.constant 0 : index
    %c0_2 = arith.constant 0 : index
    %1 = vector.load %arg2[%c0_1, %c0_2] : memref<4x128xf32, #tpu.memory_space<vmem>>, vector<4x128xf32>
    %2 = arith.maximumf %0, %1 : vector<4x128xf32>
    %c0_3 = arith.constant 0 : index
    %c0_4 = arith.constant 0 : index
    %3 = vector.load %arg3[%c0_3, %c0_4] : memref<4x128xf32, #tpu.memory_space<vmem>>, vector<4x128xf32>
    %c0_5 = arith.constant 0 : index
    %c0_6 = arith.constant 0 : index
    %4 = vector.load %arg4[%c0_5, %c0_6] : memref<4x128xf32, #tpu.memory_space<vmem>>, vector<4x128xf32>
    %5 = arith.maximumf %3, %4 : vector<4x128xf32>
    %6 = arith.maximumf %2, %5 : vector<4x128xf32>
    %c0_7 = arith.constant 0 : index
    %c0_8 = arith.constant 0 : index
    %7 = vector.load %arg5[%c0_7, %c0_8] : memref<4x128xf32, #tpu.memory_space<vmem>>, vector<4x128xf32>
    tpu.vector_store %arg5[%c0_7, %c0_8], %6 {strides = array<i32>} : memref<4x128xf32, #tpu.memory_space<vmem>>, vector<4x128xf32>,
    return
  }
  func.func @transform_0(%arg0: i32) -> (i32, i32) {
    %c0_i32 = arith.constant 0 : i32
    %c0_i32_0 = arith.constant 0 : i32
    return %arg0, %c0_i32 : i32, i32
  }
  func.func @transform_1(%arg0: i32) -> (i32, i32) {
    %c0_i32 = arith.constant 0 : i32
    %c0_i32_0 = arith.constant 0 : i32
    return %arg0, %c0_i32 : i32, i32
  }
  func.func @transform_2(%arg0: i32) -> (i32, i32) {
    %c0_i32 = arith.constant 0 : i32
    %c0_i32_0 = arith.constant 0 : i32
    return %arg0, %c0_i32 : i32, i32
  }
  func.func @transform_3(%arg0: i32) -> (i32, i32) {
    %c0_i32 = arith.constant 0 : i32
    %c0_i32_0 = arith.constant 0 : i32
    return %arg0, %c0_i32 : i32, i32
  }
  func.func @transform_4(%arg0: i32) -> (i32, i32) {
    %c0_i32 = arith.constant 0 : i32
    %c0_i32_0 = arith.constant 0 : i32
    return %arg0, %c0_i32 : i32, i32
  }
}

module attributes {stable_mosaic.version = 11 : i64} {
  func.func @_matmul_stats_kernel(%arg0: i32, %arg1: memref<32x144xbf16, #tpu.memory_space<vmem>>, %arg2: memref<144x32xbf16, #tpu.memory_space<vmem>>, %arg3: memref<32x32xf32, #tpu.memory_space<vmem>>, %arg4: memref<1x32xf32, #tpu.memory_space<vmem>>, %arg5: memref<1x32xf32, #tpu.memory_space<vmem>>) attributes {dimension_semantics = [#tpu.dimension_semantics<arbitrary>], iteration_bounds = array<i64: 1>, scalar_prefetch = 0 : i64, scratch_operands = 0 : i64, tpu.core_type = #tpu.core_type<tc>, window_params = [{transform_indices = @transform_0, window_bounds = array<i64: 32, 144>}, {pipeline_mode = #tpu.pipeline_mode<synchronous>, transform_indices = @transform_1, window_bounds = array<i64: 144, 32>}, {transform_indices = @transform_2, window_bounds = array<i64: 32, 32>}, {pipeline_mode = #tpu.pipeline_mode<synchronous>, transform_indices = @transform_3, window_bounds = array<i64: 1, 32>}, {pipeline_mode = #tpu.pipeline_mode<synchronous>, transform_indices = @transform_4, window_bounds = array<i64: 1, 32>}]} {
    %c0 = arith.constant 0 : index
    %c0_0 = arith.constant 0 : index
    %0 = vector.load %arg1[%c0, %c0_0] : memref<32x144xbf16, #tpu.memory_space<vmem>>, vector<32x144xbf16>
    %c0_1 = arith.constant 0 : index
    %c0_2 = arith.constant 0 : index
    %1 = vector.load %arg2[%c0_1, %c0_2] : memref<144x32xbf16, #tpu.memory_space<vmem>>, vector<144x32xbf16>
    %cst = arith.constant dense<0.000000e+00> : vector<32x32xf32>
    %2 = tpu.matmul %0, %1, %cst {dimension_numbers = #tpu.dot_dimension_numbers<[1], [0], [0], [1], [0, 0, 1, 1], [], []>} : vector<32x144xbf16>, vector<144x32xbf16>, vector<32x32xf32> -> vector<32x32xf32>
    %c0_3 = arith.constant 0 : index
    %c0_4 = arith.constant 0 : index
    %3 = vector.load %arg3[%c0_3, %c0_4] : memref<32x32xf32, #tpu.memory_space<vmem>>, vector<32x32xf32>
    tpu.vector_store %arg3[%c0_3, %c0_4], %2 {strides = array<i32>} : memref<32x32xf32, #tpu.memory_space<vmem>>, vector<32x32xf32>,
    %c0_i32 = arith.constant 0 : i32
    %4 = arith.cmpi eq, %arg0, %c0_i32 : i32
    %5 = arith.extui %4 : i1 to i32
    %c0_i32_5 = arith.constant 0 : i32
    %6 = arith.cmpi ne, %5, %c0_i32_5 : i32
    scf.if %6 {
      %cst_16 = arith.constant 0.000000e+00 : f32
      %18 = vector.broadcast %cst_16 : f32 to vector<1x32xf32>
      %c0_17 = arith.constant 0 : index
      %c0_18 = arith.constant 0 : index
      %19 = vector.load %arg4[%c0_17, %c0_18] : memref<1x32xf32, #tpu.memory_space<vmem>>, vector<1x32xf32>
      tpu.vector_store %arg4[%c0_17, %c0_18], %18 {strides = array<i32>} : memref<1x32xf32, #tpu.memory_space<vmem>>, vector<1x32xf32>,
      %cst_19 = arith.constant 0.000000e+00 : f32
      %20 = vector.broadcast %cst_19 : f32 to vector<1x32xf32>
      %c0_20 = arith.constant 0 : index
      %c0_21 = arith.constant 0 : index
      %21 = vector.load %arg5[%c0_20, %c0_21] : memref<1x32xf32, #tpu.memory_space<vmem>>, vector<1x32xf32>
      tpu.vector_store %arg5[%c0_20, %c0_21], %20 {strides = array<i32>} : memref<1x32xf32, #tpu.memory_space<vmem>>, vector<1x32xf32>,
    } else {
    }
    %c0_6 = arith.constant 0 : index
    %c0_7 = arith.constant 0 : index
    %7 = vector.load %arg4[%c0_6, %c0_7] : memref<1x32xf32, #tpu.memory_space<vmem>>, vector<1x32xf32>
    %cst_8 = arith.constant dense<0.000000e+00> : vector<32xf32>
    %8 = vector.multi_reduction <add>, %2, %cst_8 [0] : vector<32x32xf32> to vector<32xf32>
    %9 = vector.shape_cast %8 : vector<32xf32> to vector<1x32xf32>
    %10 = arith.addf %7, %9 : vector<1x32xf32>
    %c0_9 = arith.constant 0 : index
    %c0_10 = arith.constant 0 : index
    %11 = vector.load %arg4[%c0_9, %c0_10] : memref<1x32xf32, #tpu.memory_space<vmem>>, vector<1x32xf32>
    tpu.vector_store %arg4[%c0_9, %c0_10], %10 {strides = array<i32>} : memref<1x32xf32, #tpu.memory_space<vmem>>, vector<1x32xf32>,
    %c0_11 = arith.constant 0 : index
    %c0_12 = arith.constant 0 : index
    %12 = vector.load %arg5[%c0_11, %c0_12] : memref<1x32xf32, #tpu.memory_space<vmem>>, vector<1x32xf32>
    %13 = arith.mulf %2, %2 : vector<32x32xf32>
    %cst_13 = arith.constant dense<0.000000e+00> : vector<32xf32>
    %14 = vector.multi_reduction <add>, %13, %cst_13 [0] : vector<32x32xf32> to vector<32xf32>
    %15 = vector.shape_cast %14 : vector<32xf32> to vector<1x32xf32>
    %16 = arith.addf %12, %15 : vector<1x32xf32>
    %c0_14 = arith.constant 0 : index
    %c0_15 = arith.constant 0 : index
    %17 = vector.load %arg5[%c0_14, %c0_15] : memref<1x32xf32, #tpu.memory_space<vmem>>, vector<1x32xf32>
    tpu.vector_store %arg5[%c0_14, %c0_15], %16 {strides = array<i32>} : memref<1x32xf32, #tpu.memory_space<vmem>>, vector<1x32xf32>,
    return
  }
  func.func @transform_0(%arg0: i32) -> (i32, i32) {
    %c0_i32 = arith.constant 0 : i32
    %c0_i32_0 = arith.constant 0 : i32
    return %arg0, %c0_i32 : i32, i32
  }
  func.func @transform_1(%arg0: i32) -> (i32, i32) {
    %c0_i32 = arith.constant 0 : i32
    %c0_i32_0 = arith.constant 0 : i32
    %c0_i32_1 = arith.constant 0 : i32
    return %c0_i32, %c0_i32_0 : i32, i32
  }
  func.func @transform_2(%arg0: i32) -> (i32, i32) {
    %c0_i32 = arith.constant 0 : i32
    %c0_i32_0 = arith.constant 0 : i32
    return %arg0, %c0_i32 : i32, i32
  }
  func.func @transform_3(%arg0: i32) -> (i32, i32) {
    %c0_i32 = arith.constant 0 : i32
    %c0_i32_0 = arith.constant 0 : i32
    %c0_i32_1 = arith.constant 0 : i32
    return %c0_i32, %c0_i32_0 : i32, i32
  }
  func.func @transform_4(%arg0: i32) -> (i32, i32) {
    %c0_i32 = arith.constant 0 : i32
    %c0_i32_0 = arith.constant 0 : i32
    %c0_i32_1 = arith.constant 0 : i32
    return %c0_i32, %c0_i32_0 : i32, i32
  }
}

module attributes {stable_mosaic.version = 11 : i64} {
  func.func @_affine_relu_kernel(%arg0: i32, %arg1: memref<8x128xf32, #tpu.memory_space<vmem>>, %arg2: memref<1x128xf32, #tpu.memory_space<vmem>>, %arg3: memref<1x128xf32, #tpu.memory_space<vmem>>, %arg4: memref<8x128xf32, #tpu.memory_space<vmem>>) attributes {dimension_semantics = [#tpu.dimension_semantics<parallel>], iteration_bounds = array<i64: 1>, scalar_prefetch = 0 : i64, scratch_operands = 0 : i64, tpu.core_type = #tpu.core_type<tc>, window_params = [{transform_indices = @transform_0, window_bounds = array<i64: 8, 128>}, {pipeline_mode = #tpu.pipeline_mode<synchronous>, transform_indices = @transform_1, window_bounds = array<i64: 1, 128>}, {pipeline_mode = #tpu.pipeline_mode<synchronous>, transform_indices = @transform_2, window_bounds = array<i64: 1, 128>}, {transform_indices = @transform_3, window_bounds = array<i64: 8, 128>}]} {
    %c0 = arith.constant 0 : index
    %c0_0 = arith.constant 0 : index
    %0 = vector.load %arg1[%c0, %c0_0] : memref<8x128xf32, #tpu.memory_space<vmem>>, vector<8x128xf32>
    %c0_1 = arith.constant 0 : index
    %c0_2 = arith.constant 0 : index
    %1 = vector.load %arg2[%c0_1, %c0_2] : memref<1x128xf32, #tpu.memory_space<vmem>>, vector<1x128xf32>
    %2 = vector.broadcast %1 : vector<1x128xf32> to vector<8x128xf32>
    %3 = arith.mulf %0, %2 : vector<8x128xf32>
    %c0_3 = arith.constant 0 : index
    %c0_4 = arith.constant 0 : index
    %4 = vector.load %arg3[%c0_3, %c0_4] : memref<1x128xf32, #tpu.memory_space<vmem>>, vector<1x128xf32>
    %5 = vector.broadcast %4 : vector<1x128xf32> to vector<8x128xf32>
    %6 = arith.addf %3, %5 : vector<8x128xf32>
    %cst = arith.constant 0.000000e+00 : f32
    %7 = vector.broadcast %cst : f32 to vector<8x128xf32>
    %8 = arith.maximumf %6, %7 : vector<8x128xf32>
    %c0_5 = arith.constant 0 : index
    %c0_6 = arith.constant 0 : index
    %9 = vector.load %arg4[%c0_5, %c0_6] : memref<8x128xf32, #tpu.memory_space<vmem>>, vector<8x128xf32>
    tpu.vector_store %arg4[%c0_5, %c0_6], %8 {strides = array<i32>} : memref<8x128xf32, #tpu.memory_space<vmem>>, vector<8x128xf32>,
    return
  }
  func.func @transform_0(%arg0: i32) -> (i32, i32) {
    %c0_i32 = arith.constant 0 : i32
    %c0_i32_0 = arith.constant 0 : i32
    return %arg0, %c0_i32 : i32, i32
  }
  func.func @transform_1(%arg0: i32) -> (i32, i32) {
    %c0_i32 = arith.constant 0 : i32
    %c0_i32_0 = arith.constant 0 : i32
    %c0_i32_1 = arith.constant 0 : i32
    return %c0_i32, %c0_i32_0 : i32, i32
  }
  func.func @transform_2(%arg0: i32) -> (i32, i32) {
    %c0_i32 = arith.constant 0 : i32
    %c0_i32_0 = arith.constant 0 : i32
    %c0_i32_1 = arith.constant 0 : i32
    return %c0_i32, %c0_i32_0 : i32, i32
  }
  func.func @transform_3(%arg0: i32) -> (i32, i32) {
    %c0_i32 = arith.constant 0 : i32
    %c0_i32_0 = arith.constant 0 : i32
    return %arg0, %c0_i32 : i32, i32
  }
}

module attributes {stable_mosaic.version = 11 : i64} {
  func.func @_matmul_stats_kernel(%arg0: i32, %arg1: memref<32x288xbf16, #tpu.memory_space<vmem>>, %arg2: memref<288x32xbf16, #tpu.memory_space<vmem>>, %arg3: memref<32x32xf32, #tpu.memory_space<vmem>>, %arg4: memref<1x32xf32, #tpu.memory_space<vmem>>, %arg5: memref<1x32xf32, #tpu.memory_space<vmem>>) attributes {dimension_semantics = [#tpu.dimension_semantics<arbitrary>], iteration_bounds = array<i64: 1>, scalar_prefetch = 0 : i64, scratch_operands = 0 : i64, tpu.core_type = #tpu.core_type<tc>, window_params = [{transform_indices = @transform_0, window_bounds = array<i64: 32, 288>}, {pipeline_mode = #tpu.pipeline_mode<synchronous>, transform_indices = @transform_1, window_bounds = array<i64: 288, 32>}, {transform_indices = @transform_2, window_bounds = array<i64: 32, 32>}, {pipeline_mode = #tpu.pipeline_mode<synchronous>, transform_indices = @transform_3, window_bounds = array<i64: 1, 32>}, {pipeline_mode = #tpu.pipeline_mode<synchronous>, transform_indices = @transform_4, window_bounds = array<i64: 1, 32>}]} {
    %c0 = arith.constant 0 : index
    %c0_0 = arith.constant 0 : index
    %0 = vector.load %arg1[%c0, %c0_0] : memref<32x288xbf16, #tpu.memory_space<vmem>>, vector<32x288xbf16>
    %c0_1 = arith.constant 0 : index
    %c0_2 = arith.constant 0 : index
    %1 = vector.load %arg2[%c0_1, %c0_2] : memref<288x32xbf16, #tpu.memory_space<vmem>>, vector<288x32xbf16>
    %cst = arith.constant dense<0.000000e+00> : vector<32x32xf32>
    %2 = tpu.matmul %0, %1, %cst {dimension_numbers = #tpu.dot_dimension_numbers<[1], [0], [0], [1], [0, 0, 1, 1], [], []>} : vector<32x288xbf16>, vector<288x32xbf16>, vector<32x32xf32> -> vector<32x32xf32>
    %c0_3 = arith.constant 0 : index
    %c0_4 = arith.constant 0 : index
    %3 = vector.load %arg3[%c0_3, %c0_4] : memref<32x32xf32, #tpu.memory_space<vmem>>, vector<32x32xf32>
    tpu.vector_store %arg3[%c0_3, %c0_4], %2 {strides = array<i32>} : memref<32x32xf32, #tpu.memory_space<vmem>>, vector<32x32xf32>,
    %c0_i32 = arith.constant 0 : i32
    %4 = arith.cmpi eq, %arg0, %c0_i32 : i32
    %5 = arith.extui %4 : i1 to i32
    %c0_i32_5 = arith.constant 0 : i32
    %6 = arith.cmpi ne, %5, %c0_i32_5 : i32
    scf.if %6 {
      %cst_16 = arith.constant 0.000000e+00 : f32
      %18 = vector.broadcast %cst_16 : f32 to vector<1x32xf32>
      %c0_17 = arith.constant 0 : index
      %c0_18 = arith.constant 0 : index
      %19 = vector.load %arg4[%c0_17, %c0_18] : memref<1x32xf32, #tpu.memory_space<vmem>>, vector<1x32xf32>
      tpu.vector_store %arg4[%c0_17, %c0_18], %18 {strides = array<i32>} : memref<1x32xf32, #tpu.memory_space<vmem>>, vector<1x32xf32>,
      %cst_19 = arith.constant 0.000000e+00 : f32
      %20 = vector.broadcast %cst_19 : f32 to vector<1x32xf32>
      %c0_20 = arith.constant 0 : index
      %c0_21 = arith.constant 0 : index
      %21 = vector.load %arg5[%c0_20, %c0_21] : memref<1x32xf32, #tpu.memory_space<vmem>>, vector<1x32xf32>
      tpu.vector_store %arg5[%c0_20, %c0_21], %20 {strides = array<i32>} : memref<1x32xf32, #tpu.memory_space<vmem>>, vector<1x32xf32>,
    } else {
    }
    %c0_6 = arith.constant 0 : index
    %c0_7 = arith.constant 0 : index
    %7 = vector.load %arg4[%c0_6, %c0_7] : memref<1x32xf32, #tpu.memory_space<vmem>>, vector<1x32xf32>
    %cst_8 = arith.constant dense<0.000000e+00> : vector<32xf32>
    %8 = vector.multi_reduction <add>, %2, %cst_8 [0] : vector<32x32xf32> to vector<32xf32>
    %9 = vector.shape_cast %8 : vector<32xf32> to vector<1x32xf32>
    %10 = arith.addf %7, %9 : vector<1x32xf32>
    %c0_9 = arith.constant 0 : index
    %c0_10 = arith.constant 0 : index
    %11 = vector.load %arg4[%c0_9, %c0_10] : memref<1x32xf32, #tpu.memory_space<vmem>>, vector<1x32xf32>
    tpu.vector_store %arg4[%c0_9, %c0_10], %10 {strides = array<i32>} : memref<1x32xf32, #tpu.memory_space<vmem>>, vector<1x32xf32>,
    %c0_11 = arith.constant 0 : index
    %c0_12 = arith.constant 0 : index
    %12 = vector.load %arg5[%c0_11, %c0_12] : memref<1x32xf32, #tpu.memory_space<vmem>>, vector<1x32xf32>
    %13 = arith.mulf %2, %2 : vector<32x32xf32>
    %cst_13 = arith.constant dense<0.000000e+00> : vector<32xf32>
    %14 = vector.multi_reduction <add>, %13, %cst_13 [0] : vector<32x32xf32> to vector<32xf32>
    %15 = vector.shape_cast %14 : vector<32xf32> to vector<1x32xf32>
    %16 = arith.addf %12, %15 : vector<1x32xf32>
    %c0_14 = arith.constant 0 : index
    %c0_15 = arith.constant 0 : index
    %17 = vector.load %arg5[%c0_14, %c0_15] : memref<1x32xf32, #tpu.memory_space<vmem>>, vector<1x32xf32>
    tpu.vector_store %arg5[%c0_14, %c0_15], %16 {strides = array<i32>} : memref<1x32xf32, #tpu.memory_space<vmem>>, vector<1x32xf32>,
    return
  }
  func.func @transform_0(%arg0: i32) -> (i32, i32) {
    %c0_i32 = arith.constant 0 : i32
    %c0_i32_0 = arith.constant 0 : i32
    return %arg0, %c0_i32 : i32, i32
  }
  func.func @transform_1(%arg0: i32) -> (i32, i32) {
    %c0_i32 = arith.constant 0 : i32
    %c0_i32_0 = arith.constant 0 : i32
    %c0_i32_1 = arith.constant 0 : i32
    return %c0_i32, %c0_i32_0 : i32, i32
  }
  func.func @transform_2(%arg0: i32) -> (i32, i32) {
    %c0_i32 = arith.constant 0 : i32
    %c0_i32_0 = arith.constant 0 : i32
    return %arg0, %c0_i32 : i32, i32
  }
  func.func @transform_3(%arg0: i32) -> (i32, i32) {
    %c0_i32 = arith.constant 0 : i32
    %c0_i32_0 = arith.constant 0 : i32
    %c0_i32_1 = arith.constant 0 : i32
    return %c0_i32, %c0_i32_0 : i32, i32
  }
  func.func @transform_4(%arg0: i32) -> (i32, i32) {
    %c0_i32 = arith.constant 0 : i32
    %c0_i32_0 = arith.constant 0 : i32
    %c0_i32_1 = arith.constant 0 : i32
    return %c0_i32, %c0_i32_0 : i32, i32
  }
}

module attributes {stable_mosaic.version = 11 : i64} {
  func.func @_max4_kernel(%arg0: i32, %arg1: memref<2x128xf32, #tpu.memory_space<vmem>>, %arg2: memref<2x128xf32, #tpu.memory_space<vmem>>, %arg3: memref<2x128xf32, #tpu.memory_space<vmem>>, %arg4: memref<2x128xf32, #tpu.memory_space<vmem>>, %arg5: memref<2x128xf32, #tpu.memory_space<vmem>>) attributes {dimension_semantics = [#tpu.dimension_semantics<parallel>], iteration_bounds = array<i64: 1>, scalar_prefetch = 0 : i64, scratch_operands = 0 : i64, tpu.core_type = #tpu.core_type<tc>, window_params = [{transform_indices = @transform_0, window_bounds = array<i64: 2, 128>}, {transform_indices = @transform_1, window_bounds = array<i64: 2, 128>}, {transform_indices = @transform_2, window_bounds = array<i64: 2, 128>}, {transform_indices = @transform_3, window_bounds = array<i64: 2, 128>}, {transform_indices = @transform_4, window_bounds = array<i64: 2, 128>}]} {
    %c0 = arith.constant 0 : index
    %c0_0 = arith.constant 0 : index
    %0 = vector.load %arg1[%c0, %c0_0] : memref<2x128xf32, #tpu.memory_space<vmem>>, vector<2x128xf32>
    %c0_1 = arith.constant 0 : index
    %c0_2 = arith.constant 0 : index
    %1 = vector.load %arg2[%c0_1, %c0_2] : memref<2x128xf32, #tpu.memory_space<vmem>>, vector<2x128xf32>
    %2 = arith.maximumf %0, %1 : vector<2x128xf32>
    %c0_3 = arith.constant 0 : index
    %c0_4 = arith.constant 0 : index
    %3 = vector.load %arg3[%c0_3, %c0_4] : memref<2x128xf32, #tpu.memory_space<vmem>>, vector<2x128xf32>
    %c0_5 = arith.constant 0 : index
    %c0_6 = arith.constant 0 : index
    %4 = vector.load %arg4[%c0_5, %c0_6] : memref<2x128xf32, #tpu.memory_space<vmem>>, vector<2x128xf32>
    %5 = arith.maximumf %3, %4 : vector<2x128xf32>
    %6 = arith.maximumf %2, %5 : vector<2x128xf32>
    %c0_7 = arith.constant 0 : index
    %c0_8 = arith.constant 0 : index
    %7 = vector.load %arg5[%c0_7, %c0_8] : memref<2x128xf32, #tpu.memory_space<vmem>>, vector<2x128xf32>
    tpu.vector_store %arg5[%c0_7, %c0_8], %6 {strides = array<i32>} : memref<2x128xf32, #tpu.memory_space<vmem>>, vector<2x128xf32>,
    return
  }
  func.func @transform_0(%arg0: i32) -> (i32, i32) {
    %c0_i32 = arith.constant 0 : i32
    %c0_i32_0 = arith.constant 0 : i32
    return %arg0, %c0_i32 : i32, i32
  }
  func.func @transform_1(%arg0: i32) -> (i32, i32) {
    %c0_i32 = arith.constant 0 : i32
    %c0_i32_0 = arith.constant 0 : i32
    return %arg0, %c0_i32 : i32, i32
  }
  func.func @transform_2(%arg0: i32) -> (i32, i32) {
    %c0_i32 = arith.constant 0 : i32
    %c0_i32_0 = arith.constant 0 : i32
    return %arg0, %c0_i32 : i32, i32
  }
  func.func @transform_3(%arg0: i32) -> (i32, i32) {
    %c0_i32 = arith.constant 0 : i32
    %c0_i32_0 = arith.constant 0 : i32
    return %arg0, %c0_i32 : i32, i32
  }
  func.func @transform_4(%arg0: i32) -> (i32, i32) {
    %c0_i32 = arith.constant 0 : i32
    %c0_i32_0 = arith.constant 0 : i32
    return %arg0, %c0_i32 : i32, i32
  }
}

module attributes {stable_mosaic.version = 11 : i64} {
  func.func @_matmul_stats_kernel(%arg0: i32, %arg1: memref<8x288xbf16, #tpu.memory_space<vmem>>, %arg2: memref<288x64xbf16, #tpu.memory_space<vmem>>, %arg3: memref<8x64xf32, #tpu.memory_space<vmem>>, %arg4: memref<1x64xf32, #tpu.memory_space<vmem>>, %arg5: memref<1x64xf32, #tpu.memory_space<vmem>>) attributes {dimension_semantics = [#tpu.dimension_semantics<arbitrary>], iteration_bounds = array<i64: 1>, scalar_prefetch = 0 : i64, scratch_operands = 0 : i64, tpu.core_type = #tpu.core_type<tc>, window_params = [{transform_indices = @transform_0, window_bounds = array<i64: 8, 288>}, {pipeline_mode = #tpu.pipeline_mode<synchronous>, transform_indices = @transform_1, window_bounds = array<i64: 288, 64>}, {transform_indices = @transform_2, window_bounds = array<i64: 8, 64>}, {pipeline_mode = #tpu.pipeline_mode<synchronous>, transform_indices = @transform_3, window_bounds = array<i64: 1, 64>}, {pipeline_mode = #tpu.pipeline_mode<synchronous>, transform_indices = @transform_4, window_bounds = array<i64: 1, 64>}]} {
    %c0 = arith.constant 0 : index
    %c0_0 = arith.constant 0 : index
    %0 = vector.load %arg1[%c0, %c0_0] : memref<8x288xbf16, #tpu.memory_space<vmem>>, vector<8x288xbf16>
    %c0_1 = arith.constant 0 : index
    %c0_2 = arith.constant 0 : index
    %1 = vector.load %arg2[%c0_1, %c0_2] : memref<288x64xbf16, #tpu.memory_space<vmem>>, vector<288x64xbf16>
    %cst = arith.constant dense<0.000000e+00> : vector<8x64xf32>
    %2 = tpu.matmul %0, %1, %cst {dimension_numbers = #tpu.dot_dimension_numbers<[1], [0], [0], [1], [0, 0, 1, 1], [], []>} : vector<8x288xbf16>, vector<288x64xbf16>, vector<8x64xf32> -> vector<8x64xf32>
    %c0_3 = arith.constant 0 : index
    %c0_4 = arith.constant 0 : index
    %3 = vector.load %arg3[%c0_3, %c0_4] : memref<8x64xf32, #tpu.memory_space<vmem>>, vector<8x64xf32>
    tpu.vector_store %arg3[%c0_3, %c0_4], %2 {strides = array<i32>} : memref<8x64xf32, #tpu.memory_space<vmem>>, vector<8x64xf32>,
    %c0_i32 = arith.constant 0 : i32
    %4 = arith.cmpi eq, %arg0, %c0_i32 : i32
    %5 = arith.extui %4 : i1 to i32
    %c0_i32_5 = arith.constant 0 : i32
    %6 = arith.cmpi ne, %5, %c0_i32_5 : i32
    scf.if %6 {
      %cst_16 = arith.constant 0.000000e+00 : f32
      %18 = vector.broadcast %cst_16 : f32 to vector<1x64xf32>
      %c0_17 = arith.constant 0 : index
      %c0_18 = arith.constant 0 : index
      %19 = vector.load %arg4[%c0_17, %c0_18] : memref<1x64xf32, #tpu.memory_space<vmem>>, vector<1x64xf32>
      tpu.vector_store %arg4[%c0_17, %c0_18], %18 {strides = array<i32>} : memref<1x64xf32, #tpu.memory_space<vmem>>, vector<1x64xf32>,
      %cst_19 = arith.constant 0.000000e+00 : f32
      %20 = vector.broadcast %cst_19 : f32 to vector<1x64xf32>
      %c0_20 = arith.constant 0 : index
      %c0_21 = arith.constant 0 : index
      %21 = vector.load %arg5[%c0_20, %c0_21] : memref<1x64xf32, #tpu.memory_space<vmem>>, vector<1x64xf32>
      tpu.vector_store %arg5[%c0_20, %c0_21], %20 {strides = array<i32>} : memref<1x64xf32, #tpu.memory_space<vmem>>, vector<1x64xf32>,
    } else {
    }
    %c0_6 = arith.constant 0 : index
    %c0_7 = arith.constant 0 : index
    %7 = vector.load %arg4[%c0_6, %c0_7] : memref<1x64xf32, #tpu.memory_space<vmem>>, vector<1x64xf32>
    %cst_8 = arith.constant dense<0.000000e+00> : vector<64xf32>
    %8 = vector.multi_reduction <add>, %2, %cst_8 [0] : vector<8x64xf32> to vector<64xf32>
    %9 = vector.shape_cast %8 : vector<64xf32> to vector<1x64xf32>
    %10 = arith.addf %7, %9 : vector<1x64xf32>
    %c0_9 = arith.constant 0 : index
    %c0_10 = arith.constant 0 : index
    %11 = vector.load %arg4[%c0_9, %c0_10] : memref<1x64xf32, #tpu.memory_space<vmem>>, vector<1x64xf32>
    tpu.vector_store %arg4[%c0_9, %c0_10], %10 {strides = array<i32>} : memref<1x64xf32, #tpu.memory_space<vmem>>, vector<1x64xf32>,
    %c0_11 = arith.constant 0 : index
    %c0_12 = arith.constant 0 : index
    %12 = vector.load %arg5[%c0_11, %c0_12] : memref<1x64xf32, #tpu.memory_space<vmem>>, vector<1x64xf32>
    %13 = arith.mulf %2, %2 : vector<8x64xf32>
    %cst_13 = arith.constant dense<0.000000e+00> : vector<64xf32>
    %14 = vector.multi_reduction <add>, %13, %cst_13 [0] : vector<8x64xf32> to vector<64xf32>
    %15 = vector.shape_cast %14 : vector<64xf32> to vector<1x64xf32>
    %16 = arith.addf %12, %15 : vector<1x64xf32>
    %c0_14 = arith.constant 0 : index
    %c0_15 = arith.constant 0 : index
    %17 = vector.load %arg5[%c0_14, %c0_15] : memref<1x64xf32, #tpu.memory_space<vmem>>, vector<1x64xf32>
    tpu.vector_store %arg5[%c0_14, %c0_15], %16 {strides = array<i32>} : memref<1x64xf32, #tpu.memory_space<vmem>>, vector<1x64xf32>,
    return
  }
  func.func @transform_0(%arg0: i32) -> (i32, i32) {
    %c0_i32 = arith.constant 0 : i32
    %c0_i32_0 = arith.constant 0 : i32
    return %arg0, %c0_i32 : i32, i32
  }
  func.func @transform_1(%arg0: i32) -> (i32, i32) {
    %c0_i32 = arith.constant 0 : i32
    %c0_i32_0 = arith.constant 0 : i32
    %c0_i32_1 = arith.constant 0 : i32
    return %c0_i32, %c0_i32_0 : i32, i32
  }
  func.func @transform_2(%arg0: i32) -> (i32, i32) {
    %c0_i32 = arith.constant 0 : i32
    %c0_i32_0 = arith.constant 0 : i32
    return %arg0, %c0_i32 : i32, i32
  }
  func.func @transform_3(%arg0: i32) -> (i32, i32) {
    %c0_i32 = arith.constant 0 : i32
    %c0_i32_0 = arith.constant 0 : i32
    %c0_i32_1 = arith.constant 0 : i32
    return %c0_i32, %c0_i32_0 : i32, i32
  }
  func.func @transform_4(%arg0: i32) -> (i32, i32) {
    %c0_i32 = arith.constant 0 : i32
    %c0_i32_0 = arith.constant 0 : i32
    %c0_i32_1 = arith.constant 0 : i32
    return %c0_i32, %c0_i32_0 : i32, i32
  }
}

module attributes {stable_mosaic.version = 11 : i64} {
  func.func @_affine_relu_kernel(%arg0: i32, %arg1: memref<4x128xf32, #tpu.memory_space<vmem>>, %arg2: memref<1x128xf32, #tpu.memory_space<vmem>>, %arg3: memref<1x128xf32, #tpu.memory_space<vmem>>, %arg4: memref<4x128xf32, #tpu.memory_space<vmem>>) attributes {dimension_semantics = [#tpu.dimension_semantics<parallel>], iteration_bounds = array<i64: 1>, scalar_prefetch = 0 : i64, scratch_operands = 0 : i64, tpu.core_type = #tpu.core_type<tc>, window_params = [{transform_indices = @transform_0, window_bounds = array<i64: 4, 128>}, {pipeline_mode = #tpu.pipeline_mode<synchronous>, transform_indices = @transform_1, window_bounds = array<i64: 1, 128>}, {pipeline_mode = #tpu.pipeline_mode<synchronous>, transform_indices = @transform_2, window_bounds = array<i64: 1, 128>}, {transform_indices = @transform_3, window_bounds = array<i64: 4, 128>}]} {
    %c0 = arith.constant 0 : index
    %c0_0 = arith.constant 0 : index
    %0 = vector.load %arg1[%c0, %c0_0] : memref<4x128xf32, #tpu.memory_space<vmem>>, vector<4x128xf32>
    %c0_1 = arith.constant 0 : index
    %c0_2 = arith.constant 0 : index
    %1 = vector.load %arg2[%c0_1, %c0_2] : memref<1x128xf32, #tpu.memory_space<vmem>>, vector<1x128xf32>
    %2 = vector.broadcast %1 : vector<1x128xf32> to vector<4x128xf32>
    %3 = arith.mulf %0, %2 : vector<4x128xf32>
    %c0_3 = arith.constant 0 : index
    %c0_4 = arith.constant 0 : index
    %4 = vector.load %arg3[%c0_3, %c0_4] : memref<1x128xf32, #tpu.memory_space<vmem>>, vector<1x128xf32>
    %5 = vector.broadcast %4 : vector<1x128xf32> to vector<4x128xf32>
    %6 = arith.addf %3, %5 : vector<4x128xf32>
    %cst = arith.constant 0.000000e+00 : f32
    %7 = vector.broadcast %cst : f32 to vector<4x128xf32>
    %8 = arith.maximumf %6, %7 : vector<4x128xf32>
    %c0_5 = arith.constant 0 : index
    %c0_6 = arith.constant 0 : index
    %9 = vector.load %arg4[%c0_5, %c0_6] : memref<4x128xf32, #tpu.memory_space<vmem>>, vector<4x128xf32>
    tpu.vector_store %arg4[%c0_5, %c0_6], %8 {strides = array<i32>} : memref<4x128xf32, #tpu.memory_space<vmem>>, vector<4x128xf32>,
    return
  }
  func.func @transform_0(%arg0: i32) -> (i32, i32) {
    %c0_i32 = arith.constant 0 : i32
    %c0_i32_0 = arith.constant 0 : i32
    return %arg0, %c0_i32 : i32, i32
  }
  func.func @transform_1(%arg0: i32) -> (i32, i32) {
    %c0_i32 = arith.constant 0 : i32
    %c0_i32_0 = arith.constant 0 : i32
    %c0_i32_1 = arith.constant 0 : i32
    return %c0_i32, %c0_i32_0 : i32, i32
  }
  func.func @transform_2(%arg0: i32) -> (i32, i32) {
    %c0_i32 = arith.constant 0 : i32
    %c0_i32_0 = arith.constant 0 : i32
    %c0_i32_1 = arith.constant 0 : i32
    return %c0_i32, %c0_i32_0 : i32, i32
  }
  func.func @transform_3(%arg0: i32) -> (i32, i32) {
    %c0_i32 = arith.constant 0 : i32
    %c0_i32_0 = arith.constant 0 : i32
    return %arg0, %c0_i32 : i32, i32
  }
}

module attributes {stable_mosaic.version = 11 : i64} {
  func.func @_matmul_stats_kernel(%arg0: i32, %arg1: memref<8x576xbf16, #tpu.memory_space<vmem>>, %arg2: memref<576x64xbf16, #tpu.memory_space<vmem>>, %arg3: memref<8x64xf32, #tpu.memory_space<vmem>>, %arg4: memref<1x64xf32, #tpu.memory_space<vmem>>, %arg5: memref<1x64xf32, #tpu.memory_space<vmem>>) attributes {dimension_semantics = [#tpu.dimension_semantics<arbitrary>], iteration_bounds = array<i64: 1>, scalar_prefetch = 0 : i64, scratch_operands = 0 : i64, tpu.core_type = #tpu.core_type<tc>, window_params = [{transform_indices = @transform_0, window_bounds = array<i64: 8, 576>}, {pipeline_mode = #tpu.pipeline_mode<synchronous>, transform_indices = @transform_1, window_bounds = array<i64: 576, 64>}, {transform_indices = @transform_2, window_bounds = array<i64: 8, 64>}, {pipeline_mode = #tpu.pipeline_mode<synchronous>, transform_indices = @transform_3, window_bounds = array<i64: 1, 64>}, {pipeline_mode = #tpu.pipeline_mode<synchronous>, transform_indices = @transform_4, window_bounds = array<i64: 1, 64>}]} {
    %c0 = arith.constant 0 : index
    %c0_0 = arith.constant 0 : index
    %0 = vector.load %arg1[%c0, %c0_0] : memref<8x576xbf16, #tpu.memory_space<vmem>>, vector<8x576xbf16>
    %c0_1 = arith.constant 0 : index
    %c0_2 = arith.constant 0 : index
    %1 = vector.load %arg2[%c0_1, %c0_2] : memref<576x64xbf16, #tpu.memory_space<vmem>>, vector<576x64xbf16>
    %cst = arith.constant dense<0.000000e+00> : vector<8x64xf32>
    %2 = tpu.matmul %0, %1, %cst {dimension_numbers = #tpu.dot_dimension_numbers<[1], [0], [0], [1], [0, 0, 1, 1], [], []>} : vector<8x576xbf16>, vector<576x64xbf16>, vector<8x64xf32> -> vector<8x64xf32>
    %c0_3 = arith.constant 0 : index
    %c0_4 = arith.constant 0 : index
    %3 = vector.load %arg3[%c0_3, %c0_4] : memref<8x64xf32, #tpu.memory_space<vmem>>, vector<8x64xf32>
    tpu.vector_store %arg3[%c0_3, %c0_4], %2 {strides = array<i32>} : memref<8x64xf32, #tpu.memory_space<vmem>>, vector<8x64xf32>,
    %c0_i32 = arith.constant 0 : i32
    %4 = arith.cmpi eq, %arg0, %c0_i32 : i32
    %5 = arith.extui %4 : i1 to i32
    %c0_i32_5 = arith.constant 0 : i32
    %6 = arith.cmpi ne, %5, %c0_i32_5 : i32
    scf.if %6 {
      %cst_16 = arith.constant 0.000000e+00 : f32
      %18 = vector.broadcast %cst_16 : f32 to vector<1x64xf32>
      %c0_17 = arith.constant 0 : index
      %c0_18 = arith.constant 0 : index
      %19 = vector.load %arg4[%c0_17, %c0_18] : memref<1x64xf32, #tpu.memory_space<vmem>>, vector<1x64xf32>
      tpu.vector_store %arg4[%c0_17, %c0_18], %18 {strides = array<i32>} : memref<1x64xf32, #tpu.memory_space<vmem>>, vector<1x64xf32>,
      %cst_19 = arith.constant 0.000000e+00 : f32
      %20 = vector.broadcast %cst_19 : f32 to vector<1x64xf32>
      %c0_20 = arith.constant 0 : index
      %c0_21 = arith.constant 0 : index
      %21 = vector.load %arg5[%c0_20, %c0_21] : memref<1x64xf32, #tpu.memory_space<vmem>>, vector<1x64xf32>
      tpu.vector_store %arg5[%c0_20, %c0_21], %20 {strides = array<i32>} : memref<1x64xf32, #tpu.memory_space<vmem>>, vector<1x64xf32>,
    } else {
    }
    %c0_6 = arith.constant 0 : index
    %c0_7 = arith.constant 0 : index
    %7 = vector.load %arg4[%c0_6, %c0_7] : memref<1x64xf32, #tpu.memory_space<vmem>>, vector<1x64xf32>
    %cst_8 = arith.constant dense<0.000000e+00> : vector<64xf32>
    %8 = vector.multi_reduction <add>, %2, %cst_8 [0] : vector<8x64xf32> to vector<64xf32>
    %9 = vector.shape_cast %8 : vector<64xf32> to vector<1x64xf32>
    %10 = arith.addf %7, %9 : vector<1x64xf32>
    %c0_9 = arith.constant 0 : index
    %c0_10 = arith.constant 0 : index
    %11 = vector.load %arg4[%c0_9, %c0_10] : memref<1x64xf32, #tpu.memory_space<vmem>>, vector<1x64xf32>
    tpu.vector_store %arg4[%c0_9, %c0_10], %10 {strides = array<i32>} : memref<1x64xf32, #tpu.memory_space<vmem>>, vector<1x64xf32>,
    %c0_11 = arith.constant 0 : index
    %c0_12 = arith.constant 0 : index
    %12 = vector.load %arg5[%c0_11, %c0_12] : memref<1x64xf32, #tpu.memory_space<vmem>>, vector<1x64xf32>
    %13 = arith.mulf %2, %2 : vector<8x64xf32>
    %cst_13 = arith.constant dense<0.000000e+00> : vector<64xf32>
    %14 = vector.multi_reduction <add>, %13, %cst_13 [0] : vector<8x64xf32> to vector<64xf32>
    %15 = vector.shape_cast %14 : vector<64xf32> to vector<1x64xf32>
    %16 = arith.addf %12, %15 : vector<1x64xf32>
    %c0_14 = arith.constant 0 : index
    %c0_15 = arith.constant 0 : index
    %17 = vector.load %arg5[%c0_14, %c0_15] : memref<1x64xf32, #tpu.memory_space<vmem>>, vector<1x64xf32>
    tpu.vector_store %arg5[%c0_14, %c0_15], %16 {strides = array<i32>} : memref<1x64xf32, #tpu.memory_space<vmem>>, vector<1x64xf32>,
    return
  }
  func.func @transform_0(%arg0: i32) -> (i32, i32) {
    %c0_i32 = arith.constant 0 : i32
    %c0_i32_0 = arith.constant 0 : i32
    return %arg0, %c0_i32 : i32, i32
  }
  func.func @transform_1(%arg0: i32) -> (i32, i32) {
    %c0_i32 = arith.constant 0 : i32
    %c0_i32_0 = arith.constant 0 : i32
    %c0_i32_1 = arith.constant 0 : i32
    return %c0_i32, %c0_i32_0 : i32, i32
  }
  func.func @transform_2(%arg0: i32) -> (i32, i32) {
    %c0_i32 = arith.constant 0 : i32
    %c0_i32_0 = arith.constant 0 : i32
    return %arg0, %c0_i32 : i32, i32
  }
  func.func @transform_3(%arg0: i32) -> (i32, i32) {
    %c0_i32 = arith.constant 0 : i32
    %c0_i32_0 = arith.constant 0 : i32
    %c0_i32_1 = arith.constant 0 : i32
    return %c0_i32, %c0_i32_0 : i32, i32
  }
  func.func @transform_4(%arg0: i32) -> (i32, i32) {
    %c0_i32 = arith.constant 0 : i32
    %c0_i32_0 = arith.constant 0 : i32
    %c0_i32_1 = arith.constant 0 : i32
    return %c0_i32, %c0_i32_0 : i32, i32
  }
}

module attributes {stable_mosaic.version = 11 : i64} {
  func.func @_max4_kernel(%arg0: i32, %arg1: memref<1x128xf32, #tpu.memory_space<vmem>>, %arg2: memref<1x128xf32, #tpu.memory_space<vmem>>, %arg3: memref<1x128xf32, #tpu.memory_space<vmem>>, %arg4: memref<1x128xf32, #tpu.memory_space<vmem>>, %arg5: memref<1x128xf32, #tpu.memory_space<vmem>>) attributes {dimension_semantics = [#tpu.dimension_semantics<parallel>], iteration_bounds = array<i64: 1>, scalar_prefetch = 0 : i64, scratch_operands = 0 : i64, tpu.core_type = #tpu.core_type<tc>, window_params = [{transform_indices = @transform_0, window_bounds = array<i64: 1, 128>}, {transform_indices = @transform_1, window_bounds = array<i64: 1, 128>}, {transform_indices = @transform_2, window_bounds = array<i64: 1, 128>}, {transform_indices = @transform_3, window_bounds = array<i64: 1, 128>}, {transform_indices = @transform_4, window_bounds = array<i64: 1, 128>}]} {
    %c0 = arith.constant 0 : index
    %c0_0 = arith.constant 0 : index
    %0 = vector.load %arg1[%c0, %c0_0] : memref<1x128xf32, #tpu.memory_space<vmem>>, vector<1x128xf32>
    %c0_1 = arith.constant 0 : index
    %c0_2 = arith.constant 0 : index
    %1 = vector.load %arg2[%c0_1, %c0_2] : memref<1x128xf32, #tpu.memory_space<vmem>>, vector<1x128xf32>
    %2 = arith.maximumf %0, %1 : vector<1x128xf32>
    %c0_3 = arith.constant 0 : index
    %c0_4 = arith.constant 0 : index
    %3 = vector.load %arg3[%c0_3, %c0_4] : memref<1x128xf32, #tpu.memory_space<vmem>>, vector<1x128xf32>
    %c0_5 = arith.constant 0 : index
    %c0_6 = arith.constant 0 : index
    %4 = vector.load %arg4[%c0_5, %c0_6] : memref<1x128xf32, #tpu.memory_space<vmem>>, vector<1x128xf32>
    %5 = arith.maximumf %3, %4 : vector<1x128xf32>
    %6 = arith.maximumf %2, %5 : vector<1x128xf32>
    %c0_7 = arith.constant 0 : index
    %c0_8 = arith.constant 0 : index
    %7 = vector.load %arg5[%c0_7, %c0_8] : memref<1x128xf32, #tpu.memory_space<vmem>>, vector<1x128xf32>
    tpu.vector_store %arg5[%c0_7, %c0_8], %6 {strides = array<i32>} : memref<1x128xf32, #tpu.memory_space<vmem>>, vector<1x128xf32>,
    return
  }
  func.func @transform_0(%arg0: i32) -> (i32, i32) {
    %c0_i32 = arith.constant 0 : i32
    %c0_i32_0 = arith.constant 0 : i32
    return %arg0, %c0_i32 : i32, i32
  }
  func.func @transform_1(%arg0: i32) -> (i32, i32) {
    %c0_i32 = arith.constant 0 : i32
    %c0_i32_0 = arith.constant 0 : i32
    return %arg0, %c0_i32 : i32, i32
  }
  func.func @transform_2(%arg0: i32) -> (i32, i32) {
    %c0_i32 = arith.constant 0 : i32
    %c0_i32_0 = arith.constant 0 : i32
    return %arg0, %c0_i32 : i32, i32
  }
  func.func @transform_3(%arg0: i32) -> (i32, i32) {
    %c0_i32 = arith.constant 0 : i32
    %c0_i32_0 = arith.constant 0 : i32
    return %arg0, %c0_i32 : i32, i32
  }
  func.func @transform_4(%arg0: i32) -> (i32, i32) {
    %c0_i32 = arith.constant 0 : i32
    %c0_i32_0 = arith.constant 0 : i32
    return %arg0, %c0_i32 : i32, i32
  }
}

module attributes {stable_mosaic.version = 11 : i64} {
  func.func @_matmul_stats_kernel(%arg0: i32, %arg1: memref<2x576xbf16, #tpu.memory_space<vmem>>, %arg2: memref<576x128xbf16, #tpu.memory_space<vmem>>, %arg3: memref<2x128xf32, #tpu.memory_space<vmem>>, %arg4: memref<1x128xf32, #tpu.memory_space<vmem>>, %arg5: memref<1x128xf32, #tpu.memory_space<vmem>>) attributes {dimension_semantics = [#tpu.dimension_semantics<arbitrary>], iteration_bounds = array<i64: 1>, scalar_prefetch = 0 : i64, scratch_operands = 0 : i64, tpu.core_type = #tpu.core_type<tc>, window_params = [{transform_indices = @transform_0, window_bounds = array<i64: 2, 576>}, {pipeline_mode = #tpu.pipeline_mode<synchronous>, transform_indices = @transform_1, window_bounds = array<i64: 576, 128>}, {transform_indices = @transform_2, window_bounds = array<i64: 2, 128>}, {pipeline_mode = #tpu.pipeline_mode<synchronous>, transform_indices = @transform_3, window_bounds = array<i64: 1, 128>}, {pipeline_mode = #tpu.pipeline_mode<synchronous>, transform_indices = @transform_4, window_bounds = array<i64: 1, 128>}]} {
    %c0 = arith.constant 0 : index
    %c0_0 = arith.constant 0 : index
    %0 = vector.load %arg1[%c0, %c0_0] : memref<2x576xbf16, #tpu.memory_space<vmem>>, vector<2x576xbf16>
    %c0_1 = arith.constant 0 : index
    %c0_2 = arith.constant 0 : index
    %1 = vector.load %arg2[%c0_1, %c0_2] : memref<576x128xbf16, #tpu.memory_space<vmem>>, vector<576x128xbf16>
    %cst = arith.constant dense<0.000000e+00> : vector<2x128xf32>
    %2 = tpu.matmul %0, %1, %cst {dimension_numbers = #tpu.dot_dimension_numbers<[1], [0], [0], [1], [0, 0, 1, 1], [], []>} : vector<2x576xbf16>, vector<576x128xbf16>, vector<2x128xf32> -> vector<2x128xf32>
    %c0_3 = arith.constant 0 : index
    %c0_4 = arith.constant 0 : index
    %3 = vector.load %arg3[%c0_3, %c0_4] : memref<2x128xf32, #tpu.memory_space<vmem>>, vector<2x128xf32>
    tpu.vector_store %arg3[%c0_3, %c0_4], %2 {strides = array<i32>} : memref<2x128xf32, #tpu.memory_space<vmem>>, vector<2x128xf32>,
    %c0_i32 = arith.constant 0 : i32
    %4 = arith.cmpi eq, %arg0, %c0_i32 : i32
    %5 = arith.extui %4 : i1 to i32
    %c0_i32_5 = arith.constant 0 : i32
    %6 = arith.cmpi ne, %5, %c0_i32_5 : i32
    scf.if %6 {
      %cst_16 = arith.constant 0.000000e+00 : f32
      %18 = vector.broadcast %cst_16 : f32 to vector<1x128xf32>
      %c0_17 = arith.constant 0 : index
      %c0_18 = arith.constant 0 : index
      %19 = vector.load %arg4[%c0_17, %c0_18] : memref<1x128xf32, #tpu.memory_space<vmem>>, vector<1x128xf32>
      tpu.vector_store %arg4[%c0_17, %c0_18], %18 {strides = array<i32>} : memref<1x128xf32, #tpu.memory_space<vmem>>, vector<1x128xf32>,
      %cst_19 = arith.constant 0.000000e+00 : f32
      %20 = vector.broadcast %cst_19 : f32 to vector<1x128xf32>
      %c0_20 = arith.constant 0 : index
      %c0_21 = arith.constant 0 : index
      %21 = vector.load %arg5[%c0_20, %c0_21] : memref<1x128xf32, #tpu.memory_space<vmem>>, vector<1x128xf32>
      tpu.vector_store %arg5[%c0_20, %c0_21], %20 {strides = array<i32>} : memref<1x128xf32, #tpu.memory_space<vmem>>, vector<1x128xf32>,
    } else {
    }
    %c0_6 = arith.constant 0 : index
    %c0_7 = arith.constant 0 : index
    %7 = vector.load %arg4[%c0_6, %c0_7] : memref<1x128xf32, #tpu.memory_space<vmem>>, vector<1x128xf32>
    %cst_8 = arith.constant dense<0.000000e+00> : vector<128xf32>
    %8 = vector.multi_reduction <add>, %2, %cst_8 [0] : vector<2x128xf32> to vector<128xf32>
    %9 = vector.shape_cast %8 : vector<128xf32> to vector<1x128xf32>
    %10 = arith.addf %7, %9 : vector<1x128xf32>
    %c0_9 = arith.constant 0 : index
    %c0_10 = arith.constant 0 : index
    %11 = vector.load %arg4[%c0_9, %c0_10] : memref<1x128xf32, #tpu.memory_space<vmem>>, vector<1x128xf32>
    tpu.vector_store %arg4[%c0_9, %c0_10], %10 {strides = array<i32>} : memref<1x128xf32, #tpu.memory_space<vmem>>, vector<1x128xf32>,
    %c0_11 = arith.constant 0 : index
    %c0_12 = arith.constant 0 : index
    %12 = vector.load %arg5[%c0_11, %c0_12] : memref<1x128xf32, #tpu.memory_space<vmem>>, vector<1x128xf32>
    %13 = arith.mulf %2, %2 : vector<2x128xf32>
    %cst_13 = arith.constant dense<0.000000e+00> : vector<128xf32>
    %14 = vector.multi_reduction <add>, %13, %cst_13 [0] : vector<2x128xf32> to vector<128xf32>
    %15 = vector.shape_cast %14 : vector<128xf32> to vector<1x128xf32>
    %16 = arith.addf %12, %15 : vector<1x128xf32>
    %c0_14 = arith.constant 0 : index
    %c0_15 = arith.constant 0 : index
    %17 = vector.load %arg5[%c0_14, %c0_15] : memref<1x128xf32, #tpu.memory_space<vmem>>, vector<1x128xf32>
    tpu.vector_store %arg5[%c0_14, %c0_15], %16 {strides = array<i32>} : memref<1x128xf32, #tpu.memory_space<vmem>>, vector<1x128xf32>,
    return
  }
  func.func @transform_0(%arg0: i32) -> (i32, i32) {
    %c0_i32 = arith.constant 0 : i32
    %c0_i32_0 = arith.constant 0 : i32
    return %arg0, %c0_i32 : i32, i32
  }
  func.func @transform_1(%arg0: i32) -> (i32, i32) {
    %c0_i32 = arith.constant 0 : i32
    %c0_i32_0 = arith.constant 0 : i32
    %c0_i32_1 = arith.constant 0 : i32
    return %c0_i32, %c0_i32_0 : i32, i32
  }
  func.func @transform_2(%arg0: i32) -> (i32, i32) {
    %c0_i32 = arith.constant 0 : i32
    %c0_i32_0 = arith.constant 0 : i32
    return %arg0, %c0_i32 : i32, i32
  }
  func.func @transform_3(%arg0: i32) -> (i32, i32) {
    %c0_i32 = arith.constant 0 : i32
    %c0_i32_0 = arith.constant 0 : i32
    %c0_i32_1 = arith.constant 0 : i32
    return %c0_i32, %c0_i32_0 : i32, i32
  }
  func.func @transform_4(%arg0: i32) -> (i32, i32) {
    %c0_i32 = arith.constant 0 : i32
    %c0_i32_0 = arith.constant 0 : i32
    %c0_i32_1 = arith.constant 0 : i32
    return %c0_i32, %c0_i32_0 : i32, i32
  }
}

module attributes {stable_mosaic.version = 11 : i64} {
  func.func @_affine_relu_kernel(%arg0: i32, %arg1: memref<2x128xf32, #tpu.memory_space<vmem>>, %arg2: memref<1x128xf32, #tpu.memory_space<vmem>>, %arg3: memref<1x128xf32, #tpu.memory_space<vmem>>, %arg4: memref<2x128xf32, #tpu.memory_space<vmem>>) attributes {dimension_semantics = [#tpu.dimension_semantics<parallel>], iteration_bounds = array<i64: 1>, scalar_prefetch = 0 : i64, scratch_operands = 0 : i64, tpu.core_type = #tpu.core_type<tc>, window_params = [{transform_indices = @transform_0, window_bounds = array<i64: 2, 128>}, {pipeline_mode = #tpu.pipeline_mode<synchronous>, transform_indices = @transform_1, window_bounds = array<i64: 1, 128>}, {pipeline_mode = #tpu.pipeline_mode<synchronous>, transform_indices = @transform_2, window_bounds = array<i64: 1, 128>}, {transform_indices = @transform_3, window_bounds = array<i64: 2, 128>}]} {
    %c0 = arith.constant 0 : index
    %c0_0 = arith.constant 0 : index
    %0 = vector.load %arg1[%c0, %c0_0] : memref<2x128xf32, #tpu.memory_space<vmem>>, vector<2x128xf32>
    %c0_1 = arith.constant 0 : index
    %c0_2 = arith.constant 0 : index
    %1 = vector.load %arg2[%c0_1, %c0_2] : memref<1x128xf32, #tpu.memory_space<vmem>>, vector<1x128xf32>
    %2 = vector.broadcast %1 : vector<1x128xf32> to vector<2x128xf32>
    %3 = arith.mulf %0, %2 : vector<2x128xf32>
    %c0_3 = arith.constant 0 : index
    %c0_4 = arith.constant 0 : index
    %4 = vector.load %arg3[%c0_3, %c0_4] : memref<1x128xf32, #tpu.memory_space<vmem>>, vector<1x128xf32>
    %5 = vector.broadcast %4 : vector<1x128xf32> to vector<2x128xf32>
    %6 = arith.addf %3, %5 : vector<2x128xf32>
    %cst = arith.constant 0.000000e+00 : f32
    %7 = vector.broadcast %cst : f32 to vector<2x128xf32>
    %8 = arith.maximumf %6, %7 : vector<2x128xf32>
    %c0_5 = arith.constant 0 : index
    %c0_6 = arith.constant 0 : index
    %9 = vector.load %arg4[%c0_5, %c0_6] : memref<2x128xf32, #tpu.memory_space<vmem>>, vector<2x128xf32>
    tpu.vector_store %arg4[%c0_5, %c0_6], %8 {strides = array<i32>} : memref<2x128xf32, #tpu.memory_space<vmem>>, vector<2x128xf32>,
    return
  }
  func.func @transform_0(%arg0: i32) -> (i32, i32) {
    %c0_i32 = arith.constant 0 : i32
    %c0_i32_0 = arith.constant 0 : i32
    return %arg0, %c0_i32 : i32, i32
  }
  func.func @transform_1(%arg0: i32) -> (i32, i32) {
    %c0_i32 = arith.constant 0 : i32
    %c0_i32_0 = arith.constant 0 : i32
    %c0_i32_1 = arith.constant 0 : i32
    return %c0_i32, %c0_i32_0 : i32, i32
  }
  func.func @transform_2(%arg0: i32) -> (i32, i32) {
    %c0_i32 = arith.constant 0 : i32
    %c0_i32_0 = arith.constant 0 : i32
    %c0_i32_1 = arith.constant 0 : i32
    return %c0_i32, %c0_i32_0 : i32, i32
  }
  func.func @transform_3(%arg0: i32) -> (i32, i32) {
    %c0_i32 = arith.constant 0 : i32
    %c0_i32_0 = arith.constant 0 : i32
    return %arg0, %c0_i32 : i32, i32
  }
}

module attributes {stable_mosaic.version = 11 : i64} {
  func.func @_matmul_stats_kernel(%arg0: i32, %arg1: memref<2x1152xbf16, #tpu.memory_space<vmem>>, %arg2: memref<1152x128xbf16, #tpu.memory_space<vmem>>, %arg3: memref<2x128xf32, #tpu.memory_space<vmem>>, %arg4: memref<1x128xf32, #tpu.memory_space<vmem>>, %arg5: memref<1x128xf32, #tpu.memory_space<vmem>>) attributes {dimension_semantics = [#tpu.dimension_semantics<arbitrary>], iteration_bounds = array<i64: 1>, scalar_prefetch = 0 : i64, scratch_operands = 0 : i64, tpu.core_type = #tpu.core_type<tc>, window_params = [{transform_indices = @transform_0, window_bounds = array<i64: 2, 1152>}, {pipeline_mode = #tpu.pipeline_mode<synchronous>, transform_indices = @transform_1, window_bounds = array<i64: 1152, 128>}, {transform_indices = @transform_2, window_bounds = array<i64: 2, 128>}, {pipeline_mode = #tpu.pipeline_mode<synchronous>, transform_indices = @transform_3, window_bounds = array<i64: 1, 128>}, {pipeline_mode = #tpu.pipeline_mode<synchronous>, transform_indices = @transform_4, window_bounds = array<i64: 1, 128>}]} {
    %c0 = arith.constant 0 : index
    %c0_0 = arith.constant 0 : index
    %0 = vector.load %arg1[%c0, %c0_0] : memref<2x1152xbf16, #tpu.memory_space<vmem>>, vector<2x1152xbf16>
    %c0_1 = arith.constant 0 : index
    %c0_2 = arith.constant 0 : index
    %1 = vector.load %arg2[%c0_1, %c0_2] : memref<1152x128xbf16, #tpu.memory_space<vmem>>, vector<1152x128xbf16>
    %cst = arith.constant dense<0.000000e+00> : vector<2x128xf32>
    %2 = tpu.matmul %0, %1, %cst {dimension_numbers = #tpu.dot_dimension_numbers<[1], [0], [0], [1], [0, 0, 1, 1], [], []>} : vector<2x1152xbf16>, vector<1152x128xbf16>, vector<2x128xf32> -> vector<2x128xf32>
    %c0_3 = arith.constant 0 : index
    %c0_4 = arith.constant 0 : index
    %3 = vector.load %arg3[%c0_3, %c0_4] : memref<2x128xf32, #tpu.memory_space<vmem>>, vector<2x128xf32>
    tpu.vector_store %arg3[%c0_3, %c0_4], %2 {strides = array<i32>} : memref<2x128xf32, #tpu.memory_space<vmem>>, vector<2x128xf32>,
    %c0_i32 = arith.constant 0 : i32
    %4 = arith.cmpi eq, %arg0, %c0_i32 : i32
    %5 = arith.extui %4 : i1 to i32
    %c0_i32_5 = arith.constant 0 : i32
    %6 = arith.cmpi ne, %5, %c0_i32_5 : i32
    scf.if %6 {
      %cst_16 = arith.constant 0.000000e+00 : f32
      %18 = vector.broadcast %cst_16 : f32 to vector<1x128xf32>
      %c0_17 = arith.constant 0 : index
      %c0_18 = arith.constant 0 : index
      %19 = vector.load %arg4[%c0_17, %c0_18] : memref<1x128xf32, #tpu.memory_space<vmem>>, vector<1x128xf32>
      tpu.vector_store %arg4[%c0_17, %c0_18], %18 {strides = array<i32>} : memref<1x128xf32, #tpu.memory_space<vmem>>, vector<1x128xf32>,
      %cst_19 = arith.constant 0.000000e+00 : f32
      %20 = vector.broadcast %cst_19 : f32 to vector<1x128xf32>
      %c0_20 = arith.constant 0 : index
      %c0_21 = arith.constant 0 : index
      %21 = vector.load %arg5[%c0_20, %c0_21] : memref<1x128xf32, #tpu.memory_space<vmem>>, vector<1x128xf32>
      tpu.vector_store %arg5[%c0_20, %c0_21], %20 {strides = array<i32>} : memref<1x128xf32, #tpu.memory_space<vmem>>, vector<1x128xf32>,
    } else {
    }
    %c0_6 = arith.constant 0 : index
    %c0_7 = arith.constant 0 : index
    %7 = vector.load %arg4[%c0_6, %c0_7] : memref<1x128xf32, #tpu.memory_space<vmem>>, vector<1x128xf32>
    %cst_8 = arith.constant dense<0.000000e+00> : vector<128xf32>
    %8 = vector.multi_reduction <add>, %2, %cst_8 [0] : vector<2x128xf32> to vector<128xf32>
    %9 = vector.shape_cast %8 : vector<128xf32> to vector<1x128xf32>
    %10 = arith.addf %7, %9 : vector<1x128xf32>
    %c0_9 = arith.constant 0 : index
    %c0_10 = arith.constant 0 : index
    %11 = vector.load %arg4[%c0_9, %c0_10] : memref<1x128xf32, #tpu.memory_space<vmem>>, vector<1x128xf32>
    tpu.vector_store %arg4[%c0_9, %c0_10], %10 {strides = array<i32>} : memref<1x128xf32, #tpu.memory_space<vmem>>, vector<1x128xf32>,
    %c0_11 = arith.constant 0 : index
    %c0_12 = arith.constant 0 : index
    %12 = vector.load %arg5[%c0_11, %c0_12] : memref<1x128xf32, #tpu.memory_space<vmem>>, vector<1x128xf32>
    %13 = arith.mulf %2, %2 : vector<2x128xf32>
    %cst_13 = arith.constant dense<0.000000e+00> : vector<128xf32>
    %14 = vector.multi_reduction <add>, %13, %cst_13 [0] : vector<2x128xf32> to vector<128xf32>
    %15 = vector.shape_cast %14 : vector<128xf32> to vector<1x128xf32>
    %16 = arith.addf %12, %15 : vector<1x128xf32>
    %c0_14 = arith.constant 0 : index
    %c0_15 = arith.constant 0 : index
    %17 = vector.load %arg5[%c0_14, %c0_15] : memref<1x128xf32, #tpu.memory_space<vmem>>, vector<1x128xf32>
    tpu.vector_store %arg5[%c0_14, %c0_15], %16 {strides = array<i32>} : memref<1x128xf32, #tpu.memory_space<vmem>>, vector<1x128xf32>,
    return
  }
  func.func @transform_0(%arg0: i32) -> (i32, i32) {
    %c0_i32 = arith.constant 0 : i32
    %c0_i32_0 = arith.constant 0 : i32
    return %arg0, %c0_i32 : i32, i32
  }
  func.func @transform_1(%arg0: i32) -> (i32, i32) {
    %c0_i32 = arith.constant 0 : i32
    %c0_i32_0 = arith.constant 0 : i32
    %c0_i32_1 = arith.constant 0 : i32
    return %c0_i32, %c0_i32_0 : i32, i32
  }
  func.func @transform_2(%arg0: i32) -> (i32, i32) {
    %c0_i32 = arith.constant 0 : i32
    %c0_i32_0 = arith.constant 0 : i32
    return %arg0, %c0_i32 : i32, i32
  }
  func.func @transform_3(%arg0: i32) -> (i32, i32) {
    %c0_i32 = arith.constant 0 : i32
    %c0_i32_0 = arith.constant 0 : i32
    %c0_i32_1 = arith.constant 0 : i32
    return %c0_i32, %c0_i32_0 : i32, i32
  }
  func.func @transform_4(%arg0: i32) -> (i32, i32) {
    %c0_i32 = arith.constant 0 : i32
    %c0_i32_0 = arith.constant 0 : i32
    %c0_i32_1 = arith.constant 0 : i32
    return %c0_i32, %c0_i32_0 : i32, i32
  }
}

module attributes {stable_mosaic.version = 11 : i64} {
  func.func @_matmul_bias_kernel(%arg0: i32, %arg1: memref<2x128xbf16, #tpu.memory_space<vmem>>, %arg2: memref<128x256xbf16, #tpu.memory_space<vmem>>, %arg3: memref<1x256xf32, #tpu.memory_space<vmem>>, %arg4: memref<2x256xf32, #tpu.memory_space<vmem>>) attributes {dimension_semantics = [#tpu.dimension_semantics<parallel>], iteration_bounds = array<i64: 1>, scalar_prefetch = 0 : i64, scratch_operands = 0 : i64, tpu.core_type = #tpu.core_type<tc>, window_params = [{transform_indices = @transform_0, window_bounds = array<i64: 2, 128>}, {pipeline_mode = #tpu.pipeline_mode<synchronous>, transform_indices = @transform_1, window_bounds = array<i64: 128, 256>}, {pipeline_mode = #tpu.pipeline_mode<synchronous>, transform_indices = @transform_2, window_bounds = array<i64: 1, 256>}, {transform_indices = @transform_3, window_bounds = array<i64: 2, 256>}]} {
    %c0 = arith.constant 0 : index
    %c0_0 = arith.constant 0 : index
    %0 = vector.load %arg1[%c0, %c0_0] : memref<2x128xbf16, #tpu.memory_space<vmem>>, vector<2x128xbf16>
    %c0_1 = arith.constant 0 : index
    %c0_2 = arith.constant 0 : index
    %1 = vector.load %arg2[%c0_1, %c0_2] : memref<128x256xbf16, #tpu.memory_space<vmem>>, vector<128x256xbf16>
    %cst = arith.constant dense<0.000000e+00> : vector<2x256xf32>
    %2 = tpu.matmul %0, %1, %cst {dimension_numbers = #tpu.dot_dimension_numbers<[1], [0], [0], [1], [0, 0, 1, 1], [], []>} : vector<2x128xbf16>, vector<128x256xbf16>, vector<2x256xf32> -> vector<2x256xf32>
    %c0_3 = arith.constant 0 : index
    %c0_4 = arith.constant 0 : index
    %3 = vector.load %arg3[%c0_3, %c0_4] : memref<1x256xf32, #tpu.memory_space<vmem>>, vector<1x256xf32>
    %4 = vector.broadcast %3 : vector<1x256xf32> to vector<2x256xf32>
    %5 = arith.addf %2, %4 : vector<2x256xf32>
    %c0_5 = arith.constant 0 : index
    %c0_6 = arith.constant 0 : index
    %6 = vector.load %arg4[%c0_5, %c0_6] : memref<2x256xf32, #tpu.memory_space<vmem>>, vector<2x256xf32>
    tpu.vector_store %arg4[%c0_5, %c0_6], %5 {strides = array<i32>} : memref<2x256xf32, #tpu.memory_space<vmem>>, vector<2x256xf32>,
    return
  }
  func.func @transform_0(%arg0: i32) -> (i32, i32) {
    %c0_i32 = arith.constant 0 : i32
    %c0_i32_0 = arith.constant 0 : i32
    return %arg0, %c0_i32 : i32, i32
  }
  func.func @transform_1(%arg0: i32) -> (i32, i32) {
    %c0_i32 = arith.constant 0 : i32
    %c0_i32_0 = arith.constant 0 : i32
    %c0_i32_1 = arith.constant 0 : i32
    return %c0_i32, %c0_i32_0 : i32, i32
  }
  func.func @transform_2(%arg0: i32) -> (i32, i32) {
    %c0_i32 = arith.constant 0 : i32
    %c0_i32_0 = arith.constant 0 : i32
    %c0_i32_1 = arith.constant 0 : i32
    return %c0_i32, %c0_i32_0 : i32, i32
  }
  func.func @transform_3(%arg0: i32) -> (i32, i32) {
    %c0_i32 = arith.constant 0 : i32
    %c0_i32_0 = arith.constant 0 : i32
    return %arg0, %c0_i32 : i32, i32
  }
}

module attributes {stable_mosaic.version = 11 : i64} {
  func.func @_matmul_stats_kernel(%arg0: i32, %arg1: memref<8x1152xbf16, #tpu.memory_space<vmem>>, %arg2: memref<1152x64xbf16, #tpu.memory_space<vmem>>, %arg3: memref<8x64xf32, #tpu.memory_space<vmem>>, %arg4: memref<1x64xf32, #tpu.memory_space<vmem>>, %arg5: memref<1x64xf32, #tpu.memory_space<vmem>>) attributes {dimension_semantics = [#tpu.dimension_semantics<arbitrary>], iteration_bounds = array<i64: 1>, scalar_prefetch = 0 : i64, scratch_operands = 0 : i64, tpu.core_type = #tpu.core_type<tc>, window_params = [{transform_indices = @transform_0, window_bounds = array<i64: 8, 1152>}, {pipeline_mode = #tpu.pipeline_mode<synchronous>, transform_indices = @transform_1, window_bounds = array<i64: 1152, 64>}, {transform_indices = @transform_2, window_bounds = array<i64: 8, 64>}, {pipeline_mode = #tpu.pipeline_mode<synchronous>, transform_indices = @transform_3, window_bounds = array<i64: 1, 64>}, {pipeline_mode = #tpu.pipeline_mode<synchronous>, transform_indices = @transform_4, window_bounds = array<i64: 1, 64>}]} {
    %c0 = arith.constant 0 : index
    %c0_0 = arith.constant 0 : index
    %0 = vector.load %arg1[%c0, %c0_0] : memref<8x1152xbf16, #tpu.memory_space<vmem>>, vector<8x1152xbf16>
    %c0_1 = arith.constant 0 : index
    %c0_2 = arith.constant 0 : index
    %1 = vector.load %arg2[%c0_1, %c0_2] : memref<1152x64xbf16, #tpu.memory_space<vmem>>, vector<1152x64xbf16>
    %cst = arith.constant dense<0.000000e+00> : vector<8x64xf32>
    %2 = tpu.matmul %0, %1, %cst {dimension_numbers = #tpu.dot_dimension_numbers<[1], [0], [0], [1], [0, 0, 1, 1], [], []>} : vector<8x1152xbf16>, vector<1152x64xbf16>, vector<8x64xf32> -> vector<8x64xf32>
    %c0_3 = arith.constant 0 : index
    %c0_4 = arith.constant 0 : index
    %3 = vector.load %arg3[%c0_3, %c0_4] : memref<8x64xf32, #tpu.memory_space<vmem>>, vector<8x64xf32>
    tpu.vector_store %arg3[%c0_3, %c0_4], %2 {strides = array<i32>} : memref<8x64xf32, #tpu.memory_space<vmem>>, vector<8x64xf32>,
    %c0_i32 = arith.constant 0 : i32
    %4 = arith.cmpi eq, %arg0, %c0_i32 : i32
    %5 = arith.extui %4 : i1 to i32
    %c0_i32_5 = arith.constant 0 : i32
    %6 = arith.cmpi ne, %5, %c0_i32_5 : i32
    scf.if %6 {
      %cst_16 = arith.constant 0.000000e+00 : f32
      %18 = vector.broadcast %cst_16 : f32 to vector<1x64xf32>
      %c0_17 = arith.constant 0 : index
      %c0_18 = arith.constant 0 : index
      %19 = vector.load %arg4[%c0_17, %c0_18] : memref<1x64xf32, #tpu.memory_space<vmem>>, vector<1x64xf32>
      tpu.vector_store %arg4[%c0_17, %c0_18], %18 {strides = array<i32>} : memref<1x64xf32, #tpu.memory_space<vmem>>, vector<1x64xf32>,
      %cst_19 = arith.constant 0.000000e+00 : f32
      %20 = vector.broadcast %cst_19 : f32 to vector<1x64xf32>
      %c0_20 = arith.constant 0 : index
      %c0_21 = arith.constant 0 : index
      %21 = vector.load %arg5[%c0_20, %c0_21] : memref<1x64xf32, #tpu.memory_space<vmem>>, vector<1x64xf32>
      tpu.vector_store %arg5[%c0_20, %c0_21], %20 {strides = array<i32>} : memref<1x64xf32, #tpu.memory_space<vmem>>, vector<1x64xf32>,
    } else {
    }
    %c0_6 = arith.constant 0 : index
    %c0_7 = arith.constant 0 : index
    %7 = vector.load %arg4[%c0_6, %c0_7] : memref<1x64xf32, #tpu.memory_space<vmem>>, vector<1x64xf32>
    %cst_8 = arith.constant dense<0.000000e+00> : vector<64xf32>
    %8 = vector.multi_reduction <add>, %2, %cst_8 [0] : vector<8x64xf32> to vector<64xf32>
    %9 = vector.shape_cast %8 : vector<64xf32> to vector<1x64xf32>
    %10 = arith.addf %7, %9 : vector<1x64xf32>
    %c0_9 = arith.constant 0 : index
    %c0_10 = arith.constant 0 : index
    %11 = vector.load %arg4[%c0_9, %c0_10] : memref<1x64xf32, #tpu.memory_space<vmem>>, vector<1x64xf32>
    tpu.vector_store %arg4[%c0_9, %c0_10], %10 {strides = array<i32>} : memref<1x64xf32, #tpu.memory_space<vmem>>, vector<1x64xf32>,
    %c0_11 = arith.constant 0 : index
    %c0_12 = arith.constant 0 : index
    %12 = vector.load %arg5[%c0_11, %c0_12] : memref<1x64xf32, #tpu.memory_space<vmem>>, vector<1x64xf32>
    %13 = arith.mulf %2, %2 : vector<8x64xf32>
    %cst_13 = arith.constant dense<0.000000e+00> : vector<64xf32>
    %14 = vector.multi_reduction <add>, %13, %cst_13 [0] : vector<8x64xf32> to vector<64xf32>
    %15 = vector.shape_cast %14 : vector<64xf32> to vector<1x64xf32>
    %16 = arith.addf %12, %15 : vector<1x64xf32>
    %c0_14 = arith.constant 0 : index
    %c0_15 = arith.constant 0 : index
    %17 = vector.load %arg5[%c0_14, %c0_15] : memref<1x64xf32, #tpu.memory_space<vmem>>, vector<1x64xf32>
    tpu.vector_store %arg5[%c0_14, %c0_15], %16 {strides = array<i32>} : memref<1x64xf32, #tpu.memory_space<vmem>>, vector<1x64xf32>,
    return
  }
  func.func @transform_0(%arg0: i32) -> (i32, i32) {
    %c0_i32 = arith.constant 0 : i32
    %c0_i32_0 = arith.constant 0 : i32
    return %arg0, %c0_i32 : i32, i32
  }
  func.func @transform_1(%arg0: i32) -> (i32, i32) {
    %c0_i32 = arith.constant 0 : i32
    %c0_i32_0 = arith.constant 0 : i32
    %c0_i32_1 = arith.constant 0 : i32
    return %c0_i32, %c0_i32_0 : i32, i32
  }
  func.func @transform_2(%arg0: i32) -> (i32, i32) {
    %c0_i32 = arith.constant 0 : i32
    %c0_i32_0 = arith.constant 0 : i32
    return %arg0, %c0_i32 : i32, i32
  }
  func.func @transform_3(%arg0: i32) -> (i32, i32) {
    %c0_i32 = arith.constant 0 : i32
    %c0_i32_0 = arith.constant 0 : i32
    %c0_i32_1 = arith.constant 0 : i32
    return %c0_i32, %c0_i32_0 : i32, i32
  }
  func.func @transform_4(%arg0: i32) -> (i32, i32) {
    %c0_i32 = arith.constant 0 : i32
    %c0_i32_0 = arith.constant 0 : i32
    %c0_i32_1 = arith.constant 0 : i32
    return %c0_i32, %c0_i32_0 : i32, i32
  }
}

module attributes {stable_mosaic.version = 11 : i64} {
  func.func @_matmul_bias_kernel(%arg0: i32, %arg1: memref<8x64xbf16, #tpu.memory_space<vmem>>, %arg2: memref<64x128xbf16, #tpu.memory_space<vmem>>, %arg3: memref<1x128xf32, #tpu.memory_space<vmem>>, %arg4: memref<8x128xf32, #tpu.memory_space<vmem>>) attributes {dimension_semantics = [#tpu.dimension_semantics<parallel>], iteration_bounds = array<i64: 1>, scalar_prefetch = 0 : i64, scratch_operands = 0 : i64, tpu.core_type = #tpu.core_type<tc>, window_params = [{transform_indices = @transform_0, window_bounds = array<i64: 8, 64>}, {pipeline_mode = #tpu.pipeline_mode<synchronous>, transform_indices = @transform_1, window_bounds = array<i64: 64, 128>}, {pipeline_mode = #tpu.pipeline_mode<synchronous>, transform_indices = @transform_2, window_bounds = array<i64: 1, 128>}, {transform_indices = @transform_3, window_bounds = array<i64: 8, 128>}]} {
    %c0 = arith.constant 0 : index
    %c0_0 = arith.constant 0 : index
    %0 = vector.load %arg1[%c0, %c0_0] : memref<8x64xbf16, #tpu.memory_space<vmem>>, vector<8x64xbf16>
    %c0_1 = arith.constant 0 : index
    %c0_2 = arith.constant 0 : index
    %1 = vector.load %arg2[%c0_1, %c0_2] : memref<64x128xbf16, #tpu.memory_space<vmem>>, vector<64x128xbf16>
    %cst = arith.constant dense<0.000000e+00> : vector<8x128xf32>
    %2 = tpu.matmul %0, %1, %cst {dimension_numbers = #tpu.dot_dimension_numbers<[1], [0], [0], [1], [0, 0, 1, 1], [], []>} : vector<8x64xbf16>, vector<64x128xbf16>, vector<8x128xf32> -> vector<8x128xf32>
    %c0_3 = arith.constant 0 : index
    %c0_4 = arith.constant 0 : index
    %3 = vector.load %arg3[%c0_3, %c0_4] : memref<1x128xf32, #tpu.memory_space<vmem>>, vector<1x128xf32>
    %4 = vector.broadcast %3 : vector<1x128xf32> to vector<8x128xf32>
    %5 = arith.addf %2, %4 : vector<8x128xf32>
    %c0_5 = arith.constant 0 : index
    %c0_6 = arith.constant 0 : index
    %6 = vector.load %arg4[%c0_5, %c0_6] : memref<8x128xf32, #tpu.memory_space<vmem>>, vector<8x128xf32>
    tpu.vector_store %arg4[%c0_5, %c0_6], %5 {strides = array<i32>} : memref<8x128xf32, #tpu.memory_space<vmem>>, vector<8x128xf32>,
    return
  }
  func.func @transform_0(%arg0: i32) -> (i32, i32) {
    %c0_i32 = arith.constant 0 : i32
    %c0_i32_0 = arith.constant 0 : i32
    return %arg0, %c0_i32 : i32, i32
  }
  func.func @transform_1(%arg0: i32) -> (i32, i32) {
    %c0_i32 = arith.constant 0 : i32
    %c0_i32_0 = arith.constant 0 : i32
    %c0_i32_1 = arith.constant 0 : i32
    return %c0_i32, %c0_i32_0 : i32, i32
  }
  func.func @transform_2(%arg0: i32) -> (i32, i32) {
    %c0_i32 = arith.constant 0 : i32
    %c0_i32_0 = arith.constant 0 : i32
    %c0_i32_1 = arith.constant 0 : i32
    return %c0_i32, %c0_i32_0 : i32, i32
  }
  func.func @transform_3(%arg0: i32) -> (i32, i32) {
    %c0_i32 = arith.constant 0 : i32
    %c0_i32_0 = arith.constant 0 : i32
    return %arg0, %c0_i32 : i32, i32
  }
}

module attributes {stable_mosaic.version = 11 : i64} {
  func.func @_matmul_stats_kernel(%arg0: i32, %arg1: memref<32x576xbf16, #tpu.memory_space<vmem>>, %arg2: memref<576x32xbf16, #tpu.memory_space<vmem>>, %arg3: memref<32x32xf32, #tpu.memory_space<vmem>>, %arg4: memref<1x32xf32, #tpu.memory_space<vmem>>, %arg5: memref<1x32xf32, #tpu.memory_space<vmem>>) attributes {dimension_semantics = [#tpu.dimension_semantics<arbitrary>], iteration_bounds = array<i64: 1>, scalar_prefetch = 0 : i64, scratch_operands = 0 : i64, tpu.core_type = #tpu.core_type<tc>, window_params = [{transform_indices = @transform_0, window_bounds = array<i64: 32, 576>}, {pipeline_mode = #tpu.pipeline_mode<synchronous>, transform_indices = @transform_1, window_bounds = array<i64: 576, 32>}, {transform_indices = @transform_2, window_bounds = array<i64: 32, 32>}, {pipeline_mode = #tpu.pipeline_mode<synchronous>, transform_indices = @transform_3, window_bounds = array<i64: 1, 32>}, {pipeline_mode = #tpu.pipeline_mode<synchronous>, transform_indices = @transform_4, window_bounds = array<i64: 1, 32>}]} {
    %c0 = arith.constant 0 : index
    %c0_0 = arith.constant 0 : index
    %0 = vector.load %arg1[%c0, %c0_0] : memref<32x576xbf16, #tpu.memory_space<vmem>>, vector<32x576xbf16>
    %c0_1 = arith.constant 0 : index
    %c0_2 = arith.constant 0 : index
    %1 = vector.load %arg2[%c0_1, %c0_2] : memref<576x32xbf16, #tpu.memory_space<vmem>>, vector<576x32xbf16>
    %cst = arith.constant dense<0.000000e+00> : vector<32x32xf32>
    %2 = tpu.matmul %0, %1, %cst {dimension_numbers = #tpu.dot_dimension_numbers<[1], [0], [0], [1], [0, 0, 1, 1], [], []>} : vector<32x576xbf16>, vector<576x32xbf16>, vector<32x32xf32> -> vector<32x32xf32>
    %c0_3 = arith.constant 0 : index
    %c0_4 = arith.constant 0 : index
    %3 = vector.load %arg3[%c0_3, %c0_4] : memref<32x32xf32, #tpu.memory_space<vmem>>, vector<32x32xf32>
    tpu.vector_store %arg3[%c0_3, %c0_4], %2 {strides = array<i32>} : memref<32x32xf32, #tpu.memory_space<vmem>>, vector<32x32xf32>,
    %c0_i32 = arith.constant 0 : i32
    %4 = arith.cmpi eq, %arg0, %c0_i32 : i32
    %5 = arith.extui %4 : i1 to i32
    %c0_i32_5 = arith.constant 0 : i32
    %6 = arith.cmpi ne, %5, %c0_i32_5 : i32
    scf.if %6 {
      %cst_16 = arith.constant 0.000000e+00 : f32
      %18 = vector.broadcast %cst_16 : f32 to vector<1x32xf32>
      %c0_17 = arith.constant 0 : index
      %c0_18 = arith.constant 0 : index
      %19 = vector.load %arg4[%c0_17, %c0_18] : memref<1x32xf32, #tpu.memory_space<vmem>>, vector<1x32xf32>
      tpu.vector_store %arg4[%c0_17, %c0_18], %18 {strides = array<i32>} : memref<1x32xf32, #tpu.memory_space<vmem>>, vector<1x32xf32>,
      %cst_19 = arith.constant 0.000000e+00 : f32
      %20 = vector.broadcast %cst_19 : f32 to vector<1x32xf32>
      %c0_20 = arith.constant 0 : index
      %c0_21 = arith.constant 0 : index
      %21 = vector.load %arg5[%c0_20, %c0_21] : memref<1x32xf32, #tpu.memory_space<vmem>>, vector<1x32xf32>
      tpu.vector_store %arg5[%c0_20, %c0_21], %20 {strides = array<i32>} : memref<1x32xf32, #tpu.memory_space<vmem>>, vector<1x32xf32>,
    } else {
    }
    %c0_6 = arith.constant 0 : index
    %c0_7 = arith.constant 0 : index
    %7 = vector.load %arg4[%c0_6, %c0_7] : memref<1x32xf32, #tpu.memory_space<vmem>>, vector<1x32xf32>
    %cst_8 = arith.constant dense<0.000000e+00> : vector<32xf32>
    %8 = vector.multi_reduction <add>, %2, %cst_8 [0] : vector<32x32xf32> to vector<32xf32>
    %9 = vector.shape_cast %8 : vector<32xf32> to vector<1x32xf32>
    %10 = arith.addf %7, %9 : vector<1x32xf32>
    %c0_9 = arith.constant 0 : index
    %c0_10 = arith.constant 0 : index
    %11 = vector.load %arg4[%c0_9, %c0_10] : memref<1x32xf32, #tpu.memory_space<vmem>>, vector<1x32xf32>
    tpu.vector_store %arg4[%c0_9, %c0_10], %10 {strides = array<i32>} : memref<1x32xf32, #tpu.memory_space<vmem>>, vector<1x32xf32>,
    %c0_11 = arith.constant 0 : index
    %c0_12 = arith.constant 0 : index
    %12 = vector.load %arg5[%c0_11, %c0_12] : memref<1x32xf32, #tpu.memory_space<vmem>>, vector<1x32xf32>
    %13 = arith.mulf %2, %2 : vector<32x32xf32>
    %cst_13 = arith.constant dense<0.000000e+00> : vector<32xf32>
    %14 = vector.multi_reduction <add>, %13, %cst_13 [0] : vector<32x32xf32> to vector<32xf32>
    %15 = vector.shape_cast %14 : vector<32xf32> to vector<1x32xf32>
    %16 = arith.addf %12, %15 : vector<1x32xf32>
    %c0_14 = arith.constant 0 : index
    %c0_15 = arith.constant 0 : index
    %17 = vector.load %arg5[%c0_14, %c0_15] : memref<1x32xf32, #tpu.memory_space<vmem>>, vector<1x32xf32>
    tpu.vector_store %arg5[%c0_14, %c0_15], %16 {strides = array<i32>} : memref<1x32xf32, #tpu.memory_space<vmem>>, vector<1x32xf32>,
    return
  }
  func.func @transform_0(%arg0: i32) -> (i32, i32) {
    %c0_i32 = arith.constant 0 : i32
    %c0_i32_0 = arith.constant 0 : i32
    return %arg0, %c0_i32 : i32, i32
  }
  func.func @transform_1(%arg0: i32) -> (i32, i32) {
    %c0_i32 = arith.constant 0 : i32
    %c0_i32_0 = arith.constant 0 : i32
    %c0_i32_1 = arith.constant 0 : i32
    return %c0_i32, %c0_i32_0 : i32, i32
  }
  func.func @transform_2(%arg0: i32) -> (i32, i32) {
    %c0_i32 = arith.constant 0 : i32
    %c0_i32_0 = arith.constant 0 : i32
    return %arg0, %c0_i32 : i32, i32
  }
  func.func @transform_3(%arg0: i32) -> (i32, i32) {
    %c0_i32 = arith.constant 0 : i32
    %c0_i32_0 = arith.constant 0 : i32
    %c0_i32_1 = arith.constant 0 : i32
    return %c0_i32, %c0_i32_0 : i32, i32
  }
  func.func @transform_4(%arg0: i32) -> (i32, i32) {
    %c0_i32 = arith.constant 0 : i32
    %c0_i32_0 = arith.constant 0 : i32
    %c0_i32_1 = arith.constant 0 : i32
    return %c0_i32, %c0_i32_0 : i32, i32
  }
}

module attributes {stable_mosaic.version = 11 : i64} {
  func.func @_matmul_bias_kernel(%arg0: i32, %arg1: memref<32x32xbf16, #tpu.memory_space<vmem>>, %arg2: memref<32x64xbf16, #tpu.memory_space<vmem>>, %arg3: memref<1x64xf32, #tpu.memory_space<vmem>>, %arg4: memref<32x64xf32, #tpu.memory_space<vmem>>) attributes {dimension_semantics = [#tpu.dimension_semantics<parallel>], iteration_bounds = array<i64: 1>, scalar_prefetch = 0 : i64, scratch_operands = 0 : i64, tpu.core_type = #tpu.core_type<tc>, window_params = [{transform_indices = @transform_0, window_bounds = array<i64: 32, 32>}, {pipeline_mode = #tpu.pipeline_mode<synchronous>, transform_indices = @transform_1, window_bounds = array<i64: 32, 64>}, {pipeline_mode = #tpu.pipeline_mode<synchronous>, transform_indices = @transform_2, window_bounds = array<i64: 1, 64>}, {transform_indices = @transform_3, window_bounds = array<i64: 32, 64>}]} {
    %c0 = arith.constant 0 : index
    %c0_0 = arith.constant 0 : index
    %0 = vector.load %arg1[%c0, %c0_0] : memref<32x32xbf16, #tpu.memory_space<vmem>>, vector<32x32xbf16>
    %c0_1 = arith.constant 0 : index
    %c0_2 = arith.constant 0 : index
    %1 = vector.load %arg2[%c0_1, %c0_2] : memref<32x64xbf16, #tpu.memory_space<vmem>>, vector<32x64xbf16>
    %cst = arith.constant dense<0.000000e+00> : vector<32x64xf32>
    %2 = tpu.matmul %0, %1, %cst {dimension_numbers = #tpu.dot_dimension_numbers<[1], [0], [0], [1], [0, 0, 1, 1], [], []>} : vector<32x32xbf16>, vector<32x64xbf16>, vector<32x64xf32> -> vector<32x64xf32>
    %c0_3 = arith.constant 0 : index
    %c0_4 = arith.constant 0 : index
    %3 = vector.load %arg3[%c0_3, %c0_4] : memref<1x64xf32, #tpu.memory_space<vmem>>, vector<1x64xf32>
    %4 = vector.broadcast %3 : vector<1x64xf32> to vector<32x64xf32>
    %5 = arith.addf %2, %4 : vector<32x64xf32>
    %c0_5 = arith.constant 0 : index
    %c0_6 = arith.constant 0 : index
    %6 = vector.load %arg4[%c0_5, %c0_6] : memref<32x64xf32, #tpu.memory_space<vmem>>, vector<32x64xf32>
    tpu.vector_store %arg4[%c0_5, %c0_6], %5 {strides = array<i32>} : memref<32x64xf32, #tpu.memory_space<vmem>>, vector<32x64xf32>,
    return
  }
  func.func @transform_0(%arg0: i32) -> (i32, i32) {
    %c0_i32 = arith.constant 0 : i32
    %c0_i32_0 = arith.constant 0 : i32
    return %arg0, %c0_i32 : i32, i32
  }
  func.func @transform_1(%arg0: i32) -> (i32, i32) {
    %c0_i32 = arith.constant 0 : i32
    %c0_i32_0 = arith.constant 0 : i32
    %c0_i32_1 = arith.constant 0 : i32
    return %c0_i32, %c0_i32_0 : i32, i32
  }
  func.func @transform_2(%arg0: i32) -> (i32, i32) {
    %c0_i32 = arith.constant 0 : i32
    %c0_i32_0 = arith.constant 0 : i32
    %c0_i32_1 = arith.constant 0 : i32
    return %c0_i32, %c0_i32_0 : i32, i32
  }
  func.func @transform_3(%arg0: i32) -> (i32, i32) {
    %c0_i32 = arith.constant 0 : i32
    %c0_i32_0 = arith.constant 0 : i32
    return %arg0, %c0_i32 : i32, i32
  }
}

module attributes {stable_mosaic.version = 11 : i64} {
  func.func @_matmul_stats_kernel(%arg0: i32, %arg1: memref<128x288xbf16, #tpu.memory_space<vmem>>, %arg2: memref<288x16xbf16, #tpu.memory_space<vmem>>, %arg3: memref<128x16xf32, #tpu.memory_space<vmem>>, %arg4: memref<1x16xf32, #tpu.memory_space<vmem>>, %arg5: memref<1x16xf32, #tpu.memory_space<vmem>>) attributes {dimension_semantics = [#tpu.dimension_semantics<arbitrary>], iteration_bounds = array<i64: 1>, scalar_prefetch = 0 : i64, scratch_operands = 0 : i64, tpu.core_type = #tpu.core_type<tc>, window_params = [{transform_indices = @transform_0, window_bounds = array<i64: 128, 288>}, {pipeline_mode = #tpu.pipeline_mode<synchronous>, transform_indices = @transform_1, window_bounds = array<i64: 288, 16>}, {transform_indices = @transform_2, window_bounds = array<i64: 128, 16>}, {pipeline_mode = #tpu.pipeline_mode<synchronous>, transform_indices = @transform_3, window_bounds = array<i64: 1, 16>}, {pipeline_mode = #tpu.pipeline_mode<synchronous>, transform_indices = @transform_4, window_bounds = array<i64: 1, 16>}]} {
    %c0 = arith.constant 0 : index
    %c0_0 = arith.constant 0 : index
    %0 = vector.load %arg1[%c0, %c0_0] : memref<128x288xbf16, #tpu.memory_space<vmem>>, vector<128x288xbf16>
    %c0_1 = arith.constant 0 : index
    %c0_2 = arith.constant 0 : index
    %1 = vector.load %arg2[%c0_1, %c0_2] : memref<288x16xbf16, #tpu.memory_space<vmem>>, vector<288x16xbf16>
    %cst = arith.constant dense<0.000000e+00> : vector<128x16xf32>
    %2 = tpu.matmul %0, %1, %cst {dimension_numbers = #tpu.dot_dimension_numbers<[1], [0], [0], [1], [0, 0, 1, 1], [], []>} : vector<128x288xbf16>, vector<288x16xbf16>, vector<128x16xf32> -> vector<128x16xf32>
    %c0_3 = arith.constant 0 : index
    %c0_4 = arith.constant 0 : index
    %3 = vector.load %arg3[%c0_3, %c0_4] : memref<128x16xf32, #tpu.memory_space<vmem>>, vector<128x16xf32>
    tpu.vector_store %arg3[%c0_3, %c0_4], %2 {strides = array<i32>} : memref<128x16xf32, #tpu.memory_space<vmem>>, vector<128x16xf32>,
    %c0_i32 = arith.constant 0 : i32
    %4 = arith.cmpi eq, %arg0, %c0_i32 : i32
    %5 = arith.extui %4 : i1 to i32
    %c0_i32_5 = arith.constant 0 : i32
    %6 = arith.cmpi ne, %5, %c0_i32_5 : i32
    scf.if %6 {
      %cst_16 = arith.constant 0.000000e+00 : f32
      %18 = vector.broadcast %cst_16 : f32 to vector<1x16xf32>
      %c0_17 = arith.constant 0 : index
      %c0_18 = arith.constant 0 : index
      %19 = vector.load %arg4[%c0_17, %c0_18] : memref<1x16xf32, #tpu.memory_space<vmem>>, vector<1x16xf32>
      tpu.vector_store %arg4[%c0_17, %c0_18], %18 {strides = array<i32>} : memref<1x16xf32, #tpu.memory_space<vmem>>, vector<1x16xf32>,
      %cst_19 = arith.constant 0.000000e+00 : f32
      %20 = vector.broadcast %cst_19 : f32 to vector<1x16xf32>
      %c0_20 = arith.constant 0 : index
      %c0_21 = arith.constant 0 : index
      %21 = vector.load %arg5[%c0_20, %c0_21] : memref<1x16xf32, #tpu.memory_space<vmem>>, vector<1x16xf32>
      tpu.vector_store %arg5[%c0_20, %c0_21], %20 {strides = array<i32>} : memref<1x16xf32, #tpu.memory_space<vmem>>, vector<1x16xf32>,
    } else {
    }
    %c0_6 = arith.constant 0 : index
    %c0_7 = arith.constant 0 : index
    %7 = vector.load %arg4[%c0_6, %c0_7] : memref<1x16xf32, #tpu.memory_space<vmem>>, vector<1x16xf32>
    %cst_8 = arith.constant dense<0.000000e+00> : vector<16xf32>
    %8 = vector.multi_reduction <add>, %2, %cst_8 [0] : vector<128x16xf32> to vector<16xf32>
    %9 = vector.shape_cast %8 : vector<16xf32> to vector<1x16xf32>
    %10 = arith.addf %7, %9 : vector<1x16xf32>
    %c0_9 = arith.constant 0 : index
    %c0_10 = arith.constant 0 : index
    %11 = vector.load %arg4[%c0_9, %c0_10] : memref<1x16xf32, #tpu.memory_space<vmem>>, vector<1x16xf32>
    tpu.vector_store %arg4[%c0_9, %c0_10], %10 {strides = array<i32>} : memref<1x16xf32, #tpu.memory_space<vmem>>, vector<1x16xf32>,
    %c0_11 = arith.constant 0 : index
    %c0_12 = arith.constant 0 : index
    %12 = vector.load %arg5[%c0_11, %c0_12] : memref<1x16xf32, #tpu.memory_space<vmem>>, vector<1x16xf32>
    %13 = arith.mulf %2, %2 : vector<128x16xf32>
    %cst_13 = arith.constant dense<0.000000e+00> : vector<16xf32>
    %14 = vector.multi_reduction <add>, %13, %cst_13 [0] : vector<128x16xf32> to vector<16xf32>
    %15 = vector.shape_cast %14 : vector<16xf32> to vector<1x16xf32>
    %16 = arith.addf %12, %15 : vector<1x16xf32>
    %c0_14 = arith.constant 0 : index
    %c0_15 = arith.constant 0 : index
    %17 = vector.load %arg5[%c0_14, %c0_15] : memref<1x16xf32, #tpu.memory_space<vmem>>, vector<1x16xf32>
    tpu.vector_store %arg5[%c0_14, %c0_15], %16 {strides = array<i32>} : memref<1x16xf32, #tpu.memory_space<vmem>>, vector<1x16xf32>,
    return
  }
  func.func @transform_0(%arg0: i32) -> (i32, i32) {
    %c0_i32 = arith.constant 0 : i32
    %c0_i32_0 = arith.constant 0 : i32
    return %arg0, %c0_i32 : i32, i32
  }
  func.func @transform_1(%arg0: i32) -> (i32, i32) {
    %c0_i32 = arith.constant 0 : i32
    %c0_i32_0 = arith.constant 0 : i32
    %c0_i32_1 = arith.constant 0 : i32
    return %c0_i32, %c0_i32_0 : i32, i32
  }
  func.func @transform_2(%arg0: i32) -> (i32, i32) {
    %c0_i32 = arith.constant 0 : i32
    %c0_i32_0 = arith.constant 0 : i32
    return %arg0, %c0_i32 : i32, i32
  }
  func.func @transform_3(%arg0: i32) -> (i32, i32) {
    %c0_i32 = arith.constant 0 : i32
    %c0_i32_0 = arith.constant 0 : i32
    %c0_i32_1 = arith.constant 0 : i32
    return %c0_i32, %c0_i32_0 : i32, i32
  }
  func.func @transform_4(%arg0: i32) -> (i32, i32) {
    %c0_i32 = arith.constant 0 : i32
    %c0_i32_0 = arith.constant 0 : i32
    %c0_i32_1 = arith.constant 0 : i32
    return %c0_i32, %c0_i32_0 : i32, i32
  }
}

module attributes {stable_mosaic.version = 11 : i64} {
  func.func @_matmul_bias_kernel(%arg0: i32, %arg1: memref<128x16xbf16, #tpu.memory_space<vmem>>, %arg2: memref<16x32xbf16, #tpu.memory_space<vmem>>, %arg3: memref<1x32xf32, #tpu.memory_space<vmem>>, %arg4: memref<128x32xf32, #tpu.memory_space<vmem>>) attributes {dimension_semantics = [#tpu.dimension_semantics<parallel>], iteration_bounds = array<i64: 1>, scalar_prefetch = 0 : i64, scratch_operands = 0 : i64, tpu.core_type = #tpu.core_type<tc>, window_params = [{transform_indices = @transform_0, window_bounds = array<i64: 128, 16>}, {pipeline_mode = #tpu.pipeline_mode<synchronous>, transform_indices = @transform_1, window_bounds = array<i64: 16, 32>}, {pipeline_mode = #tpu.pipeline_mode<synchronous>, transform_indices = @transform_2, window_bounds = array<i64: 1, 32>}, {transform_indices = @transform_3, window_bounds = array<i64: 128, 32>}]} {
    %c0 = arith.constant 0 : index
    %c0_0 = arith.constant 0 : index
    %0 = vector.load %arg1[%c0, %c0_0] : memref<128x16xbf16, #tpu.memory_space<vmem>>, vector<128x16xbf16>
    %c0_1 = arith.constant 0 : index
    %c0_2 = arith.constant 0 : index
    %1 = vector.load %arg2[%c0_1, %c0_2] : memref<16x32xbf16, #tpu.memory_space<vmem>>, vector<16x32xbf16>
    %cst = arith.constant dense<0.000000e+00> : vector<128x32xf32>
    %2 = tpu.matmul %0, %1, %cst {dimension_numbers = #tpu.dot_dimension_numbers<[1], [0], [0], [1], [0, 0, 1, 1], [], []>} : vector<128x16xbf16>, vector<16x32xbf16>, vector<128x32xf32> -> vector<128x32xf32>
    %c0_3 = arith.constant 0 : index
    %c0_4 = arith.constant 0 : index
    %3 = vector.load %arg3[%c0_3, %c0_4] : memref<1x32xf32, #tpu.memory_space<vmem>>, vector<1x32xf32>
    %4 = vector.broadcast %3 : vector<1x32xf32> to vector<128x32xf32>
    %5 = arith.addf %2, %4 : vector<128x32xf32>
    %c0_5 = arith.constant 0 : index
    %c0_6 = arith.constant 0 : index
    %6 = vector.load %arg4[%c0_5, %c0_6] : memref<128x32xf32, #tpu.memory_space<vmem>>, vector<128x32xf32>
    tpu.vector_store %arg4[%c0_5, %c0_6], %5 {strides = array<i32>} : memref<128x32xf32, #tpu.memory_space<vmem>>, vector<128x32xf32>,
    return
  }
  func.func @transform_0(%arg0: i32) -> (i32, i32) {
    %c0_i32 = arith.constant 0 : i32
    %c0_i32_0 = arith.constant 0 : i32
    return %arg0, %c0_i32 : i32, i32
  }
  func.func @transform_1(%arg0: i32) -> (i32, i32) {
    %c0_i32 = arith.constant 0 : i32
    %c0_i32_0 = arith.constant 0 : i32
    %c0_i32_1 = arith.constant 0 : i32
    return %c0_i32, %c0_i32_0 : i32, i32
  }
  func.func @transform_2(%arg0: i32) -> (i32, i32) {
    %c0_i32 = arith.constant 0 : i32
    %c0_i32_0 = arith.constant 0 : i32
    %c0_i32_1 = arith.constant 0 : i32
    return %c0_i32, %c0_i32_0 : i32, i32
  }
  func.func @transform_3(%arg0: i32) -> (i32, i32) {
    %c0_i32 = arith.constant 0 : i32
    %c0_i32_0 = arith.constant 0 : i32
    return %arg0, %c0_i32 : i32, i32
  }
}

module attributes {stable_mosaic.version = 11 : i64} {
  func.func @_matmul_stats_kernel(%arg0: i32, %arg1: memref<256x144xbf16, #tpu.memory_space<vmem>>, %arg2: memref<144x8xbf16, #tpu.memory_space<vmem>>, %arg3: memref<256x8xf32, #tpu.memory_space<vmem>>, %arg4: memref<1x8xf32, #tpu.memory_space<vmem>>, %arg5: memref<1x8xf32, #tpu.memory_space<vmem>>) attributes {dimension_semantics = [#tpu.dimension_semantics<arbitrary>], iteration_bounds = array<i64: 2>, scalar_prefetch = 0 : i64, scratch_operands = 0 : i64, tpu.core_type = #tpu.core_type<tc>, window_params = [{transform_indices = @transform_0, window_bounds = array<i64: 256, 144>}, {pipeline_mode = #tpu.pipeline_mode<synchronous>, transform_indices = @transform_1, window_bounds = array<i64: 144, 8>}, {transform_indices = @transform_2, window_bounds = array<i64: 256, 8>}, {pipeline_mode = #tpu.pipeline_mode<synchronous>, transform_indices = @transform_3, window_bounds = array<i64: 1, 8>}, {pipeline_mode = #tpu.pipeline_mode<synchronous>, transform_indices = @transform_4, window_bounds = array<i64: 1, 8>}]} {
    %c0 = arith.constant 0 : index
    %c0_0 = arith.constant 0 : index
    %0 = vector.load %arg1[%c0, %c0_0] : memref<256x144xbf16, #tpu.memory_space<vmem>>, vector<256x144xbf16>
    %c0_1 = arith.constant 0 : index
    %c0_2 = arith.constant 0 : index
    %1 = vector.load %arg2[%c0_1, %c0_2] : memref<144x8xbf16, #tpu.memory_space<vmem>>, vector<144x8xbf16>
    %cst = arith.constant dense<0.000000e+00> : vector<256x8xf32>
    %2 = tpu.matmul %0, %1, %cst {dimension_numbers = #tpu.dot_dimension_numbers<[1], [0], [0], [1], [0, 0, 1, 1], [], []>} : vector<256x144xbf16>, vector<144x8xbf16>, vector<256x8xf32> -> vector<256x8xf32>
    %c0_3 = arith.constant 0 : index
    %c0_4 = arith.constant 0 : index
    %3 = vector.load %arg3[%c0_3, %c0_4] : memref<256x8xf32, #tpu.memory_space<vmem>>, vector<256x8xf32>
    tpu.vector_store %arg3[%c0_3, %c0_4], %2 {strides = array<i32>} : memref<256x8xf32, #tpu.memory_space<vmem>>, vector<256x8xf32>,
    %c0_i32 = arith.constant 0 : i32
    %4 = arith.cmpi eq, %arg0, %c0_i32 : i32
    %5 = arith.extui %4 : i1 to i32
    %c0_i32_5 = arith.constant 0 : i32
    %6 = arith.cmpi ne, %5, %c0_i32_5 : i32
    scf.if %6 {
      %cst_16 = arith.constant 0.000000e+00 : f32
      %18 = vector.broadcast %cst_16 : f32 to vector<1x8xf32>
      %c0_17 = arith.constant 0 : index
      %c0_18 = arith.constant 0 : index
      %19 = vector.load %arg4[%c0_17, %c0_18] : memref<1x8xf32, #tpu.memory_space<vmem>>, vector<1x8xf32>
      tpu.vector_store %arg4[%c0_17, %c0_18], %18 {strides = array<i32>} : memref<1x8xf32, #tpu.memory_space<vmem>>, vector<1x8xf32>,
      %cst_19 = arith.constant 0.000000e+00 : f32
      %20 = vector.broadcast %cst_19 : f32 to vector<1x8xf32>
      %c0_20 = arith.constant 0 : index
      %c0_21 = arith.constant 0 : index
      %21 = vector.load %arg5[%c0_20, %c0_21] : memref<1x8xf32, #tpu.memory_space<vmem>>, vector<1x8xf32>
      tpu.vector_store %arg5[%c0_20, %c0_21], %20 {strides = array<i32>} : memref<1x8xf32, #tpu.memory_space<vmem>>, vector<1x8xf32>,
    } else {
    }
    %c0_6 = arith.constant 0 : index
    %c0_7 = arith.constant 0 : index
    %7 = vector.load %arg4[%c0_6, %c0_7] : memref<1x8xf32, #tpu.memory_space<vmem>>, vector<1x8xf32>
    %cst_8 = arith.constant dense<0.000000e+00> : vector<8xf32>
    %8 = vector.multi_reduction <add>, %2, %cst_8 [0] : vector<256x8xf32> to vector<8xf32>
    %9 = vector.shape_cast %8 : vector<8xf32> to vector<1x8xf32>
    %10 = arith.addf %7, %9 : vector<1x8xf32>
    %c0_9 = arith.constant 0 : index
    %c0_10 = arith.constant 0 : index
    %11 = vector.load %arg4[%c0_9, %c0_10] : memref<1x8xf32, #tpu.memory_space<vmem>>, vector<1x8xf32>
    tpu.vector_store %arg4[%c0_9, %c0_10], %10 {strides = array<i32>} : memref<1x8xf32, #tpu.memory_space<vmem>>, vector<1x8xf32>,
    %c0_11 = arith.constant 0 : index
    %c0_12 = arith.constant 0 : index
    %12 = vector.load %arg5[%c0_11, %c0_12] : memref<1x8xf32, #tpu.memory_space<vmem>>, vector<1x8xf32>
    %13 = arith.mulf %2, %2 : vector<256x8xf32>
    %cst_13 = arith.constant dense<0.000000e+00> : vector<8xf32>
    %14 = vector.multi_reduction <add>, %13, %cst_13 [0] : vector<256x8xf32> to vector<8xf32>
    %15 = vector.shape_cast %14 : vector<8xf32> to vector<1x8xf32>
    %16 = arith.addf %12, %15 : vector<1x8xf32>
    %c0_14 = arith.constant 0 : index
    %c0_15 = arith.constant 0 : index
    %17 = vector.load %arg5[%c0_14, %c0_15] : memref<1x8xf32, #tpu.memory_space<vmem>>, vector<1x8xf32>
    tpu.vector_store %arg5[%c0_14, %c0_15], %16 {strides = array<i32>} : memref<1x8xf32, #tpu.memory_space<vmem>>, vector<1x8xf32>,
    return
  }
  func.func @transform_0(%arg0: i32) -> (i32, i32) {
    %c0_i32 = arith.constant 0 : i32
    %c0_i32_0 = arith.constant 0 : i32
    return %arg0, %c0_i32 : i32, i32
  }
  func.func @transform_1(%arg0: i32) -> (i32, i32) {
    %c0_i32 = arith.constant 0 : i32
    %c0_i32_0 = arith.constant 0 : i32
    %c0_i32_1 = arith.constant 0 : i32
    return %c0_i32, %c0_i32_0 : i32, i32
  }
  func.func @transform_2(%arg0: i32) -> (i32, i32) {
    %c0_i32 = arith.constant 0 : i32
    %c0_i32_0 = arith.constant 0 : i32
    return %arg0, %c0_i32 : i32, i32
  }
  func.func @transform_3(%arg0: i32) -> (i32, i32) {
    %c0_i32 = arith.constant 0 : i32
    %c0_i32_0 = arith.constant 0 : i32
    %c0_i32_1 = arith.constant 0 : i32
    return %c0_i32, %c0_i32_0 : i32, i32
  }
  func.func @transform_4(%arg0: i32) -> (i32, i32) {
    %c0_i32 = arith.constant 0 : i32
    %c0_i32_0 = arith.constant 0 : i32
    %c0_i32_1 = arith.constant 0 : i32
    return %c0_i32, %c0_i32_0 : i32, i32
  }
}

module attributes {stable_mosaic.version = 11 : i64} {
  func.func @_matmul_bias_kernel(%arg0: i32, %arg1: memref<256x8xbf16, #tpu.memory_space<vmem>>, %arg2: memref<8x2xbf16, #tpu.memory_space<vmem>>, %arg3: memref<1x2xf32, #tpu.memory_space<vmem>>, %arg4: memref<256x2xf32, #tpu.memory_space<vmem>>) attributes {dimension_semantics = [#tpu.dimension_semantics<parallel>], iteration_bounds = array<i64: 2>, scalar_prefetch = 0 : i64, scratch_operands = 0 : i64, tpu.core_type = #tpu.core_type<tc>, window_params = [{transform_indices = @transform_0, window_bounds = array<i64: 256, 8>}, {pipeline_mode = #tpu.pipeline_mode<synchronous>, transform_indices = @transform_1, window_bounds = array<i64: 8, 2>}, {pipeline_mode = #tpu.pipeline_mode<synchronous>, transform_indices = @transform_2, window_bounds = array<i64: 1, 2>}, {transform_indices = @transform_3, window_bounds = array<i64: 256, 2>}]} {
    %c0 = arith.constant 0 : index
    %c0_0 = arith.constant 0 : index
    %0 = vector.load %arg1[%c0, %c0_0] : memref<256x8xbf16, #tpu.memory_space<vmem>>, vector<256x8xbf16>
    %c0_1 = arith.constant 0 : index
    %c0_2 = arith.constant 0 : index
    %1 = vector.load %arg2[%c0_1, %c0_2] : memref<8x2xbf16, #tpu.memory_space<vmem>>, vector<8x2xbf16>
    %cst = arith.constant dense<0.000000e+00> : vector<256x2xf32>
    %2 = tpu.matmul %0, %1, %cst {dimension_numbers = #tpu.dot_dimension_numbers<[1], [0], [0], [1], [0, 0, 1, 1], [], []>} : vector<256x8xbf16>, vector<8x2xbf16>, vector<256x2xf32> -> vector<256x2xf32>
    %c0_3 = arith.constant 0 : index
    %c0_4 = arith.constant 0 : index
    %3 = vector.load %arg3[%c0_3, %c0_4] : memref<1x2xf32, #tpu.memory_space<vmem>>, vector<1x2xf32>
    %4 = vector.broadcast %3 : vector<1x2xf32> to vector<256x2xf32>
    %5 = arith.addf %2, %4 : vector<256x2xf32>
    %c0_5 = arith.constant 0 : index
    %c0_6 = arith.constant 0 : index
    %6 = vector.load %arg4[%c0_5, %c0_6] : memref<256x2xf32, #tpu.memory_space<vmem>>, vector<256x2xf32>
    tpu.vector_store %arg4[%c0_5, %c0_6], %5 {strides = array<i32>} : memref<256x2xf32, #tpu.memory_space<vmem>>, vector<256x2xf32>,
    return
  }
  func.func @transform_0(%arg0: i32) -> (i32, i32) {
    %c0_i32 = arith.constant 0 : i32
    %c0_i32_0 = arith.constant 0 : i32
    return %arg0, %c0_i32 : i32, i32
  }
  func.func @transform_1(%arg0: i32) -> (i32, i32) {
    %c0_i32 = arith.constant 0 : i32
    %c0_i32_0 = arith.constant 0 : i32
    %c0_i32_1 = arith.constant 0 : i32
    return %c0_i32, %c0_i32_0 : i32, i32
  }
  func.func @transform_2(%arg0: i32) -> (i32, i32) {
    %c0_i32 = arith.constant 0 : i32
    %c0_i32_0 = arith.constant 0 : i32
    %c0_i32_1 = arith.constant 0 : i32
    return %c0_i32, %c0_i32_0 : i32, i32
  }
  func.func @transform_3(%arg0: i32) -> (i32, i32) {
    %c0_i32 = arith.constant 0 : i32
    %c0_i32_0 = arith.constant 0 : i32
    return %arg0, %c0_i32 : i32, i32
  }
}

</mosaic_0001>

<bundles_post_ra>
// kernel: tile.163
= control target key start
LH: loop header
LB: loop body
LE: loop exit
PB: predicated region body
PF: predicated region fallthrough
CT: control target
= control target key end

     0   :  { %s28_s0 = inlined_call_operand.vmem [shape: f32[8], index: 0, kind: input, shape index: {}]   ;;  %s29_s1 = inlined_call_operand.vmem [shape: f32[16,8], index: 1, kind: output, shape index: {}]  }
   0x1   :  { %v4_v0 = vld [vmem:[%s28_s0] ss:$0 sm:$0xff] }
   0x2   :  { %5 = vst [vmem:[%s29_s1] sm:$0xff] %v4_v0  ;;  %8 = vst [vmem:[%s29_s1 + $0x8] sm:$0xff] %v4_v0 }

// kernel: tile.168
= control target key start
LH: loop header
LB: loop body
LE: loop exit
PB: predicated region body
PF: predicated region fallthrough
CT: control target
= control target key end

     0   :  { %s131_s10 = smov 120   ;;  %s132_s11 = smov 104   ;;  %vm3_vm0 = vcmask 64512   ;;  %vm9_vm1 = vcmask 1048512   ;;  %vm15_vm2 = vcmask 982912   ;;  %vm21_vm3 = vcmask 917312   ;;  %s207_s0 = inlined_call_operand.vmem [shape: f32[16,8], index: 0, kind: input, shape index: {}]   ;;  %s208_s1 = inlined_call_operand.vmem [shape: f32[1,128], index: 1, kind: output, shape index: {}]  }
   0x1   :  { %v101_v0 = vld [vmem:[%s207_s0 + $0xf] sm:$0x1]   ;;  %v103_v1 = vld [vmem:[%s207_s0 + $0xd] sm:$0x1]   ;;  %v102_v2 = vld [vmem:[%s207_s0 + $0xe] sm:$0x1]  }
   0x2   :  { %7 = vrot.lane.b32.xlu0 %v101_v0, %s131_s10  ;;  %19 = vrot.lane.b32.xlu1 %v103_v1, %s132_s11  ;;  %v104_v3 = vld [vmem:[%s207_s0 + $0xc] sm:$0x1]   ;;  %s133_s16 = smov 112   ;;  %s134_s17 = smov 96   ;;  %v105_v4 = vld [vmem:[%s207_s0 + $0xb] sm:$0x1]  }
   0x3   :  { %v106_v5 = vld [vmem:[%s207_s0 + $0xa] sm:$0x1]   ;;  %v2_v6 = vld [vmem:[%s207_s0] sm:$0x1]   ;;  %s135_s24 = smov 88   ;;  %s136_s25 = smov 80  }
   0x4   :  { %4 = vst.msk [vmem:[#allocation0] sm:$0x1] %vm3_vm0, %v2_v6   ;;  %v107_v7 = vld [vmem:[%s207_s0 + $0x9] sm:$0x1]   ;;  %v108_v8 = vld [vmem:[%s207_s0 + $0x8] sm:$0x1]  }
   0x5   :  { %s137_s30 = smov 72   ;;  %s138_s2 = smov 64   ;;  %v109_v9 = vld [vmem:[%s207_s0 + $0x7] sm:$0x1]   ;;  %v110_v10 = vld [vmem:[%s207_s0 + $0x6] sm:$0x1]  }
   0x6   :  { %13 = vrot.lane.b32.xlu0 %v102_v2, %s133_s16  ;;  %25 = vrot.lane.b32.xlu1 %v104_v3, %s134_s17  ;;  %s139_s7 = smov 56   ;;  %s140_s8 = smov 48   ;;  %v111_v11 = vld [vmem:[%s207_s0 + $0x5] sm:$0x1]   ;;  %v112_v12 = vld [vmem:[%s207_s0 + $0x4] sm:$0x1]  }
   0x7   :  { %s141_s13 = smov 40   ;;  %s142_s14 = smov 32   ;;  %v113_v13 = vld [vmem:[%s207_s0 + $0x3] sm:$0x1]   ;;  %v114_v14 = vld [vmem:[%s207_s0 + $0x2] sm:$0x1]  }
   0x8   :  { %s143_s19 = smov 24   ;;  %s144_s20 = smov 16   ;;  %v115_v15 = vld [vmem:[%s207_s0 + $0x1] sm:$0x1]   ;;  %vm27_vm4 = vcmask 851712   ;;  %vm33_vm5 = vcmask 786112  }
   0x9   :  { %s145_s0 = smov 8   ;;  %vm39_vm6 = vcmask 720512   ;;  %vm45_vm7 = vcmask 654912   ;;  %vm51_vm8 = vcmask 589312   ;;  %vm57_vm9 = vcmask 523712  }
   0xa   :  { %31 = vrot.lane.b32.xlu0 %v105_v4, %s135_s24  ;;  %37 = vrot.lane.b32.xlu1 %v106_v5, %s136_s25  ;;  %vm63_vm10 = vcmask 458112   ;;  %vm69_vm11 = vcmask 392512   ;;  %vm75_vm12 = vcmask 326912   ;;  %vm81_vm13 = vcmask 261312  }
   0xb   :  { %vm87_vm14 = vcmask 195712   ;;  %vm93_vm15 = vcmask 130112  }
   0xe   :  { %43 = vrot.lane.b32.xlu0 %v107_v7, %s137_s30  ;;  %49 = vrot.lane.b32.xlu1 %v108_v8, %s138_s2 }
  0x12   :  { %55 = vrot.lane.b32.xlu0 %v109_v9, %s139_s7  ;;  %61 = vrot.lane.b32.xlu1 %v110_v10, %s140_s8 }
  0x16   :  { %67 = vrot.lane.b32.xlu0 %v111_v11, %s141_s13  ;;  %73 = vrot.lane.b32.xlu1 %v112_v12, %s142_s14 }
  0x1a   :  { %79 = vrot.lane.b32.xlu0 %v113_v13, %s143_s19  ;;  %85 = vrot.lane.b32.xlu1 %v114_v14, %s144_s20 }
  0x1e   :  { %91 = vrot.lane.b32.xlu0 %v115_v15, %s145_s0 }
  0x74   :  { %v8_v16 = vpop.permute.xlu0 %7   ;;  %v20_v17 = vpop.permute.xlu1 %19  }
  0x75   :  { %10 = vst.msk [vmem:[#allocation0] sm:$0x1] %vm9_vm1, %v8_v16  }
  0x78   :  { %v14_v18 = vpop.permute.xlu0 %13   ;;  %v26_v19 = vpop.permute.xlu1 %25  }
  0x79   :  { %16 = vst.msk [vmem:[#allocation0] sm:$0x1] %vm15_vm2, %v14_v18  }
  0x7a   :  { %22 = vst.msk [vmem:[#allocation0] sm:$0x1] %vm21_vm3, %v20_v17  }
  0x7b   :  { %28 = vst.msk [vmem:[#allocation0] sm:$0x1] %vm27_vm4, %v26_v19  }
  0x7c   :  { %v32_v20 = vpop.permute.xlu0 %31   ;;  %v38_v21 = vpop.permute.xlu1 %37  }
  0x7d   :  { %34 = vst.msk [vmem:[#allocation0] sm:$0x1] %vm33_vm5, %v32_v20  }
  0x7e   :  { %40 = vst.msk [vmem:[#allocation0] sm:$0x1] %vm39_vm6, %v38_v21  }
  0x80   :  { %v44_v22 = vpop.permute.xlu0 %43   ;;  %v50_v23 = vpop.permute.xlu1 %49  }
  0x81   :  { %46 = vst.msk [vmem:[#allocation0] sm:$0x1] %vm45_vm7, %v44_v22  }
  0x82   :  { %52 = vst.msk [vmem:[#allocation0] sm:$0x1] %vm51_vm8, %v50_v23  }
  0x84   :  { %v56_v24 = vpop.permute.xlu0 %55   ;;  %v62_v25 = vpop.permute.xlu1 %61  }
  0x85   :  { %58 = vst.msk [vmem:[#allocation0] sm:$0x1] %vm57_vm9, %v56_v24  }
  0x86   :  { %64 = vst.msk [vmem:[#allocation0] sm:$0x1] %vm63_vm10, %v62_v25  }
  0x88   :  { %v68_v26 = vpop.permute.xlu0 %67   ;;  %v74_v27 = vpop.permute.xlu1 %73  }
  0x89   :  { %70 = vst.msk [vmem:[#allocation0] sm:$0x1] %vm69_vm11, %v68_v26  }
  0x8a   :  { %76 = vst.msk [vmem:[#allocation0] sm:$0x1] %vm75_vm12, %v74_v27  }
  0x8c   :  { %v80_v28 = vpop.permute.xlu0 %79   ;;  %v86_v29 = vpop.permute.xlu1 %85  }
  0x8d   :  { %82 = vst.msk [vmem:[#allocation0] sm:$0x1] %vm81_vm13, %v80_v28  }
  0x8e   :  { %88 = vst.msk [vmem:[#allocation0] sm:$0x1] %vm87_vm14, %v86_v29  }
  0x90   :  { %v92_v30 = vpop.permute.xlu0 %91  }
  0x91   :  { %94 = vst.msk [vmem:[#allocation0] sm:$0x1] %vm93_vm15, %v92_v30  }
  0x98   :  { %v98_v31 = vld [vmem:[#allocation0] sm:$0x1] }
  0x99   :  { %100 = vst [vmem:[%s208_s1] sm:$0x1] %v98_v31 }

// kernel: runet_forward.46
= control target key start
LH: loop header
LB: loop body
LE: loop exit
PB: predicated region body
PF: predicated region fallthrough
CT: control target
= control target key end

     0   :  { %s104_s0 = inlined_call_operand.vmem [shape: f32[32,128], index: 0, kind: input, shape index: {}]   ;;  %s105_s1 = inlined_call_operand.vmem [shape: f32[1,128], index: 1, kind: input, shape index: {}]   ;;  %s106_s2 = inlined_call_operand.vmem [shape: f32[1,128], index: 2, kind: input, shape index: {}]   ;;  %s107_s3 = inlined_call_operand.vmem [shape: f32[32,128], index: 3, kind: output, shape index: {}]  }
   0x1   :  { %v14_v0 = vld [vmem:[%s104_s0] sm:$0xff]  ;;  %v15_v4 = vld [vmem:[%s104_s0 + $0x8] sm:$0xff]  ;;  %v16_v5 = vld [vmem:[%s104_s0 + $0x10] sm:$0xff] }
   0x2   :  { %v52_v1 = vld [vmem:[%s105_s1] ss:$0 sm:$0xff]  ;;  %v17_v6 = vld [vmem:[%s104_s0 + $0x18] sm:$0xff] }
   0x3   :  { %v53_v2 = vld [vmem:[%s106_s2] ss:$0 sm:$0xff]  ;;  %v25_v3 = vmul.f32 %v52_v1, %v14_v0  ;;  %v26_v7 = vmul.f32 %v52_v1, %v15_v4  ;;  %v27_v8 = vmul.f32 %v52_v1, %v16_v5  ;;  %v28_v9 = vmul.f32 %v52_v1, %v17_v6 }
   0x5   :  { %v36_v10 = vadd.f32 %v53_v2, %v25_v3  ;;  %v37_v11 = vadd.f32 %v53_v2, %v26_v7  ;;  %v38_v12 = vadd.f32 %v53_v2, %v27_v8  ;;  %v39_v13 = vadd.f32 %v53_v2, %v28_v9 }
   0x7   :  { %v40_v14 = vmax.f32 %v36_v10, 0.0  ;;  %v41_v15 = vmax.f32 %v37_v11, 0.0  ;;  %v42_v16 = vmax.f32 %v38_v12, 0.0  ;;  %v43_v17 = vmax.f32 %v39_v13, 0.0 }
   0x9   :  { %44 = vst [vmem:[%s107_s3] sm:$0xff] %v40_v14  ;;  %45 = vst [vmem:[%s107_s3 + $0x8] sm:$0xff] %v41_v15 }
   0xa   :  { %46 = vst [vmem:[%s107_s3 + $0x10] sm:$0xff] %v42_v16  ;;  %47 = vst [vmem:[%s107_s3 + $0x18] sm:$0xff] %v43_v17 }

// kernel: runet_forward.45
= control target key start
LH: loop header
LB: loop body
LE: loop exit
PB: predicated region body
PF: predicated region fallthrough
CT: control target
= control target key end

     0   :  { %s993_s15 = smov 0   ;;  %s1400_s0 = inlined_call_operand.vmem [shape: bf16[512,27], index: 0, kind: input, shape index: {}]   ;;  %s1401_s1 = inlined_call_operand.vmem [shape: bf16[27,8], index: 1, kind: input, shape index: {}]   ;;  %s1402_s2 = inlined_call_operand.vmem [shape: f32[512,8], index: 2, kind: output, shape index: {0}]   ;;  %s1403_s3 = inlined_call_operand.vmem [shape: f32[1,8], index: 3, kind: output, shape index: {1}]   ;;  %s1404_s4 = inlined_call_operand.vmem [shape: f32[1,8], index: 4, kind: output, shape index: {2}]  }
   0x1 LB: > { %s826_s16 = sadd.s32 4294967295, %s964_s15   ;;  %p830_p0 = scmp.ge.s32.totalorder %s964_s15, 1  ;;  %s964_s15 = sphi %s993_s15, %s15_s15  }
   0x2   : > { %p158_p1 = scmp.lt.s32.totalorder %s964_s15, 3 }
   0x4   : > { %p159_p2 = pnand %p830_p0, %p158_p1 }
   0x5   : > { %v940_v0 = vld [vmem:[%s1401_s1] sm:$0xff] (!%p159_p2)   ;;  %vm373_vm0 = vcmask (!%p159_p2), 1044480   ;;  %v941_v1 = vld [vmem:[%s1401_s1 + $0x8] sm:$0x3f] (!%p159_p2)   ;;  %vm374_vm1 = vcmask (!%p159_p2), 1045504   ;;  %s831_s21 = sshll.u32 (!%p159_p2), %s826_s16, 5 }
   0x6   : > { %162 = sbr.rel (%p159_p2) target bundleno = 342 (0x156), region = 28  ;;  %890 = vmatprep.subr.bf16.mxu0 (!%p159_p2), %v940_v0  ;;  %926 = vmatprep.subr.bf16.mxu1 (!%p159_p2), %v940_v0  ;;  %v966_v2 = vmov (!%p159_p2), 65535   ;;  %p185_p3 = scmp.lt.s32.totalorder (!%p159_p2), %s831_s21, 63  ;;  %vm324_vm2 = vcmask (!%p159_p2), 220160   ;;  %vm541_vm3 = vcmask (!%p159_p2), 64512  }
   0x7   : > { %891 = vmatpush3.bf16.msra.mxu0 (!%p159_p2), %v940_v0  ;;  %928 = vmatpush3.bf16.msra.mxu1 (!%p159_p2), %v940_v0  ;;  %v375_v3 = vsel (!%p159_p2), %vm373_vm0, 4294967295, %v966_v2  ;;  %p869_p4 = scmp.ne.s32.totalorder (!%p159_p2), %s826_s16, 0 }
   0x8   : > { %v376_v4 = vsel (!%p159_p2), %vm374_vm1, %v375_v3, 0 }
   0x9   : > { %v378_v5 = vand.u32 (!%p159_p2), %v941_v1, %v376_v4 }
   0xb   : > { %892 = vmatprep.subr.bf16.mxu0 (!%p159_p2), %v378_v5  ;;  %927 = vmatprep.subr.bf16.mxu1 (!%p159_p2), %v378_v5 }
   0xc   : > { %893 = vmatpush3.bf16.msra.mxu0 (!%p159_p2), %v378_v5  ;;  %929 = vmatpush3.bf16.msra.mxu1 (!%p159_p2), %v378_v5 }
   0xd   : > { %s1406_s21 = smov (!%p185_p3, %s831_s21), 63  ;;  %vm578_vm4 = vcmask (!%p869_p4), 57344   ;;  %v967_v54 = vmov (!%p869_p4), 0.0  }
   0xe   : > { %s832_s22 = sshll.u32 %s1406_s21, 2  ;;  %s834_s26 = sshll.u32 %s1406_s21, 3  ;;  %579 = vst.msk [vmem:[%s1403_s3] sm:$0x1] (!%p869_p4), %vm578_vm4, %v967_v54  ;;  %580 = vst.msk [vmem:[%s1404_s4] sm:$0x1] (!%p869_p4), %vm578_vm4, %v967_v54 }
   0xf   : > { %s1015_s25 = scalar_lea.vmem %s1400_s0, %s832_s22  ;;  %s1053_s29 = scalar_lea.vmem %s1402_s2, %s834_s26 }
  0x10   : > { %v942_v6 = vld [vmem:[%s1015_s25] sm:$0xff]   ;;  %v944_v8 = vld [vmem:[%s1015_s25 + $0x8] sm:$0xff]   ;;  %v946_v10 = vld [vmem:[%s1015_s25 + $0x10] sm:$0xff]  }
  0x11   : > { %v943_v7 = vld [vmem:[%s1015_s25 + $0x40] sm:$0xff]   ;;  %894 = vmatprep.mubr.msk.bf16.mxu0 %vm324_vm2, %v942_v6  ;;  %v945_v9 = vld [vmem:[%s1015_s25 + $0x48] sm:$0xff]   ;;  %v947_v11 = vld [vmem:[%s1015_s25 + $0x50] sm:$0xff]  }
  0x12   : > { %910 = vmatprep.mubr.msk.bf16.mxu1 %vm324_vm2, %v943_v7  ;;  %895 = vmatmul.mubr.msk.bf16.vlgmr.msra.gmra.mrb[0].mxu0 %vm324_vm2, %v944_v8  ;;  %v948_v12 = vld [vmem:[%s1015_s25 + $0x18] sm:$0xff]   ;;  %v950_v14 = vld [vmem:[%s1015_s25 + $0x20] sm:$0xff]   ;;  %v952_v16 = vld [vmem:[%s1015_s25 + $0x28] sm:$0xff]  }
  0x13   : > { %911 = vmatmul.mubr.msk.bf16.vlgmr.msra.gmra.mrb[0].mxu1 %vm324_vm2, %v945_v9  ;;  %898 = vmatprep.mubr.msk.bf16.mxu0 %vm324_vm2, %v946_v10  ;;  %v949_v13 = vld [vmem:[%s1015_s25 + $0x58] sm:$0xff]   ;;  %v951_v15 = vld [vmem:[%s1015_s25 + $0x60] sm:$0xff]   ;;  %v953_v17 = vld [vmem:[%s1015_s25 + $0x68] sm:$0xff]  }
  0x14   : > { %914 = vmatprep.mubr.msk.bf16.mxu1 %vm324_vm2, %v947_v11  ;;  %v954_v18 = vld [vmem:[%s1015_s25 + $0x30] sm:$0xff]   ;;  %v956_v20 = vld [vmem:[%s1015_s25 + $0x38] sm:$0xff]  }
  0x15   : > { %v955_v19 = vld [vmem:[%s1015_s25 + $0x70] sm:$0xff]   ;;  %v957_v21 = vld [vmem:[%s1015_s25 + $0x78] sm:$0xff]  }
  0x1a   : > { %899 = vmatmul.mubr.msk.bf16.gmra.mrb[4].mxu0 %vm324_vm2, %v948_v12 }
  0x1b   : > { %915 = vmatmul.mubr.msk.bf16.gmra.mrb[4].mxu1 %vm324_vm2, %v949_v13  ;;  %902 = vmatprep.mubr.msk.bf16.mxu0 %vm324_vm2, %v950_v14 }
  0x1c   : > { %918 = vmatprep.mubr.msk.bf16.mxu1 %vm324_vm2, %v951_v15 }
  0x22   : > { %903 = vmatmul.mubr.msk.bf16.gmra.mrb[8].mxu0 %vm324_vm2, %v952_v16 }
  0x23   : > { %919 = vmatmul.mubr.msk.bf16.gmra.mrb[8].mxu1 %vm324_vm2, %v953_v17  ;;  %906 = vmatprep.mubr.msk.bf16.mxu0 %vm324_vm2, %v954_v18 }
  0x24   : > { %922 = vmatprep.mubr.msk.bf16.mxu1 %vm324_vm2, %v955_v19 }
  0x2a   : > { %907 = vmatmul.mubr.msk.bf16.gmra.mrb[12].mxu0 %vm324_vm2, %v956_v20 }
  0x2b   : > { %923 = vmatmul.mubr.msk.bf16.gmra.mrb[12].mxu1 %vm324_vm2, %v957_v21 }
  0xe5   : > { %v1055_v22 = vpop.f32.mrb[0].mxu0 }
  0xe6   : > { %544 = vst.msk [vmem:[%s1053_s29 + $0x10] sm:$0xff] %vm541_vm3, %v1055_v22  ;;  %v1060_v23 = vpop.f32.mrb[0].mxu1  ;;  %v1062_v24 = vpop.f32.mrb[1].mxu0 }
  0xe7   : > { %560 = vst.msk [vmem:[%s1053_s29 + $0x90] sm:$0xff] %vm541_vm3, %v1060_v23  ;;  %542 = vst.msk [vmem:[%s1053_s29] sm:$0xff] %vm541_vm3, %v1062_v24  ;;  %v1070_v25 = vpop.f32.mrb[1].mxu1  ;;  %v1072_v26 = vpop.f32.mrb[2].mxu0 }
  0xe8   : > { %558 = vst.msk [vmem:[%s1053_s29 + $0x80] sm:$0xff] %vm541_vm3, %v1070_v25  ;;  %545 = vst.msk [vmem:[%s1053_s29 + $0x18] sm:$0xff] %vm541_vm3, %v1072_v26  ;;  %v1080_v27 = vpop.f32.mrb[2].mxu1  ;;  %v1082_v28 = vpop.f32.mrb[3].mxu0 }
  0xe9   : > { %561 = vst.msk [vmem:[%s1053_s29 + $0x98] sm:$0xff] %vm541_vm3, %v1080_v27  ;;  %543 = vst.msk [vmem:[%s1053_s29 + $0x8] sm:$0xff] %vm541_vm3, %v1082_v28  ;;  %v1090_v29 = vpop.f32.mrb[3].mxu1 }
  0xea   : > { %559 = vst.msk [vmem:[%s1053_s29 + $0x88] sm:$0xff] %vm541_vm3, %v1090_v29 }
  0xed   : > { %v1095_v30 = vpop.f32.mrb[4].mxu0 }
  0xee   : > { %548 = vst.msk [vmem:[%s1053_s29 + $0x30] sm:$0xff] %vm541_vm3, %v1095_v30  ;;  %v1100_v31 = vpop.f32.mrb[4].mxu1  ;;  %v1102_v32 = vpop.f32.mrb[5].mxu0 }
  0xef   : > { %564 = vst.msk [vmem:[%s1053_s29 + $0xb0] sm:$0xff] %vm541_vm3, %v1100_v31  ;;  %546 = vst.msk [vmem:[%s1053_s29 + $0x20] sm:$0xff] %vm541_vm3, %v1102_v32  ;;  %v1110_v33 = vpop.f32.mrb[5].mxu1  ;;  %v1112_v34 = vpop.f32.mrb[6].mxu0 }
  0xf0   : > { %562 = vst.msk [vmem:[%s1053_s29 + $0xa0] sm:$0xff] %vm541_vm3, %v1110_v33  ;;  %549 = vst.msk [vmem:[%s1053_s29 + $0x38] sm:$0xff] %vm541_vm3, %v1112_v34  ;;  %v1120_v35 = vpop.f32.mrb[6].mxu1  ;;  %v1122_v36 = vpop.f32.mrb[7].mxu0 }
  0xf1   : > { %565 = vst.msk [vmem:[%s1053_s29 + $0xb8] sm:$0xff] %vm541_vm3, %v1120_v35  ;;  %547 = vst.msk [vmem:[%s1053_s29 + $0x28] sm:$0xff] %vm541_vm3, %v1122_v36  ;;  %v1130_v37 = vpop.f32.mrb[7].mxu1 }
  0xf2   : > { %563 = vst.msk [vmem:[%s1053_s29 + $0xa8] sm:$0xff] %vm541_vm3, %v1130_v37 }
  0xf5   : > { %v1135_v38 = vpop.f32.mrb[8].mxu0 }
  0xf6   : > { %552 = vst.msk [vmem:[%s1053_s29 + $0x50] sm:$0xff] %vm541_vm3, %v1135_v38  ;;  %v1140_v39 = vpop.f32.mrb[8].mxu1  ;;  %v1142_v40 = vpop.f32.mrb[9].mxu0 }
  0xf7   : > { %568 = vst.msk [vmem:[%s1053_s29 + $0xd0] sm:$0xff] %vm541_vm3, %v1140_v39  ;;  %550 = vst.msk [vmem:[%s1053_s29 + $0x40] sm:$0xff] %vm541_vm3, %v1142_v40  ;;  %v1150_v41 = vpop.f32.mrb[9].mxu1  ;;  %v1152_v42 = vpop.f32.mrb[10].mxu0 }
  0xf8   : > { %566 = vst.msk [vmem:[%s1053_s29 + $0xc0] sm:$0xff] %vm541_vm3, %v1150_v41  ;;  %553 = vst.msk [vmem:[%s1053_s29 + $0x58] sm:$0xff] %vm541_vm3, %v1152_v42  ;;  %v1160_v43 = vpop.f32.mrb[10].mxu1  ;;  %v1162_v44 = vpop.f32.mrb[11].mxu0 }
  0xf9   : > { %569 = vst.msk [vmem:[%s1053_s29 + $0xd8] sm:$0xff] %vm541_vm3, %v1160_v43  ;;  %551 = vst.msk [vmem:[%s1053_s29 + $0x48] sm:$0xff] %vm541_vm3, %v1162_v44  ;;  %v1170_v45 = vpop.f32.mrb[11].mxu1 }
  0xfa   : > { %567 = vst.msk [vmem:[%s1053_s29 + $0xc8] sm:$0xff] %vm541_vm3, %v1170_v45 }
  0xfc   : > { %577 = sbr.rel (%p869_p4) target bundleno = 259 (0x103), region = 32 }
  0xfd   : > { %v1175_v46 = vpop.f32.mrb[12].mxu0 }
  0xfe   : > { %556 = vst.msk [vmem:[%s1053_s29 + $0x70] sm:$0xff] %vm541_vm3, %v1175_v46  ;;  %v1180_v47 = vpop.f32.mrb[12].mxu1  ;;  %v1182_v48 = vpop.f32.mrb[13].mxu0 }
  0xff   : > { %572 = vst.msk [vmem:[%s1053_s29 + $0xf0] sm:$0xff] %vm541_vm3, %v1180_v47  ;;  %554 = vst.msk [vmem:[%s1053_s29 + $0x60] sm:$0xff] %vm541_vm3, %v1182_v48  ;;  %v1190_v49 = vpop.f32.mrb[13].mxu1  ;;  %v1192_v50 = vpop.f32.mrb[14].mxu0 }
 0x100   : > { %570 = vst.msk [vmem:[%s1053_s29 + $0xe0] sm:$0xff] %vm541_vm3, %v1190_v49  ;;  %557 = vst.msk [vmem:[%s1053_s29 + $0x78] sm:$0xff] %vm541_vm3, %v1192_v50  ;;  %v1200_v51 = vpop.f32.mrb[14].mxu1  ;;  %v1202_v52 = vpop.f32.mrb[15].mxu0 }
 0x101   : > { %573 = vst.msk [vmem:[%s1053_s29 + $0xf8] sm:$0xff] %vm541_vm3, %v1200_v51  ;;  %555 = vst.msk [vmem:[%s1053_s29 + $0x68] sm:$0xff] %vm541_vm3, %v1202_v52  ;;  %v1210_v53 = vpop.f32.mrb[15].mxu1 }
 0x102   : > { %571 = vst.msk [vmem:[%s1053_s29 + $0xe8] sm:$0xff] %vm541_vm3, %v1210_v53 }
 0x103 PF: > { %v582_v55 = vsel %vm541_vm3, %v1062_v24, 0.0  ;;  %v583_v56 = vsel %vm541_vm3, %v1082_v28, 0.0  ;;  %v585_v57 = vsel %vm541_vm3, %v1055_v22, 0.0  ;;  %v587_v59 = vsel %vm541_vm3, %v1072_v26, 0.0 }
 0x104   : > { %v584_v58 = vadd.f32 %v583_v56, %v582_v55  ;;  %v589_v61 = vsel %vm541_vm3, %v1102_v32, 0.0  ;;  %v591_v63 = vsel %vm541_vm3, %v1122_v36, 0.0  ;;  %v593_v1 = vsel %vm541_vm3, %v1095_v30, 0.0 }
 0x105   : > { %v595_v3 = vsel %vm541_vm3, %v1112_v34, 0.0  ;;  %v597_v5 = vsel %vm541_vm3, %v1142_v40, 0.0  ;;  %v599_v7 = vsel %vm541_vm3, %v1162_v44, 0.0  ;;  %v655_v8 = vmul.f32 %v1062_v24, %v1062_v24 }
 0x106   : > { %v586_v60 = vadd.f32 %v585_v57, %v584_v58  ;;  %v656_v9 = vmul.f32 %v1082_v28, %v1082_v28  ;;  %v657_v11 = vmul.f32 %v1055_v22, %v1055_v22  ;;  %v601_v12 = vsel %vm541_vm3, %v1135_v38, 0.0 }
 0x107   : > { %v658_v13 = vmul.f32 %v1072_v26, %v1072_v26  ;;  %v603_v15 = vsel %vm541_vm3, %v1152_v42, 0.0  ;;  %v659_v16 = vmul.f32 %v1102_v32, %v1102_v32  ;;  %v687_v17 = vsel %vm541_vm3, %v655_v8, 0.0 }
 0x108   : > { %v588_v62 = vadd.f32 %v587_v59, %v586_v60  ;;  %v688_v18 = vsel %vm541_vm3, %v656_v9, 0.0  ;;  %v690_v21 = vsel %vm541_vm3, %v657_v11, 0.0  ;;  %v605_v22 = vsel %vm541_vm3, %v1182_v48, 0.0 }
 0x109   : > { %v689_v20 = vadd.f32 %v688_v18, %v687_v17  ;;  %v660_v24 = vmul.f32 %v1122_v36, %v1122_v36  ;;  %v692_v26 = vsel %vm541_vm3, %v658_v13, 0.0  ;;  %v607_v32 = vsel %vm541_vm3, %v1202_v52, 0.0 }
 0x10a   : > { %v590_v0 = vadd.f32 %v589_v61, %v588_v62  ;;  %v661_v55 = vmul.f32 %v1095_v30, %v1095_v30  ;;  %v694_v56 = vsel %vm541_vm3, %v659_v16, 0.0  ;;  %v609_v59 = vsel %vm541_vm3, %v1175_v46, 0.0 }
 0x10b   : > { %v691_v54 = vadd.f32 %v690_v21, %v689_v20  ;;  %v662_v36 = vmul.f32 %v1112_v34, %v1112_v34  ;;  %v696_v60 = vsel %vm541_vm3, %v660_v24, 0.0  ;;  %v663_v30 = vmul.f32 %v1142_v40, %v1142_v40 }
 0x10c   : > { %v592_v2 = vadd.f32 %v591_v63, %v590_v0  ;;  %v611_v63 = vsel %vm541_vm3, %v1192_v50, 0.0  ;;  %v698_v0 = vsel %vm541_vm3, %v661_v55, 0.0  ;;  %v664_v34 = vmul.f32 %v1162_v44, %v1162_v44 }
 0x10d   : > { %v693_v58 = vadd.f32 %v692_v26, %v691_v54  ;;  %v665_v40 = vmul.f32 %v1135_v38, %v1135_v38  ;;  %v702_v8 = vsel %vm541_vm3, %v663_v30, 0.0  ;;  %v617_v11 = vsel %vm541_vm3, %v1060_v23, 0.0 }
 0x10e   : > { %v594_v4 = vadd.f32 %v593_v1, %v592_v2  ;;  %v666_v44 = vmul.f32 %v1152_v42, %v1152_v42  ;;  %v667_v38 = vmul.f32 %v1182_v48, %v1182_v48  ;;  %v668_v42 = vmul.f32 %v1202_v52, %v1202_v52 }
 0x10f   : > { %v695_v62 = vadd.f32 %v694_v56, %v693_v58  ;;  %v706_v16 = vsel %vm541_vm3, %v665_v40, 0.0  ;;  %v623_v24 = vsel %vm541_vm3, %v1130_v37, 0.0  ;;  %v669_v48 = vmul.f32 %v1175_v46, %v1175_v46 }
 0x110   : > { %v596_v6 = vadd.f32 %v595_v3, %v594_v4  ;;  %v613_v3 = vsel %vm541_vm3, %v1070_v25, 0.0  ;;  %v700_v4 = vsel %vm541_vm3, %v662_v36, 0.0  ;;  %v708_v20 = vsel %vm541_vm3, %v666_v44, 0.0 }
 0x111   : > { %v697_v2 = vadd.f32 %v696_v60, %v695_v62  ;;  %v710_v26 = vsel %vm541_vm3, %v667_v38, 0.0  ;;  %v670_v52 = vmul.f32 %v1192_v50, %v1192_v50  ;;  %v712_v55 = vsel %vm541_vm3, %v668_v42, 0.0 }
 0x112   : > { %v598_v10 = vadd.f32 %v597_v5, %v596_v6  ;;  %v627_v58 = vsel %vm541_vm3, %v1120_v35, 0.0  ;;  %v671_v46 = vmul.f32 %v1070_v25, %v1070_v25  ;;  %v672_v50 = vmul.f32 %v1090_v29, %v1090_v29 }
 0x113   : > { %v699_v6 = vadd.f32 %v698_v0, %v697_v2  ;;  %v716_v62 = vsel %vm541_vm3, %v670_v52, 0.0  ;;  %v631_v0 = vsel %vm541_vm3, %v1170_v45, 0.0  ;;  %v673_v25 = vmul.f32 %v1060_v23, %v1060_v23 }
 0x114   : > { %v600_v14 = vadd.f32 %v599_v7, %v598_v10  ;;  %v615_v7 = vsel %vm541_vm3, %v1090_v29, 0.0  ;;  %v674_v29 = vmul.f32 %v1080_v27, %v1080_v27  ;;  %v675_v23 = vmul.f32 %v1110_v33, %v1110_v33 }
 0x115   : > { %v701_v10 = vadd.f32 %v700_v4, %v699_v6  ;;  %v720_v4 = vsel %vm541_vm3, %v672_v50, 0.0  ;;  %v722_v40 = vsel %vm541_vm3, %v673_v25, 0.0  ;;  %v643_v42 = vsel %vm541_vm3, %v1200_v51, 0.0 }
 0x116   : > { %v602_v19 = vadd.f32 %v601_v12, %v600_v14  ;;  %v704_v12 = vsel %vm541_vm3, %v664_v34, 0.0  ;;  %v633_v34 = vsel %vm541_vm3, %v1140_v39, 0.0  ;;  %vm652_vm5 = vcmask 57344  }
 0x117   : > { %v703_v14 = vadd.f32 %v702_v8, %v701_v10  ;;  %v637_v10 = vsel %vm541_vm3, %v1190_v49, 0.0 }
 0x118   : > { %v604_v28 = vadd.f32 %v603_v15, %v602_v19  ;;  %v619_v15 = vsel %vm541_vm3, %v1080_v27, 0.0  ;;  %v621_v19 = vsel %vm541_vm3, %v1110_v33, 0.0  ;;  %v676_v27 = vmul.f32 %v1130_v37, %v1130_v37 }
 0x119   : > { %v705_v18 = vadd.f32 %v704_v12, %v703_v14  ;;  %v677_v33 = vmul.f32 %v1100_v31, %v1100_v31  ;;  %v726_v14 = vsel %vm541_vm3, %v675_v23, 0.0  ;;  %v678_v37 = vmul.f32 %v1120_v35, %v1120_v35  ;;  %v654_v23 = vld [vmem:[%s1404_s4] sm:$0x1] }
 0x11a   : > { %v606_v57 = vadd.f32 %v605_v22, %v604_v28 }
 0x11b   : > { %v707_v22 = vadd.f32 %v706_v16, %v705_v18  ;;  %v641_v16 = vsel %vm541_vm3, %v1180_v47, 0.0 }
 0x11c   : > { %v608_v61 = vadd.f32 %v607_v32, %v606_v57  ;;  %v625_v32 = vsel %vm541_vm3, %v1100_v31, 0.0  ;;  %v679_v31 = vmul.f32 %v1150_v41, %v1150_v41 }
 0x11d   : > { %v709_v54 = vadd.f32 %v708_v20, %v707_v22  ;;  %v730_v20 = vsel %vm541_vm3, %v677_v33, 0.0 }
 0x11e   : > { %v610_v1 = vadd.f32 %v609_v59, %v608_v61  ;;  %v714_v59 = vsel %vm541_vm3, %v669_v48, 0.0  ;;  %v629_v61 = vsel %vm541_vm3, %v1150_v41, 0.0  ;;  %v732_v48 = vsel %vm541_vm3, %v678_v37, 0.0 }
 0x11f   : > { %v711_v57 = vadd.f32 %v710_v26, %v709_v54  ;;  %v734_v54 = vsel %vm541_vm3, %v679_v31, 0.0  ;;  %v682_v41 = vmul.f32 %v1160_v43, %v1160_v43 }
 0x120   : > { %v612_v5 = vadd.f32 %v611_v63, %v610_v1  ;;  %v718_v1 = vsel %vm541_vm3, %v671_v46, 0.0 }
 0x121   : > { %v713_v60 = vadd.f32 %v712_v55, %v711_v57 }
 0x122   : > { %v614_v9 = vadd.f32 %v613_v3, %v612_v5 }
 0x123   : > { %v715_v30 = vadd.f32 %v714_v59, %v713_v60 }
 0x124   : > { %v616_v13 = vadd.f32 %v615_v7, %v614_v9  ;;  %v635_v7 = vsel %vm541_vm3, %v1160_v43, 0.0  ;;  %v685_v43 = vmul.f32 %v1180_v47, %v1180_v47 }
 0x125   : > { %v717_v3 = vadd.f32 %v716_v62, %v715_v30  ;;  %v686_v30 = vmul.f32 %v1200_v51, %v1200_v51 }
 0x126   : > { %v618_v17 = vadd.f32 %v617_v11, %v616_v13  ;;  %v724_v11 = vsel %vm541_vm3, %v674_v29, 0.0  ;;  %v639_v13 = vsel %vm541_vm3, %v1210_v53, 0.0 }
 0x127   : > { %v719_v6 = vadd.f32 %v718_v1, %v717_v3  ;;  %v746_v1 = vsel %vm541_vm3, %v685_v43, 0.0  ;;  %v748_v3 = vsel %vm541_vm3, %v686_v30, 0.0 }
 0x128   : > { %v620_v21 = vadd.f32 %v619_v15, %v618_v17  ;;  %v728_v17 = vsel %vm541_vm3, %v676_v27, 0.0 }
 0x129   : > { %v721_v9 = vadd.f32 %v720_v4, %v719_v6 }
 0x12a   : > { %v622_v28 = vadd.f32 %v621_v19, %v620_v21 }
 0x12b   : > { %v723_v12 = vadd.f32 %v722_v40, %v721_v9 }
 0x12c   : > { %v624_v56 = vadd.f32 %v623_v24, %v622_v28  ;;  %v680_v24 = vmul.f32 %v1170_v45, %v1170_v45  ;;  %v681_v28 = vmul.f32 %v1140_v39, %v1140_v39  ;;  %v683_v45 = vmul.f32 %v1190_v49, %v1190_v49  ;;  %v581_v49 = vld [vmem:[%s1403_s3] sm:$0x1] }
 0x12d   : > { %v725_v38 = vadd.f32 %v724_v11, %v723_v12  ;;  %v684_v39 = vmul.f32 %v1210_v53, %v1210_v53 }
 0x12e   : > { %v626_v36 = vadd.f32 %v625_v32, %v624_v56  ;;  %v736_v55 = vsel %vm541_vm3, %v680_v24, 0.0  ;;  %v742_v50 = vsel %vm541_vm3, %v683_v45, 0.0 }
 0x12f   : > { %v727_v19 = vadd.f32 %v726_v14, %v725_v38  ;;  %v744_v53 = vsel %vm541_vm3, %v684_v39, 0.0 }
 0x130   : > { %v628_v63 = vadd.f32 %v627_v58, %v626_v36  ;;  %v738_v58 = vsel %vm541_vm3, %v681_v28, 0.0  ;;  %v740_v36 = vsel %vm541_vm3, %v682_v41, 0.0 }
 0x131   : > { %v729_v22 = vadd.f32 %v728_v17, %v727_v19 }
 0x132   : > { %v630_v2 = vadd.f32 %v629_v61, %v628_v63 }
 0x133   : > { %v731_v26 = vadd.f32 %v730_v20, %v729_v22 }
 0x134   : > { %v632_v5 = vadd.f32 %v631_v0, %v630_v2 }
 0x135   : > { %v733_v52 = vadd.f32 %v732_v48, %v731_v26 }
 0x136   : > { %v634_v8 = vadd.f32 %v633_v34, %v632_v5 }
 0x137   : > { %v735_v57 = vadd.f32 %v734_v54, %v733_v52 }
 0x138   : > { %v636_v44 = vadd.f32 %v635_v7, %v634_v8 }
 0x139   : > { %v737_v59 = vadd.f32 %v736_v55, %v735_v57 }
 0x13a   : > { %v638_v15 = vadd.f32 %v637_v10, %v636_v44 }
 0x13b   : > { %v739_v61 = vadd.f32 %v738_v58, %v737_v59 }
 0x13c   : > { %v640_v18 = vadd.f32 %v639_v13, %v638_v15 }
 0x13d   : > { %v741_v63 = vadd.f32 %v740_v36, %v739_v61 }
 0x13e   : > { %v642_v21 = vadd.f32 %v641_v16, %v640_v18 }
 0x13f   : > { %v743_v25 = vadd.f32 %v742_v50, %v741_v63 }
 0x140   : > { %v644_v35 = vadd.f32 %v643_v42, %v642_v21 }
 0x141   : > { %v745_v47 = vadd.f32 %v744_v53, %v743_v25 }
 0x142   : > { %v645_v32 = vrot.slane %v644_v35, 4 }
 0x143   : > { %v747_v34 = vadd.f32 %v746_v1, %v745_v47 }
 0x144   : > { %v646_v56 = vadd.f32 %v645_v32, %v644_v35 }
 0x145   : > { %v749_v29 = vadd.f32 %v748_v3, %v747_v34 }
 0x146   : > { %v647_v46 = vrot.slane %v646_v56, 2 }
 0x147   : > { %v750_v4 = vrot.slane %v749_v29, 4 }
 0x148   : > { %v648_v60 = vadd.f32 %v647_v46, %v646_v56 }
 0x149   : > { %v751_v51 = vadd.f32 %v750_v4, %v749_v29 }
 0x14a   : > { %v649_v62 = vrot.slane %v648_v60, 1 }
 0x14b   : > { %v752_v5 = vrot.slane %v751_v51, 2 }
 0x14c   : > { %v650_v0 = vadd.f32 %v649_v62, %v648_v60 }
 0x14d   : > { %v753_v6 = vadd.f32 %v752_v5, %v751_v51 }
 0x14e   : > { %v651_v2 = vadd.f32 %v650_v0, %v581_v49 }
 0x14f   : > { %v754_v7 = vrot.slane %v753_v6, 1 }
 0x150   : > { %653 = vst.msk [vmem:[%s1403_s3] sm:$0x1] %vm652_vm5, %v651_v2 }
 0x151   : > { %v755_v40 = vadd.f32 %v754_v7, %v753_v6 }
 0x153   : > { %v756_v8 = vadd.f32 %v755_v40, %v654_v23 }
 0x155   : > { %757 = vst.msk [vmem:[%s1404_s4] sm:$0x1] %vm652_vm5, %v756_v8 }
 0x156 PF: > { %s15_s15 = sadd.s32 1, %s964_s15  }
 0x157   : > { %p12_p5 = scmp.ge.s32.totalorder %s15_s15, 4  }
 0x159   :  { %14 = sbr.rel (!%p12_p5) target bundleno = 1 (0x1), region = 78 }

// kernel: runet_forward.47
= control target key start
LH: loop header
LB: loop body
LE: loop exit
PB: predicated region body
PF: predicated region fallthrough
CT: control target
= control target key end

     0   :  { %s1032_s15 = smov 0   ;;  %s1448_s0 = inlined_call_operand.vmem [shape: bf16[512,72], index: 0, kind: input, shape index: {}]   ;;  %s1449_s1 = inlined_call_operand.vmem [shape: bf16[72,8], index: 1, kind: input, shape index: {}]   ;;  %s1450_s2 = inlined_call_operand.vmem [shape: f32[512,8], index: 2, kind: output, shape index: {0}]   ;;  %s1451_s3 = inlined_call_operand.vmem [shape: f32[1,8], index: 3, kind: output, shape index: {1}]   ;;  %s1452_s4 = inlined_call_operand.vmem [shape: f32[1,8], index: 4, kind: output, shape index: {2}]  }
   0x1 LB: > { %s844_s16 = sadd.s32 4294967295, %s1004_s15   ;;  %p848_p0 = scmp.ge.s32.totalorder %s1004_s15, 1  ;;  %s1004_s15 = sphi %s1032_s15, %s15_s15  }
   0x2   : > { %p158_p1 = scmp.lt.s32.totalorder %s1004_s15, 3 }
   0x4   : > { %p159_p2 = pnand %p848_p0, %p158_p1 }
   0x5   : > { %v977_v0 = vld [vmem:[%s1449_s1] sm:$0xff] (!%p159_p2)   ;;  %v978_v1 = vld [vmem:[%s1449_s1 + $0x8] sm:$0xff] (!%p159_p2)   ;;  %s849_s21 = sshll.u32 (!%p159_p2), %s844_s16, 5  ;;  %v979_v2 = vld [vmem:[%s1449_s1 + $0x10] sm:$0xff] (!%p159_p2)   ;;  %vm345_vm0 = vcmask (!%p159_p2), 588800   ;;  %vm394_vm1 = vcmask (!%p159_p2), 1043456  }
   0x6   : > { %162 = sbr.rel (%p159_p2) target bundleno = 349 (0x15d), region = 28  ;;  %914 = vmatprep.subr.bf16.mxu0 (!%p159_p2), %v977_v0  ;;  %956 = vmatprep.subr.bf16.mxu1 (!%p159_p2), %v977_v0  ;;  %p185_p3 = scmp.lt.s32.totalorder (!%p159_p2), %s849_s21, 63  ;;  %v980_v3 = vld [vmem:[%s1449_s1 + $0x18] sm:$0xff] (!%p159_p2)   ;;  %v981_v6 = vld [vmem:[%s1449_s1 + $0x20] ss:$0 sps:$4 sm:$0xff] (!%p159_p2)   ;;  %vm559_vm2 = vcmask (!%p159_p2), 64512  }
   0x7   : > { %915 = vmatpush3.bf16.msra.mxu0 (!%p159_p2), %v977_v0  ;;  %961 = vmatpush3.bf16.msra.mxu1 (!%p159_p2), %v977_v0  ;;  %v396_v7 = vsel (!%p159_p2), %vm394_vm1, %v981_v6, 0  ;;  %p890_p4 = scmp.ne.s32.totalorder (!%p159_p2), %s844_s16, 0 }
   0x8   : > { %916 = vmatprep.subr.bf16.mxu0 (!%p159_p2), %v978_v1  ;;  %957 = vmatprep.subr.bf16.mxu1 (!%p159_p2), %v978_v1 }
   0xb   : > { %917 = vmatpush3.bf16.msra.mxu0 (!%p159_p2), %v978_v1  ;;  %962 = vmatpush3.bf16.msra.mxu1 (!%p159_p2), %v978_v1 }
   0xc   : > { %918 = vmatprep.subr.bf16.mxu0 (!%p159_p2), %v979_v2  ;;  %958 = vmatprep.subr.bf16.mxu1 (!%p159_p2), %v979_v2 }
   0xd   : > { %s1454_s21 = smov (!%p185_p3, %s849_s21), 63  ;;  %vm596_vm3 = vcmask (!%p890_p4), 57344   ;;  %v1006_v54 = vmov (!%p890_p4), 0.0  }
   0xe   : > { %s850_s24 = sshll.u32 %s1454_s21, 2  ;;  %s852_s6 = sshll.u32 %s1454_s21, 3  ;;  %597 = vst.msk [vmem:[%s1451_s3] sm:$0x1] (!%p890_p4), %vm596_vm3, %v1006_v54  ;;  %598 = vst.msk [vmem:[%s1452_s4] sm:$0x1] (!%p890_p4), %vm596_vm3, %v1006_v54 }
   0xf   : > { %s1060_s29 = scalar_lea.vmem %s1448_s0, %s850_s24  ;;  %919 = vmatpush3.bf16.msra.mxu0 %v979_v2  ;;  %963 = vmatpush3.bf16.msra.mxu1 %v979_v2  ;;  %s1101_s9 = scalar_lea.vmem %s1450_s2, %s852_s6 }
  0x10   : > { %v982_v4 = vld [vmem:[%s1060_s29] sm:$0xff]   ;;  %920 = vmatprep.subr.bf16.mxu0 %v980_v3  ;;  %959 = vmatprep.subr.bf16.mxu1 %v980_v3  ;;  %v984_v8 = vld [vmem:[%s1060_s29 + $0x8] sm:$0xff]   ;;  %v986_v10 = vld [vmem:[%s1060_s29 + $0x10] sm:$0xff]  }
  0x11   : > { %v983_v5 = vld [vmem:[%s1060_s29 + $0x40] sm:$0xff]   ;;  %924 = vmatprep.mubr.msk.bf16.mxu0 %vm345_vm0, %v982_v4  ;;  %v985_v9 = vld [vmem:[%s1060_s29 + $0x48] sm:$0xff]   ;;  %v987_v11 = vld [vmem:[%s1060_s29 + $0x50] sm:$0xff]  }
  0x12   : > { %940 = vmatprep.mubr.msk.bf16.mxu1 %vm345_vm0, %v983_v5  ;;  %v988_v12 = vld [vmem:[%s1060_s29 + $0x18] sm:$0xff]   ;;  %v990_v14 = vld [vmem:[%s1060_s29 + $0x20] sm:$0xff]   ;;  %v992_v16 = vld [vmem:[%s1060_s29 + $0x28] sm:$0xff]  }
  0x13   : > { %921 = vmatpush3.bf16.msra.mxu0 %v980_v3  ;;  %964 = vmatpush3.bf16.msra.mxu1 %v980_v3  ;;  %v989_v13 = vld [vmem:[%s1060_s29 + $0x58] sm:$0xff]   ;;  %v991_v15 = vld [vmem:[%s1060_s29 + $0x60] sm:$0xff]   ;;  %v993_v17 = vld [vmem:[%s1060_s29 + $0x68] sm:$0xff]  }
  0x14   : > { %966 = vmatprep.subr.msk.bf16.mxu0 %vm394_vm1, %v981_v6  ;;  %967 = vmatprep.subr.msk.bf16.mxu1 %vm394_vm1, %v981_v6  ;;  %v994_v18 = vld [vmem:[%s1060_s29 + $0x30] sm:$0xff]   ;;  %v996_v20 = vld [vmem:[%s1060_s29 + $0x38] sm:$0xff]  }
  0x15   : > { %v995_v19 = vld [vmem:[%s1060_s29 + $0x70] sm:$0xff]   ;;  %v997_v21 = vld [vmem:[%s1060_s29 + $0x78] sm:$0xff]  }
  0x17   : > { %923 = vmatpush3.bf16.msra.mxu0 %v396_v7  ;;  %965 = vmatpush3.bf16.msra.mxu1 %v396_v7 }
  0x1a   : > { %925 = vmatmul.mubr.msk.bf16.vlgmr.msra.gmra.mrb[0].mxu0 %vm345_vm0, %v984_v8  ;;  %941 = vmatmul.mubr.msk.bf16.vlgmr.msra.gmra.mrb[0].mxu1 %vm345_vm0, %v985_v9 }
  0x1b   : > { %928 = vmatprep.mubr.msk.bf16.mxu0 %vm345_vm0, %v986_v10  ;;  %944 = vmatprep.mubr.msk.bf16.mxu1 %vm345_vm0, %v987_v11 }
  0x22   : > { %929 = vmatmul.mubr.msk.bf16.gmra.mrb[4].mxu0 %vm345_vm0, %v988_v12  ;;  %945 = vmatmul.mubr.msk.bf16.gmra.mrb[4].mxu1 %vm345_vm0, %v989_v13 }
  0x23   : > { %932 = vmatprep.mubr.msk.bf16.mxu0 %vm345_vm0, %v990_v14  ;;  %948 = vmatprep.mubr.msk.bf16.mxu1 %vm345_vm0, %v991_v15 }
  0x2a   : > { %933 = vmatmul.mubr.msk.bf16.gmra.mrb[8].mxu0 %vm345_vm0, %v992_v16  ;;  %949 = vmatmul.mubr.msk.bf16.gmra.mrb[8].mxu1 %vm345_vm0, %v993_v17 }
  0x2b   : > { %936 = vmatprep.mubr.msk.bf16.mxu0 %vm345_vm0, %v994_v18  ;;  %952 = vmatprep.mubr.msk.bf16.mxu1 %vm345_vm0, %v995_v19 }
  0x32   : > { %937 = vmatmul.mubr.msk.bf16.gmra.mrb[12].mxu0 %vm345_vm0, %v996_v20  ;;  %953 = vmatmul.mubr.msk.bf16.gmra.mrb[12].mxu1 %vm345_vm0, %v997_v21 }
  0xed   : > { %v1103_v22 = vpop.f32.mrb[0].mxu0  ;;  %v1105_v23 = vpop.f32.mrb[0].mxu1 }
  0xee   : > { %562 = vst.msk [vmem:[%s1101_s9 + $0x10] sm:$0xff] %vm559_vm2, %v1103_v22  ;;  %578 = vst.msk [vmem:[%s1101_s9 + $0x90] sm:$0xff] %vm559_vm2, %v1105_v23  ;;  %v1113_v24 = vpop.f32.mrb[1].mxu0  ;;  %v1115_v25 = vpop.f32.mrb[1].mxu1 }
  0xef   : > { %560 = vst.msk [vmem:[%s1101_s9] sm:$0xff] %vm559_vm2, %v1113_v24  ;;  %576 = vst.msk [vmem:[%s1101_s9 + $0x80] sm:$0xff] %vm559_vm2, %v1115_v25  ;;  %v1123_v26 = vpop.f32.mrb[2].mxu0  ;;  %v1125_v27 = vpop.f32.mrb[2].mxu1 }
  0xf0   : > { %563 = vst.msk [vmem:[%s1101_s9 + $0x18] sm:$0xff] %vm559_vm2, %v1123_v26  ;;  %579 = vst.msk [vmem:[%s1101_s9 + $0x98] sm:$0xff] %vm559_vm2, %v1125_v27  ;;  %v1133_v28 = vpop.f32.mrb[3].mxu0  ;;  %v1135_v29 = vpop.f32.mrb[3].mxu1 }
  0xf1   : > { %561 = vst.msk [vmem:[%s1101_s9 + $0x8] sm:$0xff] %vm559_vm2, %v1133_v28  ;;  %577 = vst.msk [vmem:[%s1101_s9 + $0x88] sm:$0xff] %vm559_vm2, %v1135_v29 }
  0xf5   : > { %v1143_v30 = vpop.f32.mrb[4].mxu0  ;;  %v1145_v31 = vpop.f32.mrb[4].mxu1 }
  0xf6   : > { %566 = vst.msk [vmem:[%s1101_s9 + $0x30] sm:$0xff] %vm559_vm2, %v1143_v30  ;;  %582 = vst.msk [vmem:[%s1101_s9 + $0xb0] sm:$0xff] %vm559_vm2, %v1145_v31  ;;  %v1153_v32 = vpop.f32.mrb[5].mxu0  ;;  %v1155_v33 = vpop.f32.mrb[5].mxu1 }
  0xf7   : > { %564 = vst.msk [vmem:[%s1101_s9 + $0x20] sm:$0xff] %vm559_vm2, %v1153_v32  ;;  %580 = vst.msk [vmem:[%s1101_s9 + $0xa0] sm:$0xff] %vm559_vm2, %v1155_v33  ;;  %v1163_v34 = vpop.f32.mrb[6].mxu0  ;;  %v1165_v35 = vpop.f32.mrb[6].mxu1 }
  0xf8   : > { %567 = vst.msk [vmem:[%s1101_s9 + $0x38] sm:$0xff] %vm559_vm2, %v1163_v34  ;;  %583 = vst.msk [vmem:[%s1101_s9 + $0xb8] sm:$0xff] %vm559_vm2, %v1165_v35  ;;  %v1173_v36 = vpop.f32.mrb[7].mxu0  ;;  %v1175_v37 = vpop.f32.mrb[7].mxu1 }
  0xf9   : > { %565 = vst.msk [vmem:[%s1101_s9 + $0x28] sm:$0xff] %vm559_vm2, %v1173_v36  ;;  %581 = vst.msk [vmem:[%s1101_s9 + $0xa8] sm:$0xff] %vm559_vm2, %v1175_v37 }
  0xfd   : > { %v1183_v38 = vpop.f32.mrb[8].mxu0  ;;  %v1185_v39 = vpop.f32.mrb[8].mxu1 }
  0xfe   : > { %570 = vst.msk [vmem:[%s1101_s9 + $0x50] sm:$0xff] %vm559_vm2, %v1183_v38  ;;  %586 = vst.msk [vmem:[%s1101_s9 + $0xd0] sm:$0xff] %vm559_vm2, %v1185_v39  ;;  %v1193_v40 = vpop.f32.mrb[9].mxu0  ;;  %v1195_v41 = vpop.f32.mrb[9].mxu1 }
  0xff   : > { %568 = vst.msk [vmem:[%s1101_s9 + $0x40] sm:$0xff] %vm559_vm2, %v1193_v40  ;;  %584 = vst.msk [vmem:[%s1101_s9 + $0xc0] sm:$0xff] %vm559_vm2, %v1195_v41  ;;  %v1203_v42 = vpop.f32.mrb[10].mxu0  ;;  %v1205_v43 = vpop.f32.mrb[10].mxu1 }
 0x100   : > { %571 = vst.msk [vmem:[%s1101_s9 + $0x58] sm:$0xff] %vm559_vm2, %v1203_v42  ;;  %587 = vst.msk [vmem:[%s1101_s9 + $0xd8] sm:$0xff] %vm559_vm2, %v1205_v43  ;;  %v1213_v44 = vpop.f32.mrb[11].mxu0  ;;  %v1215_v45 = vpop.f32.mrb[11].mxu1 }
 0x101   : > { %569 = vst.msk [vmem:[%s1101_s9 + $0x48] sm:$0xff] %vm559_vm2, %v1213_v44  ;;  %585 = vst.msk [vmem:[%s1101_s9 + $0xc8] sm:$0xff] %vm559_vm2, %v1215_v45 }
 0x103   : > { %595 = sbr.rel (%p890_p4) target bundleno = 266 (0x10a), region = 32 }
 0x105   : > { %v1223_v46 = vpop.f32.mrb[12].mxu0  ;;  %v1225_v47 = vpop.f32.mrb[12].mxu1 }
 0x106   : > { %574 = vst.msk [vmem:[%s1101_s9 + $0x70] sm:$0xff] %vm559_vm2, %v1223_v46  ;;  %590 = vst.msk [vmem:[%s1101_s9 + $0xf0] sm:$0xff] %vm559_vm2, %v1225_v47  ;;  %v1233_v48 = vpop.f32.mrb[13].mxu0  ;;  %v1235_v49 = vpop.f32.mrb[13].mxu1 }
 0x107   : > { %572 = vst.msk [vmem:[%s1101_s9 + $0x60] sm:$0xff] %vm559_vm2, %v1233_v48  ;;  %588 = vst.msk [vmem:[%s1101_s9 + $0xe0] sm:$0xff] %vm559_vm2, %v1235_v49  ;;  %v1243_v50 = vpop.f32.mrb[14].mxu0  ;;  %v1245_v51 = vpop.f32.mrb[14].mxu1 }
 0x108   : > { %575 = vst.msk [vmem:[%s1101_s9 + $0x78] sm:$0xff] %vm559_vm2, %v1243_v50  ;;  %591 = vst.msk [vmem:[%s1101_s9 + $0xf8] sm:$0xff] %vm559_vm2, %v1245_v51  ;;  %v1253_v52 = vpop.f32.mrb[15].mxu0  ;;  %v1255_v53 = vpop.f32.mrb[15].mxu1 }
 0x109   : > { %573 = vst.msk [vmem:[%s1101_s9 + $0x68] sm:$0xff] %vm559_vm2, %v1253_v52  ;;  %589 = vst.msk [vmem:[%s1101_s9 + $0xe8] sm:$0xff] %vm559_vm2, %v1255_v53 }
 0x10a PF: > { %v600_v55 = vsel %vm559_vm2, %v1113_v24, 0.0  ;;  %v601_v56 = vsel %vm559_vm2, %v1133_v28, 0.0  ;;  %v603_v57 = vsel %vm559_vm2, %v1103_v22, 0.0  ;;  %v605_v59 = vsel %vm559_vm2, %v1123_v26, 0.0 }
 0x10b   : > { %v602_v58 = vadd.f32 %v601_v56, %v600_v55  ;;  %v607_v61 = vsel %vm559_vm2, %v1153_v32, 0.0  ;;  %v609_v63 = vsel %vm559_vm2, %v1173_v36, 0.0  ;;  %v611_v1 = vsel %vm559_vm2, %v1143_v30, 0.0 }
 0x10c   : > { %v613_v3 = vsel %vm559_vm2, %v1163_v34, 0.0  ;;  %v615_v5 = vsel %vm559_vm2, %v1193_v40, 0.0  ;;  %v617_v7 = vsel %vm559_vm2, %v1213_v44, 0.0  ;;  %v673_v8 = vmul.f32 %v1113_v24, %v1113_v24 }
 0x10d   : > { %v604_v60 = vadd.f32 %v603_v57, %v602_v58  ;;  %v674_v9 = vmul.f32 %v1133_v28, %v1133_v28  ;;  %v675_v11 = vmul.f32 %v1103_v22, %v1103_v22  ;;  %v619_v12 = vsel %vm559_vm2, %v1183_v38, 0.0 }
 0x10e   : > { %v676_v13 = vmul.f32 %v1123_v26, %v1123_v26  ;;  %v621_v15 = vsel %vm559_vm2, %v1203_v42, 0.0  ;;  %v677_v16 = vmul.f32 %v1153_v32, %v1153_v32  ;;  %v705_v17 = vsel %vm559_vm2, %v673_v8, 0.0 }
 0x10f   : > { %v606_v62 = vadd.f32 %v605_v59, %v604_v60  ;;  %v706_v18 = vsel %vm559_vm2, %v674_v9, 0.0  ;;  %v708_v21 = vsel %vm559_vm2, %v675_v11, 0.0  ;;  %v623_v22 = vsel %vm559_vm2, %v1233_v48, 0.0 }
 0x110   : > { %v707_v20 = vadd.f32 %v706_v18, %v705_v17  ;;  %v678_v24 = vmul.f32 %v1173_v36, %v1173_v36  ;;  %v710_v26 = vsel %vm559_vm2, %v676_v13, 0.0  ;;  %v625_v32 = vsel %vm559_vm2, %v1253_v52, 0.0 }
 0x111   : > { %v608_v0 = vadd.f32 %v607_v61, %v606_v62  ;;  %v679_v55 = vmul.f32 %v1143_v30, %v1143_v30  ;;  %v712_v56 = vsel %vm559_vm2, %v677_v16, 0.0  ;;  %v627_v59 = vsel %vm559_vm2, %v1223_v46, 0.0 }
 0x112   : > { %v709_v54 = vadd.f32 %v708_v21, %v707_v20  ;;  %v680_v36 = vmul.f32 %v1163_v34, %v1163_v34  ;;  %v714_v60 = vsel %vm559_vm2, %v678_v24, 0.0  ;;  %v681_v30 = vmul.f32 %v1193_v40, %v1193_v40 }
 0x113   : > { %v610_v2 = vadd.f32 %v609_v63, %v608_v0  ;;  %v629_v63 = vsel %vm559_vm2, %v1243_v50, 0.0  ;;  %v716_v0 = vsel %vm559_vm2, %v679_v55, 0.0  ;;  %v682_v34 = vmul.f32 %v1213_v44, %v1213_v44 }
 0x114   : > { %v711_v58 = vadd.f32 %v710_v26, %v709_v54  ;;  %v683_v40 = vmul.f32 %v1183_v38, %v1183_v38  ;;  %v720_v8 = vsel %vm559_vm2, %v681_v30, 0.0  ;;  %v635_v11 = vsel %vm559_vm2, %v1105_v23, 0.0 }
 0x115   : > { %v612_v4 = vadd.f32 %v611_v1, %v610_v2  ;;  %v684_v44 = vmul.f32 %v1203_v42, %v1203_v42  ;;  %v685_v38 = vmul.f32 %v1233_v48, %v1233_v48  ;;  %v686_v42 = vmul.f32 %v1253_v52, %v1253_v52 }
 0x116   : > { %v713_v62 = vadd.f32 %v712_v56, %v711_v58  ;;  %v724_v16 = vsel %vm559_vm2, %v683_v40, 0.0  ;;  %v641_v24 = vsel %vm559_vm2, %v1175_v37, 0.0  ;;  %v687_v48 = vmul.f32 %v1223_v46, %v1223_v46 }
 0x117   : > { %v614_v6 = vadd.f32 %v613_v3, %v612_v4  ;;  %v631_v3 = vsel %vm559_vm2, %v1115_v25, 0.0  ;;  %v718_v4 = vsel %vm559_vm2, %v680_v36, 0.0  ;;  %v726_v20 = vsel %vm559_vm2, %v684_v44, 0.0 }
 0x118   : > { %v715_v2 = vadd.f32 %v714_v60, %v713_v62  ;;  %v728_v26 = vsel %vm559_vm2, %v685_v38, 0.0  ;;  %v688_v52 = vmul.f32 %v1243_v50, %v1243_v50  ;;  %v730_v55 = vsel %vm559_vm2, %v686_v42, 0.0 }
 0x119   : > { %v616_v10 = vadd.f32 %v615_v5, %v614_v6  ;;  %v645_v58 = vsel %vm559_vm2, %v1165_v35, 0.0  ;;  %v689_v46 = vmul.f32 %v1115_v25, %v1115_v25  ;;  %v690_v50 = vmul.f32 %v1135_v29, %v1135_v29 }
 0x11a   : > { %v717_v6 = vadd.f32 %v716_v0, %v715_v2  ;;  %v734_v62 = vsel %vm559_vm2, %v688_v52, 0.0  ;;  %v649_v0 = vsel %vm559_vm2, %v1215_v45, 0.0  ;;  %v691_v25 = vmul.f32 %v1105_v23, %v1105_v23 }
 0x11b   : > { %v618_v14 = vadd.f32 %v617_v7, %v616_v10  ;;  %v633_v7 = vsel %vm559_vm2, %v1135_v29, 0.0  ;;  %v692_v29 = vmul.f32 %v1125_v27, %v1125_v27  ;;  %v693_v23 = vmul.f32 %v1155_v33, %v1155_v33 }
 0x11c   : > { %v719_v10 = vadd.f32 %v718_v4, %v717_v6  ;;  %v738_v4 = vsel %vm559_vm2, %v690_v50, 0.0  ;;  %v740_v40 = vsel %vm559_vm2, %v691_v25, 0.0  ;;  %v661_v42 = vsel %vm559_vm2, %v1245_v51, 0.0 }
 0x11d   : > { %v620_v19 = vadd.f32 %v619_v12, %v618_v14  ;;  %v722_v12 = vsel %vm559_vm2, %v682_v34, 0.0  ;;  %v651_v34 = vsel %vm559_vm2, %v1185_v39, 0.0  ;;  %vm670_vm4 = vcmask 57344  }
 0x11e   : > { %v721_v14 = vadd.f32 %v720_v8, %v719_v10  ;;  %v655_v10 = vsel %vm559_vm2, %v1235_v49, 0.0 }
 0x11f   : > { %v622_v28 = vadd.f32 %v621_v15, %v620_v19  ;;  %v637_v15 = vsel %vm559_vm2, %v1125_v27, 0.0  ;;  %v639_v19 = vsel %vm559_vm2, %v1155_v33, 0.0  ;;  %v694_v27 = vmul.f32 %v1175_v37, %v1175_v37 }
 0x120   : > { %v723_v18 = vadd.f32 %v722_v12, %v721_v14  ;;  %v695_v33 = vmul.f32 %v1145_v31, %v1145_v31  ;;  %v744_v14 = vsel %vm559_vm2, %v693_v23, 0.0  ;;  %v696_v37 = vmul.f32 %v1165_v35, %v1165_v35  ;;  %v672_v23 = vld [vmem:[%s1452_s4] sm:$0x1] }
 0x121   : > { %v624_v57 = vadd.f32 %v623_v22, %v622_v28 }
 0x122   : > { %v725_v22 = vadd.f32 %v724_v16, %v723_v18  ;;  %v659_v16 = vsel %vm559_vm2, %v1225_v47, 0.0 }
 0x123   : > { %v626_v61 = vadd.f32 %v625_v32, %v624_v57  ;;  %v643_v32 = vsel %vm559_vm2, %v1145_v31, 0.0  ;;  %v697_v31 = vmul.f32 %v1195_v41, %v1195_v41 }
 0x124   : > { %v727_v54 = vadd.f32 %v726_v20, %v725_v22  ;;  %v748_v20 = vsel %vm559_vm2, %v695_v33, 0.0 }
 0x125   : > { %v628_v1 = vadd.f32 %v627_v59, %v626_v61  ;;  %v732_v59 = vsel %vm559_vm2, %v687_v48, 0.0  ;;  %v647_v61 = vsel %vm559_vm2, %v1195_v41, 0.0  ;;  %v750_v48 = vsel %vm559_vm2, %v696_v37, 0.0 }
 0x126   : > { %v729_v57 = vadd.f32 %v728_v26, %v727_v54  ;;  %v752_v54 = vsel %vm559_vm2, %v697_v31, 0.0  ;;  %v700_v41 = vmul.f32 %v1205_v43, %v1205_v43 }
 0x127   : > { %v630_v5 = vadd.f32 %v629_v63, %v628_v1  ;;  %v736_v1 = vsel %vm559_vm2, %v689_v46, 0.0 }
 0x128   : > { %v731_v60 = vadd.f32 %v730_v55, %v729_v57 }
 0x129   : > { %v632_v9 = vadd.f32 %v631_v3, %v630_v5 }
 0x12a   : > { %v733_v30 = vadd.f32 %v732_v59, %v731_v60 }
 0x12b   : > { %v634_v13 = vadd.f32 %v633_v7, %v632_v9  ;;  %v653_v7 = vsel %vm559_vm2, %v1205_v43, 0.0  ;;  %v703_v43 = vmul.f32 %v1225_v47, %v1225_v47 }
 0x12c   : > { %v735_v3 = vadd.f32 %v734_v62, %v733_v30  ;;  %v704_v30 = vmul.f32 %v1245_v51, %v1245_v51 }
 0x12d   : > { %v636_v17 = vadd.f32 %v635_v11, %v634_v13  ;;  %v742_v11 = vsel %vm559_vm2, %v692_v29, 0.0  ;;  %v657_v13 = vsel %vm559_vm2, %v1255_v53, 0.0 }
 0x12e   : > { %v737_v6 = vadd.f32 %v736_v1, %v735_v3  ;;  %v764_v1 = vsel %vm559_vm2, %v703_v43, 0.0  ;;  %v766_v3 = vsel %vm559_vm2, %v704_v30, 0.0 }
 0x12f   : > { %v638_v21 = vadd.f32 %v637_v15, %v636_v17  ;;  %v746_v17 = vsel %vm559_vm2, %v694_v27, 0.0 }
 0x130   : > { %v739_v9 = vadd.f32 %v738_v4, %v737_v6 }
 0x131   : > { %v640_v28 = vadd.f32 %v639_v19, %v638_v21 }
 0x132   : > { %v741_v12 = vadd.f32 %v740_v40, %v739_v9 }
 0x133   : > { %v642_v56 = vadd.f32 %v641_v24, %v640_v28  ;;  %v698_v24 = vmul.f32 %v1215_v45, %v1215_v45  ;;  %v699_v28 = vmul.f32 %v1185_v39, %v1185_v39  ;;  %v701_v45 = vmul.f32 %v1235_v49, %v1235_v49  ;;  %v599_v49 = vld [vmem:[%s1451_s3] sm:$0x1] }
 0x134   : > { %v743_v38 = vadd.f32 %v742_v11, %v741_v12  ;;  %v702_v39 = vmul.f32 %v1255_v53, %v1255_v53 }
 0x135   : > { %v644_v36 = vadd.f32 %v643_v32, %v642_v56  ;;  %v754_v55 = vsel %vm559_vm2, %v698_v24, 0.0  ;;  %v760_v50 = vsel %vm559_vm2, %v701_v45, 0.0 }
 0x136   : > { %v745_v19 = vadd.f32 %v744_v14, %v743_v38  ;;  %v762_v53 = vsel %vm559_vm2, %v702_v39, 0.0 }
 0x137   : > { %v646_v63 = vadd.f32 %v645_v58, %v644_v36  ;;  %v756_v58 = vsel %vm559_vm2, %v699_v28, 0.0  ;;  %v758_v36 = vsel %vm559_vm2, %v700_v41, 0.0 }
 0x138   : > { %v747_v22 = vadd.f32 %v746_v17, %v745_v19 }
 0x139   : > { %v648_v2 = vadd.f32 %v647_v61, %v646_v63 }
 0x13a   : > { %v749_v26 = vadd.f32 %v748_v20, %v747_v22 }
 0x13b   : > { %v650_v5 = vadd.f32 %v649_v0, %v648_v2 }
 0x13c   : > { %v751_v52 = vadd.f32 %v750_v48, %v749_v26 }
 0x13d   : > { %v652_v8 = vadd.f32 %v651_v34, %v650_v5 }
 0x13e   : > { %v753_v57 = vadd.f32 %v752_v54, %v751_v52 }
 0x13f   : > { %v654_v44 = vadd.f32 %v653_v7, %v652_v8 }
 0x140   : > { %v755_v59 = vadd.f32 %v754_v55, %v753_v57 }
 0x141   : > { %v656_v15 = vadd.f32 %v655_v10, %v654_v44 }
 0x142   : > { %v757_v61 = vadd.f32 %v756_v58, %v755_v59 }
 0x143   : > { %v658_v18 = vadd.f32 %v657_v13, %v656_v15 }
 0x144   : > { %v759_v63 = vadd.f32 %v758_v36, %v757_v61 }
 0x145   : > { %v660_v21 = vadd.f32 %v659_v16, %v658_v18 }
 0x146   : > { %v761_v25 = vadd.f32 %v760_v50, %v759_v63 }
 0x147   : > { %v662_v35 = vadd.f32 %v661_v42, %v660_v21 }
 0x148   : > { %v763_v47 = vadd.f32 %v762_v53, %v761_v25 }
 0x149   : > { %v663_v32 = vrot.slane %v662_v35, 4 }
 0x14a   : > { %v765_v34 = vadd.f32 %v764_v1, %v763_v47 }
 0x14b   : > { %v664_v56 = vadd.f32 %v663_v32, %v662_v35 }
 0x14c   : > { %v767_v29 = vadd.f32 %v766_v3, %v765_v34 }
 0x14d   : > { %v665_v46 = vrot.slane %v664_v56, 2 }
 0x14e   : > { %v768_v4 = vrot.slane %v767_v29, 4 }
 0x14f   : > { %v666_v60 = vadd.f32 %v665_v46, %v664_v56 }
 0x150   : > { %v769_v51 = vadd.f32 %v768_v4, %v767_v29 }
 0x151   : > { %v667_v62 = vrot.slane %v666_v60, 1 }
 0x152   : > { %v770_v5 = vrot.slane %v769_v51, 2 }
 0x153   : > { %v668_v0 = vadd.f32 %v667_v62, %v666_v60 }
 0x154   : > { %v771_v6 = vadd.f32 %v770_v5, %v769_v51 }
 0x155   : > { %v669_v2 = vadd.f32 %v668_v0, %v599_v49 }
 0x156   : > { %v772_v7 = vrot.slane %v771_v6, 1 }
 0x157   : > { %671 = vst.msk [vmem:[%s1451_s3] sm:$0x1] %vm670_vm4, %v669_v2 }
 0x158   : > { %v773_v40 = vadd.f32 %v772_v7, %v771_v6 }
 0x15a   : > { %v774_v8 = vadd.f32 %v773_v40, %v672_v23 }
 0x15c   : > { %775 = vst.msk [vmem:[%s1452_s4] sm:$0x1] %vm670_vm4, %v774_v8 }
 0x15d PF: > { %s15_s15 = sadd.s32 1, %s1004_s15  }
 0x15e   : > { %p12_p5 = scmp.ge.s32.totalorder %s15_s15, 4  }
 0x160   :  { %14 = sbr.rel (!%p12_p5) target bundleno = 1 (0x1), region = 78 }

// kernel: squeeze.56
= control target key start
LH: loop header
LB: loop body
LE: loop exit
PB: predicated region body
PF: predicated region fallthrough
CT: control target
= control target key end

     0   :  { %vm6_vm0 = vcmask 1043458   ;;  %vm10_vm1 = vcmask 1045508   ;;  %vm14_vm2 = vcmask 1047558   ;;  %s19_s6 = smov 3  ;;  %s22_s7 = smov 12  ;;  %vm16_vm3 = vcmask 64512   ;;  %s736_s0 = inlined_call_operand.vmem [shape: f32[2,8,1,8,1,8], index: 0, kind: input, shape index: {}]   ;;  %s737_s1 = inlined_call_operand.vmem [shape: f32[8,128], index: 1, kind: output, shape index: {}]  }
   0x1   :  { %v348_v0 = vld [vmem:[%s736_s0 + $0xf] ss:$16 sm:%s19_s6]   ;;  %s27_s12 = smov 48  ;;  %s32_s13 = smov 192  ;;  %vm38_vm4 = vcmask 1048512   ;;  %vm60_vm5 = vcmask 982912  }
   0x2   :  { %v349_v1 = vld [vmem:[%s736_s0 + $0xf] ss:$16 sm:%s22_s7]   ;;  %s63_s18 = smov 3  ;;  %s66_s21 = smov 12  ;;  %vm82_vm6 = vcmask 917312   ;;  %vm104_vm7 = vcmask 851712  }
   0x3   :  { %v25_v2 = vsel %vm6_vm0, %v349_v1, %v348_v0  ;;  %v350_v3 = vld [vmem:[%s736_s0 + $0xf] ss:$16 sm:%s27_s12]   ;;  %v356_v6 = vld [vmem:[%s736_s0 + $0xd] ss:$16 sm:%s63_s18]   ;;  %s71_s22 = smov 48  ;;  %s76_s27 = smov 192 }
   0x4   :  { %v351_v4 = vld [vmem:[%s736_s0 + $0xf] ss:$16 sm:%s32_s13]   ;;  %v30_v5 = vsel %vm10_vm1, %v350_v3, %v25_v2  ;;  %v357_v8 = vld [vmem:[%s736_s0 + $0xd] ss:$16 sm:%s66_s21]   ;;  %s423_s28 = smov 120   ;;  %s41_s2 = smov 3 }
   0x5   :  { %v35_v7 = vsel %vm14_vm2, %v351_v4, %v30_v5  ;;  %v358_v9 = vld [vmem:[%s736_s0 + $0xd] ss:$16 sm:%s71_s22]   ;;  %v69_v10 = vsel %vm6_vm0, %v357_v8, %v356_v6  ;;  %s44_s3 = smov 12  ;;  %v352_v13 = vld [vmem:[%s736_s0 + $0xe] ss:$16 sm:%s41_s2]   ;;  %s49_s8 = smov 48 }
   0x6   :  { %36 = vrot.lane.b32.xlu0 %v35_v7, %s423_s28  ;;  %v359_v11 = vld [vmem:[%s736_s0 + $0xd] ss:$16 sm:%s76_s27]   ;;  %v74_v12 = vsel %vm10_vm1, %v358_v9, %v69_v10  ;;  %s54_s9 = smov 192  ;;  %s85_s14 = smov 3  ;;  %vm126_vm8 = vcmask 786112   ;;  %vm148_vm9 = vcmask 720512  }
   0x7   :  { %v353_v14 = vld [vmem:[%s736_s0 + $0xe] ss:$16 sm:%s44_s3]   ;;  %v79_v15 = vsel %vm14_vm2, %v359_v11, %v74_v12  ;;  %s424_s15 = smov 104   ;;  %v360_v20 = vld [vmem:[%s736_s0 + $0xc] ss:$16 sm:%s85_s14]   ;;  %s88_s18 = smov 12 }
   0x8   :  { %v47_v16 = vsel %vm6_vm0, %v353_v14, %v352_v13  ;;  %v354_v17 = vld [vmem:[%s736_s0 + $0xe] ss:$16 sm:%s49_s8]   ;;  %80 = vrot.lane.b32.xlu1 %v79_v15, %s424_s15  ;;  %s93_s19 = smov 48  ;;  %s98_s24 = smov 192  ;;  %vm170_vm10 = vcmask 654912   ;;  %vm192_vm11 = vcmask 589312  }
   0x9   :  { %v355_v18 = vld [vmem:[%s736_s0 + $0xe] ss:$16 sm:%s54_s9]   ;;  %v52_v19 = vsel %vm10_vm1, %v354_v17, %v47_v16  ;;  %v361_v22 = vld [vmem:[%s736_s0 + $0xc] ss:$16 sm:%s88_s18]   ;;  %s425_s25 = smov 112   ;;  %s107_s28 = smov 3 }
   0xa   :  { %v57_v21 = vsel %vm14_vm2, %v355_v18, %v52_v19  ;;  %v362_v23 = vld [vmem:[%s736_s0 + $0xc] ss:$16 sm:%s93_s19]   ;;  %v91_v24 = vsel %vm6_vm0, %v361_v22, %v360_v20  ;;  %s110_s29 = smov 12  ;;  %v364_v27 = vld [vmem:[%s736_s0 + $0xb] ss:$16 sm:%s107_s28]   ;;  %s115_s5 = smov 48 }
   0xb   :  { %58 = vrot.lane.b32.xlu0 %v57_v21, %s425_s25  ;;  %v363_v25 = vld [vmem:[%s736_s0 + $0xc] ss:$16 sm:%s98_s24]   ;;  %v96_v26 = vsel %vm10_vm1, %v362_v23, %v91_v24  ;;  %s120_s6 = smov 192  ;;  %s129_s11 = smov 3  ;;  %vm214_vm12 = vcmask 523712   ;;  %vm236_vm13 = vcmask 458112  }
   0xc   :  { %v365_v28 = vld [vmem:[%s736_s0 + $0xb] ss:$16 sm:%s110_s29]   ;;  %v101_v29 = vsel %vm14_vm2, %v363_v25, %v96_v26  ;;  %s426_s12 = smov 96   ;;  %v368_v34 = vld [vmem:[%s736_s0 + $0xa] ss:$16 sm:%s129_s11]   ;;  %s132_s15 = smov 12 }
   0xd   :  { %v113_v30 = vsel %vm6_vm0, %v365_v28, %v364_v27  ;;  %v366_v31 = vld [vmem:[%s736_s0 + $0xb] ss:$16 sm:%s115_s5]   ;;  %102 = vrot.lane.b32.xlu1 %v101_v29, %s426_s12  ;;  %s137_s16 = smov 48  ;;  %s142_s21 = smov 192  ;;  %vm258_vm14 = vcmask 392512   ;;  %vm280_vm15 = vcmask 326912  }
   0xe   :  { %v367_v32 = vld [vmem:[%s736_s0 + $0xb] ss:$16 sm:%s120_s6]   ;;  %v118_v33 = vsel %vm10_vm1, %v366_v31, %v113_v30  ;;  %v369_v36 = vld [vmem:[%s736_s0 + $0xa] ss:$16 sm:%s132_s15]   ;;  %s427_s22 = smov 88   ;;  %s151_s25 = smov 3 }
   0xf   :  { %v123_v35 = vsel %vm14_vm2, %v367_v32, %v118_v33  ;;  %v370_v37 = vld [vmem:[%s736_s0 + $0xa] ss:$16 sm:%s137_s16]   ;;  %v135_v38 = vsel %vm6_vm0, %v369_v36, %v368_v34  ;;  %s154_s26 = smov 12  ;;  %v372_v41 = vld [vmem:[%s736_s0 + $0x9] ss:$16 sm:%s151_s25]   ;;  %s159_s2 = smov 48 }
  0x10   :  { %124 = vrot.lane.b32.xlu0 %v123_v35, %s427_s22  ;;  %v371_v39 = vld [vmem:[%s736_s0 + $0xa] ss:$16 sm:%s142_s21]   ;;  %v140_v40 = vsel %vm10_vm1, %v370_v37, %v135_v38  ;;  %s164_s3 = smov 192  ;;  %s173_s8 = smov 3 }
  0x11   :  { %v373_v42 = vld [vmem:[%s736_s0 + $0x9] ss:$16 sm:%s154_s26]   ;;  %v145_v43 = vsel %vm14_vm2, %v371_v39, %v140_v40  ;;  %s428_s9 = smov 80   ;;  %v376_v48 = vld [vmem:[%s736_s0 + $0x8] ss:$16 sm:%s173_s8]   ;;  %s176_s12 = smov 12 }
  0x12   :  { %v157_v44 = vsel %vm6_vm0, %v373_v42, %v372_v41  ;;  %v374_v45 = vld [vmem:[%s736_s0 + $0x9] ss:$16 sm:%s159_s2]   ;;  %146 = vrot.lane.b32.xlu1 %v145_v43, %s428_s9  ;;  %s181_s13 = smov 48  ;;  %s186_s18 = smov 192 }
  0x13   :  { %v375_v46 = vld [vmem:[%s736_s0 + $0x9] ss:$16 sm:%s164_s3]   ;;  %v162_v47 = vsel %vm10_vm1, %v374_v45, %v157_v44  ;;  %v377_v50 = vld [vmem:[%s736_s0 + $0x8] ss:$16 sm:%s176_s12]   ;;  %s429_s19 = smov 72   ;;  %s195_s22 = smov 3 }
  0x14   :  { %v167_v49 = vsel %vm14_vm2, %v375_v46, %v162_v47  ;;  %v378_v51 = vld [vmem:[%s736_s0 + $0x8] ss:$16 sm:%s181_s13]   ;;  %v179_v52 = vsel %vm6_vm0, %v377_v50, %v376_v48  ;;  %s198_s23 = smov 12  ;;  %v380_v55 = vld [vmem:[%s736_s0 + $0x7] ss:$16 sm:%s195_s22]   ;;  %s203_s28 = smov 48 }
  0x15   :  { %168 = vrot.lane.b32.xlu0 %v167_v49, %s429_s19  ;;  %v379_v53 = vld [vmem:[%s736_s0 + $0x8] ss:$16 sm:%s186_s18]   ;;  %v184_v54 = vsel %vm10_vm1, %v378_v51, %v179_v52  ;;  %s208_s29 = smov 192  ;;  %s217_s5 = smov 3 }
  0x16   :  { %v381_v56 = vld [vmem:[%s736_s0 + $0x7] ss:$16 sm:%s198_s23]   ;;  %v189_v57 = vsel %vm14_vm2, %v379_v53, %v184_v54  ;;  %s430_s6 = smov 64   ;;  %v384_v62 = vld [vmem:[%s736_s0 + $0x6] ss:$16 sm:%s217_s5]   ;;  %s220_s9 = smov 12 }
  0x17   :  { %v201_v58 = vsel %vm6_vm0, %v381_v56, %v380_v55  ;;  %v382_v59 = vld [vmem:[%s736_s0 + $0x7] ss:$16 sm:%s203_s28]   ;;  %190 = vrot.lane.b32.xlu1 %v189_v57, %s430_s6  ;;  %s225_s10 = smov 48  ;;  %s230_s15 = smov 192 }
  0x18   :  { %v383_v60 = vld [vmem:[%s736_s0 + $0x7] ss:$16 sm:%s208_s29]   ;;  %v206_v61 = vsel %vm10_vm1, %v382_v59, %v201_v58  ;;  %v385_v0 = vld [vmem:[%s736_s0 + $0x6] ss:$16 sm:%s220_s9]   ;;  %s431_s16 = smov 56   ;;  %s239_s19 = smov 3 }
  0x19   :  { %v211_v63 = vsel %vm14_vm2, %v383_v60, %v206_v61  ;;  %v386_v1 = vld [vmem:[%s736_s0 + $0x6] ss:$16 sm:%s225_s10]   ;;  %v223_v2 = vsel %vm6_vm0, %v385_v0, %v384_v62  ;;  %s242_s20 = smov 12  ;;  %v388_v5 = vld [vmem:[%s736_s0 + $0x5] ss:$16 sm:%s239_s19]   ;;  %s247_s25 = smov 48 }
  0x1a   :  { %212 = vrot.lane.b32.xlu0 %v211_v63, %s431_s16  ;;  %v387_v3 = vld [vmem:[%s736_s0 + $0x6] ss:$16 sm:%s230_s15]   ;;  %v228_v4 = vsel %vm10_vm1, %v386_v1, %v223_v2  ;;  %s252_s26 = smov 192  ;;  %s261_s2 = smov 3 }
  0x1b   :  { %v389_v6 = vld [vmem:[%s736_s0 + $0x5] ss:$16 sm:%s242_s20]   ;;  %v233_v7 = vsel %vm14_vm2, %v387_v3, %v228_v4  ;;  %s432_s3 = smov 48   ;;  %v392_v12 = vld [vmem:[%s736_s0 + $0x4] ss:$16 sm:%s261_s2]   ;;  %s264_s6 = smov 12 }
  0x1c   :  { %v245_v8 = vsel %vm6_vm0, %v389_v6, %v388_v5  ;;  %v390_v9 = vld [vmem:[%s736_s0 + $0x5] ss:$16 sm:%s247_s25]   ;;  %234 = vrot.lane.b32.xlu1 %v233_v7, %s432_s3  ;;  %s269_s7 = smov 48  ;;  %s274_s12 = smov 192 }
  0x1d   :  { %v391_v10 = vld [vmem:[%s736_s0 + $0x5] ss:$16 sm:%s252_s26]   ;;  %v250_v11 = vsel %vm10_vm1, %v390_v9, %v245_v8  ;;  %v393_v14 = vld [vmem:[%s736_s0 + $0x4] ss:$16 sm:%s264_s6]   ;;  %s433_s13 = smov 40   ;;  %s283_s16 = smov 3 }
  0x1e   :  { %v255_v13 = vsel %vm14_vm2, %v391_v10, %v250_v11  ;;  %v394_v15 = vld [vmem:[%s736_s0 + $0x4] ss:$16 sm:%s269_s7]   ;;  %v267_v16 = vsel %vm6_vm0, %v393_v14, %v392_v12  ;;  %s286_s17 = smov 12  ;;  %v396_v19 = vld [vmem:[%s736_s0 + $0x3] ss:$16 sm:%s283_s16]   ;;  %s291_s22 = smov 48 }
  0x1f   :  { %256 = vrot.lane.b32.xlu0 %v255_v13, %s433_s13  ;;  %v395_v17 = vld [vmem:[%s736_s0 + $0x4] ss:$16 sm:%s274_s12]   ;;  %v272_v18 = vsel %vm10_vm1, %v394_v15, %v267_v16  ;;  %s296_s23 = smov 192  ;;  %s305_s28 = smov 3 }
  0x20   :  { %v397_v20 = vld [vmem:[%s736_s0 + $0x3] ss:$16 sm:%s286_s17]   ;;  %v277_v21 = vsel %vm14_vm2, %v395_v17, %v272_v18  ;;  %s434_s29 = smov 32   ;;  %v400_v26 = vld [vmem:[%s736_s0 + $0x2] ss:$16 sm:%s305_s28]   ;;  %s308_s3 = smov 12 }
  0x21   :  { %v289_v22 = vsel %vm6_vm0, %v397_v20, %v396_v19  ;;  %v398_v23 = vld [vmem:[%s736_s0 + $0x3] ss:$16 sm:%s291_s22]   ;;  %278 = vrot.lane.b32.xlu1 %v277_v21, %s434_s29  ;;  %s313_s4 = smov 48  ;;  %s318_s9 = smov 192 }
  0x22   :  { %v399_v24 = vld [vmem:[%s736_s0 + $0x3] ss:$16 sm:%s296_s23]   ;;  %v294_v25 = vsel %vm10_vm1, %v398_v23, %v289_v22  ;;  %v401_v28 = vld [vmem:[%s736_s0 + $0x2] ss:$16 sm:%s308_s3]   ;;  %s435_s10 = smov 24   ;;  %s327_s13 = smov 3 }
  0x23   :  { %v299_v27 = vsel %vm14_vm2, %v399_v24, %v294_v25  ;;  %v402_v29 = vld [vmem:[%s736_s0 + $0x2] ss:$16 sm:%s313_s4]   ;;  %v311_v30 = vsel %vm6_vm0, %v401_v28, %v400_v26  ;;  %s330_s14 = smov 12  ;;  %v404_v33 = vld [vmem:[%s736_s0 + $0x1] ss:$16 sm:%s327_s13]   ;;  %s335_s19 = smov 48 }
  0x24   :  { %300 = vrot.lane.b32.xlu0 %v299_v27, %s435_s10  ;;  %v403_v31 = vld [vmem:[%s736_s0 + $0x2] ss:$16 sm:%s318_s9]   ;;  %v316_v32 = vsel %vm10_vm1, %v402_v29, %v311_v30  ;;  %s340_s20 = smov 192  ;;  %s2_s25 = smov 3 }
  0x25   :  { %v405_v34 = vld [vmem:[%s736_s0 + $0x1] ss:$16 sm:%s330_s14]   ;;  %v321_v35 = vsel %vm14_vm2, %v403_v31, %v316_v32  ;;  %s436_s26 = smov 16   ;;  %s4_s27 = smov 12  ;;  %v3_v40 = vld [vmem:[%s736_s0] ss:$16 sm:%s2_s25]  }
  0x26   :  { %v333_v36 = vsel %vm6_vm0, %v405_v34, %v404_v33  ;;  %v406_v37 = vld [vmem:[%s736_s0 + $0x1] ss:$16 sm:%s335_s19]   ;;  %322 = vrot.lane.b32.xlu1 %v321_v35, %s436_s26  ;;  %s8_s28 = smov 48  ;;  %s12_s2 = smov 192 }
  0x27   :  { %v407_v38 = vld [vmem:[%s736_s0 + $0x1] ss:$16 sm:%s340_s20]   ;;  %v338_v39 = vsel %vm10_vm1, %v406_v37, %v333_v36  ;;  %v5_v42 = vld [vmem:[%s736_s0] ss:$16 sm:%s4_s27]   ;;  %s437_s7 = smov 8  }
  0x28   :  { %v343_v41 = vsel %vm14_vm2, %v407_v38, %v338_v39  ;;  %v9_v43 = vld [vmem:[%s736_s0] ss:$16 sm:%s8_s28]   ;;  %v7_v44 = vsel %vm6_vm0, %v5_v42, %v3_v40  ;;  %vm302_vm0 = vcmask 261312  }
  0x29   :  { %344 = vrot.lane.b32.xlu0 %v343_v41, %s437_s7  ;;  %v13_v45 = vld [vmem:[%s736_s0] ss:$16 sm:%s12_s2]   ;;  %v11_v46 = vsel %vm10_vm1, %v9_v43, %v7_v44  ;;  %vm324_vm1 = vcmask 195712  }
  0x2a   :  { %v15_v47 = vsel %vm14_vm2, %v13_v45, %v11_v46  ;;  %vm346_vm2 = vcmask 130112  }
  0x2b   :  { %17 = vst.msk [vmem:[%s737_s1] sm:$0xff] %vm16_vm3, %v15_v47  }
  0x78   :  { %v37_v48 = vpop.permute.xlu0 %36  }
  0x79   :  { %39 = vst.msk [vmem:[%s737_s1] sm:$0xff] %vm38_vm4, %v37_v48  }
  0x7a   :  { %v81_v49 = vpop.permute.xlu1 %80  }
  0x7d   :  { %v59_v50 = vpop.permute.xlu0 %58  }
  0x7e   :  { %61 = vst.msk [vmem:[%s737_s1] sm:$0xff] %vm60_vm5, %v59_v50  }
  0x7f   :  { %83 = vst.msk [vmem:[%s737_s1] sm:$0xff] %vm82_vm6, %v81_v49   ;;  %v103_v51 = vpop.permute.xlu1 %102  }
  0x80   :  { %105 = vst.msk [vmem:[%s737_s1] sm:$0xff] %vm104_vm7, %v103_v51  }
  0x82   :  { %v125_v52 = vpop.permute.xlu0 %124  }
  0x83   :  { %127 = vst.msk [vmem:[%s737_s1] sm:$0xff] %vm126_vm8, %v125_v52  }
  0x84   :  { %v147_v53 = vpop.permute.xlu1 %146  }
  0x85   :  { %149 = vst.msk [vmem:[%s737_s1] sm:$0xff] %vm148_vm9, %v147_v53  }
  0x87   :  { %v169_v54 = vpop.permute.xlu0 %168  }
  0x88   :  { %171 = vst.msk [vmem:[%s737_s1] sm:$0xff] %vm170_vm10, %v169_v54  }
  0x89   :  { %v191_v55 = vpop.permute.xlu1 %190  }
  0x8a   :  { %193 = vst.msk [vmem:[%s737_s1] sm:$0xff] %vm192_vm11, %v191_v55  }
  0x8c   :  { %v213_v56 = vpop.permute.xlu0 %212  }
  0x8d   :  { %215 = vst.msk [vmem:[%s737_s1] sm:$0xff] %vm214_vm12, %v213_v56  }
  0x8e   :  { %v235_v57 = vpop.permute.xlu1 %234  }
  0x8f   :  { %237 = vst.msk [vmem:[%s737_s1] sm:$0xff] %vm236_vm13, %v235_v57  }
  0x91   :  { %v257_v58 = vpop.permute.xlu0 %256  }
  0x92   :  { %259 = vst.msk [vmem:[%s737_s1] sm:$0xff] %vm258_vm14, %v257_v58  }
  0x93   :  { %v279_v59 = vpop.permute.xlu1 %278  }
  0x94   :  { %281 = vst.msk [vmem:[%s737_s1] sm:$0xff] %vm280_vm15, %v279_v59  }
  0x96   :  { %v301_v60 = vpop.permute.xlu0 %300  }
  0x97   :  { %303 = vst.msk [vmem:[%s737_s1] sm:$0xff] %vm302_vm0, %v301_v60  }
  0x98   :  { %v323_v61 = vpop.permute.xlu1 %322  }
  0x99   :  { %325 = vst.msk [vmem:[%s737_s1] sm:$0xff] %vm324_vm1, %v323_v61  }
  0x9b   :  { %v345_v62 = vpop.permute.xlu0 %344  }
  0x9c   :  { %347 = vst.msk [vmem:[%s737_s1] sm:$0xff] %vm346_vm2, %v345_v62  }

// kernel: runet_forward.49
= control target key start
LH: loop header
LB: loop body
LE: loop exit
PB: predicated region body
PF: predicated region fallthrough
CT: control target
= control target key end

     0   :  { %s69_s0 = inlined_call_operand.vmem [shape: f32[8,128], index: 0, kind: input, shape index: {}]   ;;  %s70_s1 = inlined_call_operand.vmem [shape: f32[8,128], index: 1, kind: input, shape index: {}]   ;;  %s71_s2 = inlined_call_operand.vmem [shape: f32[8,128], index: 2, kind: input, shape index: {}]   ;;  %s72_s3 = inlined_call_operand.vmem [shape: f32[8,128], index: 3, kind: input, shape index: {}]   ;;  %s73_s4 = inlined_call_operand.vmem [shape: f32[8,128], index: 4, kind: output, shape index: {}]  }
   0x1   :  { %v17_v0 = vld [vmem:[%s69_s0] sm:$0xff] }
   0x2   :  { %v18_v1 = vld [vmem:[%s70_s1] sm:$0xff] }
   0x3   :  { %v20_v2 = vld [vmem:[%s71_s2] sm:$0xff]  ;;  %v19_v3 = vmax.f32 %v17_v0, %v18_v1 }
   0x4   :  { %v21_v4 = vld [vmem:[%s72_s3] sm:$0xff] }
   0x5   :  { %v22_v5 = vmax.f32 %v20_v2, %v21_v4 }
   0x7   :  { %v23_v6 = vmax.f32 %v19_v3, %v22_v5 }
   0x9   :  { %24 = vst [vmem:[%s73_s4] sm:$0xff] %v23_v6 }

// kernel: runet_forward.50
= control target key start
LH: loop header
LB: loop body
LE: loop exit
PB: predicated region body
PF: predicated region fallthrough
CT: control target
= control target key end

     0   :  { %vm107_vm0 = vcmask 588800   ;;  %vm132_vm1 = vcmask 1043456   ;;  %vm254_vm2 = vcmask 122880   ;;  %v452_v14 = vmov 0.0   ;;  %s661_s1 = inlined_call_operand.vmem [shape: bf16[72,16], index: 1, kind: input, shape index: {}]   ;;  %s662_s0 = inlined_call_operand.vmem [shape: bf16[128,72], index: 0, kind: input, shape index: {}]   ;;  %s663_s3 = inlined_call_operand.vmem [shape: f32[1,16], index: 3, kind: output, shape index: {1}]   ;;  %s664_s4 = inlined_call_operand.vmem [shape: f32[1,16], index: 4, kind: output, shape index: {2}]   ;;  %s665_s2 = inlined_call_operand.vmem [shape: f32[128,16], index: 2, kind: output, shape index: {0}]  }
   0x1   :  { %v439_v0 = vld [vmem:[%s661_s1] sm:$0xff]   ;;  %v440_v1 = vld [vmem:[%s661_s1 + $0x8] sm:$0xff]   ;;  %v441_v2 = vld [vmem:[%s661_s1 + $0x10] sm:$0xff]   ;;  %255 = vst.msk [vmem:[%s663_s3] sm:$0x1] %vm254_vm2, %v452_v14  ;;  %vm233_vm3 = vcmask 130048  }
   0x2   :  { %400 = vmatprep.subr.bf16.mxu0 %v439_v0  ;;  %426 = vmatprep.subr.bf16.mxu1 %v439_v0  ;;  %v444_v3 = vld [vmem:[%s662_s0] sm:$0xff]   ;;  %v442_v4 = vld [vmem:[%s661_s1 + $0x18] sm:$0xff]   ;;  %v445_v8 = vld [vmem:[%s662_s0 + $0x8] sm:$0xff]   ;;  %256 = vst.msk [vmem:[%s664_s4] sm:$0x1] %vm254_vm2, %v452_v14 }
   0x3   :  { %401 = vmatpush3.bf16.msra.mxu0 %v439_v0  ;;  %431 = vmatpush3.bf16.msra.mxu1 %v439_v0  ;;  %v448_v5 = vld [vmem:[%s662_s0 + $0x20] sm:$0xff]   ;;  %v449_v9 = vld [vmem:[%s662_s0 + $0x28] sm:$0xff]   ;;  %v446_v10 = vld [vmem:[%s662_s0 + $0x10] sm:$0xff]  }
   0x4   :  { %402 = vmatprep.subr.bf16.mxu0 %v440_v1  ;;  %427 = vmatprep.subr.bf16.mxu1 %v440_v1  ;;  %v443_v6 = vld [vmem:[%s661_s1 + $0x20] ss:$0 sps:$4 sm:$0xff]   ;;  %v450_v11 = vld [vmem:[%s662_s0 + $0x30] sm:$0xff]   ;;  %v447_v12 = vld [vmem:[%s662_s0 + $0x18] sm:$0xff]  }
   0x5   :  { %410 = vmatprep.mubr.msk.bf16.mxu0 %vm107_vm0, %v444_v3  ;;  %418 = vmatprep.mubr.msk.bf16.mxu1 %vm107_vm0, %v448_v5  ;;  %v134_v7 = vsel %vm132_vm1, %v443_v6, 0  ;;  %v451_v13 = vld [vmem:[%s662_s0 + $0x38] sm:$0xff]  }
   0x7   :  { %403 = vmatpush3.bf16.msra.mxu0 %v440_v1  ;;  %432 = vmatpush3.bf16.msra.mxu1 %v440_v1 }
   0x8   :  { %404 = vmatprep.subr.bf16.mxu0 %v441_v2  ;;  %428 = vmatprep.subr.bf16.mxu1 %v441_v2 }
   0xb   :  { %405 = vmatpush3.bf16.msra.mxu0 %v441_v2  ;;  %433 = vmatpush3.bf16.msra.mxu1 %v441_v2 }
   0xc   :  { %406 = vmatprep.subr.bf16.mxu0 %v442_v4  ;;  %429 = vmatprep.subr.bf16.mxu1 %v442_v4 }
   0xf   :  { %407 = vmatpush3.bf16.msra.mxu0 %v442_v4  ;;  %434 = vmatpush3.bf16.msra.mxu1 %v442_v4 }
  0x10   :  { %436 = vmatprep.subr.msk.bf16.mxu0 %vm132_vm1, %v443_v6  ;;  %437 = vmatprep.subr.msk.bf16.mxu1 %vm132_vm1, %v443_v6 }
  0x13   :  { %409 = vmatpush3.bf16.msra.mxu0 %v134_v7  ;;  %435 = vmatpush3.bf16.msra.mxu1 %v134_v7 }
  0x16   :  { %411 = vmatmul.mubr.msk.bf16.vlgmr.msra.gmra.mrb[0].mxu0 %vm107_vm0, %v445_v8  ;;  %419 = vmatmul.mubr.msk.bf16.vlgmr.msra.gmra.mrb[0].mxu1 %vm107_vm0, %v449_v9 }
  0x17   :  { %414 = vmatprep.mubr.msk.bf16.mxu0 %vm107_vm0, %v446_v10  ;;  %422 = vmatprep.mubr.msk.bf16.mxu1 %vm107_vm0, %v450_v11 }
  0x1e   :  { %415 = vmatmul.mubr.msk.bf16.gmra.mrb[4].mxu0 %vm107_vm0, %v447_v12  ;;  %423 = vmatmul.mubr.msk.bf16.gmra.mrb[4].mxu1 %vm107_vm0, %v451_v13 }
  0xe9   :  { %v412_v15 = vpop.f32.mrb[0].mxu0  ;;  %v533_v16 = vpop.f32.mrb[0].mxu1 }
  0xea   :  { %236 = vst.msk [vmem:[%s665_s2 + $0x10] sm:$0xff] %vm233_vm3, %v412_v15  ;;  %v170_v17 = vpop.f32.mrb[1].mxu0  ;;  %244 = vst.msk [vmem:[%s665_s2 + $0x50] sm:$0xff] %vm233_vm3, %v533_v16  ;;  %v202_v18 = vpop.f32.mrb[1].mxu1  ;;  %v301_v24 = vmul.f32 %v412_v15, %v412_v15  ;;  %v261_v29 = vsel %vm233_vm3, %v412_v15, 0.0  ;;  %v309_v10 = vmul.f32 %v533_v16, %v533_v16  ;;  %v277_v14 = vsel %vm233_vm3, %v533_v16, 0.0 }
  0xeb   :  { %234 = vst.msk [vmem:[%s665_s2] sm:$0xff] %vm233_vm3, %v170_v17  ;;  %v299_v19 = vmul.f32 %v170_v17, %v170_v17  ;;  %v413_v20 = vpop.f32.mrb[2].mxu0  ;;  %242 = vst.msk [vmem:[%s665_s2 + $0x40] sm:$0xff] %vm233_vm3, %v202_v18  ;;  %v552_v21 = vpop.f32.mrb[2].mxu1  ;;  %v258_v25 = vsel %vm233_vm3, %v170_v17, 0.0  ;;  %v307_v61 = vmul.f32 %v202_v18, %v202_v18  ;;  %v273_v2 = vsel %vm233_vm3, %v202_v18, 0.0 }
  0xec   :  { %237 = vst.msk [vmem:[%s665_s2 + $0x18] sm:$0xff] %vm233_vm3, %v413_v20  ;;  %v173_v22 = vpop.f32.mrb[3].mxu0  ;;  %245 = vst.msk [vmem:[%s665_s2 + $0x58] sm:$0xff] %vm233_vm3, %v552_v21  ;;  %v205_v23 = vpop.f32.mrb[3].mxu1  ;;  %v302_v31 = vmul.f32 %v413_v20, %v413_v20  ;;  %v318_v35 = vsel %vm233_vm3, %v301_v24, 0.0  ;;  %v263_v36 = vsel %vm233_vm3, %v413_v20, 0.0  ;;  %v310_v15 = vmul.f32 %v552_v21, %v552_v21 }
  0xed   :  { %235 = vst.msk [vmem:[%s665_s2 + $0x8] sm:$0xff] %vm233_vm3, %v173_v22  ;;  %v259_v26 = vsel %vm233_vm3, %v173_v22, 0.0  ;;  %v300_v27 = vmul.f32 %v173_v22, %v173_v22  ;;  %243 = vst.msk [vmem:[%s665_s2 + $0x48] sm:$0xff] %vm233_vm3, %v205_v23  ;;  %v315_v30 = vsel %vm233_vm3, %v299_v19, 0.0  ;;  %v330_v6 = vsel %vm233_vm3, %v307_v61, 0.0 }
  0xee   :  { %v260_v28 = vadd.f32 %v259_v26, %v258_v25  ;;  %v320_v43 = vsel %vm233_vm3, %v302_v31, 0.0  ;;  %v308_v7 = vmul.f32 %v205_v23, %v205_v23  ;;  %v275_v11 = vsel %vm233_vm3, %v205_v23, 0.0 }
  0xef   :  { %v316_v32 = vsel %vm233_vm3, %v300_v27, 0.0  ;;  %v334_v22 = vsel %vm233_vm3, %v309_v10, 0.0  ;;  %v279_v24 = vsel %vm233_vm3, %v552_v21, 0.0  ;;  %v336_v27 = vsel %vm233_vm3, %v310_v15, 0.0 }
  0xf0   :  { %v262_v33 = vadd.f32 %v261_v29, %v260_v28  ;;  %v317_v34 = vadd.f32 %v316_v32, %v315_v30  ;;  %v332_v17 = vsel %vm233_vm3, %v308_v7, 0.0 }
  0xf1   :  { %v416_v37 = vpop.f32.mrb[4].mxu0  ;;  %v578_v38 = vpop.f32.mrb[4].mxu1 }
  0xf2   :  { %v319_v39 = vadd.f32 %v318_v35, %v317_v34  ;;  %240 = vst.msk [vmem:[%s665_s2 + $0x30] sm:$0xff] %vm233_vm3, %v416_v37  ;;  %v186_v40 = vpop.f32.mrb[5].mxu0  ;;  %v264_v41 = vadd.f32 %v263_v36, %v262_v33  ;;  %248 = vst.msk [vmem:[%s665_s2 + $0x70] sm:$0xff] %vm233_vm3, %v578_v38  ;;  %v218_v42 = vpop.f32.mrb[5].mxu1  ;;  %v305_v52 = vmul.f32 %v416_v37, %v416_v37  ;;  %v269_v58 = vsel %vm233_vm3, %v416_v37, 0.0 }
  0xf3   :  { %238 = vst.msk [vmem:[%s665_s2 + $0x20] sm:$0xff] %vm233_vm3, %v186_v40  ;;  %v265_v44 = vsel %vm233_vm3, %v186_v40, 0.0  ;;  %v303_v45 = vmul.f32 %v186_v40, %v186_v40  ;;  %v417_v46 = vpop.f32.mrb[6].mxu0  ;;  %246 = vst.msk [vmem:[%s665_s2 + $0x60] sm:$0xff] %vm233_vm3, %v218_v42  ;;  %v425_v47 = vpop.f32.mrb[6].mxu1  ;;  %v311_v18 = vmul.f32 %v218_v42, %v218_v42  ;;  %v281_v23 = vsel %vm233_vm3, %v218_v42, 0.0 }
  0xf4   :  { %v266_v48 = vadd.f32 %v265_v44, %v264_v41  ;;  %v321_v49 = vadd.f32 %v320_v43, %v319_v39  ;;  %241 = vst.msk [vmem:[%s665_s2 + $0x38] sm:$0xff] %vm233_vm3, %v417_v46  ;;  %v189_v50 = vpop.f32.mrb[7].mxu0  ;;  %249 = vst.msk [vmem:[%s665_s2 + $0x78] sm:$0xff] %vm233_vm3, %v425_v47  ;;  %v221_v51 = vpop.f32.mrb[7].mxu1  ;;  %v306_v59 = vmul.f32 %v417_v46, %v417_v46  ;;  %v326_v0 = vsel %vm233_vm3, %v305_v52, 0.0 }
  0xf5   :  { %v322_v53 = vsel %vm233_vm3, %v303_v45, 0.0  ;;  %239 = vst.msk [vmem:[%s665_s2 + $0x28] sm:$0xff] %vm233_vm3, %v189_v50  ;;  %v267_v54 = vsel %vm233_vm3, %v189_v50, 0.0  ;;  %v304_v55 = vmul.f32 %v189_v50, %v189_v50  ;;  %247 = vst.msk [vmem:[%s665_s2 + $0x68] sm:$0xff] %vm233_vm3, %v221_v51  ;;  %v271_v1 = vsel %vm233_vm3, %v417_v46, 0.0 }
  0xf6   :  { %v323_v56 = vadd.f32 %v322_v53, %v321_v49  ;;  %v268_v57 = vadd.f32 %v267_v54, %v266_v48  ;;  %v328_v5 = vsel %vm233_vm3, %v306_v59, 0.0  ;;  %v338_v16 = vsel %vm233_vm3, %v311_v18, 0.0 }
  0xf7   :  { %v324_v60 = vsel %vm233_vm3, %v304_v55, 0.0  ;;  %v312_v28 = vmul.f32 %v221_v51, %v221_v51  ;;  %v313_v31 = vmul.f32 %v578_v38, %v578_v38  ;;  %v283_v32 = vsel %vm233_vm3, %v221_v51, 0.0  ;;  %v257_v55 = vld [vmem:[%s663_s3] sm:$0x1] }
  0xf8   :  { %v270_v62 = vadd.f32 %v269_v58, %v268_v57  ;;  %v325_v63 = vadd.f32 %v324_v60, %v323_v56  ;;  %v285_v21 = vsel %vm233_vm3, %v578_v38, 0.0  ;;  %v314_v35 = vmul.f32 %v425_v47, %v425_v47  ;;  %v298_v57 = vld [vmem:[%s664_s4] sm:$0x1] }
  0xf9   :  { %v340_v36 = vsel %vm233_vm3, %v312_v28, 0.0  ;;  %v342_v40 = vsel %vm233_vm3, %v313_v31, 0.0  ;;  %v287_v41 = vsel %vm233_vm3, %v425_v47, 0.0 }
  0xfa   :  { %v327_v3 = vadd.f32 %v326_v0, %v325_v63  ;;  %v272_v4 = vadd.f32 %v271_v1, %v270_v62  ;;  %v344_v44 = vsel %vm233_vm3, %v314_v35, 0.0 }
  0xfc   :  { %v274_v8 = vadd.f32 %v273_v2, %v272_v4  ;;  %v329_v9 = vadd.f32 %v328_v5, %v327_v3 }
  0xfe   :  { %v331_v12 = vadd.f32 %v330_v6, %v329_v9  ;;  %v276_v13 = vadd.f32 %v275_v11, %v274_v8 }
 0x100   :  { %v278_v19 = vadd.f32 %v277_v14, %v276_v13  ;;  %v333_v20 = vadd.f32 %v332_v17, %v331_v12 }
 0x102   :  { %v335_v25 = vadd.f32 %v334_v22, %v333_v20  ;;  %v280_v26 = vadd.f32 %v279_v24, %v278_v19 }
 0x104   :  { %v282_v29 = vadd.f32 %v281_v23, %v280_v26  ;;  %v337_v30 = vadd.f32 %v336_v27, %v335_v25 }
 0x106   :  { %v339_v33 = vadd.f32 %v338_v16, %v337_v30  ;;  %v284_v34 = vadd.f32 %v283_v32, %v282_v29 }
 0x108   :  { %v286_v37 = vadd.f32 %v285_v21, %v284_v34  ;;  %v341_v39 = vadd.f32 %v340_v36, %v339_v33 }
 0x10a   :  { %v288_v42 = vadd.f32 %v287_v41, %v286_v37  ;;  %v343_v43 = vadd.f32 %v342_v40, %v341_v39 }
 0x10c   :  { %v289_v45 = vrot.slane %v288_v42, 4  ;;  %v345_v46 = vadd.f32 %v344_v44, %v343_v43 }
 0x10e   :  { %v290_v48 = vadd.f32 %v289_v45, %v288_v42  ;;  %v346_v49 = vrot.slane %v345_v46, 4 }
 0x110   :  { %v291_v50 = vrot.slane %v290_v48, 2  ;;  %v347_v51 = vadd.f32 %v346_v49, %v345_v46 }
 0x112   :  { %v292_v38 = vadd.f32 %v291_v50, %v290_v48  ;;  %v348_v52 = vrot.slane %v347_v51, 2 }
 0x114   :  { %v293_v53 = vrot.slane %v292_v38, 1  ;;  %v349_v54 = vadd.f32 %v348_v52, %v347_v51 }
 0x116   :  { %v294_v56 = vadd.f32 %v293_v53, %v292_v38  ;;  %v350_v47 = vrot.slane %v349_v54, 1 }
 0x118   :  { %v295_v58 = vadd.f32 %v294_v56, %v257_v55  ;;  %v351_v59 = vadd.f32 %v350_v47, %v349_v54 }
 0x11a   :  { %297 = vst.msk [vmem:[%s663_s3] sm:$0x1] %vm254_vm2, %v295_v58  ;;  %v352_v60 = vadd.f32 %v351_v59, %v298_v57 }
 0x11c   :  { %353 = vst.msk [vmem:[%s664_s4] sm:$0x1] %vm254_vm2, %v352_v60 }

// kernel: tile.183
= control target key start
LH: loop header
LB: loop body
LE: loop exit
PB: predicated region body
PF: predicated region fallthrough
CT: control target
= control target key end

     0   :  { %s22_s0 = inlined_call_operand.vmem [shape: f32[16], index: 0, kind: input, shape index: {}]   ;;  %s23_s1 = inlined_call_operand.vmem [shape: f32[8,16], index: 1, kind: output, shape index: {}]  }
   0x1   :  { %v4_v0 = vld [vmem:[%s22_s0] ss:$0 sm:$0xff] }
   0x2   :  { %5 = vst [vmem:[%s23_s1] sm:$0xff] %v4_v0 }

// kernel: tile.188
= control target key start
LH: loop header
LB: loop body
LE: loop exit
PB: predicated region body
PF: predicated region fallthrough
CT: control target
= control target key end

     0   :  { %s67_s10 = smov 112   ;;  %s68_s11 = smov 80   ;;  %vm3_vm0 = vcmask 130048   ;;  %vm9_vm1 = vcmask 1048448   ;;  %vm15_vm2 = vcmask 917248   ;;  %vm21_vm3 = vcmask 786048   ;;  %s111_s0 = inlined_call_operand.vmem [shape: f32[8,16], index: 0, kind: input, shape index: {}]   ;;  %s112_s1 = inlined_call_operand.vmem [shape: f32[1,128], index: 1, kind: output, shape index: {}]  }
   0x1   :  { %v53_v0 = vld [vmem:[%s111_s0 + $0x7] sm:$0x1]   ;;  %v55_v1 = vld [vmem:[%s111_s0 + $0x5] sm:$0x1]   ;;  %v54_v2 = vld [vmem:[%s111_s0 + $0x6] sm:$0x1]  }
   0x2   :  { %7 = vrot.lane.b32.xlu0 %v53_v0, %s67_s10  ;;  %19 = vrot.lane.b32.xlu1 %v55_v1, %s68_s11  ;;  %v56_v3 = vld [vmem:[%s111_s0 + $0x4] sm:$0x1]   ;;  %v2_v4 = vld [vmem:[%s111_s0] sm:$0x1]   ;;  %s69_s18 = smov 96   ;;  %s70_s19 = smov 64  }
   0x3   :  { %4 = vst.msk [vmem:[#allocation0] sm:$0x1] %vm3_vm0, %v2_v4   ;;  %v57_v5 = vld [vmem:[%s111_s0 + $0x3] sm:$0x1]   ;;  %v58_v6 = vld [vmem:[%s111_s0 + $0x2] sm:$0x1]  }
   0x4   :  { %s71_s24 = smov 48   ;;  %s72_s25 = smov 32   ;;  %v59_v7 = vld [vmem:[%s111_s0 + $0x1] sm:$0x1]   ;;  %vm27_vm4 = vcmask 654848   ;;  %vm33_vm5 = vcmask 523648  }
   0x5   :  { %s73_s0 = smov 16   ;;  %vm39_vm6 = vcmask 392448   ;;  %vm45_vm7 = vcmask 261248  }
   0x6   :  { %13 = vrot.lane.b32.xlu0 %v54_v2, %s69_s18  ;;  %25 = vrot.lane.b32.xlu1 %v56_v3, %s70_s19 }
   0xa   :  { %31 = vrot.lane.b32.xlu0 %v57_v5, %s71_s24  ;;  %37 = vrot.lane.b32.xlu1 %v58_v6, %s72_s25 }
   0xe   :  { %43 = vrot.lane.b32.xlu0 %v59_v7, %s73_s0 }
  0x74   :  { %v8_v8 = vpop.permute.xlu0 %7   ;;  %v20_v9 = vpop.permute.xlu1 %19  }
  0x75   :  { %10 = vst.msk [vmem:[#allocation0] sm:$0x1] %vm9_vm1, %v8_v8  }
  0x78   :  { %v14_v10 = vpop.permute.xlu0 %13   ;;  %v26_v11 = vpop.permute.xlu1 %25  }
  0x79   :  { %16 = vst.msk [vmem:[#allocation0] sm:$0x1] %vm15_vm2, %v14_v10  }
  0x7a   :  { %22 = vst.msk [vmem:[#allocation0] sm:$0x1] %vm21_vm3, %v20_v9  }
  0x7b   :  { %28 = vst.msk [vmem:[#allocation0] sm:$0x1] %vm27_vm4, %v26_v11  }
  0x7c   :  { %v32_v12 = vpop.permute.xlu0 %31   ;;  %v38_v13 = vpop.permute.xlu1 %37  }
  0x7d   :  { %34 = vst.msk [vmem:[#allocation0] sm:$0x1] %vm33_vm5, %v32_v12  }
  0x7e   :  { %40 = vst.msk [vmem:[#allocation0] sm:$0x1] %vm39_vm6, %v38_v13  }
  0x80   :  { %v44_v14 = vpop.permute.xlu0 %43  }
  0x81   :  { %46 = vst.msk [vmem:[#allocation0] sm:$0x1] %vm45_vm7, %v44_v14  }
  0x88   :  { %v50_v15 = vld [vmem:[#allocation0] sm:$0x1] }
  0x89   :  { %52 = vst [vmem:[%s112_s1] sm:$0x1] %v50_v15 }

// kernel: runet_forward.51
= control target key start
LH: loop header
LB: loop body
LE: loop exit
PB: predicated region body
PF: predicated region fallthrough
CT: control target
= control target key end

     0   :  { %s82_s0 = inlined_call_operand.vmem [shape: f32[16,128], index: 0, kind: input, shape index: {}]   ;;  %s83_s1 = inlined_call_operand.vmem [shape: f32[1,128], index: 1, kind: input, shape index: {}]   ;;  %s84_s2 = inlined_call_operand.vmem [shape: f32[1,128], index: 2, kind: input, shape index: {}]   ;;  %s85_s3 = inlined_call_operand.vmem [shape: f32[16,128], index: 3, kind: output, shape index: {}]  }
   0x1   :  { %v14_v0 = vld [vmem:[%s82_s0] sm:$0xff]  ;;  %v15_v4 = vld [vmem:[%s82_s0 + $0x8] sm:$0xff] }
   0x2   :  { %v42_v1 = vld [vmem:[%s83_s1] ss:$0 sm:$0xff] }
   0x3   :  { %v43_v2 = vld [vmem:[%s84_s2] ss:$0 sm:$0xff]  ;;  %v23_v3 = vmul.f32 %v42_v1, %v14_v0  ;;  %v24_v5 = vmul.f32 %v42_v1, %v15_v4 }
   0x5   :  { %v32_v6 = vadd.f32 %v43_v2, %v23_v3  ;;  %v33_v7 = vadd.f32 %v43_v2, %v24_v5 }
   0x7   :  { %v34_v8 = vmax.f32 %v32_v6, 0.0  ;;  %v35_v9 = vmax.f32 %v33_v7, 0.0 }
   0x9   :  { %36 = vst [vmem:[%s85_s3] sm:$0xff] %v34_v8  ;;  %37 = vst [vmem:[%s85_s3 + $0x8] sm:$0xff] %v35_v9 }

// kernel: runet_forward.52
= control target key start
LH: loop header
LB: loop body
LE: loop exit
PB: predicated region body
PF: predicated region fallthrough
CT: control target
= control target key end

     0   :  { %v515_v0 = vmov 0   ;;  %vm175_vm0 = vcmask 130048   ;;  %vm317_vm1 = vcmask 122880   ;;  %v516_v26 = vmov 0.0   ;;  %s773_s1 = inlined_call_operand.vmem [shape: bf16[144,16], index: 1, kind: input, shape index: {}]   ;;  %s774_s0 = inlined_call_operand.vmem [shape: bf16[128,144], index: 0, kind: input, shape index: {}]   ;;  %s775_s3 = inlined_call_operand.vmem [shape: f32[1,16], index: 3, kind: output, shape index: {1}]   ;;  %s776_s4 = inlined_call_operand.vmem [shape: f32[1,16], index: 4, kind: output, shape index: {2}]   ;;  %s777_s2 = inlined_call_operand.vmem [shape: f32[128,16], index: 2, kind: output, shape index: {0}]  }
   0x1   :  { %200 = vmatprep.subr.bf16.mxu0 %v515_v0  ;;  %v482_v1 = vld [vmem:[%s773_s1] sm:$0xff]   ;;  %462 = vmatprep.subr.bf16.mxu1 %v515_v0  ;;  %v483_v2 = vld [vmem:[%s773_s1 + $0x8] sm:$0xff]   ;;  %v484_v3 = vld [vmem:[%s773_s1 + $0x10] sm:$0xff]   ;;  %318 = vst.msk [vmem:[%s775_s3] sm:$0x1] %vm317_vm1, %v516_v26 }
   0x2   :  { %201 = vmatpush1.bf16.msra.mxu0 %v482_v1  ;;  %471 = vmatpush1.bf16.msra.mxu1 %v482_v1  ;;  %v485_v4 = vld [vmem:[%s773_s1 + $0x18] sm:$0xff]   ;;  %v493_v5 = vld [vmem:[%s774_s0 + $0x4] ss:$8 sps:$4 sm:$0xff]   ;;  %v488_v9 = vld [vmem:[%s773_s1 + $0x30] sm:$0xff]   ;;  %319 = vst.msk [vmem:[%s776_s4] sm:$0x1] %vm317_vm1, %v516_v26 }
   0x3   :  { %202 = vmatprep.subr.bf16.mxu0 %v515_v0  ;;  %463 = vmatprep.subr.bf16.mxu1 %v515_v0  ;;  %v499_v6 = vld [vmem:[%s774_s0 + $0x44] ss:$8 sps:$4 sm:$0xff]   ;;  %v489_v10 = vld [vmem:[%s773_s1 + $0x38] sm:$0xff]   ;;  %v491_v12 = vld [vmem:[%s774_s0] ss:$8 sps:$4 sm:$0xff]  }
   0x4   :  { %454 = vmatprep.mubr.msk.bf16.mxu0 %vm175_vm0, %v493_v5  ;;  %v486_v7 = vld [vmem:[%s773_s1 + $0x20] sm:$0xff]   ;;  %458 = vmatprep.mubr.msk.bf16.mxu1 %vm175_vm0, %v499_v6  ;;  %v487_v8 = vld [vmem:[%s773_s1 + $0x28] sm:$0xff]   ;;  %v494_v14 = vld [vmem:[%s774_s0 + $0x14] ss:$8 sps:$4 sm:$0xff]  }
   0x5   :  { %v490_v11 = vld [vmem:[%s773_s1 + $0x40] sm:$0xff]   ;;  %v503_v15 = vld [vmem:[%s774_s0 + $0x54] ss:$8 sps:$4 sm:$0xff]   ;;  %v496_v16 = vld [vmem:[%s774_s0 + $0x10] ss:$8 sps:$4 sm:$0xff]  }
   0x6   :  { %203 = vmatpush1.bf16.msra.mxu0 %v483_v2  ;;  %472 = vmatpush1.bf16.msra.mxu1 %v483_v2  ;;  %v497_v13 = vld [vmem:[%s774_s0 + $0x40] ss:$8 sps:$4 sm:$0xff]   ;;  %v505_v17 = vld [vmem:[%s774_s0 + $0x50] ss:$8 sps:$4 sm:$0xff]   ;;  %v500_v18 = vld [vmem:[%s774_s0 + $0x24] ss:$8 sps:$4 sm:$0xff]  }
   0x7   :  { %204 = vmatprep.subr.bf16.mxu0 %v515_v0  ;;  %464 = vmatprep.subr.bf16.mxu1 %v515_v0  ;;  %v509_v19 = vld [vmem:[%s774_s0 + $0x64] ss:$8 sps:$4 sm:$0xff]   ;;  %v502_v20 = vld [vmem:[%s774_s0 + $0x20] ss:$8 sps:$4 sm:$0xff]   ;;  %v506_v22 = vld [vmem:[%s774_s0 + $0x34] ss:$8 sps:$4 sm:$0xff]  }
   0x8   :  { %v511_v21 = vld [vmem:[%s774_s0 + $0x60] ss:$8 sps:$4 sm:$0xff]   ;;  %v512_v23 = vld [vmem:[%s774_s0 + $0x74] ss:$8 sps:$4 sm:$0xff]   ;;  %v508_v24 = vld [vmem:[%s774_s0 + $0x30] ss:$8 sps:$4 sm:$0xff]  }
   0x9   :  { %v514_v25 = vld [vmem:[%s774_s0 + $0x70] ss:$8 sps:$4 sm:$0xff]  }
   0xa   :  { %205 = vmatpush1.bf16.msra.mxu0 %v484_v3  ;;  %473 = vmatpush1.bf16.msra.mxu1 %v484_v3 }
   0xb   :  { %206 = vmatprep.subr.bf16.mxu0 %v515_v0  ;;  %465 = vmatprep.subr.bf16.mxu1 %v515_v0 }
   0xe   :  { %207 = vmatpush1.bf16.msra.mxu0 %v485_v4  ;;  %474 = vmatpush1.bf16.msra.mxu1 %v485_v4 }
   0xf   :  { %208 = vmatprep.subr.bf16.mxu0 %v515_v0  ;;  %466 = vmatprep.subr.bf16.mxu1 %v515_v0 }
  0x12   :  { %209 = vmatpush1.bf16.msra.mxu0 %v486_v7  ;;  %475 = vmatpush1.bf16.msra.mxu1 %v486_v7 }
  0x13   :  { %210 = vmatprep.subr.bf16.mxu0 %v515_v0  ;;  %467 = vmatprep.subr.bf16.mxu1 %v515_v0 }
  0x16   :  { %211 = vmatpush1.bf16.msra.mxu0 %v487_v8  ;;  %476 = vmatpush1.bf16.msra.mxu1 %v487_v8 }
  0x17   :  { %212 = vmatprep.subr.bf16.mxu0 %v515_v0  ;;  %468 = vmatprep.subr.bf16.mxu1 %v515_v0 }
  0x1a   :  { %213 = vmatpush1.bf16.msra.mxu0 %v488_v9  ;;  %477 = vmatpush1.bf16.msra.mxu1 %v488_v9 }
  0x1b   :  { %214 = vmatprep.subr.bf16.mxu0 %v515_v0  ;;  %469 = vmatprep.subr.bf16.mxu1 %v515_v0 }
  0x1e   :  { %215 = vmatpush1.bf16.msra.mxu0 %v489_v10  ;;  %478 = vmatpush1.bf16.msra.mxu1 %v489_v10 }
  0x1f   :  { %216 = vmatprep.subr.bf16.mxu0 %v515_v0  ;;  %470 = vmatprep.subr.bf16.mxu1 %v515_v0 }
  0x22   :  { %217 = vmatpush1.bf16.msra.mxu0 %v490_v11  ;;  %479 = vmatpush1.bf16.msra.mxu1 %v490_v11 }
  0x25   :  { %233 = vmatmul.mubr.bf16.vlgmr.msra.gmra.mrb[0].mxu0 %v491_v12  ;;  %265 = vmatmul.mubr.bf16.vlgmr.msra.gmra.mrb[0].mxu1 %v497_v13 }
  0x26   :  { %455 = vmatprep.mubr.msk.bf16.mxu0 %vm175_vm0, %v494_v14  ;;  %459 = vmatprep.mubr.msk.bf16.mxu1 %vm175_vm0, %v503_v15 }
  0x2d   :  { %241 = vmatmul.mubr.bf16.gmra.mrb[4].mxu0 %v496_v16  ;;  %273 = vmatmul.mubr.bf16.gmra.mrb[4].mxu1 %v505_v17 }
  0x2e   :  { %456 = vmatprep.mubr.msk.bf16.mxu0 %vm175_vm0, %v500_v18  ;;  %460 = vmatprep.mubr.msk.bf16.mxu1 %vm175_vm0, %v509_v19 }
  0x35   :  { %249 = vmatmul.mubr.bf16.gmra.mrb[8].mxu0 %v502_v20  ;;  %281 = vmatmul.mubr.bf16.gmra.mrb[8].mxu1 %v511_v21 }
  0x36   :  { %457 = vmatprep.mubr.msk.bf16.mxu0 %vm175_vm0, %v506_v22  ;;  %461 = vmatprep.mubr.msk.bf16.mxu1 %vm175_vm0, %v512_v23 }
  0x3d   :  { %257 = vmatmul.mubr.bf16.gmra.mrb[12].mxu0 %v508_v24  ;;  %289 = vmatmul.mubr.bf16.gmra.mrb[12].mxu1 %v514_v25 }
  0xf8   :  { %v234_v27 = vpop.f32.mrb[0].mxu0  ;;  %v633_v28 = vpop.f32.mrb[0].mxu1 }
  0xf9   :  { %297 = vst.msk [vmem:[%s777_s2] sm:$0xff] %vm175_vm0, %v234_v27  ;;  %v362_v29 = vmul.f32 %v234_v27, %v234_v27  ;;  %v236_v30 = vpop.f32.mrb[1].mxu0  ;;  %305 = vst.msk [vmem:[%s777_s2 + $0x40] sm:$0xff] %vm175_vm0, %v633_v28  ;;  %v268_v31 = vpop.f32.mrb[1].mxu1  ;;  %v321_v34 = vsel %vm175_vm0, %v234_v27, 0.0  ;;  %v370_v24 = vmul.f32 %v633_v28, %v633_v28 }
  0xfa   :  { %v237_v32 = vpop.f32.mrb[2].mxu0  ;;  %v644_v33 = vpop.f32.mrb[2].mxu1 }
  0xfb   :  { %298 = vst.msk [vmem:[%s777_s2 + $0x8] sm:$0xff] %vm175_vm0, %v237_v32  ;;  %v322_v35 = vsel %vm175_vm0, %v237_v32, 0.0  ;;  %v363_v36 = vmul.f32 %v237_v32, %v237_v32  ;;  %v239_v37 = vpop.f32.mrb[3].mxu0  ;;  %306 = vst.msk [vmem:[%s777_s2 + $0x48] sm:$0xff] %vm175_vm0, %v644_v33  ;;  %v271_v38 = vpop.f32.mrb[3].mxu1  ;;  %v378_v40 = vsel %vm175_vm0, %v362_v29, 0.0 }
  0xfc   :  { %v323_v39 = vadd.f32 %v322_v35, %v321_v34  ;;  %v336_v34 = vsel %vm175_vm0, %v633_v28, 0.0  ;;  %v371_v35 = vmul.f32 %v644_v33, %v644_v33 }
  0xfd   :  { %v379_v41 = vsel %vm175_vm0, %v363_v36, 0.0 }
  0xfe   :  { %v380_v42 = vadd.f32 %v379_v41, %v378_v40  ;;  %v338_v40 = vsel %vm175_vm0, %v644_v33, 0.0 }
 0x100   :  { %v242_v43 = vpop.f32.mrb[4].mxu0  ;;  %v659_v44 = vpop.f32.mrb[4].mxu1 }
 0x101   :  { %299 = vst.msk [vmem:[%s777_s2 + $0x10] sm:$0xff] %vm175_vm0, %v242_v43  ;;  %v324_v45 = vsel %vm175_vm0, %v242_v43, 0.0  ;;  %v364_v46 = vmul.f32 %v242_v43, %v242_v43  ;;  %v244_v47 = vpop.f32.mrb[5].mxu0  ;;  %307 = vst.msk [vmem:[%s777_s2 + $0x50] sm:$0xff] %vm175_vm0, %v659_v44  ;;  %v276_v48 = vpop.f32.mrb[5].mxu1  ;;  %v372_v41 = vmul.f32 %v659_v44, %v659_v44  ;;  %v340_v28 = vsel %vm175_vm0, %v659_v44, 0.0 }
 0x102   :  { %v325_v49 = vadd.f32 %v324_v45, %v323_v39  ;;  %v245_v50 = vpop.f32.mrb[6].mxu0  ;;  %v671_v51 = vpop.f32.mrb[6].mxu1  ;;  %v393_v39 = vsel %vm175_vm0, %v370_v24, 0.0  ;;  %v395_v45 = vsel %vm175_vm0, %v371_v35, 0.0 }
 0x103   :  { %v381_v52 = vsel %vm175_vm0, %v364_v46, 0.0  ;;  %300 = vst.msk [vmem:[%s777_s2 + $0x18] sm:$0xff] %vm175_vm0, %v245_v50  ;;  %v326_v53 = vsel %vm175_vm0, %v245_v50, 0.0  ;;  %v365_v54 = vmul.f32 %v245_v50, %v245_v50  ;;  %v247_v55 = vpop.f32.mrb[7].mxu0  ;;  %308 = vst.msk [vmem:[%s777_s2 + $0x58] sm:$0xff] %vm175_vm0, %v671_v51  ;;  %v279_v56 = vpop.f32.mrb[7].mxu1  ;;  %v373_v46 = vmul.f32 %v671_v51, %v671_v51 }
 0x104   :  { %v382_v57 = vadd.f32 %v381_v52, %v380_v42  ;;  %v327_v58 = vadd.f32 %v326_v53, %v325_v49  ;;  %v397_v49 = vsel %vm175_vm0, %v372_v41, 0.0  ;;  %v342_v33 = vsel %vm175_vm0, %v671_v51, 0.0 }
 0x105   :  { %v383_v59 = vsel %vm175_vm0, %v365_v54, 0.0  ;;  %v399_v54 = vsel %vm175_vm0, %v373_v46, 0.0 }
 0x106   :  { %v384_v60 = vadd.f32 %v383_v59, %v382_v57 }
 0x108   :  { %v250_v61 = vpop.f32.mrb[8].mxu0  ;;  %v685_v62 = vpop.f32.mrb[8].mxu1 }
 0x109   :  { %301 = vst.msk [vmem:[%s777_s2 + $0x20] sm:$0xff] %vm175_vm0, %v250_v61  ;;  %v328_v63 = vsel %vm175_vm0, %v250_v61, 0.0  ;;  %v366_v0 = vmul.f32 %v250_v61, %v250_v61  ;;  %v252_v1 = vpop.f32.mrb[9].mxu0  ;;  %309 = vst.msk [vmem:[%s777_s2 + $0x60] sm:$0xff] %vm175_vm0, %v685_v62  ;;  %v284_v2 = vpop.f32.mrb[9].mxu1  ;;  %v374_v50 = vmul.f32 %v685_v62, %v685_v62  ;;  %v344_v44 = vsel %vm175_vm0, %v685_v62, 0.0 }
 0x10a   :  { %v329_v3 = vadd.f32 %v328_v63, %v327_v58  ;;  %v253_v4 = vpop.f32.mrb[10].mxu0  ;;  %v285_v5 = vpop.f32.mrb[10].mxu1 }
 0x10b   :  { %v385_v6 = vsel %vm175_vm0, %v366_v0, 0.0  ;;  %302 = vst.msk [vmem:[%s777_s2 + $0x28] sm:$0xff] %vm175_vm0, %v253_v4  ;;  %v330_v7 = vsel %vm175_vm0, %v253_v4, 0.0  ;;  %v367_v8 = vmul.f32 %v253_v4, %v253_v4  ;;  %v255_v9 = vpop.f32.mrb[11].mxu0  ;;  %310 = vst.msk [vmem:[%s777_s2 + $0x68] sm:$0xff] %vm175_vm0, %v285_v5  ;;  %v287_v10 = vpop.f32.mrb[11].mxu1  ;;  %v375_v55 = vmul.f32 %v285_v5, %v285_v5 }
 0x10c   :  { %v386_v11 = vadd.f32 %v385_v6, %v384_v60  ;;  %v331_v12 = vadd.f32 %v330_v7, %v329_v3  ;;  %v401_v59 = vsel %vm175_vm0, %v374_v50, 0.0  ;;  %v346_v60 = vsel %vm175_vm0, %v285_v5, 0.0 }
 0x10d   :  { %v387_v13 = vsel %vm175_vm0, %v367_v8, 0.0  ;;  %v403_v0 = vsel %vm175_vm0, %v375_v55, 0.0 }
 0x10e   :  { %v388_v14 = vadd.f32 %v387_v13, %v386_v11 }
 0x110   :  { %v258_v15 = vpop.f32.mrb[12].mxu0  ;;  %v290_v16 = vpop.f32.mrb[12].mxu1 }
 0x111   :  { %303 = vst.msk [vmem:[%s777_s2 + $0x30] sm:$0xff] %vm175_vm0, %v258_v15  ;;  %v332_v17 = vsel %vm175_vm0, %v258_v15, 0.0  ;;  %v368_v18 = vmul.f32 %v258_v15, %v258_v15  ;;  %v260_v19 = vpop.f32.mrb[13].mxu0  ;;  %311 = vst.msk [vmem:[%s777_s2 + $0x70] sm:$0xff] %vm175_vm0, %v290_v16  ;;  %v292_v20 = vpop.f32.mrb[13].mxu1  ;;  %v376_v56 = vmul.f32 %v290_v16, %v290_v16  ;;  %v348_v51 = vsel %vm175_vm0, %v290_v16, 0.0 }
 0x112   :  { %v333_v21 = vadd.f32 %v332_v17, %v331_v12  ;;  %v261_v22 = vpop.f32.mrb[14].mxu0  ;;  %v293_v23 = vpop.f32.mrb[14].mxu1 }
 0x113   :  { %v389_v25 = vsel %vm175_vm0, %v368_v18, 0.0  ;;  %304 = vst.msk [vmem:[%s777_s2 + $0x38] sm:$0xff] %vm175_vm0, %v261_v22  ;;  %v334_v26 = vsel %vm175_vm0, %v261_v22, 0.0  ;;  %v369_v27 = vmul.f32 %v261_v22, %v261_v22  ;;  %v263_v29 = vpop.f32.mrb[15].mxu0  ;;  %312 = vst.msk [vmem:[%s777_s2 + $0x78] sm:$0xff] %vm175_vm0, %v293_v23  ;;  %v295_v30 = vpop.f32.mrb[15].mxu1  ;;  %v377_v2 = vmul.f32 %v293_v23, %v293_v23 }
 0x114   :  { %v390_v31 = vadd.f32 %v389_v25, %v388_v14  ;;  %v335_v32 = vadd.f32 %v334_v26, %v333_v21  ;;  %v405_v1 = vsel %vm175_vm0, %v376_v56, 0.0  ;;  %v350_v62 = vsel %vm175_vm0, %v293_v23, 0.0  ;;  %v320_v18 = vld [vmem:[%s775_s3] sm:$0x1] }
 0x115   :  { %v391_v36 = vsel %vm175_vm0, %v369_v27, 0.0  ;;  %v407_v8 = vsel %vm175_vm0, %v377_v2, 0.0  ;;  %v361_v21 = vld [vmem:[%s776_s4] sm:$0x1] }
 0x116   :  { %v337_v37 = vadd.f32 %v336_v34, %v335_v32  ;;  %v392_v38 = vadd.f32 %v391_v36, %v390_v31 }
 0x118   :  { %v339_v42 = vadd.f32 %v338_v40, %v337_v37  ;;  %v394_v43 = vadd.f32 %v393_v39, %v392_v38 }
 0x11a   :  { %v396_v47 = vadd.f32 %v395_v45, %v394_v43  ;;  %v341_v48 = vadd.f32 %v340_v28, %v339_v42 }
 0x11c   :  { %v343_v52 = vadd.f32 %v342_v33, %v341_v48  ;;  %v398_v53 = vadd.f32 %v397_v49, %v396_v47 }
 0x11e   :  { %v345_v57 = vadd.f32 %v344_v44, %v343_v52  ;;  %v400_v58 = vadd.f32 %v399_v54, %v398_v53 }
 0x120   :  { %v402_v61 = vadd.f32 %v401_v59, %v400_v58  ;;  %v347_v63 = vadd.f32 %v346_v60, %v345_v57 }
 0x122   :  { %v404_v3 = vadd.f32 %v403_v0, %v402_v61  ;;  %v349_v4 = vadd.f32 %v348_v51, %v347_v63 }
 0x124   :  { %v406_v6 = vadd.f32 %v405_v1, %v404_v3  ;;  %v351_v7 = vadd.f32 %v350_v62, %v349_v4 }
 0x126   :  { %v352_v9 = vrot.slane %v351_v7, 4  ;;  %v408_v10 = vadd.f32 %v407_v8, %v406_v6 }
 0x128   :  { %v353_v5 = vadd.f32 %v352_v9, %v351_v7  ;;  %v409_v11 = vrot.slane %v408_v10, 4 }
 0x12a   :  { %v354_v12 = vrot.slane %v353_v5, 2  ;;  %v410_v13 = vadd.f32 %v409_v11, %v408_v10 }
 0x12c   :  { %v355_v14 = vadd.f32 %v354_v12, %v353_v5  ;;  %v411_v15 = vrot.slane %v410_v13, 2 }
 0x12e   :  { %v356_v16 = vrot.slane %v355_v14, 1  ;;  %v412_v17 = vadd.f32 %v411_v15, %v410_v13 }
 0x130   :  { %v357_v19 = vadd.f32 %v356_v16, %v355_v14  ;;  %v413_v20 = vrot.slane %v412_v17, 1 }
 0x132   :  { %v358_v22 = vadd.f32 %v357_v19, %v320_v18  ;;  %v414_v23 = vadd.f32 %v413_v20, %v412_v17 }
 0x134   :  { %360 = vst.msk [vmem:[%s775_s3] sm:$0x1] %vm317_vm1, %v358_v22  ;;  %v415_v24 = vadd.f32 %v414_v23, %v361_v21 }
 0x136   :  { %416 = vst.msk [vmem:[%s776_s4] sm:$0x1] %vm317_vm1, %v415_v24 }

// kernel: squeeze.64
= control target key start
LH: loop header
LB: loop body
LE: loop exit
PB: predicated region body
PF: predicated region fallthrough
CT: control target
= control target key end

     0   :  { %s49_s18 = smov 3  ;;  %s52_s19 = smov 12  ;;  %vm44_vm0 = vcmask 1043458   ;;  %vm46_vm1 = vcmask 130048   ;;  %vm58_vm2 = vcmask 1048448   ;;  %vm70_vm3 = vcmask 917248   ;;  %s210_s0 = inlined_call_operand.vmem [shape: f32[2,4,1,4,1,16], index: 0, kind: input, shape index: {}]   ;;  %s211_s1 = inlined_call_operand.vmem [shape: f32[4,128], index: 1, kind: output, shape index: {}]  }
   0x1   :  { %v144_v0 = vld [vmem:[%s210_s0 + $0x1c] sm:$0xf]  ;;  %v146_v1 = vld [vmem:[%s210_s0 + $0x14] sm:$0xf]  ;;  %v148_v2 = vld [vmem:[%s210_s0 + $0xc] sm:$0xf] }
   0x2   :  { %8 = vst [vmem:[#allocation1 + $0x38] sm:$0xf] %v144_v0  ;;  %18 = vst [vmem:[#allocation1 + $0x28] sm:$0xf] %v146_v1  ;;  %v150_v3 = vld [vmem:[%s210_s0 + $0x4] sm:$0xf] }
   0x3   :  { %28 = vst [vmem:[#allocation1 + $0x18] sm:$0xf] %v148_v2  ;;  %37 = vst [vmem:[#allocation1 + $0x8] sm:$0xf] %v150_v3  ;;  %v145_v4 = vld [vmem:[%s210_s0 + $0x18] sm:$0xf] }
   0x4   :  { %v147_v5 = vld [vmem:[%s210_s0 + $0x10] sm:$0xf]  ;;  %13 = vst [vmem:[#allocation1 + $0x30] sm:$0xf] %v145_v4  ;;  %v149_v6 = vld [vmem:[%s210_s0 + $0x8] sm:$0xf] }
   0x5   :  { %23 = vst [vmem:[#allocation1 + $0x20] sm:$0xf] %v147_v5  ;;  %v38_v7 = vld [vmem:[%s210_s0] sm:$0xf]  ;;  %s73_s0 = smov 3  ;;  %s76_s24 = smov 12 }
   0x6   :  { %33 = vst [vmem:[#allocation1 + $0x10] sm:$0xf] %v149_v6  ;;  %39 = vst [vmem:[#allocation1] sm:$0xf] %v38_v7  ;;  %s61_s25 = smov 3  ;;  %s64_s26 = smov 12 }
   0x7   :  { %s85_s27 = smov 3  ;;  %s88_s28 = smov 12  ;;  %vm82_vm4 = vcmask 786048   ;;  %vm94_vm5 = vcmask 654848   ;;  %vm106_vm6 = vcmask 523648   ;;  %vm118_vm7 = vcmask 392448  }
   0x8   :  { %s97_s29 = smov 3  ;;  %s100_s30 = smov 12  ;;  %vm130_vm8 = vcmask 261248  }
   0x9   :  { %s158_s2 = smov 112   ;;  %s109_s3 = smov 3 }
   0xa   :  { %v50_v8 = vld [vmem:[#allocation1 + $0xb] ss:$16 sm:%s49_s18]   ;;  %v74_v10 = vld [vmem:[#allocation1 + $0x9] ss:$16 sm:%s73_s0]   ;;  %v62_v13 = vld [vmem:[#allocation1 + $0xa] ss:$16 sm:%s61_s25]  }
   0xb   :  { %v53_v9 = vld [vmem:[#allocation1 + $0xb] ss:$16 sm:%s52_s19]   ;;  %v77_v12 = vld [vmem:[#allocation1 + $0x9] ss:$16 sm:%s76_s24]   ;;  %v65_v14 = vld [vmem:[#allocation1 + $0xa] ss:$16 sm:%s64_s26]  }
   0xc   :  { %v55_v11 = vsel %vm44_vm0, %v53_v9, %v50_v8  ;;  %v79_v15 = vsel %vm44_vm0, %v77_v12, %v74_v10  ;;  %v86_v16 = vld [vmem:[#allocation1 + $0x8] ss:$16 sm:%s85_s27]   ;;  %s159_s4 = smov 80   ;;  %v67_v18 = vsel %vm44_vm0, %v65_v14, %v62_v13  ;;  %s112_s5 = smov 12 }
   0xd   :  { %56 = vrot.lane.b32.xlu0 %v55_v11, %s158_s2  ;;  %v89_v17 = vld [vmem:[#allocation1 + $0x8] ss:$16 sm:%s88_s28]   ;;  %80 = vrot.lane.b32.xlu1 %v79_v15, %s159_s4  ;;  %v98_v20 = vld [vmem:[#allocation1 + $0x3] ss:$16 sm:%s97_s29]   ;;  %s121_s6 = smov 3  ;;  %s124_s7 = smov 12 }
   0xe   :  { %v91_v19 = vsel %vm44_vm0, %v89_v17, %v86_v16  ;;  %v101_v21 = vld [vmem:[#allocation1 + $0x3] ss:$16 sm:%s100_s30]   ;;  %v110_v22 = vld [vmem:[#allocation1 + $0x2] ss:$16 sm:%s109_s3]   ;;  %s40_s8 = smov 3  ;;  %s160_s9 = smov 96  }
   0xf   :  { %v113_v23 = vld [vmem:[#allocation1 + $0x2] ss:$16 sm:%s112_s5]   ;;  %v41_v24 = vld [vmem:[#allocation1] ss:$16 sm:%s40_s8]   ;;  %s42_s10 = smov 12  ;;  %s161_s11 = smov 64   ;;  %v103_v25 = vsel %vm44_vm0, %v101_v21, %v98_v20 }
  0x10   :  { %v43_v26 = vld [vmem:[#allocation1] ss:$16 sm:%s42_s10]   ;;  %v115_v27 = vsel %vm44_vm0, %v113_v23, %v110_v22  ;;  %v122_v28 = vld [vmem:[#allocation1 + $0x1] ss:$16 sm:%s121_s6]   ;;  %s162_s12 = smov 48   ;;  %s163_s13 = smov 32  }
  0x11   :  { %68 = vrot.lane.b32.xlu0 %v67_v18, %s160_s9  ;;  %92 = vrot.lane.b32.xlu1 %v91_v19, %s161_s11  ;;  %v125_v29 = vld [vmem:[#allocation1 + $0x1] ss:$16 sm:%s124_s7]   ;;  %v45_v30 = vsel %vm44_vm0, %v43_v26, %v41_v24  ;;  %s164_s14 = smov 16  }
  0x12   :  { %47 = vst.msk [vmem:[#allocation0] sm:$0xf] %vm46_vm1, %v45_v30   ;;  %v127_v31 = vsel %vm44_vm0, %v125_v29, %v122_v28 }
  0x15   :  { %104 = vrot.lane.b32.xlu0 %v103_v25, %s162_s12  ;;  %116 = vrot.lane.b32.xlu1 %v115_v27, %s163_s13 }
  0x19   :  { %128 = vrot.lane.b32.xlu0 %v127_v31, %s164_s14 }
  0x7f   :  { %v57_v32 = vpop.permute.xlu0 %56   ;;  %v81_v33 = vpop.permute.xlu1 %80  }
  0x80   :  { %59 = vst.msk [vmem:[#allocation0] sm:$0xf] %vm58_vm2, %v57_v32  }
  0x83   :  { %v69_v34 = vpop.permute.xlu0 %68   ;;  %v93_v35 = vpop.permute.xlu1 %92  }
  0x84   :  { %71 = vst.msk [vmem:[#allocation0] sm:$0xf] %vm70_vm3, %v69_v34  }
  0x85   :  { %83 = vst.msk [vmem:[#allocation0] sm:$0xf] %vm82_vm4, %v81_v33  }
  0x86   :  { %95 = vst.msk [vmem:[#allocation0] sm:$0xf] %vm94_vm5, %v93_v35  }
  0x87   :  { %v105_v36 = vpop.permute.xlu0 %104   ;;  %v117_v37 = vpop.permute.xlu1 %116  }
  0x88   :  { %107 = vst.msk [vmem:[#allocation0] sm:$0xf] %vm106_vm6, %v105_v36  }
  0x89   :  { %119 = vst.msk [vmem:[#allocation0] sm:$0xf] %vm118_vm7, %v117_v37  }
  0x8b   :  { %v129_v38 = vpop.permute.xlu0 %128  }
  0x8c   :  { %131 = vst.msk [vmem:[#allocation0] sm:$0xf] %vm130_vm8, %v129_v38  }
  0x93   :  { %v135_v39 = vld [vmem:[#allocation0] sm:$0xf] }
  0x94   :  { %137 = vst [vmem:[%s211_s1] sm:$0xf] %v135_v39 }

// kernel: runet_forward.54
= control target key start
LH: loop header
LB: loop body
LE: loop exit
PB: predicated region body
PF: predicated region fallthrough
CT: control target
= control target key end

     0   :  { %s69_s0 = inlined_call_operand.vmem [shape: f32[4,128], index: 0, kind: input, shape index: {}]   ;;  %s70_s1 = inlined_call_operand.vmem [shape: f32[4,128], index: 1, kind: input, shape index: {}]   ;;  %s71_s2 = inlined_call_operand.vmem [shape: f32[4,128], index: 2, kind: input, shape index: {}]   ;;  %s72_s3 = inlined_call_operand.vmem [shape: f32[4,128], index: 3, kind: input, shape index: {}]   ;;  %s73_s4 = inlined_call_operand.vmem [shape: f32[4,128], index: 4, kind: output, shape index: {}]  }
   0x1   :  { %v17_v0 = vld [vmem:[%s69_s0] sm:$0xf] }
   0x2   :  { %v18_v1 = vld [vmem:[%s70_s1] sm:$0xf] }
   0x3   :  { %v20_v2 = vld [vmem:[%s71_s2] sm:$0xf]  ;;  %v19_v3 = vmax.f32 %v17_v0, %v18_v1 }
   0x4   :  { %v21_v4 = vld [vmem:[%s72_s3] sm:$0xf] }
   0x5   :  { %v22_v5 = vmax.f32 %v20_v2, %v21_v4 }
   0x7   :  { %v23_v6 = vmax.f32 %v19_v3, %v22_v5 }
   0x9   :  { %24 = vst [vmem:[%s73_s4] sm:$0xf] %v23_v6 }

// kernel: tile.203
= control target key start
LH: loop header
LB: loop body
LE: loop exit
PB: predicated region body
PF: predicated region fallthrough
CT: control target
= control target key end

     0   :  { %s22_s0 = inlined_call_operand.vmem [shape: f32[32], index: 0, kind: input, shape index: {}]   ;;  %s23_s1 = inlined_call_operand.vmem [shape: f32[4,32], index: 1, kind: output, shape index: {}]  }
   0x1   :  { %v4_v0 = vld [vmem:[%s22_s0] ss:$0 sm:$0xff] }
   0x2   :  { %5 = vst [vmem:[%s23_s1] sm:$0xf] %v4_v0 }

// kernel: tile.208
= control target key start
LH: loop header
LB: loop body
LE: loop exit
PB: predicated region body
PF: predicated region fallthrough
CT: control target
= control target key end

     0   :  { %vm7_vm0 = vcmask 261120   ;;  %s37_s8 = smov 32   ;;  %s38_s9 = smov 64   ;;  %vm13_vm1 = vcmask 1048320   ;;  %vm19_vm2 = vcmask 785920   ;;  %vm25_vm3 = vcmask 523520   ;;  %s55_s0 = inlined_call_operand.vmem [shape: f32[4,32], index: 0, kind: input, shape index: {}]   ;;  %s56_s1 = inlined_call_operand.vmem [shape: f32[1,128], index: 1, kind: output, shape index: {}]  }
   0x1   :  { %v4_v0 = vld [vmem:[%s55_s0] sm:$0xf]  ;;  %s36_s0 = smov 96  }
   0x2   :  { %5 = vst [vmem:[#allocation1] sm:$0xf] %v4_v0 }
   0x9   :  { %v10_v1 = vld [vmem:[#allocation1 + $0x3] sm:$0x1]   ;;  %v22_v2 = vld [vmem:[#allocation1 + $0x1] sm:$0x1]   ;;  %v6_v3 = vld [vmem:[#allocation1] sm:$0x1]  }
   0xa   :  { %11 = vrot.lane.b32.xlu0 %v10_v1, %s36_s0  ;;  %23 = vrot.lane.b32.xlu1 %v22_v2, %s37_s8  ;;  %v16_v4 = vld [vmem:[#allocation1 + $0x2] sm:$0x1]   ;;  %8 = vst.msk [vmem:[#allocation0] sm:$0x1] %vm7_vm0, %v6_v3  }
   0xe   :  { %17 = vrot.lane.b32.xlu0 %v16_v4, %s38_s9 }
  0x7c   :  { %v12_v5 = vpop.permute.xlu0 %11   ;;  %v24_v6 = vpop.permute.xlu1 %23  }
  0x7d   :  { %14 = vst.msk [vmem:[#allocation0] sm:$0x1] %vm13_vm1, %v12_v5  }
  0x80   :  { %v18_v7 = vpop.permute.xlu0 %17  }
  0x81   :  { %20 = vst.msk [vmem:[#allocation0] sm:$0x1] %vm19_vm2, %v18_v7  }
  0x82   :  { %26 = vst.msk [vmem:[#allocation0] sm:$0x1] %vm25_vm3, %v24_v6  }
  0x89   :  { %v30_v8 = vld [vmem:[#allocation0] sm:$0x1] }
  0x8a   :  { %32 = vst [vmem:[%s56_s1] sm:$0x1] %v30_v8 }

// kernel: runet_forward.55
= control target key start
LH: loop header
LB: loop body
LE: loop exit
PB: predicated region body
PF: predicated region fallthrough
CT: control target
= control target key end

     0   :  { %v276_v0 = vmov 0   ;;  %vm109_vm0 = vcmask 130048   ;;  %vm174_vm1 = vcmask 253952   ;;  %v277_v14 = vmov 0.0   ;;  %s388_s1 = inlined_call_operand.vmem [shape: bf16[144,32], index: 1, kind: input, shape index: {}]   ;;  %s389_s0 = inlined_call_operand.vmem [shape: bf16[32,144], index: 0, kind: input, shape index: {}]   ;;  %s390_s3 = inlined_call_operand.vmem [shape: f32[1,32], index: 3, kind: output, shape index: {1}]   ;;  %s391_s4 = inlined_call_operand.vmem [shape: f32[1,32], index: 4, kind: output, shape index: {2}]   ;;  %s392_s2 = inlined_call_operand.vmem [shape: f32[32,32], index: 2, kind: output, shape index: {0}]  }
   0x1   :  { %116 = vmatprep.subr.bf16.mxu0 %v276_v0  ;;  %241 = vmatprep.subr.bf16.mxu1 %v276_v0  ;;  %v261_v1 = vld [vmem:[%s388_s1] sm:$0xff]   ;;  %v262_v2 = vld [vmem:[%s388_s1 + $0x8] sm:$0xff]   ;;  %v263_v3 = vld [vmem:[%s388_s1 + $0x10] sm:$0xff]   ;;  %175 = vst.msk [vmem:[%s390_s3] sm:$0x1] %vm174_vm1, %v277_v14  ;;  %vm165_vm2 = vcmask 261120  }
   0x2   :  { %117 = vmatpush1.bf16.msra.mxu0 %v261_v1  ;;  %250 = vmatpush1.bf16.msra.mxu1 %v261_v1  ;;  %v264_v4 = vld [vmem:[%s388_s1 + $0x18] sm:$0xff]   ;;  %v272_v5 = vld [vmem:[%s389_s0 + $0x4] ss:$8 sps:$4 sm:$0xff]   ;;  %v267_v9 = vld [vmem:[%s388_s1 + $0x30] sm:$0xff]   ;;  %176 = vst.msk [vmem:[%s391_s4] sm:$0x1] %vm174_vm1, %v277_v14 }
   0x3   :  { %118 = vmatprep.subr.bf16.mxu0 %v276_v0  ;;  %242 = vmatprep.subr.bf16.mxu1 %v276_v0  ;;  %v275_v6 = vld [vmem:[%s389_s0 + $0x14] ss:$8 sps:$4 sm:$0xff]   ;;  %v265_v7 = vld [vmem:[%s388_s1 + $0x20] sm:$0xff]   ;;  %v266_v8 = vld [vmem:[%s388_s1 + $0x28] sm:$0xff]  }
   0x4   :  { %239 = vmatprep.mubr.msk.bf16.mxu0 %vm109_vm0, %v272_v5  ;;  %240 = vmatprep.mubr.msk.bf16.mxu1 %vm109_vm0, %v275_v6  ;;  %v268_v10 = vld [vmem:[%s388_s1 + $0x38] sm:$0xff]   ;;  %v269_v11 = vld [vmem:[%s388_s1 + $0x40] sm:$0xff]  }
   0x5   :  { %v270_v12 = vld [vmem:[%s389_s0] ss:$8 sps:$4 sm:$0xff]   ;;  %v273_v13 = vld [vmem:[%s389_s0 + $0x10] ss:$8 sps:$4 sm:$0xff]  }
   0x6   :  { %119 = vmatpush1.bf16.msra.mxu0 %v262_v2  ;;  %251 = vmatpush1.bf16.msra.mxu1 %v262_v2 }
   0x7   :  { %120 = vmatprep.subr.bf16.mxu0 %v276_v0  ;;  %243 = vmatprep.subr.bf16.mxu1 %v276_v0 }
   0x8   :  { %v177_v50 = vld [vmem:[%s390_s3] sm:$0x1] }
   0x9   :  { %v194_v53 = vld [vmem:[%s391_s4] sm:$0x1] }
   0xa   :  { %121 = vmatpush1.bf16.msra.mxu0 %v263_v3  ;;  %252 = vmatpush1.bf16.msra.mxu1 %v263_v3 }
   0xb   :  { %122 = vmatprep.subr.bf16.mxu0 %v276_v0  ;;  %244 = vmatprep.subr.bf16.mxu1 %v276_v0 }
   0xe   :  { %123 = vmatpush1.bf16.msra.mxu0 %v264_v4  ;;  %253 = vmatpush1.bf16.msra.mxu1 %v264_v4 }
   0xf   :  { %124 = vmatprep.subr.bf16.mxu0 %v276_v0  ;;  %245 = vmatprep.subr.bf16.mxu1 %v276_v0 }
  0x12   :  { %125 = vmatpush1.bf16.msra.mxu0 %v265_v7  ;;  %254 = vmatpush1.bf16.msra.mxu1 %v265_v7 }
  0x13   :  { %126 = vmatprep.subr.bf16.mxu0 %v276_v0  ;;  %246 = vmatprep.subr.bf16.mxu1 %v276_v0 }
  0x16   :  { %127 = vmatpush1.bf16.msra.mxu0 %v266_v8  ;;  %255 = vmatpush1.bf16.msra.mxu1 %v266_v8 }
  0x17   :  { %128 = vmatprep.subr.bf16.mxu0 %v276_v0  ;;  %247 = vmatprep.subr.bf16.mxu1 %v276_v0 }
  0x1a   :  { %129 = vmatpush1.bf16.msra.mxu0 %v267_v9  ;;  %256 = vmatpush1.bf16.msra.mxu1 %v267_v9 }
  0x1b   :  { %130 = vmatprep.subr.bf16.mxu0 %v276_v0  ;;  %248 = vmatprep.subr.bf16.mxu1 %v276_v0 }
  0x1e   :  { %131 = vmatpush1.bf16.msra.mxu0 %v268_v10  ;;  %257 = vmatpush1.bf16.msra.mxu1 %v268_v10 }
  0x1f   :  { %132 = vmatprep.subr.bf16.mxu0 %v276_v0  ;;  %249 = vmatprep.subr.bf16.mxu1 %v276_v0 }
  0x22   :  { %133 = vmatpush1.bf16.msra.mxu0 %v269_v11  ;;  %258 = vmatpush1.bf16.msra.mxu1 %v269_v11 }
  0x25   :  { %149 = vmatmul.mubr.bf16.vlgmr.msra.gmra.mrb[0].mxu0 %v270_v12  ;;  %157 = vmatmul.mubr.bf16.vlgmr.msra.gmra.mrb[0].mxu1 %v273_v13 }
  0xf8   :  { %v150_v15 = vpop.f32.mrb[0].mxu0  ;;  %v158_v16 = vpop.f32.mrb[0].mxu1 }
  0xf9   :  { %166 = vst.msk [vmem:[%s392_s2] sm:$0xff] %vm165_vm2, %v150_v15  ;;  %v195_v17 = vmul.f32 %v150_v15, %v150_v15  ;;  %v152_v18 = vpop.f32.mrb[1].mxu0  ;;  %168 = vst.msk [vmem:[%s392_s2 + $0x10] sm:$0xff] %vm165_vm2, %v158_v16  ;;  %v197_v19 = vmul.f32 %v158_v16, %v158_v16  ;;  %v160_v20 = vpop.f32.mrb[1].mxu1  ;;  %v178_v23 = vsel %vm165_vm2, %v150_v15, 0.0  ;;  %v181_v24 = vsel %vm165_vm2, %v158_v16, 0.0 }
  0xfa   :  { %v153_v21 = vpop.f32.mrb[2].mxu0  ;;  %v161_v22 = vpop.f32.mrb[2].mxu1 }
  0xfb   :  { %167 = vst.msk [vmem:[%s392_s2 + $0x8] sm:$0xff] %vm165_vm2, %v153_v21  ;;  %v179_v25 = vsel %vm165_vm2, %v153_v21, 0.0  ;;  %v196_v26 = vmul.f32 %v153_v21, %v153_v21  ;;  %v155_v27 = vpop.f32.mrb[3].mxu0  ;;  %169 = vst.msk [vmem:[%s392_s2 + $0x18] sm:$0xff] %vm165_vm2, %v161_v22  ;;  %v163_v28 = vpop.f32.mrb[3].mxu1  ;;  %v199_v30 = vsel %vm165_vm2, %v195_v17, 0.0  ;;  %v198_v33 = vmul.f32 %v161_v22, %v161_v22 }
  0xfc   :  { %v180_v29 = vadd.f32 %v179_v25, %v178_v23  ;;  %v202_v31 = vsel %vm165_vm2, %v197_v19, 0.0  ;;  %v183_v36 = vsel %vm165_vm2, %v161_v22, 0.0 }
  0xfd   :  { %v200_v32 = vsel %vm165_vm2, %v196_v26, 0.0  ;;  %v204_v39 = vsel %vm165_vm2, %v198_v33, 0.0 }
  0xfe   :  { %v201_v34 = vadd.f32 %v200_v32, %v199_v30  ;;  %v182_v35 = vadd.f32 %v181_v24, %v180_v29 }
 0x100   :  { %v184_v37 = vadd.f32 %v183_v36, %v182_v35  ;;  %v203_v38 = vadd.f32 %v202_v31, %v201_v34 }
 0x102   :  { %v185_v40 = vrot.slane %v184_v37, 4  ;;  %v205_v41 = vadd.f32 %v204_v39, %v203_v38 }
 0x104   :  { %v186_v42 = vadd.f32 %v185_v40, %v184_v37  ;;  %v206_v43 = vrot.slane %v205_v41, 4 }
 0x106   :  { %v187_v44 = vrot.slane %v186_v42, 2  ;;  %v207_v45 = vadd.f32 %v206_v43, %v205_v41 }
 0x108   :  { %v188_v46 = vadd.f32 %v187_v44, %v186_v42  ;;  %v208_v47 = vrot.slane %v207_v45, 2 }
 0x10a   :  { %v189_v48 = vrot.slane %v188_v46, 1  ;;  %v209_v49 = vadd.f32 %v208_v47, %v207_v45 }
 0x10c   :  { %v190_v51 = vadd.f32 %v189_v48, %v188_v46  ;;  %v210_v52 = vrot.slane %v209_v49, 1 }
 0x10e   :  { %v191_v54 = vadd.f32 %v190_v51, %v177_v50  ;;  %v211_v55 = vadd.f32 %v210_v52, %v209_v49 }
 0x110   :  { %193 = vst.msk [vmem:[%s390_s3] sm:$0x1] %vm174_vm1, %v191_v54  ;;  %v212_v56 = vadd.f32 %v211_v55, %v194_v53 }
 0x112   :  { %213 = vst.msk [vmem:[%s391_s4] sm:$0x1] %vm174_vm1, %v212_v56 }

// kernel: runet_forward.56
= control target key start
LH: loop header
LB: loop body
LE: loop exit
PB: predicated region body
PF: predicated region fallthrough
CT: control target
= control target key end

     0   :  { %s71_s0 = inlined_call_operand.vmem [shape: f32[8,128], index: 0, kind: input, shape index: {}]   ;;  %s72_s1 = inlined_call_operand.vmem [shape: f32[1,128], index: 1, kind: input, shape index: {}]   ;;  %s73_s2 = inlined_call_operand.vmem [shape: f32[1,128], index: 2, kind: input, shape index: {}]   ;;  %s74_s3 = inlined_call_operand.vmem [shape: f32[8,128], index: 3, kind: output, shape index: {}]  }
   0x1   :  { %v14_v0 = vld [vmem:[%s71_s0] sm:$0xff] }
   0x2   :  { %v37_v1 = vld [vmem:[%s72_s1] ss:$0 sm:$0xff] }
   0x3   :  { %v38_v2 = vld [vmem:[%s73_s2] ss:$0 sm:$0xff]  ;;  %v22_v3 = vmul.f32 %v37_v1, %v14_v0 }
   0x5   :  { %v30_v4 = vadd.f32 %v38_v2, %v22_v3 }
   0x7   :  { %v31_v5 = vmax.f32 %v30_v4, 0.0 }
   0x9   :  { %32 = vst [vmem:[%s74_s3] sm:$0xff] %v31_v5 }

// kernel: squeeze.72
= control target key start
LH: loop header
LB: loop body
LE: loop exit
PB: predicated region body
PF: predicated region fallthrough
CT: control target
= control target key end

     0   :  { %s39_s14 = smov 3  ;;  %s20_s15 = smov 3  ;;  %vm22_vm0 = vcmask 261120   ;;  %vm29_vm1 = vcmask 1048320   ;;  %vm36_vm2 = vcmask 785920   ;;  %vm43_vm3 = vcmask 523520   ;;  %s87_s0 = inlined_call_operand.vmem [shape: f32[2,2,1,2,1,32], index: 0, kind: input, shape index: {}]   ;;  %s88_s1 = inlined_call_operand.vmem [shape: f32[2,128], index: 1, kind: output, shape index: {}]  }
   0x1   :  { %v53_v0 = vld [vmem:[%s87_s0 + $0x6] sm:$0x3]  ;;  %v55_v1 = vld [vmem:[%s87_s0 + $0x2] sm:$0x3]  ;;  %v54_v2 = vld [vmem:[%s87_s0 + $0x4] sm:$0x3] }
   0x2   :  { %8 = vst [vmem:[#allocation1 + $0x18] sm:$0x3] %v53_v0  ;;  %17 = vst [vmem:[#allocation1 + $0x8] sm:$0x3] %v55_v1  ;;  %v18_v3 = vld [vmem:[%s87_s0] sm:$0x3] }
   0x3   :  { %13 = vst [vmem:[#allocation1 + $0x10] sm:$0x3] %v54_v2  ;;  %19 = vst [vmem:[#allocation1] sm:$0x3] %v18_v3  ;;  %s25_s0 = smov 3  ;;  %s32_s16 = smov 3 }
   0x4   :  { %s59_s17 = smov 96   ;;  %s60_s18 = smov 32  }
   0x5   :  { %s61_s19 = smov 64  }
   0x9   :  { %v26_v4 = vld [vmem:[#allocation1 + $0x9] ss:$16 sm:%s25_s0]   ;;  %v33_v7 = vld [vmem:[#allocation1 + $0x8] ss:$16 sm:%s32_s16]  }
   0xa   :  { %27 = vrot.lane.b32.xlu0 %v26_v4, %s59_s17  ;;  %v40_v5 = vld [vmem:[#allocation1 + $0x1] ss:$16 sm:%s39_s14]   ;;  %v21_v6 = vld [vmem:[#allocation1] ss:$16 sm:%s20_s15]  }
   0xb   :  { %41 = vrot.lane.b32.xlu1 %v40_v5, %s60_s18  ;;  %23 = vst.msk [vmem:[#allocation0] sm:$0x3] %vm22_vm0, %v21_v6  }
   0xe   :  { %34 = vrot.lane.b32.xlu0 %v33_v7, %s61_s19 }
  0x7c   :  { %v28_v8 = vpop.permute.xlu0 %27  }
  0x7d   :  { %30 = vst.msk [vmem:[#allocation0] sm:$0x3] %vm29_vm1, %v28_v8   ;;  %v42_v9 = vpop.permute.xlu1 %41  }
  0x80   :  { %v35_v10 = vpop.permute.xlu0 %34  }
  0x81   :  { %37 = vst.msk [vmem:[#allocation0] sm:$0x3] %vm36_vm2, %v35_v10  }
  0x82   :  { %44 = vst.msk [vmem:[#allocation0] sm:$0x3] %vm43_vm3, %v42_v9  }
  0x89   :  { %v48_v11 = vld [vmem:[#allocation0] sm:$0x3] }
  0x8a   :  { %50 = vst [vmem:[%s88_s1] sm:$0x3] %v48_v11 }

// kernel: runet_forward.59
= control target key start
LH: loop header
LB: loop body
LE: loop exit
PB: predicated region body
PF: predicated region fallthrough
CT: control target
= control target key end

     0   :  { %s69_s0 = inlined_call_operand.vmem [shape: f32[2,128], index: 0, kind: input, shape index: {}]   ;;  %s70_s1 = inlined_call_operand.vmem [shape: f32[2,128], index: 1, kind: input, shape index: {}]   ;;  %s71_s2 = inlined_call_operand.vmem [shape: f32[2,128], index: 2, kind: input, shape index: {}]   ;;  %s72_s3 = inlined_call_operand.vmem [shape: f32[2,128], index: 3, kind: input, shape index: {}]   ;;  %s73_s4 = inlined_call_operand.vmem [shape: f32[2,128], index: 4, kind: output, shape index: {}]  }
   0x1   :  { %v17_v0 = vld [vmem:[%s69_s0] sm:$0x3] }
   0x2   :  { %v18_v1 = vld [vmem:[%s70_s1] sm:$0x3] }
   0x3   :  { %v20_v2 = vld [vmem:[%s71_s2] sm:$0x3]  ;;  %v19_v3 = vmax.f32 %v17_v0, %v18_v1 }
   0x4   :  { %v21_v4 = vld [vmem:[%s72_s3] sm:$0x3] }
   0x5   :  { %v22_v5 = vmax.f32 %v20_v2, %v21_v4 }
   0x7   :  { %v23_v6 = vmax.f32 %v19_v3, %v22_v5 }
   0x9   :  { %24 = vst [vmem:[%s73_s4] sm:$0x3] %v23_v6 }

// kernel: runet_forward.57
= control target key start
LH: loop header
LB: loop body
LE: loop exit
PB: predicated region body
PF: predicated region fallthrough
CT: control target
= control target key end

     0   :  { %vm197_vm0 = vcmask 261120   ;;  %vm310_vm1 = vcmask 253952   ;;  %v455_v24 = vmov 0.0   ;;  %s601_s1 = inlined_call_operand.vmem [shape: bf16[288,32], index: 1, kind: input, shape index: {}]   ;;  %s602_s0 = inlined_call_operand.vmem [shape: bf16[32,288], index: 0, kind: input, shape index: {}]   ;;  %s603_s3 = inlined_call_operand.vmem [shape: f32[1,32], index: 3, kind: output, shape index: {1}]   ;;  %s604_s4 = inlined_call_operand.vmem [shape: f32[1,32], index: 4, kind: output, shape index: {2}]   ;;  %s605_s2 = inlined_call_operand.vmem [shape: f32[32,32], index: 2, kind: output, shape index: {0}]  }
   0x1   :  { %v429_v0 = vld [vmem:[%s601_s1 + $0x40] sm:$0xff]   ;;  %v431_v2 = vld [vmem:[%s601_s1 + $0x48] sm:$0xff]   ;;  %v433_v4 = vld [vmem:[%s601_s1 + $0x50] sm:$0xff]   ;;  %311 = vst.msk [vmem:[%s603_s3] sm:$0x1] %vm310_vm1, %v455_v24 }
   0x2   :  { %v430_v1 = vld [vmem:[%s601_s1] sm:$0xff]   ;;  %388 = vmatprep.subr.bf16.mxu0 %v429_v0  ;;  %v432_v3 = vld [vmem:[%s601_s1 + $0x8] sm:$0xff]   ;;  %v434_v5 = vld [vmem:[%s601_s1 + $0x10] sm:$0xff]   ;;  %312 = vst.msk [vmem:[%s604_s4] sm:$0x1] %vm310_vm1, %v455_v24 }
   0x3   :  { %389 = vmatpush3.bf16.msra.mxu0 %v430_v1  ;;  %v435_v6 = vld [vmem:[%s601_s1 + $0x58] sm:$0xff]   ;;  %v437_v8 = vld [vmem:[%s601_s1 + $0x60] sm:$0xff]   ;;  %v439_v11 = vld [vmem:[%s601_s1 + $0x68] sm:$0xff]  }
   0x4   :  { %390 = vmatprep.subr.bf16.mxu0 %v431_v2  ;;  %v436_v7 = vld [vmem:[%s601_s1 + $0x18] sm:$0xff]   ;;  %v443_v9 = vld [vmem:[%s601_s1 + $0x80] sm:$0xff]   ;;  %v440_v12 = vld [vmem:[%s601_s1 + $0x28] sm:$0xff]  }
   0x5   :  { %v438_v10 = vld [vmem:[%s601_s1 + $0x20] sm:$0xff]   ;;  %420 = vmatprep.subr.bf16.mxu1 %v443_v9  ;;  %v446_v13 = vld [vmem:[%s601_s1 + $0x88] sm:$0xff]   ;;  %v441_v14 = vld [vmem:[%s601_s1 + $0x70] sm:$0xff]  }
   0x6   :  { %421 = vmatpush3.bf16.msra.mxu1 %v443_v9  ;;  %v449_v15 = vld [vmem:[%s602_s0 + $0x4] ss:$12 sps:$4 sm:$0xff]   ;;  %v450_v16 = vld [vmem:[%s602_s0 + $0x8] ss:$12 sps:$4 sm:$0xff]   ;;  %v451_v17 = vld [vmem:[%s602_s0 + $0x20] ss:$12 sps:$4 sm:$0xff]  }
   0x7   :  { %391 = vmatpush3.bf16.msra.mxu0 %v432_v3  ;;  %422 = vmatprep.subr.bf16.mxu1 %v446_v13  ;;  %v442_v18 = vld [vmem:[%s601_s1 + $0x30] sm:$0xff]   ;;  %v444_v19 = vld [vmem:[%s601_s1 + $0x78] sm:$0xff]   ;;  %v447_v21 = vld [vmem:[%s602_s0] ss:$12 sps:$4 sm:$0xff]  }
   0x8   :  { %392 = vmatprep.subr.bf16.mxu0 %v433_v4  ;;  %236 = vmatprep.mubr.bf16.mxu0 %v449_v15  ;;  %v445_v20 = vld [vmem:[%s601_s1 + $0x38] sm:$0xff]  }
   0x9   :  { %424 = vmatprep.mubr.msk.bf16.mxu1 %vm197_vm0, %v450_v16  ;;  %v452_v22 = vld [vmem:[%s602_s0 + $0x1c] ss:$12 sps:$4 sm:$0xff]   ;;  %v454_v23 = vld [vmem:[%s602_s0 + $0x18] ss:$12 sps:$4 sm:$0xff]  }
   0xa   :  { %423 = vmatpush3.bf16.msra.mxu1 %v446_v13 }
   0xb   :  { %393 = vmatpush3.bf16.msra.mxu0 %v434_v5 }
   0xc   :  { %394 = vmatprep.subr.bf16.mxu0 %v435_v6 }
   0xd   :  { %425 = vmatmul.mubr.msk.bf16.vlgmr.msra.gmra.mrb[0].mxu1 %vm197_vm0, %v451_v17 }
   0xf   :  { %395 = vmatpush3.bf16.msra.mxu0 %v436_v7 }
  0x10   :  { %396 = vmatprep.subr.bf16.mxu0 %v437_v8  ;;  %v313_v8 = vld [vmem:[%s603_s3] sm:$0x1] }
  0x13   :  { %397 = vmatpush3.bf16.msra.mxu0 %v438_v10 }
  0x14   :  { %398 = vmatprep.subr.bf16.mxu0 %v439_v11  ;;  %v330_v11 = vld [vmem:[%s604_s4] sm:$0x1] }
  0x17   :  { %399 = vmatpush3.bf16.msra.mxu0 %v440_v12 }
  0x18   :  { %400 = vmatprep.subr.bf16.mxu0 %v441_v14 }
  0x1b   :  { %401 = vmatpush3.bf16.msra.mxu0 %v442_v18 }
  0x1c   :  { %402 = vmatprep.subr.bf16.mxu0 %v444_v19 }
  0x1f   :  { %403 = vmatpush3.bf16.msra.mxu0 %v445_v20 }
  0x22   :  { %237 = vmatmul.mubr.bf16.vlgmr.msra.gmra.mrb[0].mxu0 %v447_v21 }
  0x23   :  { %244 = vmatprep.mubr.bf16.mxu0 %v452_v22 }
  0x2a   :  { %245 = vmatmul.mubr.bf16.gmra.mrb[4].mxu0 %v454_v23 }
  0xe0   :  { %v426_v25 = vpop.f32.mrb[0].mxu1 }
  0xe1   :  { %v287_v26 = vpop.f32.mrb[1].mxu1 }
  0xe2   :  { %v427_v27 = vpop.f32.mrb[2].mxu1 }
  0xe3   :  { %v290_v28 = vpop.f32.mrb[3].mxu1 }
  0xf5   :  { %v404_v29 = vpop.f32.mrb[0].mxu0 }
  0xf6   :  { %v405_v30 = vpop.f32.mrb[1].mxu0 }
  0xf7   :  { %v406_v31 = vadd.f32 %v405_v30, %v404_v29  ;;  %v407_v32 = vpop.f32.mrb[2].mxu0 }
  0xf8   :  { %v408_v33 = vpop.f32.mrb[3].mxu0 }
  0xf9   :  { %v409_v34 = vadd.f32 %v408_v33, %v407_v32  ;;  %v288_v35 = vadd.f32 %v406_v31, %v287_v26 }
  0xfb   :  { %302 = vst.msk [vmem:[%s605_s2] sm:$0xff] %vm197_vm0, %v288_v35  ;;  %v331_v36 = vmul.f32 %v288_v35, %v288_v35  ;;  %v291_v37 = vadd.f32 %v409_v34, %v290_v28  ;;  %v314_v38 = vsel %vm197_vm0, %v288_v35, 0.0 }
  0xfd   :  { %303 = vst.msk [vmem:[%s605_s2 + $0x8] sm:$0xff] %vm197_vm0, %v291_v37  ;;  %v315_v39 = vsel %vm197_vm0, %v291_v37, 0.0  ;;  %v332_v40 = vmul.f32 %v291_v37, %v291_v37  ;;  %v410_v41 = vpop.f32.mrb[4].mxu0  ;;  %v335_v44 = vsel %vm197_vm0, %v331_v36, 0.0 }
  0xfe   :  { %v316_v42 = vadd.f32 %v315_v39, %v314_v38  ;;  %v411_v43 = vpop.f32.mrb[5].mxu0 }
  0xff   :  { %v336_v45 = vsel %vm197_vm0, %v332_v40, 0.0  ;;  %v412_v46 = vadd.f32 %v411_v43, %v410_v41  ;;  %v413_v47 = vpop.f32.mrb[6].mxu0 }
 0x100   :  { %v337_v48 = vadd.f32 %v336_v45, %v335_v44  ;;  %v414_v49 = vpop.f32.mrb[7].mxu0 }
 0x101   :  { %v296_v50 = vadd.f32 %v426_v25, %v412_v46  ;;  %v415_v51 = vadd.f32 %v414_v49, %v413_v47 }
 0x103   :  { %304 = vst.msk [vmem:[%s605_s2 + $0x10] sm:$0xff] %vm197_vm0, %v296_v50  ;;  %v317_v52 = vsel %vm197_vm0, %v296_v50, 0.0  ;;  %v333_v53 = vmul.f32 %v296_v50, %v296_v50  ;;  %v299_v54 = vadd.f32 %v427_v27, %v415_v51 }
 0x104   :  { %v318_v55 = vadd.f32 %v317_v52, %v316_v42 }
 0x105   :  { %v338_v56 = vsel %vm197_vm0, %v333_v53, 0.0  ;;  %305 = vst.msk [vmem:[%s605_s2 + $0x18] sm:$0xff] %vm197_vm0, %v299_v54  ;;  %v319_v57 = vsel %vm197_vm0, %v299_v54, 0.0  ;;  %v334_v58 = vmul.f32 %v299_v54, %v299_v54 }
 0x106   :  { %v339_v59 = vadd.f32 %v338_v56, %v337_v48  ;;  %v320_v60 = vadd.f32 %v319_v57, %v318_v55 }
 0x107   :  { %v340_v61 = vsel %vm197_vm0, %v334_v58, 0.0 }
 0x108   :  { %v321_v62 = vrot.slane %v320_v60, 4  ;;  %v341_v63 = vadd.f32 %v340_v61, %v339_v59 }
 0x10a   :  { %v322_v0 = vadd.f32 %v321_v62, %v320_v60  ;;  %v342_v1 = vrot.slane %v341_v63, 4 }
 0x10c   :  { %v323_v2 = vrot.slane %v322_v0, 2  ;;  %v343_v3 = vadd.f32 %v342_v1, %v341_v63 }
 0x10e   :  { %v324_v4 = vadd.f32 %v323_v2, %v322_v0  ;;  %v344_v5 = vrot.slane %v343_v3, 2 }
 0x110   :  { %v325_v6 = vrot.slane %v324_v4, 1  ;;  %v345_v7 = vadd.f32 %v344_v5, %v343_v3 }
 0x112   :  { %v326_v9 = vadd.f32 %v325_v6, %v324_v4  ;;  %v346_v10 = vrot.slane %v345_v7, 1 }
 0x114   :  { %v327_v12 = vadd.f32 %v326_v9, %v313_v8  ;;  %v347_v13 = vadd.f32 %v346_v10, %v345_v7 }
 0x116   :  { %329 = vst.msk [vmem:[%s603_s3] sm:$0x1] %vm310_vm1, %v327_v12  ;;  %v348_v14 = vadd.f32 %v347_v13, %v330_v11 }
 0x118   :  { %349 = vst.msk [vmem:[%s604_s4] sm:$0x1] %vm310_vm1, %v348_v14 }

// kernel: tile.223
= control target key start
LH: loop header
LB: loop body
LE: loop exit
PB: predicated region body
PF: predicated region fallthrough
CT: control target
= control target key end

     0   :  { %s22_s0 = inlined_call_operand.vmem [shape: f32[64], index: 0, kind: input, shape index: {}]   ;;  %s23_s1 = inlined_call_operand.vmem [shape: f32[2,64], index: 1, kind: output, shape index: {}]  }
   0x1   :  { %v4_v0 = vld [vmem:[%s22_s0] ss:$0 sm:$0xff] }
   0x2   :  { %5 = vst [vmem:[%s23_s1] sm:$0x3] %v4_v0 }

// kernel: tile.228
= control target key start
LH: loop header
LB: loop body
LE: loop exit
PB: predicated region body
PF: predicated region fallthrough
CT: control target
= control target key end

     0   :  { %vm7_vm0 = vcmask 523264   ;;  %vm13_vm1 = vcmask 1048064   ;;  %s39_s0 = inlined_call_operand.vmem [shape: f32[2,64], index: 0, kind: input, shape index: {}]   ;;  %s40_s1 = inlined_call_operand.vmem [shape: f32[1,128], index: 1, kind: output, shape index: {}]  }
   0x1   :  { %v4_v0 = vld [vmem:[%s39_s0] sm:$0x3]  ;;  %s22_s0 = smov 64  }
   0x2   :  { %5 = vst [vmem:[#allocation1] sm:$0x3] %v4_v0 }
   0x9   :  { %v10_v1 = vld [vmem:[#allocation1 + $0x1] sm:$0x1]   ;;  %v6_v2 = vld [vmem:[#allocation1] sm:$0x1]  }
   0xa   :  { %11 = vrot.lane.b32.xlu0 %v10_v1, %s22_s0  ;;  %8 = vst.msk [vmem:[#allocation0] sm:$0x1] %vm7_vm0, %v6_v2  }
  0x7c   :  { %v12_v3 = vpop.permute.xlu0 %11  }
  0x7d   :  { %14 = vst.msk [vmem:[#allocation0] sm:$0x1] %vm13_vm1, %v12_v3  }
  0x84   :  { %v18_v4 = vld [vmem:[#allocation0] sm:$0x1] }
  0x85   :  { %20 = vst [vmem:[%s40_s1] sm:$0x1] %v18_v4 }

// kernel: runet_forward.60
= control target key start
LH: loop header
LB: loop body
LE: loop exit
PB: predicated region body
PF: predicated region fallthrough
CT: control target
= control target key end

     0   :  { %vm261_vm0 = vcmask 516096   ;;  %v376_v1 = vmov 0.0   ;;  %vm377_vm1 = vmmov 0   ;;  %vm171_vm2 = vcmask 261120   ;;  %s488_s1 = inlined_call_operand.vmem [shape: bf16[288,64], index: 1, kind: input, shape index: {}]   ;;  %s489_s3 = inlined_call_operand.vmem [shape: f32[1,64], index: 3, kind: output, shape index: {1}]   ;;  %s490_s4 = inlined_call_operand.vmem [shape: f32[1,64], index: 4, kind: output, shape index: {2}]   ;;  %s491_s0 = inlined_call_operand.vmem [shape: bf16[8,288], index: 0, kind: input, shape index: {}]   ;;  %s492_s2 = inlined_call_operand.vmem [shape: f32[8,64], index: 2, kind: output, shape index: {0}]  }
   0x1   :  { %v355_v0 = vld [vmem:[%s488_s1 + $0x40] sm:$0xff]   ;;  %345 = vmatprep.subr.bf16.mxu1 %v376_v1  ;;  %262 = vst.msk [vmem:[%s489_s3] sm:$0x1] %vm261_vm0, %v376_v1  ;;  %263 = vst.msk [vmem:[%s490_s4] sm:$0x1] %vm261_vm0, %v376_v1  ;;  %349 = vmatprep.mubr.msk.bf16.mxu1 %vm377_vm1, %v376_v1  ;;  %v357_v3 = vld [vmem:[%s488_s1 + $0x48] sm:$0xff]  }
   0x2   :  { %v356_v2 = vld [vmem:[%s488_s1] sm:$0xff]   ;;  %320 = vmatprep.subr.bf16.mxu0 %v355_v0  ;;  %v358_v4 = vld [vmem:[%s488_s1 + $0x8] sm:$0xff]   ;;  %v359_v5 = vld [vmem:[%s488_s1 + $0x50] sm:$0xff]   ;;  %vm255_vm3 = vcmask 523264  }
   0x3   :  { %321 = vmatpush3.bf16.msra.mxu0 %v356_v2  ;;  %v360_v6 = vld [vmem:[%s488_s1 + $0x10] sm:$0xff]   ;;  %v361_v7 = vld [vmem:[%s488_s1 + $0x58] sm:$0xff]   ;;  %v363_v9 = vld [vmem:[%s488_s1 + $0x60] sm:$0xff]  }
   0x4   :  { %322 = vmatprep.subr.bf16.mxu0 %v357_v3  ;;  %v362_v8 = vld [vmem:[%s488_s1 + $0x18] sm:$0xff]   ;;  %v364_v10 = vld [vmem:[%s488_s1 + $0x20] sm:$0xff]   ;;  %v365_v12 = vld [vmem:[%s488_s1 + $0x68] sm:$0xff]  }
   0x5   :  { %v369_v11 = vld [vmem:[%s488_s1 + $0x80] sm:$0xff]   ;;  %v372_v13 = vld [vmem:[%s488_s1 + $0x88] sm:$0xff]   ;;  %v367_v17 = vld [vmem:[%s488_s1 + $0x70] sm:$0xff]  }
   0x6   :  { %346 = vmatpush3.bf16.msra.mxu1 %v369_v11  ;;  %v15_v14 = vld [vmem:[%s491_s0] sm:$0xff]  ;;  %v366_v15 = vld [vmem:[%s488_s1 + $0x28] sm:$0xff]   ;;  %v368_v19 = vld [vmem:[%s488_s1 + $0x30] sm:$0xff]  }
   0x7   :  { %323 = vmatpush3.bf16.msra.mxu0 %v358_v4  ;;  %347 = vmatprep.subr.bf16.mxu1 %v376_v1  ;;  %v299_v16 = vcombine.high %v15_v14, %v15_v14  ;;  %v375_v18 = vld [vmem:[%s491_s0 + $0x8] ss:$0 sps:$4 sm:$0xff]   ;;  %v370_v20 = vld [vmem:[%s488_s1 + $0x78] sm:$0xff]   ;;  %v298_v22 = vcombine.low %v15_v14, %v15_v14 }
   0x8   :  { %324 = vmatprep.subr.bf16.mxu0 %v359_v5  ;;  %v371_v21 = vld [vmem:[%s488_s1 + $0x38] sm:$0xff]   ;;  %v264_v45 = vld [vmem:[%s489_s3] sm:$0x1] }
   0x9   :  { %207 = vmatprep.mubr.bf16.mxu0 %v299_v16  ;;  %v275_v48 = vld [vmem:[%s490_s4] sm:$0x1] }
   0xa   :  { %348 = vmatpush3.bf16.msra.mxu1 %v372_v13 }
   0xb   :  { %325 = vmatpush3.bf16.msra.mxu0 %v360_v6 }
   0xc   :  { %326 = vmatprep.subr.bf16.mxu0 %v361_v7 }
   0xd   :  { %350 = vmatmul.mubr.msk.bf16.vlgmr.msra.gmra.mrb[0].mxu1 %vm171_vm2, %v375_v18 }
   0xf   :  { %327 = vmatpush3.bf16.msra.mxu0 %v362_v8 }
  0x10   :  { %328 = vmatprep.subr.bf16.mxu0 %v363_v9 }
  0x13   :  { %329 = vmatpush3.bf16.msra.mxu0 %v364_v10 }
  0x14   :  { %330 = vmatprep.subr.bf16.mxu0 %v365_v12 }
  0x17   :  { %331 = vmatpush3.bf16.msra.mxu0 %v366_v15 }
  0x18   :  { %332 = vmatprep.subr.bf16.mxu0 %v367_v17 }
  0x1b   :  { %333 = vmatpush3.bf16.msra.mxu0 %v368_v19 }
  0x1c   :  { %334 = vmatprep.subr.bf16.mxu0 %v370_v20 }
  0x1f   :  { %335 = vmatpush3.bf16.msra.mxu0 %v371_v21 }
  0x22   :  { %208 = vmatmul.mubr.bf16.vlgmr.msra.gmra.mrb[0].mxu0 %v298_v22 }
  0xe0   :  { %v249_v23 = vpop.f32.mrb[0].mxu1 }
  0xe1   :  { %v351_v24 = vpop.f32.mrb[1].mxu1 }
  0xe2   :  { %v252_v25 = vpop.f32.mrb[2].mxu1 }
  0xe3   :  { %v352_v26 = vpop.f32.mrb[3].mxu1 }
  0xf5   :  { %v336_v27 = vpop.f32.mrb[0].mxu0 }
  0xf6   :  { %v337_v28 = vpop.f32.mrb[1].mxu0 }
  0xf7   :  { %v338_v29 = vadd.f32 %v337_v28, %v336_v27  ;;  %v339_v30 = vpop.f32.mrb[2].mxu0 }
  0xf8   :  { %v340_v31 = vpop.f32.mrb[3].mxu0 }
  0xf9   :  { %v250_v32 = vadd.f32 %v338_v29, %v249_v23 }
  0xfb   :  { %256 = vst.msk [vmem:[%s492_s2] sm:$0xff] %vm255_vm3, %v250_v32  ;;  %v265_v33 = vsel %vm255_vm3, %v250_v32, 0.0  ;;  %v276_v34 = vmul.f32 %v250_v32, %v250_v32 }
  0xfc   :  { %v266_v35 = vrot.slane %v265_v33, 4 }
  0xfd   :  { %v277_v36 = vsel %vm255_vm3, %v276_v34, 0.0 }
  0xfe   :  { %v267_v37 = vadd.f32 %v266_v35, %v265_v33  ;;  %v278_v38 = vrot.slane %v277_v36, 4 }
 0x100   :  { %v268_v39 = vrot.slane %v267_v37, 2  ;;  %v279_v40 = vadd.f32 %v278_v38, %v277_v36 }
 0x102   :  { %v269_v41 = vadd.f32 %v268_v39, %v267_v37  ;;  %v280_v42 = vrot.slane %v279_v40, 2 }
 0x104   :  { %v270_v43 = vrot.slane %v269_v41, 1  ;;  %v281_v44 = vadd.f32 %v280_v42, %v279_v40 }
 0x106   :  { %v271_v46 = vadd.f32 %v270_v43, %v269_v41  ;;  %v282_v47 = vrot.slane %v281_v44, 1 }
 0x108   :  { %v272_v49 = vadd.f32 %v271_v46, %v264_v45  ;;  %v283_v50 = vadd.f32 %v282_v47, %v281_v44 }
 0x10a   :  { %274 = vst.msk [vmem:[%s489_s3] sm:$0x1] %vm261_vm0, %v272_v49  ;;  %v284_v51 = vadd.f32 %v283_v50, %v275_v48 }
 0x10c   :  { %285 = vst.msk [vmem:[%s490_s4] sm:$0x1] %vm261_vm0, %v284_v51 }

// kernel: runet_forward.61
= control target key start
LH: loop header
LB: loop body
LE: loop exit
PB: predicated region body
PF: predicated region fallthrough
CT: control target
= control target key end

     0   :  { %s71_s0 = inlined_call_operand.vmem [shape: f32[4,128], index: 0, kind: input, shape index: {}]   ;;  %s72_s1 = inlined_call_operand.vmem [shape: f32[1,128], index: 1, kind: input, shape index: {}]   ;;  %s73_s2 = inlined_call_operand.vmem [shape: f32[1,128], index: 2, kind: input, shape index: {}]   ;;  %s74_s3 = inlined_call_operand.vmem [shape: f32[4,128], index: 3, kind: output, shape index: {}]  }
   0x1   :  { %v14_v0 = vld [vmem:[%s71_s0] sm:$0xf] }
   0x2   :  { %v37_v1 = vld [vmem:[%s72_s1] ss:$0 sm:$0xff] }
   0x3   :  { %v38_v2 = vld [vmem:[%s73_s2] ss:$0 sm:$0xff]  ;;  %v22_v3 = vmul.f32 %v37_v1, %v14_v0 }
   0x5   :  { %v30_v4 = vadd.f32 %v38_v2, %v22_v3 }
   0x7   :  { %v31_v5 = vmax.f32 %v30_v4, 0.0 }
   0x9   :  { %32 = vst [vmem:[%s74_s3] sm:$0xf] %v31_v5 }

// kernel: squeeze.80
= control target key start
LH: loop header
LB: loop body
LE: loop exit
PB: predicated region body
PF: predicated region fallthrough
CT: control target
= control target key end

     0   :  { %vm7_vm0 = vcmask 523264   ;;  %vm13_vm1 = vcmask 1048064   ;;  %s39_s0 = inlined_call_operand.vmem [shape: f32[2,1,1,1,1,64], index: 0, kind: input, shape index: {}]   ;;  %s40_s1 = inlined_call_operand.vmem [shape: f32[1,128], index: 1, kind: output, shape index: {}]  }
   0x1   :  { %v4_v0 = vld [vmem:[%s39_s0] sm:$0x3]  ;;  %s22_s0 = smov 64  }
   0x2   :  { %5 = vst [vmem:[#allocation1] sm:$0x3] %v4_v0 }
   0x9   :  { %v10_v1 = vld [vmem:[#allocation1 + $0x1] sm:$0x1]   ;;  %v6_v2 = vld [vmem:[#allocation1] sm:$0x1]  }
   0xa   :  { %11 = vrot.lane.b32.xlu0 %v10_v1, %s22_s0  ;;  %8 = vst.msk [vmem:[#allocation0] sm:$0x1] %vm7_vm0, %v6_v2  }
  0x7c   :  { %v12_v3 = vpop.permute.xlu0 %11  }
  0x7d   :  { %14 = vst.msk [vmem:[#allocation0] sm:$0x1] %vm13_vm1, %v12_v3  }
  0x84   :  { %v18_v4 = vld [vmem:[#allocation0] sm:$0x1] }
  0x85   :  { %20 = vst [vmem:[%s40_s1] sm:$0x1] %v18_v4 }

// kernel: runet_forward.64
= control target key start
LH: loop header
LB: loop body
LE: loop exit
PB: predicated region body
PF: predicated region fallthrough
CT: control target
= control target key end

     0   :  { %s69_s0 = inlined_call_operand.vmem [shape: f32[1,128], index: 0, kind: input, shape index: {}]   ;;  %s70_s1 = inlined_call_operand.vmem [shape: f32[1,128], index: 1, kind: input, shape index: {}]   ;;  %s71_s2 = inlined_call_operand.vmem [shape: f32[1,128], index: 2, kind: input, shape index: {}]   ;;  %s72_s3 = inlined_call_operand.vmem [shape: f32[1,128], index: 3, kind: input, shape index: {}]   ;;  %s73_s4 = inlined_call_operand.vmem [shape: f32[1,128], index: 4, kind: output, shape index: {}]  }
   0x1   :  { %v17_v0 = vld [vmem:[%s69_s0] sm:$0x1] }
   0x2   :  { %v18_v1 = vld [vmem:[%s70_s1] sm:$0x1] }
   0x3   :  { %v20_v2 = vld [vmem:[%s71_s2] sm:$0x1]  ;;  %v19_v3 = vmax.f32 %v17_v0, %v18_v1 }
   0x4   :  { %v21_v4 = vld [vmem:[%s72_s3] sm:$0x1] }
   0x5   :  { %v22_v5 = vmax.f32 %v20_v2, %v21_v4 }
   0x7   :  { %v23_v6 = vmax.f32 %v19_v3, %v22_v5 }
   0x9   :  { %24 = vst [vmem:[%s73_s4] sm:$0x1] %v23_v6 }

// kernel: runet_forward.62
= control target key start
LH: loop header
LB: loop body
LE: loop exit
PB: predicated region body
PF: predicated region fallthrough
CT: control target
= control target key end

     0   :  { %v635_v36 = vmov 0.0   ;;  %vm636_vm0 = vmmov 0   ;;  %vm323_vm1 = vcmask 523264   ;;  %vm452_vm2 = vcmask 516096   ;;  %s808_s1 = inlined_call_operand.vmem [shape: bf16[576,64], index: 1, kind: input, shape index: {}]   ;;  %s809_s0 = inlined_call_operand.vmem [shape: bf16[8,576], index: 0, kind: input, shape index: {}]   ;;  %s810_s3 = inlined_call_operand.vmem [shape: f32[1,64], index: 3, kind: output, shape index: {1}]   ;;  %s811_s4 = inlined_call_operand.vmem [shape: f32[1,64], index: 4, kind: output, shape index: {2}]   ;;  %s812_s2 = inlined_call_operand.vmem [shape: f32[8,64], index: 2, kind: output, shape index: {0}]  }
   0x1   :  { %v594_v0 = vld [vmem:[%s808_s1 + $0x40] sm:$0xff]   ;;  %v598_v4 = vld [vmem:[%s808_s1 + $0x48] sm:$0xff]   ;;  %v602_v8 = vld [vmem:[%s808_s1 + $0x50] sm:$0xff]   ;;  %453 = vst.msk [vmem:[%s810_s3] sm:$0x1] %vm452_vm2, %v635_v36 }
   0x2   :  { %v595_v1 = vld [vmem:[%s808_s1 + $0xc0] sm:$0xff]   ;;  %531 = vmatprep.subr.bf16.mxu0 %v594_v0  ;;  %v599_v5 = vld [vmem:[%s808_s1 + $0xc8] sm:$0xff]   ;;  %v603_v9 = vld [vmem:[%s808_s1 + $0xd0] sm:$0xff]   ;;  %454 = vst.msk [vmem:[%s811_s4] sm:$0x1] %vm452_vm2, %v635_v36 }
   0x3   :  { %v596_v2 = vld [vmem:[%s808_s1] sm:$0xff]   ;;  %553 = vmatprep.subr.bf16.mxu1 %v595_v1  ;;  %v600_v6 = vld [vmem:[%s808_s1 + $0x8] sm:$0xff]   ;;  %v604_v10 = vld [vmem:[%s808_s1 + $0x10] sm:$0xff]  }
   0x4   :  { %v597_v3 = vld [vmem:[%s808_s1 + $0x80] sm:$0xff]   ;;  %532 = vmatpush3.bf16.msra.mxu0 %v596_v2  ;;  %v601_v7 = vld [vmem:[%s808_s1 + $0x88] sm:$0xff]   ;;  %v605_v11 = vld [vmem:[%s808_s1 + $0x90] sm:$0xff]  }
   0x5   :  { %554 = vmatpush3.bf16.msra.mxu1 %v597_v3  ;;  %533 = vmatprep.subr.bf16.mxu0 %v598_v4  ;;  %v606_v12 = vld [vmem:[%s808_s1 + $0x58] sm:$0xff]   ;;  %v610_v16 = vld [vmem:[%s808_s1 + $0x60] sm:$0xff]   ;;  %v614_v20 = vld [vmem:[%s808_s1 + $0x68] sm:$0xff]  }
   0x6   :  { %555 = vmatprep.subr.bf16.mxu1 %v599_v5  ;;  %v607_v13 = vld [vmem:[%s808_s1 + $0xd8] sm:$0xff]   ;;  %v611_v17 = vld [vmem:[%s808_s1 + $0xe0] sm:$0xff]   ;;  %v615_v21 = vld [vmem:[%s808_s1 + $0xe8] sm:$0xff]  }
   0x7   :  { %v608_v14 = vld [vmem:[%s808_s1 + $0x18] sm:$0xff]   ;;  %v612_v18 = vld [vmem:[%s808_s1 + $0x20] sm:$0xff]   ;;  %v616_v22 = vld [vmem:[%s808_s1 + $0x28] sm:$0xff]  }
   0x8   :  { %534 = vmatpush3.bf16.msra.mxu0 %v600_v6  ;;  %v609_v15 = vld [vmem:[%s808_s1 + $0x98] sm:$0xff]   ;;  %v613_v19 = vld [vmem:[%s808_s1 + $0xa0] sm:$0xff]   ;;  %v617_v23 = vld [vmem:[%s808_s1 + $0xa8] sm:$0xff]  }
   0x9   :  { %556 = vmatpush3.bf16.msra.mxu1 %v601_v7  ;;  %535 = vmatprep.subr.bf16.mxu0 %v602_v8  ;;  %v618_v24 = vld [vmem:[%s808_s1 + $0x70] sm:$0xff]   ;;  %v622_v28 = vld [vmem:[%s808_s1 + $0x78] sm:$0xff]   ;;  %v15_v32 = vld [vmem:[%s809_s0] sm:$0xff] }
   0xa   :  { %557 = vmatprep.subr.bf16.mxu1 %v603_v9  ;;  %v619_v25 = vld [vmem:[%s808_s1 + $0xf0] sm:$0xff]   ;;  %v623_v29 = vld [vmem:[%s808_s1 + $0xf8] sm:$0xff]   ;;  %v489_v33 = vcombine.low %v15_v32, %v15_v32  ;;  %v490_v34 = vcombine.high %v15_v32, %v15_v32  ;;  %v16_v35 = vld [vmem:[%s809_s0 + $0x8] sm:$0xff] }
   0xb   :  { %v620_v26 = vld [vmem:[%s808_s1 + $0x30] sm:$0xff]   ;;  %v624_v30 = vld [vmem:[%s808_s1 + $0x38] sm:$0xff]   ;;  %v491_v37 = vcombine.low %v16_v35, %v16_v35  ;;  %v492_v38 = vcombine.high %v16_v35, %v16_v35  ;;  %v631_v39 = vld [vmem:[%s808_s1 + $0x100] sm:$0xff]  }
   0xc   :  { %536 = vmatpush3.bf16.msra.mxu0 %v604_v10  ;;  %v621_v27 = vld [vmem:[%s808_s1 + $0xb0] sm:$0xff]   ;;  %v625_v31 = vld [vmem:[%s808_s1 + $0xb8] sm:$0xff]   ;;  %359 = vmatprep.mubr.bf16.mxu0 %v490_v34  ;;  %v632_v40 = vld [vmem:[%s808_s1 + $0x108] sm:$0xff]  }
   0xd   :  { %558 = vmatpush3.bf16.msra.mxu1 %v605_v11  ;;  %537 = vmatprep.subr.bf16.mxu0 %v606_v12  ;;  %v633_v41 = vld [vmem:[%s808_s1 + $0x110] sm:$0xff]   ;;  %v634_v42 = vld [vmem:[%s808_s1 + $0x118] sm:$0xff]   ;;  %v455_v8 = vld [vmem:[%s810_s3] sm:$0x1] }
   0xe   :  { %559 = vmatprep.subr.bf16.mxu1 %v607_v13  ;;  %399 = vmatprep.mubr.bf16.mxu1 %v492_v38  ;;  %v628_v43 = vld [vmem:[%s809_s0 + $0x10] ss:$0 sps:$4 sm:$0xff]   ;;  %v466_v11 = vld [vmem:[%s811_s4] sm:$0x1] }
  0x10   :  { %538 = vmatpush3.bf16.msra.mxu0 %v608_v14 }
  0x11   :  { %560 = vmatpush3.bf16.msra.mxu1 %v609_v15  ;;  %539 = vmatprep.subr.bf16.mxu0 %v610_v16 }
  0x12   :  { %561 = vmatprep.subr.bf16.mxu1 %v611_v17 }
  0x14   :  { %540 = vmatpush3.bf16.msra.mxu0 %v612_v18 }
  0x15   :  { %562 = vmatpush3.bf16.msra.mxu1 %v613_v19  ;;  %541 = vmatprep.subr.bf16.mxu0 %v614_v20 }
  0x16   :  { %563 = vmatprep.subr.bf16.mxu1 %v615_v21 }
  0x18   :  { %542 = vmatpush3.bf16.msra.mxu0 %v616_v22 }
  0x19   :  { %564 = vmatpush3.bf16.msra.mxu1 %v617_v23  ;;  %543 = vmatprep.subr.bf16.mxu0 %v618_v24 }
  0x1a   :  { %565 = vmatprep.subr.bf16.mxu1 %v619_v25 }
  0x1c   :  { %544 = vmatpush3.bf16.msra.mxu0 %v620_v26 }
  0x1d   :  { %566 = vmatpush3.bf16.msra.mxu1 %v621_v27  ;;  %545 = vmatprep.subr.bf16.mxu0 %v622_v28 }
  0x1e   :  { %567 = vmatprep.subr.bf16.mxu1 %v623_v29 }
  0x20   :  { %546 = vmatpush3.bf16.msra.mxu0 %v624_v30 }
  0x21   :  { %568 = vmatpush3.bf16.msra.mxu1 %v625_v31  ;;  %580 = vmatprep.subr.bf16.mxu0 %v635_v36 }
  0x23   :  { %360 = vmatmul.mubr.bf16.vlgmr.msra.gmra.mrb[0].mxu0 %v489_v33 }
  0x24   :  { %400 = vmatmul.mubr.bf16.vlgmr.msra.gmra.mrb[0].mxu1 %v491_v37  ;;  %581 = vmatpush3.bf16.msra.mxu0 %v631_v39 }
  0x25   :  { %582 = vmatprep.subr.bf16.mxu0 %v635_v36  ;;  %588 = vmatprep.mubr.msk.bf16.mxu0 %vm636_vm0, %v635_v36 }
  0x28   :  { %583 = vmatpush3.bf16.msra.mxu0 %v632_v40 }
  0x29   :  { %584 = vmatprep.subr.bf16.mxu0 %v635_v36 }
  0x2c   :  { %585 = vmatpush3.bf16.msra.mxu0 %v633_v41 }
  0x2d   :  { %586 = vmatprep.subr.bf16.mxu0 %v635_v36 }
  0x30   :  { %587 = vmatpush3.bf16.msra.mxu0 %v634_v42 }
  0x33   :  { %589 = vmatmul.mubr.msk.bf16.vlgmr.msra.gmra.mrb[4].mxu0 %vm323_vm1, %v628_v43 }
  0xf6   :  { %v547_v44 = vpop.f32.mrb[0].mxu0 }
  0xf7   :  { %v569_v45 = vpop.f32.mrb[0].mxu1  ;;  %v548_v46 = vpop.f32.mrb[1].mxu0 }
  0xf8   :  { %v549_v47 = vadd.f32 %v548_v46, %v547_v44  ;;  %v570_v48 = vpop.f32.mrb[1].mxu1  ;;  %v550_v49 = vpop.f32.mrb[2].mxu0 }
  0xf9   :  { %v571_v50 = vadd.f32 %v570_v48, %v569_v45  ;;  %v551_v51 = vpop.f32.mrb[3].mxu0  ;;  %v572_v52 = vpop.f32.mrb[2].mxu1 }
  0xfa   :  { %v573_v53 = vpop.f32.mrb[3].mxu1 }
  0xfb   :  { %v402_v54 = vadd.f32 %v571_v50, %v549_v47 }
 0x106   :  { %v441_v55 = vpop.f32.mrb[4].mxu0 }
 0x107   :  { %v442_v56 = vadd.f32 %v441_v55, %v402_v54  ;;  %v590_v57 = vpop.f32.mrb[5].mxu0 }
 0x108   :  { %v444_v58 = vpop.f32.mrb[6].mxu0 }
 0x109   :  { %447 = vst.msk [vmem:[%s812_s2] sm:$0xff] %vm323_vm1, %v442_v56  ;;  %v456_v59 = vsel %vm323_vm1, %v442_v56, 0.0  ;;  %v467_v60 = vmul.f32 %v442_v56, %v442_v56  ;;  %v591_v61 = vpop.f32.mrb[7].mxu0 }
 0x10a   :  { %v457_v62 = vrot.slane %v456_v59, 4 }
 0x10b   :  { %v468_v63 = vsel %vm323_vm1, %v467_v60, 0.0 }
 0x10c   :  { %v458_v0 = vadd.f32 %v457_v62, %v456_v59  ;;  %v469_v1 = vrot.slane %v468_v63, 4 }
 0x10e   :  { %v459_v2 = vrot.slane %v458_v0, 2  ;;  %v470_v3 = vadd.f32 %v469_v1, %v468_v63 }
 0x110   :  { %v460_v4 = vadd.f32 %v459_v2, %v458_v0  ;;  %v471_v5 = vrot.slane %v470_v3, 2 }
 0x112   :  { %v461_v6 = vrot.slane %v460_v4, 1  ;;  %v472_v7 = vadd.f32 %v471_v5, %v470_v3 }
 0x114   :  { %v462_v9 = vadd.f32 %v461_v6, %v460_v4  ;;  %v473_v10 = vrot.slane %v472_v7, 1 }
 0x116   :  { %v463_v12 = vadd.f32 %v462_v9, %v455_v8  ;;  %v474_v13 = vadd.f32 %v473_v10, %v472_v7 }
 0x118   :  { %465 = vst.msk [vmem:[%s810_s3] sm:$0x1] %vm452_vm2, %v463_v12  ;;  %v475_v14 = vadd.f32 %v474_v13, %v466_v11 }
 0x11a   :  { %476 = vst.msk [vmem:[%s811_s4] sm:$0x1] %vm452_vm2, %v475_v14 }

// kernel: runet_forward.66
= control target key start
LH: loop header
LB: loop body
LE: loop exit
PB: predicated region body
PF: predicated region fallthrough
CT: control target
= control target key end

     0   :  { %s71_s0 = inlined_call_operand.vmem [shape: f32[2,128], index: 0, kind: input, shape index: {}]   ;;  %s72_s1 = inlined_call_operand.vmem [shape: f32[1,128], index: 1, kind: input, shape index: {}]   ;;  %s73_s2 = inlined_call_operand.vmem [shape: f32[1,128], index: 2, kind: input, shape index: {}]   ;;  %s74_s3 = inlined_call_operand.vmem [shape: f32[2,128], index: 3, kind: output, shape index: {}]  }
   0x1   :  { %v14_v0 = vld [vmem:[%s71_s0] sm:$0x3] }
   0x2   :  { %v37_v1 = vld [vmem:[%s72_s1] ss:$0 sm:$0xff] }
   0x3   :  { %v38_v2 = vld [vmem:[%s73_s2] ss:$0 sm:$0xff]  ;;  %v22_v3 = vmul.f32 %v37_v1, %v14_v0 }
   0x5   :  { %v30_v4 = vadd.f32 %v38_v2, %v22_v3 }
   0x7   :  { %v31_v5 = vmax.f32 %v30_v4, 0.0 }
   0x9   :  { %32 = vst [vmem:[%s74_s3] sm:$0x3] %v31_v5 }

// kernel: runet_forward.65
= control target key start
LH: loop header
LB: loop body
LE: loop exit
PB: predicated region body
PF: predicated region fallthrough
CT: control target
= control target key end

     0   :  { %v651_v22 = vmov 1966171168   ;;  %v93_v24 = vlaneseq  ;;  %v652_v40 = vmov 0.0   ;;  %vm653_vm0 = vmmov 0   ;;  %s811_s1 = inlined_call_operand.vmem [shape: bf16[576,128], index: 1, kind: input, shape index: {}]   ;;  %s812_s0 = inlined_call_operand.vmem [shape: bf16[2,576], index: 0, kind: input, shape index: {}]   ;;  %s813_s3 = inlined_call_operand.vmem [shape: f32[1,128], index: 3, kind: output, shape index: {1}]   ;;  %s814_s4 = inlined_call_operand.vmem [shape: f32[1,128], index: 4, kind: output, shape index: {2}]   ;;  %s815_s2 = inlined_call_operand.vmem [shape: f32[2,128], index: 2, kind: output, shape index: {0}]  }
   0x1   :  { %v614_v0 = vld [vmem:[%s811_s1 + $0x40] sm:$0xff]   ;;  %v618_v4 = vld [vmem:[%s811_s1 + $0x48] sm:$0xff]   ;;  %v622_v8 = vld [vmem:[%s811_s1 + $0x50] sm:$0xff]   ;;  %v91_v23 = vunpack.c.l.s4 %v651_v22  ;;  %vm348_vm1 = vcmask 523264   ;;  %477 = vst [vmem:[%s813_s3] sm:$0x1] %v652_v40  ;;  %vm480_vm2 = vcmask 1041408  }
   0x2   :  { %v615_v1 = vld [vmem:[%s811_s1 + $0xc0] sm:$0xff]   ;;  %550 = vmatprep.subr.bf16.mxu0 %v614_v0  ;;  %v619_v5 = vld [vmem:[%s811_s1 + $0xc8] sm:$0xff]   ;;  %v623_v9 = vld [vmem:[%s811_s1 + $0xd0] sm:$0xff]   ;;  %v94_v30 = vshrl.u32 %v93_v24, 7  ;;  %478 = vst [vmem:[%s814_s4] sm:$0x1] %v652_v40 }
   0x3   :  { %v616_v2 = vld [vmem:[%s811_s1] sm:$0xff]   ;;  %572 = vmatprep.subr.bf16.mxu1 %v615_v1  ;;  %v620_v6 = vld [vmem:[%s811_s1 + $0x8] sm:$0xff]   ;;  %v624_v10 = vld [vmem:[%s811_s1 + $0x10] sm:$0xff]   ;;  %v92_v29 = vunpack.c.0.s8 %v91_v23 }
   0x4   :  { %v617_v3 = vld [vmem:[%s811_s1 + $0x80] sm:$0xff]   ;;  %551 = vmatpush3.bf16.msra.mxu0 %v616_v2  ;;  %v621_v7 = vld [vmem:[%s811_s1 + $0x88] sm:$0xff]   ;;  %v625_v11 = vld [vmem:[%s811_s1 + $0x90] sm:$0xff]  }
   0x5   :  { %573 = vmatpush3.bf16.msra.mxu1 %v617_v3  ;;  %552 = vmatprep.subr.bf16.mxu0 %v618_v4  ;;  %v626_v12 = vld [vmem:[%s811_s1 + $0x58] sm:$0xff]   ;;  %v630_v16 = vld [vmem:[%s811_s1 + $0x60] sm:$0xff]   ;;  %v634_v20 = vld [vmem:[%s811_s1 + $0x68] sm:$0xff]   ;;  %v95_v35 = vsub.s32 %v92_v29, %v94_v30 }
   0x6   :  { %574 = vmatprep.subr.bf16.mxu1 %v619_v5  ;;  %v627_v13 = vld [vmem:[%s811_s1 + $0xd8] sm:$0xff]   ;;  %v631_v17 = vld [vmem:[%s811_s1 + $0xe0] sm:$0xff]   ;;  %v635_v21 = vld [vmem:[%s811_s1 + $0xe8] sm:$0xff]  }
   0x7   :  { %v628_v14 = vld [vmem:[%s811_s1 + $0x18] sm:$0xff]   ;;  %v632_v18 = vld [vmem:[%s811_s1 + $0x20] sm:$0xff]   ;;  %v636_v25 = vld [vmem:[%s811_s1 + $0x28] sm:$0xff]  }
   0x8   :  { %553 = vmatpush3.bf16.msra.mxu0 %v620_v6  ;;  %v629_v15 = vld [vmem:[%s811_s1 + $0x98] sm:$0xff]   ;;  %v633_v19 = vld [vmem:[%s811_s1 + $0xa0] sm:$0xff]   ;;  %v637_v26 = vld [vmem:[%s811_s1 + $0xa8] sm:$0xff]  }
   0x9   :  { %575 = vmatpush3.bf16.msra.mxu1 %v621_v7  ;;  %554 = vmatprep.subr.bf16.mxu0 %v622_v8  ;;  %v638_v27 = vld [vmem:[%s811_s1 + $0x70] sm:$0xff]   ;;  %v642_v33 = vld [vmem:[%s811_s1 + $0x78] sm:$0xff]   ;;  %v15_v38 = vld [vmem:[%s812_s0] sm:$0x1f] }
   0xa   :  { %576 = vmatprep.subr.bf16.mxu1 %v623_v9  ;;  %v639_v28 = vld [vmem:[%s811_s1 + $0xf0] sm:$0xff]   ;;  %v643_v34 = vld [vmem:[%s811_s1 + $0xf8] sm:$0xff]   ;;  %v96_v39 = vrot.slane %v15_v38, %v95_v35  ;;  %v647_v44 = vld [vmem:[%s811_s1 + $0x100] sm:$0xff]   ;;  %v89_v48 = vcombine.high %v15_v38, %v15_v38 }
   0xb   :  { %v640_v31 = vld [vmem:[%s811_s1 + $0x30] sm:$0xff]   ;;  %v644_v36 = vld [vmem:[%s811_s1 + $0x38] sm:$0xff]   ;;  %v648_v47 = vld [vmem:[%s811_s1 + $0x108] sm:$0xff]  }
   0xc   :  { %555 = vmatpush3.bf16.msra.mxu0 %v624_v10  ;;  %v641_v32 = vld [vmem:[%s811_s1 + $0xb0] sm:$0xff]   ;;  %v645_v37 = vld [vmem:[%s811_s1 + $0xb8] sm:$0xff]   ;;  %v104_v41 = vcombine.high %v96_v39, %v96_v39  ;;  %v111_v42 = vrot.slane %v96_v39, %v95_v35  ;;  %v103_v50 = vrot.slane %v89_v48, %v95_v35 }
   0xd   :  { %577 = vmatpush3.bf16.msra.mxu1 %v625_v11  ;;  %556 = vmatprep.subr.bf16.mxu0 %v626_v12  ;;  %v649_v49 = vld [vmem:[%s811_s1 + $0x110] sm:$0xff]   ;;  %v650_v51 = vld [vmem:[%s811_s1 + $0x118] sm:$0xff]  }
   0xe   :  { %578 = vmatprep.subr.bf16.mxu1 %v627_v13  ;;  %v125_v43 = vrot.slane %v104_v41, %v95_v35  ;;  %v126_v45 = vcombine.high %v111_v42, %v111_v42  ;;  %v118_v52 = vrot.slane %v103_v50, %v95_v35 }
  0x10   :  { %557 = vmatpush3.bf16.msra.mxu0 %v628_v14  ;;  %384 = vmatprep.mubr.bf16.mxu0 %v125_v43  ;;  %v127_v46 = vcombine.high %v125_v43, %v125_v43 }
  0x11   :  { %579 = vmatpush3.bf16.msra.mxu1 %v629_v15  ;;  %558 = vmatprep.subr.bf16.mxu0 %v630_v16 }
  0x12   :  { %580 = vmatprep.subr.bf16.mxu1 %v631_v17  ;;  %424 = vmatprep.mubr.bf16.mxu1 %v127_v46  ;;  %v479_v17 = vld [vmem:[%s813_s3] sm:$0x1] }
  0x14   :  { %559 = vmatpush3.bf16.msra.mxu0 %v632_v18 }
  0x15   :  { %581 = vmatpush3.bf16.msra.mxu1 %v633_v19  ;;  %560 = vmatprep.subr.bf16.mxu0 %v634_v20  ;;  %v490_v20 = vld [vmem:[%s814_s4] sm:$0x1] }
  0x16   :  { %582 = vmatprep.subr.bf16.mxu1 %v635_v21 }
  0x18   :  { %561 = vmatpush3.bf16.msra.mxu0 %v636_v25 }
  0x19   :  { %583 = vmatpush3.bf16.msra.mxu1 %v637_v26  ;;  %562 = vmatprep.subr.bf16.mxu0 %v638_v27 }
  0x1a   :  { %584 = vmatprep.subr.bf16.mxu1 %v639_v28 }
  0x1c   :  { %563 = vmatpush3.bf16.msra.mxu0 %v640_v31 }
  0x1d   :  { %585 = vmatpush3.bf16.msra.mxu1 %v641_v32  ;;  %564 = vmatprep.subr.bf16.mxu0 %v642_v33 }
  0x1e   :  { %586 = vmatprep.subr.bf16.mxu1 %v643_v34 }
  0x20   :  { %565 = vmatpush3.bf16.msra.mxu0 %v644_v36 }
  0x21   :  { %587 = vmatpush3.bf16.msra.mxu1 %v645_v37  ;;  %599 = vmatprep.subr.bf16.mxu0 %v652_v40 }
  0x23   :  { %385 = vmatmul.mubr.bf16.vlgmr.msra.gmra.mrb[0].mxu0 %v111_v42 }
  0x24   :  { %600 = vmatpush3.bf16.msra.mxu0 %v647_v44  ;;  %425 = vmatmul.mubr.bf16.vlgmr.msra.gmra.mrb[0].mxu1 %v126_v45 }
  0x25   :  { %601 = vmatprep.subr.bf16.mxu0 %v652_v40  ;;  %607 = vmatprep.mubr.msk.bf16.mxu0 %vm653_vm0, %v652_v40 }
  0x28   :  { %602 = vmatpush3.bf16.msra.mxu0 %v648_v47 }
  0x29   :  { %603 = vmatprep.subr.bf16.mxu0 %v652_v40 }
  0x2c   :  { %604 = vmatpush3.bf16.msra.mxu0 %v649_v49 }
  0x2d   :  { %605 = vmatprep.subr.bf16.mxu0 %v652_v40 }
  0x30   :  { %606 = vmatpush3.bf16.msra.mxu0 %v650_v51 }
  0x33   :  { %608 = vmatmul.mubr.msk.bf16.vlgmr.msra.gmra.mrb[4].mxu0 %vm348_vm1, %v118_v52 }
  0xf6   :  { %v566_v53 = vpop.f32.mrb[0].mxu0 }
  0xf7   :  { %v567_v54 = vpop.f32.mrb[1].mxu0  ;;  %v588_v55 = vpop.f32.mrb[0].mxu1 }
  0xf8   :  { %v568_v56 = vadd.f32 %v567_v54, %v566_v53  ;;  %v569_v57 = vpop.f32.mrb[2].mxu0  ;;  %v589_v58 = vpop.f32.mrb[1].mxu1 }
  0xf9   :  { %v570_v59 = vpop.f32.mrb[3].mxu0  ;;  %v590_v60 = vadd.f32 %v589_v58, %v588_v55  ;;  %v591_v61 = vpop.f32.mrb[2].mxu1 }
  0xfa   :  { %v592_v62 = vpop.f32.mrb[3].mxu1 }
  0xfb   :  { %v427_v63 = vadd.f32 %v590_v60, %v568_v56 }
 0x106   :  { %v466_v0 = vpop.f32.mrb[4].mxu0 }
 0x107   :  { %v467_v1 = vadd.f32 %v466_v0, %v427_v63  ;;  %v609_v2 = vpop.f32.mrb[5].mxu0 }
 0x108   :  { %v469_v3 = vpop.f32.mrb[6].mxu0 }
 0x109   :  { %472 = vst [vmem:[%s815_s2] sm:$0x3] %v467_v1  ;;  %v481_v4 = vsel %vm480_vm2, %v467_v1, 0.0  ;;  %v491_v5 = vmul.f32 %v467_v1, %v467_v1  ;;  %v610_v6 = vpop.f32.mrb[7].mxu0 }
 0x10a   :  { %v482_v7 = vrot.slane %v481_v4, 4 }
 0x10b   :  { %v492_v8 = vsel %vm480_vm2, %v491_v5, 0.0 }
 0x10c   :  { %v483_v9 = vadd.f32 %v482_v7, %v481_v4  ;;  %v493_v10 = vrot.slane %v492_v8, 4 }
 0x10e   :  { %v484_v11 = vrot.slane %v483_v9, 2  ;;  %v494_v12 = vadd.f32 %v493_v10, %v492_v8 }
 0x110   :  { %v485_v13 = vadd.f32 %v484_v11, %v483_v9  ;;  %v495_v14 = vrot.slane %v494_v12, 2 }
 0x112   :  { %v486_v15 = vrot.slane %v485_v13, 1  ;;  %v496_v16 = vadd.f32 %v495_v14, %v494_v12 }
 0x114   :  { %v487_v18 = vadd.f32 %v486_v15, %v485_v13  ;;  %v497_v19 = vrot.slane %v496_v16, 1 }
 0x116   :  { %v488_v21 = vadd.f32 %v487_v18, %v479_v17  ;;  %v498_v22 = vadd.f32 %v497_v19, %v496_v16 }
 0x118   :  { %489 = vst [vmem:[%s813_s3] sm:$0x1] %v488_v21  ;;  %v499_v23 = vadd.f32 %v498_v22, %v490_v20 }
 0x11a   :  { %500 = vst [vmem:[%s814_s4] sm:$0x1] %v499_v23 }

// kernel: runet_forward.69
= control target key start
LH: loop header
LB: loop body
LE: loop exit
PB: predicated region body
PF: predicated region fallthrough
CT: control target
= control target key end

     0   :  { %v223_v1 = vmov 0   ;;  %v34_v18 = vlaneseq  ;;  %s301_s1 = inlined_call_operand.vmem [shape: bf16[128,256], index: 1, kind: input, shape index: {}]   ;;  %s302_s0 = inlined_call_operand.vmem [shape: bf16[2,128], index: 0, kind: input, shape index: {}]   ;;  %s303_s2 = inlined_call_operand.vmem [shape: f32[1,256], index: 2, kind: input, shape index: {}]   ;;  %s304_s3 = inlined_call_operand.vmem [shape: f32[2,256], index: 3, kind: output, shape index: {}]  }
   0x1   :  { %v199_v0 = vld [vmem:[%s301_s1 + $0x4] ss:$8 sps:$4 sm:$0xff]   ;;  %156 = vmatprep.mubr.bf16.mxu0 %v223_v1  ;;  %v201_v2 = vld [vmem:[%s301_s1] ss:$8 sps:$4 sm:$0xff]   ;;  %v202_v3 = vld [vmem:[%s301_s1 + $0x14] ss:$8 sps:$4 sm:$0xff]  }
   0x2   :  { %124 = vmatprep.subr.bf16.mxu0 %v199_v0  ;;  %v204_v4 = vld [vmem:[%s301_s1 + $0x10] ss:$8 sps:$4 sm:$0xff]   ;;  %v205_v5 = vld [vmem:[%s301_s1 + $0x24] ss:$8 sps:$4 sm:$0xff]   ;;  %v207_v6 = vld [vmem:[%s301_s1 + $0x20] ss:$8 sps:$4 sm:$0xff]  }
   0x3   :  { %125 = vmatpush1.bf16.msra.mxu0 %v201_v2  ;;  %v208_v7 = vld [vmem:[%s301_s1 + $0x34] ss:$8 sps:$4 sm:$0xff]   ;;  %v210_v8 = vld [vmem:[%s301_s1 + $0x30] ss:$8 sps:$4 sm:$0xff]   ;;  %v211_v9 = vld [vmem:[%s301_s1 + $0x44] ss:$8 sps:$4 sm:$0xff]  }
   0x4   :  { %126 = vmatprep.subr.bf16.mxu0 %v202_v3  ;;  %v213_v10 = vld [vmem:[%s301_s1 + $0x40] ss:$8 sps:$4 sm:$0xff]   ;;  %v214_v11 = vld [vmem:[%s301_s1 + $0x54] ss:$8 sps:$4 sm:$0xff]   ;;  %v216_v12 = vld [vmem:[%s301_s1 + $0x50] ss:$8 sps:$4 sm:$0xff]  }
   0x5   :  { %v217_v13 = vld [vmem:[%s301_s1 + $0x64] ss:$8 sps:$4 sm:$0xff]   ;;  %v219_v14 = vld [vmem:[%s301_s1 + $0x60] ss:$8 sps:$4 sm:$0xff]   ;;  %v220_v15 = vld [vmem:[%s301_s1 + $0x74] ss:$8 sps:$4 sm:$0xff]  }
   0x6   :  { %v222_v16 = vld [vmem:[%s301_s1 + $0x70] ss:$8 sps:$4 sm:$0xff]   ;;  %v15_v17 = vld [vmem:[%s302_s0] sm:$0x1]  ;;  %v35_v19 = vshrl.u32 %v34_v18, 7 }
   0x7   :  { %127 = vmatpush1.bf16.msra.mxu0 %v204_v4  ;;  %v32_v21 = vld [vmem:[%s303_s2] sm:$0x3] }
   0x8   :  { %128 = vmatprep.subr.bf16.mxu0 %v205_v5  ;;  %v36_v20 = vsub.s32 0, %v35_v19  ;;  %v40_v22 = vsub.s32 1, %v35_v19 }
   0xa   :  { %v37_v23 = vrot.slane %v32_v21, %v36_v20  ;;  %v41_v24 = vrot.slane %v32_v21, %v40_v22 }
   0xb   :  { %129 = vmatpush1.bf16.msra.mxu0 %v207_v6 }
   0xc   :  { %130 = vmatprep.subr.bf16.mxu0 %v208_v7 }
   0xf   :  { %131 = vmatpush1.bf16.msra.mxu0 %v210_v8 }
  0x10   :  { %132 = vmatprep.subr.bf16.mxu0 %v211_v9 }
  0x13   :  { %133 = vmatpush1.bf16.msra.mxu0 %v213_v10 }
  0x14   :  { %134 = vmatprep.subr.bf16.mxu0 %v214_v11 }
  0x17   :  { %135 = vmatpush1.bf16.msra.mxu0 %v216_v12 }
  0x18   :  { %136 = vmatprep.subr.bf16.mxu0 %v217_v13 }
  0x1b   :  { %137 = vmatpush1.bf16.msra.mxu0 %v219_v14 }
  0x1c   :  { %138 = vmatprep.subr.bf16.mxu0 %v220_v15 }
  0x1f   :  { %139 = vmatpush1.bf16.msra.mxu0 %v222_v16 }
  0x22   :  { %157 = vmatmul.mubr.bf16.vlgmr.msra.gmra.mrb[0].mxu0 %v15_v17 }
  0xf5   :  { %v158_v25 = vpop.f32.mrb[0].mxu0 }
  0xf6   :  { %v159_v26 = vadd.f32 %v158_v25, %v37_v23  ;;  %v160_v27 = vpop.f32.mrb[1].mxu0 }
  0xf7   :  { %v161_v28 = vadd.f32 %v160_v27, %v41_v24  ;;  %v162_v29 = vpop.f32.mrb[2].mxu0 }
  0xf8   :  { %v163_v30 = vpop.f32.mrb[3].mxu0 }
  0xf9   :  { %v167_v31 = vcombine.low %v159_v26, %v161_v28 }
  0xfb   :  { %197 = vst.sshfl [vmem:[%s304_s3] sm:$0x33 pattern:$0x76325410] %v167_v31 }

// kernel: runet_forward.67
= control target key start
LH: loop header
LB: loop body
LE: loop exit
PB: predicated region body
PF: predicated region fallthrough
CT: control target
= control target key end

     0   :  { %v1174_v22 = vmov 1966171168   ;;  %v167_v24 = vlaneseq  ;;  %vm1176_vm0 = vmmov 0   ;;  %vm875_vm1 = vcmask 1041408   ;;  %s1459_s1 = inlined_call_operand.vmem [shape: bf16[1152,128], index: 1, kind: input, shape index: {}]   ;;  %s1460_s0 = inlined_call_operand.vmem [shape: bf16[2,1152], index: 0, kind: input, shape index: {}]   ;;  %s1461_s3 = inlined_call_operand.vmem [shape: f32[1,128], index: 3, kind: output, shape index: {1}]   ;;  %s1462_s4 = inlined_call_operand.vmem [shape: f32[1,128], index: 4, kind: output, shape index: {2}]   ;;  %s1463_s2 = inlined_call_operand.vmem [shape: f32[2,128], index: 2, kind: output, shape index: {0}]  }
   0x1   :  { %v1101_v0 = vld [vmem:[%s1459_s1 + $0x40] sm:$0xff]   ;;  %v1105_v4 = vld [vmem:[%s1459_s1 + $0x48] sm:$0xff]   ;;  %v1109_v8 = vld [vmem:[%s1459_s1 + $0x50] sm:$0xff]   ;;  %v165_v23 = vunpack.c.l.s4 %v1174_v22 }
   0x2   :  { %v1102_v1 = vld [vmem:[%s1459_s1 + $0xc0] sm:$0xff]   ;;  %981 = vmatprep.subr.bf16.mxu0 %v1101_v0  ;;  %v1106_v5 = vld [vmem:[%s1459_s1 + $0xc8] sm:$0xff]   ;;  %v1110_v9 = vld [vmem:[%s1459_s1 + $0xd0] sm:$0xff]   ;;  %v168_v30 = vshrl.u32 %v167_v24, 7 }
   0x3   :  { %v1103_v2 = vld [vmem:[%s1459_s1] sm:$0xff]   ;;  %1003 = vmatprep.subr.bf16.mxu1 %v1102_v1  ;;  %v1107_v6 = vld [vmem:[%s1459_s1 + $0x8] sm:$0xff]   ;;  %v1111_v10 = vld [vmem:[%s1459_s1 + $0x10] sm:$0xff]   ;;  %v166_v29 = vunpack.c.0.s8 %v165_v23 }
   0x4   :  { %v1104_v3 = vld [vmem:[%s1459_s1 + $0x80] sm:$0xff]   ;;  %982 = vmatpush3.bf16.msra.mxu0 %v1103_v2  ;;  %v1108_v7 = vld [vmem:[%s1459_s1 + $0x88] sm:$0xff]   ;;  %v1112_v11 = vld [vmem:[%s1459_s1 + $0x90] sm:$0xff]  }
   0x5   :  { %1004 = vmatpush3.bf16.msra.mxu1 %v1104_v3  ;;  %983 = vmatprep.subr.bf16.mxu0 %v1105_v4  ;;  %v1113_v12 = vld [vmem:[%s1459_s1 + $0x58] sm:$0xff]   ;;  %v1117_v16 = vld [vmem:[%s1459_s1 + $0x60] sm:$0xff]   ;;  %v1121_v20 = vld [vmem:[%s1459_s1 + $0x68] sm:$0xff]   ;;  %v1292_v35 = vsub.s32 %v166_v29, %v168_v30 }
   0x6   :  { %1005 = vmatprep.subr.bf16.mxu1 %v1106_v5  ;;  %v1114_v13 = vld [vmem:[%s1459_s1 + $0xd8] sm:$0xff]   ;;  %v1118_v17 = vld [vmem:[%s1459_s1 + $0xe0] sm:$0xff]   ;;  %v1122_v21 = vld [vmem:[%s1459_s1 + $0xe8] sm:$0xff]  }
   0x7   :  { %v1115_v14 = vld [vmem:[%s1459_s1 + $0x18] sm:$0xff]   ;;  %v1119_v18 = vld [vmem:[%s1459_s1 + $0x20] sm:$0xff]   ;;  %v1123_v25 = vld [vmem:[%s1459_s1 + $0x28] sm:$0xff]  }
   0x8   :  { %984 = vmatpush3.bf16.msra.mxu0 %v1107_v6  ;;  %v1116_v15 = vld [vmem:[%s1459_s1 + $0x98] sm:$0xff]   ;;  %v1120_v19 = vld [vmem:[%s1459_s1 + $0xa0] sm:$0xff]   ;;  %v1124_v26 = vld [vmem:[%s1459_s1 + $0xa8] sm:$0xff]  }
   0x9   :  { %1006 = vmatpush3.bf16.msra.mxu1 %v1108_v7  ;;  %985 = vmatprep.subr.bf16.mxu0 %v1109_v8  ;;  %v1125_v27 = vld [vmem:[%s1459_s1 + $0x70] sm:$0xff]   ;;  %v1129_v33 = vld [vmem:[%s1459_s1 + $0x78] sm:$0xff]   ;;  %v15_v38 = vld [vmem:[%s1460_s0] sm:$0xff] }
   0xa   :  { %1007 = vmatprep.subr.bf16.mxu1 %v1110_v9  ;;  %v1126_v28 = vld [vmem:[%s1459_s1 + $0xf0] sm:$0xff]   ;;  %v1130_v34 = vld [vmem:[%s1459_s1 + $0xf8] sm:$0xff]   ;;  %v163_v39 = vcombine.high %v15_v38, %v15_v38  ;;  %v170_v40 = vrot.slane %v15_v38, %v1292_v35  ;;  %v1134_v41 = vld [vmem:[%s1459_s1 + $0x140] sm:$0xff]  }
   0xb   :  { %v1127_v31 = vld [vmem:[%s1459_s1 + $0x30] sm:$0xff]   ;;  %v1131_v36 = vld [vmem:[%s1459_s1 + $0x38] sm:$0xff]   ;;  %v1136_v44 = vld [vmem:[%s1459_s1 + $0x1c0] sm:$0xff]  }
   0xc   :  { %986 = vmatpush3.bf16.msra.mxu0 %v1111_v10  ;;  %v1128_v32 = vld [vmem:[%s1459_s1 + $0xb0] sm:$0xff]   ;;  %v1132_v37 = vld [vmem:[%s1459_s1 + $0xb8] sm:$0xff]   ;;  %v178_v42 = vcombine.high %v170_v40, %v170_v40  ;;  %v186_v43 = vrot.slane %v170_v40, %v1292_v35  ;;  %v1312_v45 = vrot.slane %v163_v39, %v1292_v35  ;;  %v1135_v47 = vld [vmem:[%s1459_s1 + $0x100] sm:$0xff]  }
   0xd   :  { %1008 = vmatpush3.bf16.msra.mxu1 %v1112_v11  ;;  %987 = vmatprep.subr.bf16.mxu0 %v1113_v12  ;;  %v1138_v50 = vld [vmem:[%s1459_s1 + $0x148] sm:$0xff]   ;;  %v1137_v52 = vld [vmem:[%s1459_s1 + $0x180] sm:$0xff]   ;;  %v1142_v57 = vld [vmem:[%s1459_s1 + $0x150] sm:$0xff]  }
   0xe   :  { %1009 = vmatprep.subr.bf16.mxu1 %v1114_v13  ;;  %v200_v46 = vrot.slane %v178_v42, %v1292_v35  ;;  %v179_v48 = vcombine.high %v1312_v45, %v1312_v45  ;;  %v208_v49 = vcombine.high %v186_v43, %v186_v43  ;;  %v1140_v54 = vld [vmem:[%s1459_s1 + $0x1c8] sm:$0xff]   ;;  %v1144_v59 = vld [vmem:[%s1459_s1 + $0x1d0] sm:$0xff]   ;;  %v1146_v61 = vld [vmem:[%s1459_s1 + $0x158] sm:$0xff]  }
   0xf   :  { %v1139_v55 = vld [vmem:[%s1459_s1 + $0x108] sm:$0xff]   ;;  %v1143_v60 = vld [vmem:[%s1459_s1 + $0x110] sm:$0xff]   ;;  %v1148_v63 = vld [vmem:[%s1459_s1 + $0x1d8] sm:$0xff]  }
  0x10   :  { %988 = vmatpush3.bf16.msra.mxu0 %v1115_v14  ;;  %699 = vmatprep.mubr.bf16.mxu0 %v200_v46  ;;  %v210_v51 = vcombine.high %v200_v46, %v200_v46  ;;  %v207_v53 = vrot.slane %v179_v48, %v1292_v35  ;;  %v1141_v58 = vld [vmem:[%s1459_s1 + $0x188] sm:$0xff]   ;;  %v1145_v62 = vld [vmem:[%s1459_s1 + $0x190] sm:$0xff]   ;;  %v1147_v0 = vld [vmem:[%s1459_s1 + $0x118] sm:$0xff]  }
  0x11   :  { %1010 = vmatpush3.bf16.msra.mxu1 %v1116_v15  ;;  %989 = vmatprep.subr.bf16.mxu0 %v1117_v16  ;;  %v1150_v1 = vld [vmem:[%s1459_s1 + $0x160] sm:$0xff]   ;;  %v1149_v2 = vld [vmem:[%s1459_s1 + $0x198] sm:$0xff]   ;;  %v1154_v5 = vld [vmem:[%s1459_s1 + $0x168] sm:$0xff]  }
  0x12   :  { %1011 = vmatprep.subr.bf16.mxu1 %v1118_v17  ;;  %739 = vmatprep.mubr.bf16.mxu1 %v210_v51  ;;  %v211_v56 = vcombine.high %v207_v53, %v207_v53  ;;  %v1152_v3 = vld [vmem:[%s1459_s1 + $0x1e0] sm:$0xff]   ;;  %v1156_v7 = vld [vmem:[%s1459_s1 + $0x1e8] sm:$0xff]   ;;  %v1158_v9 = vld [vmem:[%s1459_s1 + $0x170] sm:$0xff]   ;;  %v193_v17 = vrot.slane %v1312_v45, %v1292_v35 }
  0x13   :  { %v1151_v4 = vld [vmem:[%s1459_s1 + $0x120] sm:$0xff]   ;;  %v1155_v8 = vld [vmem:[%s1459_s1 + $0x128] sm:$0xff]   ;;  %v1160_v11 = vld [vmem:[%s1459_s1 + $0x1f0] sm:$0xff]  }
  0x14   :  { %990 = vmatpush3.bf16.msra.mxu0 %v1119_v18  ;;  %v1153_v6 = vld [vmem:[%s1459_s1 + $0x1a0] sm:$0xff]   ;;  %v1157_v10 = vld [vmem:[%s1459_s1 + $0x1a8] sm:$0xff]   ;;  %v1159_v12 = vld [vmem:[%s1459_s1 + $0x130] sm:$0xff]  }
  0x15   :  { %1012 = vmatpush3.bf16.msra.mxu1 %v1120_v19  ;;  %991 = vmatprep.subr.bf16.mxu0 %v1121_v20  ;;  %v1162_v13 = vld [vmem:[%s1459_s1 + $0x178] sm:$0xff]   ;;  %v1161_v14 = vld [vmem:[%s1459_s1 + $0x1b0] sm:$0xff]   ;;  %v1166_v19 = vld [vmem:[%s1459_s1 + $0x200] sm:$0xff]   ;;  %v1175_v20 = vmov 0.0  }
  0x16   :  { %1013 = vmatprep.subr.bf16.mxu1 %v1122_v21  ;;  %v1164_v15 = vld [vmem:[%s1459_s1 + $0x1f8] sm:$0xff]   ;;  %v209_v21 = vcombine.high %v193_v17, %v193_v17  ;;  %v908_v22 = vld.sshfl [vmem:[%s1460_s0 + $0x8] sm:$0x1 pattern:$0x75316420]  ;;  %v1172_v29 = vld [vmem:[%s1459_s1 + $0x230] sm:$0xff]  }
  0x17   :  { %v1163_v16 = vld [vmem:[%s1459_s1 + $0x138] sm:$0xff]   ;;  %v1167_v23 = vld [vmem:[%s1459_s1 + $0x208] sm:$0xff]   ;;  %v225_v24 = vrot.slane %v908_v22, %v1292_v35  ;;  %872 = vst [vmem:[%s1461_s3] sm:$0x1] %v1175_v20  ;;  %873 = vst [vmem:[%s1462_s4] sm:$0x1] %v1175_v20 }
  0x18   :  { %992 = vmatpush3.bf16.msra.mxu0 %v1123_v25  ;;  %v1165_v18 = vld [vmem:[%s1459_s1 + $0x1b8] sm:$0xff]   ;;  %v1168_v25 = vld [vmem:[%s1459_s1 + $0x210] sm:$0xff]  }
  0x19   :  { %1014 = vmatpush3.bf16.msra.mxu1 %v1124_v26  ;;  %993 = vmatprep.subr.bf16.mxu0 %v1125_v27  ;;  %v1169_v26 = vld [vmem:[%s1459_s1 + $0x218] sm:$0xff]   ;;  %v1170_v27 = vld [vmem:[%s1459_s1 + $0x220] sm:$0xff]  }
  0x1a   :  { %1015 = vmatprep.subr.bf16.mxu1 %v1126_v28  ;;  %v1171_v28 = vld [vmem:[%s1459_s1 + $0x228] sm:$0xff]   ;;  %v1173_v30 = vld [vmem:[%s1459_s1 + $0x238] sm:$0xff]  }
  0x1c   :  { %994 = vmatpush3.bf16.msra.mxu0 %v1127_v31 }
  0x1d   :  { %1016 = vmatpush3.bf16.msra.mxu1 %v1128_v32  ;;  %995 = vmatprep.subr.bf16.mxu0 %v1129_v33 }
  0x1e   :  { %1017 = vmatprep.subr.bf16.mxu1 %v1130_v34 }
  0x20   :  { %996 = vmatpush3.bf16.msra.mxu0 %v1131_v36 }
  0x21   :  { %1018 = vmatpush3.bf16.msra.mxu1 %v1132_v37  ;;  %1025 = vmatprep.subr.bf16.mxu0 %v1134_v41 }
  0x22   :  { %1047 = vmatprep.subr.bf16.mxu1 %v1136_v44 }
  0x23   :  { %700 = vmatmul.mubr.bf16.vlgmr.msra.gmra.mrb[0].mxu0 %v186_v43 }
  0x24   :  { %1026 = vmatpush3.bf16.msra.mxu0 %v1135_v47  ;;  %740 = vmatmul.mubr.bf16.vlgmr.msra.gmra.mrb[0].mxu1 %v208_v49 }
  0x25   :  { %1027 = vmatprep.subr.bf16.mxu0 %v1138_v50  ;;  %1048 = vmatpush3.bf16.msra.mxu1 %v1137_v52 }
  0x26   :  { %779 = vmatprep.mubr.bf16.mxu0 %v207_v53  ;;  %1049 = vmatprep.subr.bf16.mxu1 %v1140_v54 }
  0x27   :  { %819 = vmatprep.mubr.bf16.mxu1 %v211_v56 }
  0x28   :  { %1028 = vmatpush3.bf16.msra.mxu0 %v1139_v55 }
  0x29   :  { %1029 = vmatprep.subr.bf16.mxu0 %v1142_v57  ;;  %1050 = vmatpush3.bf16.msra.mxu1 %v1141_v58 }
  0x2a   :  { %1051 = vmatprep.subr.bf16.mxu1 %v1144_v59 }
  0x2c   :  { %1030 = vmatpush3.bf16.msra.mxu0 %v1143_v60 }
  0x2d   :  { %1031 = vmatprep.subr.bf16.mxu0 %v1146_v61  ;;  %1052 = vmatpush3.bf16.msra.mxu1 %v1145_v62 }
  0x2e   :  { %1053 = vmatprep.subr.bf16.mxu1 %v1148_v63 }
  0x30   :  { %1032 = vmatpush3.bf16.msra.mxu0 %v1147_v0 }
  0x31   :  { %1033 = vmatprep.subr.bf16.mxu0 %v1150_v1  ;;  %1054 = vmatpush3.bf16.msra.mxu1 %v1149_v2 }
  0x32   :  { %1055 = vmatprep.subr.bf16.mxu1 %v1152_v3 }
  0x34   :  { %1034 = vmatpush3.bf16.msra.mxu0 %v1151_v4 }
  0x35   :  { %1035 = vmatprep.subr.bf16.mxu0 %v1154_v5  ;;  %1056 = vmatpush3.bf16.msra.mxu1 %v1153_v6 }
  0x36   :  { %1057 = vmatprep.subr.bf16.mxu1 %v1156_v7  ;;  %v874_v7 = vld [vmem:[%s1461_s3] sm:$0x1] }
  0x38   :  { %1036 = vmatpush3.bf16.msra.mxu0 %v1155_v8 }
  0x39   :  { %1037 = vmatprep.subr.bf16.mxu0 %v1158_v9  ;;  %1058 = vmatpush3.bf16.msra.mxu1 %v1157_v10  ;;  %v885_v10 = vld [vmem:[%s1462_s4] sm:$0x1] }
  0x3a   :  { %1059 = vmatprep.subr.bf16.mxu1 %v1160_v11 }
  0x3c   :  { %1038 = vmatpush3.bf16.msra.mxu0 %v1159_v12 }
  0x3d   :  { %1039 = vmatprep.subr.bf16.mxu0 %v1162_v13  ;;  %1060 = vmatpush3.bf16.msra.mxu1 %v1161_v14 }
  0x3e   :  { %1061 = vmatprep.subr.bf16.mxu1 %v1164_v15 }
  0x40   :  { %1040 = vmatpush3.bf16.msra.mxu0 %v1163_v16 }
  0x41   :  { %1078 = vmatprep.subr.bf16.mxu0 %v1175_v20  ;;  %1062 = vmatpush3.bf16.msra.mxu1 %v1165_v18 }
  0x43   :  { %780 = vmatmul.mubr.bf16.vlgmr.msra.gmra.mrb[4].mxu0 %v193_v17 }
  0x44   :  { %1079 = vmatpush3.bf16.msra.mxu0 %v1166_v19  ;;  %1094 = vmatprep.mubr.msk.bf16.mxu0 %vm1176_vm0, %v1175_v20 }
  0x45   :  { %820 = vmatmul.mubr.bf16.vlgmr.msra.gmra.mrb[4].mxu1 %v209_v21  ;;  %1080 = vmatprep.subr.bf16.mxu0 %v1175_v20 }
  0x48   :  { %1081 = vmatpush3.bf16.msra.mxu0 %v1167_v23 }
  0x49   :  { %1082 = vmatprep.subr.bf16.mxu0 %v1175_v20 }
  0x4c   :  { %1083 = vmatpush3.bf16.msra.mxu0 %v1168_v25 }
  0x4d   :  { %1084 = vmatprep.subr.bf16.mxu0 %v1175_v20 }
  0x50   :  { %1085 = vmatpush3.bf16.msra.mxu0 %v1169_v26 }
  0x51   :  { %1086 = vmatprep.subr.bf16.mxu0 %v1175_v20 }
  0x54   :  { %1087 = vmatpush3.bf16.msra.mxu0 %v1170_v27 }
  0x55   :  { %1088 = vmatprep.subr.bf16.mxu0 %v1175_v20 }
  0x58   :  { %1089 = vmatpush3.bf16.msra.mxu0 %v1171_v28 }
  0x59   :  { %1090 = vmatprep.subr.bf16.mxu0 %v1175_v20 }
  0x5c   :  { %1091 = vmatpush3.bf16.msra.mxu0 %v1172_v29 }
  0x5d   :  { %1092 = vmatprep.subr.bf16.mxu0 %v1175_v20 }
  0x60   :  { %1093 = vmatpush3.bf16.msra.mxu0 %v1173_v30 }
  0x63   :  { %1095 = vmatmul.mubr.bf16.vlgmr.msra.gmra.mrb[8].mxu0 %v225_v24 }
  0xf6   :  { %v997_v31 = vpop.f32.mrb[0].mxu0 }
  0xf7   :  { %v998_v32 = vpop.f32.mrb[1].mxu0  ;;  %v1019_v33 = vpop.f32.mrb[0].mxu1 }
  0xf8   :  { %v999_v34 = vadd.f32 %v998_v32, %v997_v31  ;;  %v1000_v35 = vpop.f32.mrb[2].mxu0  ;;  %v1020_v36 = vpop.f32.mrb[1].mxu1 }
  0xf9   :  { %v1001_v37 = vpop.f32.mrb[3].mxu0  ;;  %v1021_v38 = vadd.f32 %v1020_v36, %v1019_v33  ;;  %v1022_v39 = vpop.f32.mrb[2].mxu1 }
  0xfa   :  { %v1023_v40 = vpop.f32.mrb[3].mxu1 }
  0xfb   :  { %v742_v41 = vadd.f32 %v1021_v38, %v999_v34 }
 0x116   :  { %v1041_v42 = vpop.f32.mrb[4].mxu0 }
 0x117   :  { %v1042_v43 = vpop.f32.mrb[5].mxu0 }
 0x118   :  { %v1043_v44 = vadd.f32 %v1042_v43, %v1041_v42  ;;  %v1044_v45 = vpop.f32.mrb[6].mxu0  ;;  %v1063_v46 = vpop.f32.mrb[4].mxu1 }
 0x119   :  { %v1045_v47 = vpop.f32.mrb[7].mxu0  ;;  %v1064_v48 = vpop.f32.mrb[5].mxu1 }
 0x11a   :  { %v782_v49 = vadd.f32 %v1043_v44, %v742_v41  ;;  %v1065_v50 = vadd.f32 %v1064_v48, %v1063_v46  ;;  %v1066_v51 = vpop.f32.mrb[6].mxu1 }
 0x11b   :  { %v1067_v52 = vpop.f32.mrb[7].mxu1 }
 0x11c   :  { %v822_v53 = vadd.f32 %v1065_v50, %v782_v49 }
 0x136   :  { %v861_v54 = vpop.f32.mrb[8].mxu0 }
 0x137   :  { %v862_v55 = vadd.f32 %v861_v54, %v822_v53  ;;  %v1096_v56 = vpop.f32.mrb[9].mxu0 }
 0x138   :  { %v864_v57 = vpop.f32.mrb[10].mxu0 }
 0x139   :  { %867 = vst [vmem:[%s1463_s2] sm:$0x3] %v862_v55  ;;  %v876_v58 = vsel %vm875_vm1, %v862_v55, 0.0  ;;  %v886_v59 = vmul.f32 %v862_v55, %v862_v55  ;;  %v1097_v60 = vpop.f32.mrb[11].mxu0 }
 0x13a   :  { %v877_v61 = vrot.slane %v876_v58, 4 }
 0x13b   :  { %v887_v62 = vsel %vm875_vm1, %v886_v59, 0.0 }
 0x13c   :  { %v878_v63 = vadd.f32 %v877_v61, %v876_v58  ;;  %v888_v0 = vrot.slane %v887_v62, 4 }
 0x13e   :  { %v879_v1 = vrot.slane %v878_v63, 2  ;;  %v889_v2 = vadd.f32 %v888_v0, %v887_v62 }
 0x140   :  { %v880_v3 = vadd.f32 %v879_v1, %v878_v63  ;;  %v890_v4 = vrot.slane %v889_v2, 2 }
 0x142   :  { %v881_v5 = vrot.slane %v880_v3, 1  ;;  %v891_v6 = vadd.f32 %v890_v4, %v889_v2 }
 0x144   :  { %v882_v8 = vadd.f32 %v881_v5, %v880_v3  ;;  %v892_v9 = vrot.slane %v891_v6, 1 }
 0x146   :  { %v883_v11 = vadd.f32 %v882_v8, %v874_v7  ;;  %v893_v12 = vadd.f32 %v892_v9, %v891_v6 }
 0x148   :  { %884 = vst [vmem:[%s1461_s3] sm:$0x1] %v883_v11  ;;  %v894_v13 = vadd.f32 %v893_v12, %v885_v10 }
 0x14a   :  { %895 = vst [vmem:[%s1462_s4] sm:$0x1] %v894_v13 }

// kernel: runet_forward.74
= control target key start
LH: loop header
LB: loop body
LE: loop exit
PB: predicated region body
PF: predicated region fallthrough
CT: control target
= control target key end

     0   :  { %v133_v0 = vmov 0.0   ;;  %vm134_vm0 = vmmov 0   ;;  %vm55_vm1 = vcmask 523264   ;;  %s176_s1 = inlined_call_operand.vmem [shape: bf16[64,128], index: 1, kind: input, shape index: {}]   ;;  %s177_s0 = inlined_call_operand.vmem [shape: bf16[8,64], index: 0, kind: input, shape index: {}]   ;;  %s178_s2 = inlined_call_operand.vmem [shape: f32[1,128], index: 2, kind: input, shape index: {}]   ;;  %s179_s3 = inlined_call_operand.vmem [shape: f32[8,128], index: 3, kind: output, shape index: {}]  }
   0x1   :  { %115 = vmatprep.subr.bf16.mxu0 %v133_v0  ;;  %v129_v1 = vld [vmem:[%s176_s1] sm:$0xff]   ;;  %123 = vmatprep.mubr.msk.bf16.mxu0 %vm134_vm0, %v133_v0  ;;  %v130_v2 = vld [vmem:[%s176_s1 + $0x8] sm:$0xff]   ;;  %v131_v3 = vld [vmem:[%s176_s1 + $0x10] sm:$0xff]  }
   0x2   :  { %116 = vmatpush3.bf16.msra.mxu0 %v129_v1  ;;  %v132_v4 = vld [vmem:[%s176_s1 + $0x18] sm:$0xff]   ;;  %v15_v5 = vld [vmem:[%s177_s0] sm:$0xf] }
   0x3   :  { %117 = vmatprep.subr.bf16.mxu0 %v133_v0  ;;  %v104_v6 = vld [vmem:[%s178_s2] ss:$0 sm:$0xff] }
   0x6   :  { %118 = vmatpush3.bf16.msra.mxu0 %v130_v2 }
   0x7   :  { %119 = vmatprep.subr.bf16.mxu0 %v133_v0 }
   0xa   :  { %120 = vmatpush3.bf16.msra.mxu0 %v131_v3 }
   0xb   :  { %121 = vmatprep.subr.bf16.mxu0 %v133_v0 }
   0xe   :  { %122 = vmatpush3.bf16.msra.mxu0 %v132_v4 }
  0x11   :  { %124 = vmatmul.mubr.msk.bf16.vlgmr.msra.gmra.mrb[0].mxu0 %vm55_vm1, %v15_v5 }
  0xe4   :  { %v93_v7 = vpop.f32.mrb[0].mxu0 }
  0xe5   :  { %v94_v8 = vadd.f32 %v104_v6, %v93_v7  ;;  %v125_v9 = vpop.f32.mrb[1].mxu0 }
  0xe6   :  { %v96_v10 = vpop.f32.mrb[2].mxu0 }
  0xe7   :  { %99 = vst [vmem:[%s179_s3] sm:$0xff] %v94_v8  ;;  %v126_v11 = vpop.f32.mrb[3].mxu0 }

// kernel: runet_forward.70
= control target key start
LH: loop header
LB: loop body
LE: loop exit
PB: predicated region body
PF: predicated region fallthrough
CT: control target
= control target key end

     0   :  { %vm1153_vm0 = vmmov 0   ;;  %vm834_vm1 = vcmask 516096   ;;  %vm828_vm2 = vcmask 523264   ;;  %s1435_s1 = inlined_call_operand.vmem [shape: bf16[1152,64], index: 1, kind: input, shape index: {}]   ;;  %s1436_s0 = inlined_call_operand.vmem [shape: bf16[8,1152], index: 0, kind: input, shape index: {}]   ;;  %s1437_s3 = inlined_call_operand.vmem [shape: f32[1,64], index: 3, kind: output, shape index: {1}]   ;;  %s1438_s4 = inlined_call_operand.vmem [shape: f32[1,64], index: 4, kind: output, shape index: {2}]   ;;  %s1439_s2 = inlined_call_operand.vmem [shape: f32[8,64], index: 2, kind: output, shape index: {0}]  }
   0x1   :  { %v1071_v0 = vld [vmem:[%s1435_s1 + $0x40] sm:$0xff]   ;;  %v1075_v4 = vld [vmem:[%s1435_s1 + $0x48] sm:$0xff]   ;;  %v1079_v8 = vld [vmem:[%s1435_s1 + $0x50] sm:$0xff]  }
   0x2   :  { %v1072_v1 = vld [vmem:[%s1435_s1 + $0xc0] sm:$0xff]   ;;  %952 = vmatprep.subr.bf16.mxu0 %v1071_v0  ;;  %v1076_v5 = vld [vmem:[%s1435_s1 + $0xc8] sm:$0xff]   ;;  %v1080_v9 = vld [vmem:[%s1435_s1 + $0xd0] sm:$0xff]  }
   0x3   :  { %v1073_v2 = vld [vmem:[%s1435_s1] sm:$0xff]   ;;  %974 = vmatprep.subr.bf16.mxu1 %v1072_v1  ;;  %v1077_v6 = vld [vmem:[%s1435_s1 + $0x8] sm:$0xff]   ;;  %v1081_v10 = vld [vmem:[%s1435_s1 + $0x10] sm:$0xff]  }
   0x4   :  { %v1074_v3 = vld [vmem:[%s1435_s1 + $0x80] sm:$0xff]   ;;  %953 = vmatpush3.bf16.msra.mxu0 %v1073_v2  ;;  %v1078_v7 = vld [vmem:[%s1435_s1 + $0x88] sm:$0xff]   ;;  %v1082_v11 = vld [vmem:[%s1435_s1 + $0x90] sm:$0xff]  }
   0x5   :  { %975 = vmatpush3.bf16.msra.mxu1 %v1074_v3  ;;  %954 = vmatprep.subr.bf16.mxu0 %v1075_v4  ;;  %v1083_v12 = vld [vmem:[%s1435_s1 + $0x58] sm:$0xff]   ;;  %v1087_v16 = vld [vmem:[%s1435_s1 + $0x60] sm:$0xff]   ;;  %v1091_v20 = vld [vmem:[%s1435_s1 + $0x68] sm:$0xff]  }
   0x6   :  { %976 = vmatprep.subr.bf16.mxu1 %v1076_v5  ;;  %v1084_v13 = vld [vmem:[%s1435_s1 + $0xd8] sm:$0xff]   ;;  %v1088_v17 = vld [vmem:[%s1435_s1 + $0xe0] sm:$0xff]   ;;  %v1092_v21 = vld [vmem:[%s1435_s1 + $0xe8] sm:$0xff]  }
   0x7   :  { %v1085_v14 = vld [vmem:[%s1435_s1 + $0x18] sm:$0xff]   ;;  %v1089_v18 = vld [vmem:[%s1435_s1 + $0x20] sm:$0xff]   ;;  %v1093_v22 = vld [vmem:[%s1435_s1 + $0x28] sm:$0xff]  }
   0x8   :  { %955 = vmatpush3.bf16.msra.mxu0 %v1077_v6  ;;  %v1086_v15 = vld [vmem:[%s1435_s1 + $0x98] sm:$0xff]   ;;  %v1090_v19 = vld [vmem:[%s1435_s1 + $0xa0] sm:$0xff]   ;;  %v1094_v23 = vld [vmem:[%s1435_s1 + $0xa8] sm:$0xff]  }
   0x9   :  { %977 = vmatpush3.bf16.msra.mxu1 %v1078_v7  ;;  %956 = vmatprep.subr.bf16.mxu0 %v1079_v8  ;;  %v1095_v24 = vld [vmem:[%s1435_s1 + $0x70] sm:$0xff]   ;;  %v1099_v28 = vld [vmem:[%s1435_s1 + $0x78] sm:$0xff]   ;;  %v15_v32 = vld [vmem:[%s1436_s0] sm:$0xff] }
   0xa   :  { %978 = vmatprep.subr.bf16.mxu1 %v1080_v9  ;;  %v1096_v25 = vld [vmem:[%s1435_s1 + $0xf0] sm:$0xff]   ;;  %v1100_v29 = vld [vmem:[%s1435_s1 + $0xf8] sm:$0xff]   ;;  %v16_v33 = vld [vmem:[%s1436_s0 + $0x8] sm:$0xff]  ;;  %v871_v34 = vcombine.low %v15_v32, %v15_v32  ;;  %v872_v35 = vcombine.high %v15_v32, %v15_v32 }
   0xb   :  { %v1097_v26 = vld [vmem:[%s1435_s1 + $0x30] sm:$0xff]   ;;  %v1101_v30 = vld [vmem:[%s1435_s1 + $0x38] sm:$0xff]   ;;  %v873_v36 = vcombine.low %v16_v33, %v16_v33  ;;  %v874_v37 = vcombine.high %v16_v33, %v16_v33  ;;  %v1107_v38 = vld [vmem:[%s1435_s1 + $0x140] sm:$0xff]  }
   0xc   :  { %957 = vmatpush3.bf16.msra.mxu0 %v1081_v10  ;;  %v1098_v27 = vld [vmem:[%s1435_s1 + $0xb0] sm:$0xff]   ;;  %v1102_v31 = vld [vmem:[%s1435_s1 + $0xb8] sm:$0xff]   ;;  %v1108_v39 = vld [vmem:[%s1435_s1 + $0x100] sm:$0xff]   ;;  %660 = vmatprep.mubr.bf16.mxu0 %v872_v35 }
   0xd   :  { %979 = vmatpush3.bf16.msra.mxu1 %v1082_v11  ;;  %958 = vmatprep.subr.bf16.mxu0 %v1083_v12  ;;  %v1109_v40 = vld [vmem:[%s1435_s1 + $0x1c0] sm:$0xff]   ;;  %v1111_v42 = vld [vmem:[%s1435_s1 + $0x148] sm:$0xff]   ;;  %v1115_v46 = vld [vmem:[%s1435_s1 + $0x150] sm:$0xff]  }
   0xe   :  { %980 = vmatprep.subr.bf16.mxu1 %v1084_v13  ;;  %700 = vmatprep.mubr.bf16.mxu1 %v874_v37  ;;  %v1110_v41 = vld [vmem:[%s1435_s1 + $0x180] sm:$0xff]   ;;  %v1112_v43 = vld [vmem:[%s1435_s1 + $0x108] sm:$0xff]   ;;  %v1116_v47 = vld [vmem:[%s1435_s1 + $0x110] sm:$0xff]   ;;  %v1152_v13 = vmov 0.0  }
   0xf   :  { %v1113_v44 = vld [vmem:[%s1435_s1 + $0x1c8] sm:$0xff]   ;;  %v1117_v48 = vld [vmem:[%s1435_s1 + $0x1d0] sm:$0xff]   ;;  %v1119_v50 = vld [vmem:[%s1435_s1 + $0x158] sm:$0xff]   ;;  %835 = vst.msk [vmem:[%s1437_s3] sm:$0x1] %vm834_vm1, %v1152_v13 }
  0x10   :  { %959 = vmatpush3.bf16.msra.mxu0 %v1085_v14  ;;  %v1114_v45 = vld [vmem:[%s1435_s1 + $0x188] sm:$0xff]   ;;  %v1118_v49 = vld [vmem:[%s1435_s1 + $0x190] sm:$0xff]   ;;  %v1120_v51 = vld [vmem:[%s1435_s1 + $0x118] sm:$0xff]   ;;  %836 = vst.msk [vmem:[%s1438_s4] sm:$0x1] %vm834_vm1, %v1152_v13 }
  0x11   :  { %981 = vmatpush3.bf16.msra.mxu1 %v1086_v15  ;;  %960 = vmatprep.subr.bf16.mxu0 %v1087_v16  ;;  %v1121_v52 = vld [vmem:[%s1435_s1 + $0x1d8] sm:$0xff]   ;;  %v1123_v54 = vld [vmem:[%s1435_s1 + $0x160] sm:$0xff]   ;;  %v1127_v58 = vld [vmem:[%s1435_s1 + $0x168] sm:$0xff]  }
  0x12   :  { %982 = vmatprep.subr.bf16.mxu1 %v1088_v17  ;;  %v1122_v53 = vld [vmem:[%s1435_s1 + $0x198] sm:$0xff]   ;;  %v1124_v55 = vld [vmem:[%s1435_s1 + $0x120] sm:$0xff]   ;;  %v1128_v59 = vld [vmem:[%s1435_s1 + $0x128] sm:$0xff]  }
  0x13   :  { %v1125_v56 = vld [vmem:[%s1435_s1 + $0x1e0] sm:$0xff]   ;;  %v1129_v60 = vld [vmem:[%s1435_s1 + $0x1e8] sm:$0xff]   ;;  %v1131_v62 = vld [vmem:[%s1435_s1 + $0x170] sm:$0xff]  }
  0x14   :  { %961 = vmatpush3.bf16.msra.mxu0 %v1089_v18  ;;  %v1126_v57 = vld [vmem:[%s1435_s1 + $0x1a0] sm:$0xff]   ;;  %v1130_v61 = vld [vmem:[%s1435_s1 + $0x1a8] sm:$0xff]   ;;  %v1132_v63 = vld [vmem:[%s1435_s1 + $0x130] sm:$0xff]  }
  0x15   :  { %983 = vmatpush3.bf16.msra.mxu1 %v1090_v19  ;;  %962 = vmatprep.subr.bf16.mxu0 %v1091_v20  ;;  %v1133_v0 = vld [vmem:[%s1435_s1 + $0x1f0] sm:$0xff]   ;;  %v1135_v2 = vld [vmem:[%s1435_s1 + $0x178] sm:$0xff]   ;;  %v1143_v12 = vld [vmem:[%s1435_s1 + $0x200] sm:$0xff]  }
  0x16   :  { %984 = vmatprep.subr.bf16.mxu1 %v1092_v21  ;;  %v1134_v1 = vld [vmem:[%s1435_s1 + $0x1b0] sm:$0xff]   ;;  %v1136_v3 = vld [vmem:[%s1435_s1 + $0x138] sm:$0xff]   ;;  %v1144_v14 = vld [vmem:[%s1435_s1 + $0x208] sm:$0xff]  }
  0x17   :  { %v1137_v4 = vld [vmem:[%s1435_s1 + $0x1f8] sm:$0xff]   ;;  %v17_v5 = vld [vmem:[%s1436_s0 + $0x10] sm:$0xff]  ;;  %v1147_v17 = vld [vmem:[%s1435_s1 + $0x220] sm:$0xff]  }
  0x18   :  { %963 = vmatpush3.bf16.msra.mxu0 %v1093_v22  ;;  %v876_v6 = vcombine.high %v17_v5, %v17_v5  ;;  %v1140_v7 = vld [vmem:[%s1435_s1 + $0x1b8] sm:$0xff]   ;;  %v875_v8 = vcombine.low %v17_v5, %v17_v5  ;;  %v1145_v15 = vld [vmem:[%s1435_s1 + $0x210] sm:$0xff]   ;;  %v1148_v18 = vld [vmem:[%s1435_s1 + $0x228] sm:$0xff]  }
  0x19   :  { %985 = vmatpush3.bf16.msra.mxu1 %v1094_v23  ;;  %964 = vmatprep.subr.bf16.mxu0 %v1095_v24  ;;  %v18_v9 = vld [vmem:[%s1436_s0 + $0x18] sm:$0xff]  ;;  %v1149_v19 = vld [vmem:[%s1435_s1 + $0x230] sm:$0xff]   ;;  %v1151_v21 = vld [vmem:[%s1436_s0 + $0x20] ss:$0 sps:$4 sm:$0xff]  }
  0x1a   :  { %986 = vmatprep.subr.bf16.mxu1 %v1096_v25  ;;  %v877_v10 = vcombine.low %v18_v9, %v18_v9  ;;  %v878_v11 = vcombine.high %v18_v9, %v18_v9  ;;  %v1146_v16 = vld [vmem:[%s1435_s1 + $0x218] sm:$0xff]  }
  0x1b   :  { %v1150_v20 = vld [vmem:[%s1435_s1 + $0x238] sm:$0xff]  }
  0x1c   :  { %965 = vmatpush3.bf16.msra.mxu0 %v1097_v26 }
  0x1d   :  { %987 = vmatpush3.bf16.msra.mxu1 %v1098_v27  ;;  %966 = vmatprep.subr.bf16.mxu0 %v1099_v28 }
  0x1e   :  { %988 = vmatprep.subr.bf16.mxu1 %v1100_v29 }
  0x20   :  { %967 = vmatpush3.bf16.msra.mxu0 %v1101_v30 }
  0x21   :  { %989 = vmatpush3.bf16.msra.mxu1 %v1102_v31  ;;  %996 = vmatprep.subr.bf16.mxu0 %v1107_v38 }
  0x22   :  { %1018 = vmatprep.subr.bf16.mxu1 %v1109_v40 }
  0x23   :  { %661 = vmatmul.mubr.bf16.vlgmr.msra.gmra.mrb[0].mxu0 %v871_v34 }
  0x24   :  { %701 = vmatmul.mubr.bf16.vlgmr.msra.gmra.mrb[0].mxu1 %v873_v36  ;;  %997 = vmatpush3.bf16.msra.mxu0 %v1108_v39 }
  0x25   :  { %1019 = vmatpush3.bf16.msra.mxu1 %v1110_v41  ;;  %998 = vmatprep.subr.bf16.mxu0 %v1111_v42 }
  0x26   :  { %1020 = vmatprep.subr.bf16.mxu1 %v1113_v44  ;;  %740 = vmatprep.mubr.bf16.mxu0 %v876_v6 }
  0x27   :  { %780 = vmatprep.mubr.bf16.mxu1 %v878_v11 }
  0x28   :  { %999 = vmatpush3.bf16.msra.mxu0 %v1112_v43 }
  0x29   :  { %1021 = vmatpush3.bf16.msra.mxu1 %v1114_v45  ;;  %1000 = vmatprep.subr.bf16.mxu0 %v1115_v46 }
  0x2a   :  { %1022 = vmatprep.subr.bf16.mxu1 %v1117_v48 }
  0x2c   :  { %1001 = vmatpush3.bf16.msra.mxu0 %v1116_v47 }
  0x2d   :  { %1023 = vmatpush3.bf16.msra.mxu1 %v1118_v49  ;;  %1002 = vmatprep.subr.bf16.mxu0 %v1119_v50 }
  0x2e   :  { %1024 = vmatprep.subr.bf16.mxu1 %v1121_v52 }
  0x30   :  { %1003 = vmatpush3.bf16.msra.mxu0 %v1120_v51 }
  0x31   :  { %1025 = vmatpush3.bf16.msra.mxu1 %v1122_v53  ;;  %1004 = vmatprep.subr.bf16.mxu0 %v1123_v54 }
  0x32   :  { %1026 = vmatprep.subr.bf16.mxu1 %v1125_v56 }
  0x34   :  { %1005 = vmatpush3.bf16.msra.mxu0 %v1124_v55 }
  0x35   :  { %1027 = vmatpush3.bf16.msra.mxu1 %v1126_v57  ;;  %1006 = vmatprep.subr.bf16.mxu0 %v1127_v58 }
  0x36   :  { %1028 = vmatprep.subr.bf16.mxu1 %v1129_v60 }
  0x38   :  { %1007 = vmatpush3.bf16.msra.mxu0 %v1128_v59 }
  0x39   :  { %1029 = vmatpush3.bf16.msra.mxu1 %v1130_v61  ;;  %1008 = vmatprep.subr.bf16.mxu0 %v1131_v62  ;;  %v837_v62 = vld [vmem:[%s1437_s3] sm:$0x1] }
  0x3a   :  { %1030 = vmatprep.subr.bf16.mxu1 %v1133_v0 }
  0x3c   :  { %1009 = vmatpush3.bf16.msra.mxu0 %v1132_v63 }
  0x3d   :  { %1031 = vmatpush3.bf16.msra.mxu1 %v1134_v1  ;;  %1010 = vmatprep.subr.bf16.mxu0 %v1135_v2  ;;  %v848_v1 = vld [vmem:[%s1438_s4] sm:$0x1] }
  0x3e   :  { %1032 = vmatprep.subr.bf16.mxu1 %v1137_v4 }
  0x40   :  { %1011 = vmatpush3.bf16.msra.mxu0 %v1136_v3 }
  0x41   :  { %1033 = vmatpush3.bf16.msra.mxu1 %v1140_v7  ;;  %1049 = vmatprep.subr.bf16.mxu0 %v1152_v13 }
  0x43   :  { %741 = vmatmul.mubr.bf16.vlgmr.msra.gmra.mrb[4].mxu0 %v875_v8 }
  0x44   :  { %1050 = vmatpush3.bf16.msra.mxu0 %v1143_v12  ;;  %781 = vmatmul.mubr.bf16.vlgmr.msra.gmra.mrb[4].mxu1 %v877_v10 }
  0x45   :  { %1051 = vmatprep.subr.bf16.mxu0 %v1152_v13  ;;  %1065 = vmatprep.mubr.msk.bf16.mxu0 %vm1153_vm0, %v1152_v13 }
  0x48   :  { %1052 = vmatpush3.bf16.msra.mxu0 %v1144_v14 }
  0x49   :  { %1053 = vmatprep.subr.bf16.mxu0 %v1152_v13 }
  0x4c   :  { %1054 = vmatpush3.bf16.msra.mxu0 %v1145_v15 }
  0x4d   :  { %1055 = vmatprep.subr.bf16.mxu0 %v1152_v13 }
  0x50   :  { %1056 = vmatpush3.bf16.msra.mxu0 %v1146_v16 }
  0x51   :  { %1057 = vmatprep.subr.bf16.mxu0 %v1152_v13 }
  0x54   :  { %1058 = vmatpush3.bf16.msra.mxu0 %v1147_v17 }
  0x55   :  { %1059 = vmatprep.subr.bf16.mxu0 %v1152_v13 }
  0x58   :  { %1060 = vmatpush3.bf16.msra.mxu0 %v1148_v18 }
  0x59   :  { %1061 = vmatprep.subr.bf16.mxu0 %v1152_v13 }
  0x5c   :  { %1062 = vmatpush3.bf16.msra.mxu0 %v1149_v19 }
  0x5d   :  { %1063 = vmatprep.subr.bf16.mxu0 %v1152_v13 }
  0x60   :  { %1064 = vmatpush3.bf16.msra.mxu0 %v1150_v20 }
  0x63   :  { %1066 = vmatmul.mubr.bf16.vlgmr.msra.gmra.mrb[8].mxu0 %v1151_v21 }
  0xf6   :  { %v968_v22 = vpop.f32.mrb[0].mxu0 }
  0xf7   :  { %v990_v23 = vpop.f32.mrb[0].mxu1  ;;  %v969_v24 = vpop.f32.mrb[1].mxu0 }
  0xf8   :  { %v991_v25 = vpop.f32.mrb[1].mxu1  ;;  %v970_v26 = vadd.f32 %v969_v24, %v968_v22  ;;  %v971_v28 = vpop.f32.mrb[2].mxu0 }
  0xf9   :  { %v992_v27 = vadd.f32 %v991_v25, %v990_v23  ;;  %v993_v29 = vpop.f32.mrb[2].mxu1  ;;  %v972_v30 = vpop.f32.mrb[3].mxu0 }
  0xfa   :  { %v994_v31 = vpop.f32.mrb[3].mxu1 }
  0xfb   :  { %v703_v32 = vadd.f32 %v992_v27, %v970_v26 }
 0x116   :  { %v1012_v33 = vpop.f32.mrb[4].mxu0 }
 0x117   :  { %v1013_v34 = vpop.f32.mrb[5].mxu0  ;;  %v1034_v35 = vpop.f32.mrb[4].mxu1 }
 0x118   :  { %v1014_v36 = vadd.f32 %v1013_v34, %v1012_v33  ;;  %v1015_v37 = vpop.f32.mrb[6].mxu0  ;;  %v1035_v38 = vpop.f32.mrb[5].mxu1 }
 0x119   :  { %v1016_v39 = vpop.f32.mrb[7].mxu0  ;;  %v1036_v40 = vadd.f32 %v1035_v38, %v1034_v35  ;;  %v1037_v41 = vpop.f32.mrb[6].mxu1 }
 0x11a   :  { %v743_v42 = vadd.f32 %v1014_v36, %v703_v32  ;;  %v1038_v43 = vpop.f32.mrb[7].mxu1 }
 0x11c   :  { %v783_v44 = vadd.f32 %v1036_v40, %v743_v42 }
 0x136   :  { %v822_v45 = vpop.f32.mrb[8].mxu0 }
 0x137   :  { %v823_v46 = vadd.f32 %v822_v45, %v783_v44  ;;  %v1067_v47 = vpop.f32.mrb[9].mxu0 }
 0x138   :  { %v825_v48 = vpop.f32.mrb[10].mxu0 }
 0x139   :  { %829 = vst.msk [vmem:[%s1439_s2] sm:$0xff] %vm828_vm2, %v823_v46  ;;  %v838_v49 = vsel %vm828_vm2, %v823_v46, 0.0  ;;  %v849_v50 = vmul.f32 %v823_v46, %v823_v46  ;;  %v1068_v51 = vpop.f32.mrb[11].mxu0 }
 0x13a   :  { %v839_v52 = vrot.slane %v838_v49, 4 }
 0x13b   :  { %v850_v53 = vsel %vm828_vm2, %v849_v50, 0.0 }
 0x13c   :  { %v840_v54 = vadd.f32 %v839_v52, %v838_v49  ;;  %v851_v55 = vrot.slane %v850_v53, 4 }
 0x13e   :  { %v841_v56 = vrot.slane %v840_v54, 2  ;;  %v852_v57 = vadd.f32 %v851_v55, %v850_v53 }
 0x140   :  { %v842_v58 = vadd.f32 %v841_v56, %v840_v54  ;;  %v853_v59 = vrot.slane %v852_v57, 2 }
 0x142   :  { %v843_v60 = vrot.slane %v842_v58, 1  ;;  %v854_v61 = vadd.f32 %v853_v59, %v852_v57 }
 0x144   :  { %v844_v63 = vadd.f32 %v843_v60, %v842_v58  ;;  %v855_v0 = vrot.slane %v854_v61, 1 }
 0x146   :  { %v845_v2 = vadd.f32 %v844_v63, %v837_v62  ;;  %v856_v3 = vadd.f32 %v855_v0, %v854_v61 }
 0x148   :  { %847 = vst.msk [vmem:[%s1437_s3] sm:$0x1] %vm834_vm1, %v845_v2  ;;  %v857_v4 = vadd.f32 %v856_v3, %v848_v1 }
 0x14a   :  { %858 = vst.msk [vmem:[%s1438_s4] sm:$0x1] %vm834_vm1, %v857_v4 }

// kernel: runet_forward.79
= control target key start
LH: loop header
LB: loop body
LE: loop exit
PB: predicated region body
PF: predicated region fallthrough
CT: control target
= control target key end

     0   :  { %vm52_vm0 = vcmask 261120   ;;  %vm108_vm1 = vcmask 523264   ;;  %s187_s1 = inlined_call_operand.vmem [shape: bf16[32,64], index: 1, kind: input, shape index: {}]   ;;  %s188_s0 = inlined_call_operand.vmem [shape: bf16[32,32], index: 0, kind: input, shape index: {}]   ;;  %s189_s2 = inlined_call_operand.vmem [shape: f32[1,64], index: 2, kind: input, shape index: {}]   ;;  %s190_s3 = inlined_call_operand.vmem [shape: f32[32,64], index: 3, kind: output, shape index: {}]  }
   0x1   :  { %v136_v0 = vld [vmem:[%s187_s1] sm:$0xff]   ;;  %v137_v1 = vld [vmem:[%s187_s1 + $0x8] sm:$0xff]  }
   0x2   :  { %128 = vmatprep.subr.bf16.mxu0 %v136_v0  ;;  %v138_v2 = vld [vmem:[%s188_s0] sm:$0xff]   ;;  %v139_v3 = vld [vmem:[%s188_s0 + $0x8] sm:$0xff]  }
   0x3   :  { %129 = vmatpush3.bf16.msra.mxu0 %v136_v0  ;;  %132 = vmatprep.mubr.msk.bf16.mxu0 %vm52_vm0, %v138_v2  ;;  %v117_v4 = vld [vmem:[%s189_s2] ss:$0 sm:$0xff] }
   0x4   :  { %130 = vmatprep.subr.bf16.mxu0 %v137_v1 }
   0x7   :  { %131 = vmatpush3.bf16.msra.mxu0 %v137_v1 }
   0xa   :  { %133 = vmatmul.mubr.msk.bf16.vlgmr.msra.gmra.mrb[0].mxu0 %vm52_vm0, %v139_v3 }
  0xdd   :  { %v134_v5 = vpop.f32.mrb[0].mxu0 }
  0xde   :  { %v102_v6 = vadd.f32 %v134_v5, %v117_v4  ;;  %v93_v7 = vpop.f32.mrb[1].mxu0 }
  0xdf   :  { %v94_v8 = vadd.f32 %v117_v4, %v93_v7  ;;  %v135_v9 = vpop.f32.mrb[2].mxu0 }
  0xe0   :  { %111 = vst.msk [vmem:[%s190_s3 + $0x10] sm:$0xff] %vm108_vm1, %v102_v6  ;;  %v105_v10 = vadd.f32 %v135_v9, %v117_v4  ;;  %v96_v11 = vpop.f32.mrb[3].mxu0 }
  0xe1   :  { %109 = vst.msk [vmem:[%s190_s3] sm:$0xff] %vm108_vm1, %v94_v8  ;;  %v97_v12 = vadd.f32 %v117_v4, %v96_v11 }
  0xe2   :  { %112 = vst.msk [vmem:[%s190_s3 + $0x18] sm:$0xff] %vm108_vm1, %v105_v10 }
  0xe3   :  { %110 = vst.msk [vmem:[%s190_s3 + $0x8] sm:$0xff] %vm108_vm1, %v97_v12 }

// kernel: runet_forward.75
= control target key start
LH: loop header
LB: loop body
LE: loop exit
PB: predicated region body
PF: predicated region fallthrough
CT: control target
= control target key end

     0   :  { %vm365_vm0 = vcmask 523264   ;;  %vm528_vm1 = vcmask 253952   ;;  %v753_v46 = vmov 0.0   ;;  %vm519_vm2 = vcmask 261120   ;;  %s963_s1 = inlined_call_operand.vmem [shape: bf16[576,32], index: 1, kind: input, shape index: {}]   ;;  %s964_s0 = inlined_call_operand.vmem [shape: bf16[32,576], index: 0, kind: input, shape index: {}]   ;;  %s965_s3 = inlined_call_operand.vmem [shape: f32[1,32], index: 3, kind: output, shape index: {1}]   ;;  %s966_s4 = inlined_call_operand.vmem [shape: f32[1,32], index: 4, kind: output, shape index: {2}]   ;;  %s967_s2 = inlined_call_operand.vmem [shape: f32[32,32], index: 2, kind: output, shape index: {0}]  }
   0x1   :  { %v703_v0 = vld [vmem:[%s963_s1 + $0x40] sm:$0xff]   ;;  %v707_v4 = vld [vmem:[%s963_s1 + $0x48] sm:$0xff]   ;;  %v711_v8 = vld [vmem:[%s963_s1 + $0x50] sm:$0xff]   ;;  %529 = vst.msk [vmem:[%s965_s3] sm:$0x1] %vm528_vm1, %v753_v46 }
   0x2   :  { %v704_v1 = vld [vmem:[%s963_s1 + $0xc0] sm:$0xff]   ;;  %628 = vmatprep.subr.bf16.mxu0 %v703_v0  ;;  %v708_v5 = vld [vmem:[%s963_s1 + $0xc8] sm:$0xff]   ;;  %v712_v9 = vld [vmem:[%s963_s1 + $0xd0] sm:$0xff]   ;;  %530 = vst.msk [vmem:[%s966_s4] sm:$0x1] %vm528_vm1, %v753_v46 }
   0x3   :  { %v705_v2 = vld [vmem:[%s963_s1] sm:$0xff]   ;;  %656 = vmatprep.subr.bf16.mxu1 %v704_v1  ;;  %v709_v6 = vld [vmem:[%s963_s1 + $0x8] sm:$0xff]   ;;  %v713_v10 = vld [vmem:[%s963_s1 + $0x10] sm:$0xff]  }
   0x4   :  { %v706_v3 = vld [vmem:[%s963_s1 + $0x80] sm:$0xff]   ;;  %629 = vmatpush3.bf16.msra.mxu0 %v705_v2  ;;  %v710_v7 = vld [vmem:[%s963_s1 + $0x88] sm:$0xff]   ;;  %v714_v11 = vld [vmem:[%s963_s1 + $0x90] sm:$0xff]  }
   0x5   :  { %657 = vmatpush3.bf16.msra.mxu1 %v706_v3  ;;  %630 = vmatprep.subr.bf16.mxu0 %v707_v4  ;;  %v715_v12 = vld [vmem:[%s963_s1 + $0x58] sm:$0xff]   ;;  %v719_v16 = vld [vmem:[%s963_s1 + $0x60] sm:$0xff]   ;;  %v723_v20 = vld [vmem:[%s963_s1 + $0x68] sm:$0xff]  }
   0x6   :  { %658 = vmatprep.subr.bf16.mxu1 %v708_v5  ;;  %v716_v13 = vld [vmem:[%s963_s1 + $0xd8] sm:$0xff]   ;;  %v720_v17 = vld [vmem:[%s963_s1 + $0xe0] sm:$0xff]   ;;  %v724_v21 = vld [vmem:[%s963_s1 + $0xe8] sm:$0xff]  }
   0x7   :  { %v717_v14 = vld [vmem:[%s963_s1 + $0x18] sm:$0xff]   ;;  %v721_v18 = vld [vmem:[%s963_s1 + $0x20] sm:$0xff]   ;;  %v725_v22 = vld [vmem:[%s963_s1 + $0x28] sm:$0xff]  }
   0x8   :  { %631 = vmatpush3.bf16.msra.mxu0 %v709_v6  ;;  %v718_v15 = vld [vmem:[%s963_s1 + $0x98] sm:$0xff]   ;;  %v722_v19 = vld [vmem:[%s963_s1 + $0xa0] sm:$0xff]   ;;  %v726_v23 = vld [vmem:[%s963_s1 + $0xa8] sm:$0xff]  }
   0x9   :  { %659 = vmatpush3.bf16.msra.mxu1 %v710_v7  ;;  %632 = vmatprep.subr.bf16.mxu0 %v711_v8  ;;  %v727_v24 = vld [vmem:[%s963_s1 + $0x70] sm:$0xff]   ;;  %v731_v28 = vld [vmem:[%s963_s1 + $0x78] sm:$0xff]   ;;  %v740_v35 = vld [vmem:[%s964_s0 + $0xc] ss:$20 sps:$4 sm:$0xff]  }
   0xa   :  { %660 = vmatprep.subr.bf16.mxu1 %v712_v9  ;;  %v728_v25 = vld [vmem:[%s963_s1 + $0xf0] sm:$0xff]   ;;  %v732_v29 = vld [vmem:[%s963_s1 + $0xf8] sm:$0xff]   ;;  %v741_v36 = vld [vmem:[%s963_s1 + $0x100] sm:$0xff]   ;;  %453 = vmatprep.mubr.bf16.mxu1 %v740_v35 }
   0xb   :  { %v729_v26 = vld [vmem:[%s963_s1 + $0x30] sm:$0xff]   ;;  %v733_v30 = vld [vmem:[%s963_s1 + $0x38] sm:$0xff]   ;;  %v742_v37 = vld [vmem:[%s963_s1 + $0x108] sm:$0xff]  }
   0xc   :  { %633 = vmatpush3.bf16.msra.mxu0 %v713_v10  ;;  %v730_v27 = vld [vmem:[%s963_s1 + $0xb0] sm:$0xff]   ;;  %v734_v31 = vld [vmem:[%s963_s1 + $0xb8] sm:$0xff]   ;;  %v743_v38 = vld [vmem:[%s964_s0 + $0x2c] ss:$20 sps:$4 sm:$0xff]  }
   0xd   :  { %661 = vmatpush3.bf16.msra.mxu1 %v714_v11  ;;  %634 = vmatprep.subr.bf16.mxu0 %v715_v12  ;;  %v735_v32 = vld [vmem:[%s964_s0] ss:$20 sps:$4 sm:$0xff]   ;;  %v737_v33 = vld [vmem:[%s964_s0 + $0x4] ss:$20 sps:$4 sm:$0xff]   ;;  %v738_v34 = vld [vmem:[%s964_s0 + $0x8] ss:$20 sps:$4 sm:$0xff]  }
   0xe   :  { %662 = vmatprep.subr.bf16.mxu1 %v716_v13  ;;  %404 = vmatprep.mubr.bf16.mxu0 %v737_v33  ;;  %v745_v39 = vld [vmem:[%s964_s0 + $0x34] ss:$20 sps:$4 sm:$0xff]   ;;  %v748_v42 = vld [vmem:[%s964_s0 + $0x30] ss:$20 sps:$4 sm:$0xff]   ;;  %v750_v44 = vld [vmem:[%s963_s1 + $0x118] sm:$0xff]  }
   0xf   :  { %v747_v40 = vld [vmem:[%s964_s0 + $0x28] ss:$20 sps:$4 sm:$0xff]   ;;  %v749_v41 = vld [vmem:[%s963_s1 + $0x110] sm:$0xff]   ;;  %v752_v45 = vld [vmem:[%s964_s0 + $0x38] ss:$20 sps:$4 sm:$0xff]  }
  0x10   :  { %635 = vmatpush3.bf16.msra.mxu0 %v717_v14  ;;  %v751_v43 = vld [vmem:[%s964_s0 + $0x10] ss:$20 sps:$4 sm:$0xff]   ;;  %v531_v46 = vld [vmem:[%s965_s3] sm:$0x1] }
  0x11   :  { %663 = vmatpush3.bf16.msra.mxu1 %v718_v15  ;;  %636 = vmatprep.subr.bf16.mxu0 %v719_v16 }
  0x12   :  { %664 = vmatprep.subr.bf16.mxu1 %v720_v17 }
  0x14   :  { %637 = vmatpush3.bf16.msra.mxu0 %v721_v18 }
  0x15   :  { %665 = vmatpush3.bf16.msra.mxu1 %v722_v19  ;;  %638 = vmatprep.subr.bf16.mxu0 %v723_v20 }
  0x16   :  { %666 = vmatprep.subr.bf16.mxu1 %v724_v21 }
  0x18   :  { %639 = vmatpush3.bf16.msra.mxu0 %v725_v22 }
  0x19   :  { %667 = vmatpush3.bf16.msra.mxu1 %v726_v23  ;;  %640 = vmatprep.subr.bf16.mxu0 %v727_v24 }
  0x1a   :  { %668 = vmatprep.subr.bf16.mxu1 %v728_v25 }
  0x1c   :  { %641 = vmatpush3.bf16.msra.mxu0 %v729_v26 }
  0x1d   :  { %669 = vmatpush3.bf16.msra.mxu1 %v730_v27  ;;  %642 = vmatprep.subr.bf16.mxu0 %v731_v28 }
  0x1e   :  { %670 = vmatprep.subr.bf16.mxu1 %v732_v29 }
  0x20   :  { %643 = vmatpush3.bf16.msra.mxu0 %v733_v30 }
  0x21   :  { %671 = vmatpush3.bf16.msra.mxu1 %v734_v31  ;;  %690 = vmatprep.subr.bf16.mxu0 %v741_v36 }
  0x23   :  { %405 = vmatmul.mubr.bf16.vlgmr.msra.gmra.mrb[0].mxu0 %v735_v32 }
  0x24   :  { %454 = vmatmul.mubr.bf16.vlgmr.msra.gmra.mrb[0].mxu1 %v738_v34  ;;  %691 = vmatpush3.bf16.msra.mxu0 %v741_v36 }
  0x25   :  { %692 = vmatprep.subr.bf16.mxu0 %v742_v37  ;;  %412 = vmatprep.mubr.bf16.mxu0 %v743_v38 }
  0x26   :  { %461 = vmatprep.mubr.bf16.mxu1 %v745_v39 }
  0x28   :  { %693 = vmatpush3.bf16.msra.mxu0 %v742_v37 }
  0x29   :  { %694 = vmatprep.subr.bf16.mxu0 %v749_v41 }
  0x2b   :  { %413 = vmatmul.mubr.bf16.gmra.mrb[4].mxu0 %v747_v40 }
  0x2c   :  { %462 = vmatmul.mubr.bf16.gmra.mrb[4].mxu1 %v748_v42  ;;  %698 = vmatprep.mubr.msk.bf16.mxu0 %vm365_vm0, %v751_v43 }
  0x2d   :  { %695 = vmatpush3.bf16.msra.mxu0 %v749_v41 }
  0x2e   :  { %696 = vmatprep.subr.bf16.mxu0 %v750_v44 }
  0x31   :  { %697 = vmatpush3.bf16.msra.mxu0 %v750_v44 }
  0x34   :  { %699 = vmatmul.mubr.msk.bf16.vlgmr.msra.gmra.mrb[8].mxu0 %vm365_vm0, %v752_v45 }
  0xf6   :  { %v644_v47 = vpop.f32.mrb[0].mxu0 }
  0xf7   :  { %v672_v48 = vpop.f32.mrb[0].mxu1  ;;  %v645_v49 = vpop.f32.mrb[1].mxu0 }
  0xf8   :  { %v646_v50 = vadd.f32 %v645_v49, %v644_v47  ;;  %v673_v51 = vpop.f32.mrb[1].mxu1  ;;  %v647_v52 = vpop.f32.mrb[2].mxu0  ;;  %v548_v49 = vld [vmem:[%s966_s4] sm:$0x1] }
  0xf9   :  { %v674_v53 = vadd.f32 %v673_v51, %v672_v48  ;;  %v675_v54 = vpop.f32.mrb[2].mxu1  ;;  %v648_v55 = vpop.f32.mrb[3].mxu0 }
  0xfa   :  { %v649_v56 = vadd.f32 %v648_v55, %v647_v52  ;;  %v676_v57 = vpop.f32.mrb[3].mxu1 }
  0xfb   :  { %v677_v58 = vadd.f32 %v676_v57, %v675_v54  ;;  %v456_v59 = vadd.f32 %v674_v53, %v646_v50 }
  0xfd   :  { %v459_v60 = vadd.f32 %v677_v58, %v649_v56 }
  0xfe   :  { %v650_v61 = vpop.f32.mrb[4].mxu0 }
  0xff   :  { %v678_v62 = vpop.f32.mrb[4].mxu1  ;;  %v651_v63 = vpop.f32.mrb[5].mxu0 }
 0x100   :  { %v652_v0 = vadd.f32 %v651_v63, %v650_v61  ;;  %v679_v1 = vpop.f32.mrb[5].mxu1  ;;  %v653_v2 = vpop.f32.mrb[6].mxu0 }
 0x101   :  { %v680_v3 = vadd.f32 %v679_v1, %v678_v62  ;;  %v681_v4 = vpop.f32.mrb[6].mxu1  ;;  %v654_v5 = vpop.f32.mrb[7].mxu0 }
 0x102   :  { %v655_v6 = vadd.f32 %v654_v5, %v653_v2  ;;  %v682_v7 = vpop.f32.mrb[7].mxu1 }
 0x103   :  { %v683_v8 = vadd.f32 %v682_v7, %v681_v4  ;;  %v464_v9 = vadd.f32 %v680_v3, %v652_v0 }
 0x105   :  { %v467_v10 = vadd.f32 %v683_v8, %v655_v6 }
 0x107   :  { %v700_v11 = vpop.f32.mrb[8].mxu0 }
 0x108   :  { %v513_v12 = vadd.f32 %v700_v11, %v464_v9  ;;  %v504_v13 = vpop.f32.mrb[9].mxu0 }
 0x109   :  { %v505_v14 = vadd.f32 %v504_v13, %v456_v59  ;;  %v701_v15 = vpop.f32.mrb[10].mxu0 }
 0x10a   :  { %522 = vst.msk [vmem:[%s967_s2 + $0x10] sm:$0xff] %vm519_vm2, %v513_v12  ;;  %v516_v16 = vadd.f32 %v701_v15, %v467_v10  ;;  %v507_v17 = vpop.f32.mrb[11].mxu0  ;;  %v551_v20 = vmul.f32 %v513_v12, %v513_v12  ;;  %v535_v25 = vsel %vm519_vm2, %v513_v12, 0.0 }
 0x10b   :  { %520 = vst.msk [vmem:[%s967_s2] sm:$0xff] %vm519_vm2, %v505_v14  ;;  %v549_v18 = vmul.f32 %v505_v14, %v505_v14  ;;  %v508_v19 = vadd.f32 %v507_v17, %v459_v60  ;;  %v532_v21 = vsel %vm519_vm2, %v505_v14, 0.0 }
 0x10c   :  { %523 = vst.msk [vmem:[%s967_s2 + $0x18] sm:$0xff] %vm519_vm2, %v516_v16  ;;  %v552_v27 = vmul.f32 %v516_v16, %v516_v16  ;;  %v556_v31 = vsel %vm519_vm2, %v551_v20, 0.0  ;;  %v537_v32 = vsel %vm519_vm2, %v516_v16, 0.0 }
 0x10d   :  { %521 = vst.msk [vmem:[%s967_s2 + $0x8] sm:$0xff] %vm519_vm2, %v508_v19  ;;  %v533_v22 = vsel %vm519_vm2, %v508_v19, 0.0  ;;  %v550_v23 = vmul.f32 %v508_v19, %v508_v19  ;;  %v553_v26 = vsel %vm519_vm2, %v549_v18, 0.0 }
 0x10e   :  { %v534_v24 = vadd.f32 %v533_v22, %v532_v21  ;;  %v558_v35 = vsel %vm519_vm2, %v552_v27, 0.0 }
 0x10f   :  { %v554_v28 = vsel %vm519_vm2, %v550_v23, 0.0 }
 0x110   :  { %v536_v29 = vadd.f32 %v535_v25, %v534_v24  ;;  %v555_v30 = vadd.f32 %v554_v28, %v553_v26 }
 0x112   :  { %v538_v33 = vadd.f32 %v537_v32, %v536_v29  ;;  %v557_v34 = vadd.f32 %v556_v31, %v555_v30 }
 0x114   :  { %v539_v36 = vrot.slane %v538_v33, 4  ;;  %v559_v37 = vadd.f32 %v558_v35, %v557_v34 }
 0x116   :  { %v540_v38 = vadd.f32 %v539_v36, %v538_v33  ;;  %v560_v39 = vrot.slane %v559_v37, 4 }
 0x118   :  { %v541_v40 = vrot.slane %v540_v38, 2  ;;  %v561_v41 = vadd.f32 %v560_v39, %v559_v37 }
 0x11a   :  { %v542_v42 = vadd.f32 %v541_v40, %v540_v38  ;;  %v562_v43 = vrot.slane %v561_v41, 2 }
 0x11c   :  { %v543_v44 = vrot.slane %v542_v42, 1  ;;  %v563_v45 = vadd.f32 %v562_v43, %v561_v41 }
 0x11e   :  { %v544_v47 = vadd.f32 %v543_v44, %v542_v42  ;;  %v564_v48 = vrot.slane %v563_v45, 1 }
 0x120   :  { %v545_v50 = vadd.f32 %v544_v47, %v531_v46  ;;  %v565_v51 = vadd.f32 %v564_v48, %v563_v45 }
 0x122   :  { %547 = vst.msk [vmem:[%s965_s3] sm:$0x1] %vm528_vm1, %v545_v50  ;;  %v566_v52 = vadd.f32 %v565_v51, %v548_v49 }
 0x124   :  { %567 = vst.msk [vmem:[%s966_s4] sm:$0x1] %vm528_vm1, %v566_v52 }

// kernel: runet_forward.84
= control target key start
LH: loop header
LB: loop body
LE: loop exit
PB: predicated region body
PF: predicated region fallthrough
CT: control target
= control target key end

     0   :  { %vm86_vm0 = vcmask 130048   ;;  %vm208_vm1 = vcmask 261120   ;;  %s407_s1 = inlined_call_operand.vmem [shape: bf16[16,32], index: 1, kind: input, shape index: {}]   ;;  %s408_s0 = inlined_call_operand.vmem [shape: bf16[128,16], index: 0, kind: input, shape index: {}]   ;;  %s409_s2 = inlined_call_operand.vmem [shape: f32[1,32], index: 2, kind: input, shape index: {}]   ;;  %s410_s3 = inlined_call_operand.vmem [shape: f32[128,32], index: 3, kind: output, shape index: {}]  }
   0x1   :  { %v276_v0 = vld [vmem:[%s407_s1] sm:$0xff]   ;;  %v279_v3 = vld [vmem:[%s408_s0 + $0x8] sm:$0xff]   ;;  %v281_v5 = vld [vmem:[%s408_s0 + $0x10] sm:$0xff]  }
   0x2   :  { %v277_v1 = vld [vmem:[%s408_s0] sm:$0xff]   ;;  %256 = vmatprep.subr.bf16.mxu0 %v276_v0  ;;  %274 = vmatprep.subr.bf16.mxu1 %v276_v0  ;;  %v280_v4 = vld [vmem:[%s408_s0 + $0x28] sm:$0xff]   ;;  %v282_v6 = vld [vmem:[%s408_s0 + $0x30] sm:$0xff]  }
   0x3   :  { %v278_v2 = vld [vmem:[%s408_s0 + $0x20] sm:$0xff]   ;;  %257 = vmatpush3.bf16.msra.mxu0 %v276_v0  ;;  %275 = vmatpush3.bf16.msra.mxu1 %v276_v0  ;;  %v283_v7 = vld [vmem:[%s408_s0 + $0x18] sm:$0xff]  }
   0x4   :  { %258 = vmatprep.mubr.msk.bf16.mxu0 %vm86_vm0, %v277_v1  ;;  %266 = vmatprep.mubr.msk.bf16.mxu1 %vm86_vm0, %v278_v2  ;;  %v284_v8 = vld [vmem:[%s408_s0 + $0x38] sm:$0xff]   ;;  %v229_v9 = vld [vmem:[%s409_s2] ss:$0 sm:$0xff] }
   0x6   :  { %259 = vmatmul.mubr.msk.bf16.vlgmr.msra.gmra.mrb[0].mxu0 %vm86_vm0, %v279_v3  ;;  %267 = vmatmul.mubr.msk.bf16.vlgmr.msra.gmra.mrb[0].mxu1 %vm86_vm0, %v280_v4 }
   0x7   :  { %262 = vmatprep.mubr.msk.bf16.mxu0 %vm86_vm0, %v281_v5  ;;  %270 = vmatprep.mubr.msk.bf16.mxu1 %vm86_vm0, %v282_v6 }
   0xe   :  { %263 = vmatmul.mubr.msk.bf16.gmra.mrb[4].mxu0 %vm86_vm0, %v283_v7  ;;  %271 = vmatmul.mubr.msk.bf16.gmra.mrb[4].mxu1 %vm86_vm0, %v284_v8 }
  0xd9   :  { %v260_v10 = vpop.f32.mrb[0].mxu0  ;;  %v268_v11 = vpop.f32.mrb[0].mxu1 }
  0xda   :  { %v154_v12 = vadd.f32 %v260_v10, %v229_v9  ;;  %v186_v13 = vadd.f32 %v268_v11, %v229_v9  ;;  %v145_v14 = vpop.f32.mrb[1].mxu0  ;;  %v177_v15 = vpop.f32.mrb[1].mxu1 }
  0xdb   :  { %v146_v16 = vadd.f32 %v229_v9, %v145_v14  ;;  %v178_v17 = vadd.f32 %v229_v9, %v177_v15  ;;  %v261_v18 = vpop.f32.mrb[2].mxu0  ;;  %v269_v19 = vpop.f32.mrb[2].mxu1 }
  0xdc   :  { %211 = vst.msk [vmem:[%s410_s3 + $0x10] sm:$0xff] %vm208_vm1, %v154_v12  ;;  %219 = vst.msk [vmem:[%s410_s3 + $0x50] sm:$0xff] %vm208_vm1, %v186_v13  ;;  %v157_v20 = vadd.f32 %v261_v18, %v229_v9  ;;  %v189_v21 = vadd.f32 %v269_v19, %v229_v9  ;;  %v148_v22 = vpop.f32.mrb[3].mxu0  ;;  %v180_v23 = vpop.f32.mrb[3].mxu1 }
  0xdd   :  { %209 = vst.msk [vmem:[%s410_s3] sm:$0xff] %vm208_vm1, %v146_v16  ;;  %217 = vst.msk [vmem:[%s410_s3 + $0x40] sm:$0xff] %vm208_vm1, %v178_v17  ;;  %v149_v24 = vadd.f32 %v229_v9, %v148_v22  ;;  %v181_v25 = vadd.f32 %v229_v9, %v180_v23 }
  0xde   :  { %212 = vst.msk [vmem:[%s410_s3 + $0x18] sm:$0xff] %vm208_vm1, %v157_v20  ;;  %220 = vst.msk [vmem:[%s410_s3 + $0x58] sm:$0xff] %vm208_vm1, %v189_v21 }
  0xdf   :  { %210 = vst.msk [vmem:[%s410_s3 + $0x8] sm:$0xff] %vm208_vm1, %v149_v24  ;;  %218 = vst.msk [vmem:[%s410_s3 + $0x48] sm:$0xff] %vm208_vm1, %v181_v25 }
  0xe1   :  { %v264_v26 = vpop.f32.mrb[4].mxu0  ;;  %v272_v27 = vpop.f32.mrb[4].mxu1 }
  0xe2   :  { %v170_v28 = vadd.f32 %v264_v26, %v229_v9  ;;  %v202_v29 = vadd.f32 %v272_v27, %v229_v9  ;;  %v161_v30 = vpop.f32.mrb[5].mxu0  ;;  %v193_v31 = vpop.f32.mrb[5].mxu1 }
  0xe3   :  { %v162_v32 = vadd.f32 %v229_v9, %v161_v30  ;;  %v194_v33 = vadd.f32 %v229_v9, %v193_v31  ;;  %v265_v34 = vpop.f32.mrb[6].mxu0  ;;  %v273_v35 = vpop.f32.mrb[6].mxu1 }
  0xe4   :  { %215 = vst.msk [vmem:[%s410_s3 + $0x30] sm:$0xff] %vm208_vm1, %v170_v28  ;;  %223 = vst.msk [vmem:[%s410_s3 + $0x70] sm:$0xff] %vm208_vm1, %v202_v29  ;;  %v173_v36 = vadd.f32 %v265_v34, %v229_v9  ;;  %v205_v37 = vadd.f32 %v273_v35, %v229_v9  ;;  %v164_v38 = vpop.f32.mrb[7].mxu0  ;;  %v196_v39 = vpop.f32.mrb[7].mxu1 }
  0xe5   :  { %213 = vst.msk [vmem:[%s410_s3 + $0x20] sm:$0xff] %vm208_vm1, %v162_v32  ;;  %221 = vst.msk [vmem:[%s410_s3 + $0x60] sm:$0xff] %vm208_vm1, %v194_v33  ;;  %v165_v40 = vadd.f32 %v229_v9, %v164_v38  ;;  %v197_v41 = vadd.f32 %v229_v9, %v196_v39 }
  0xe6   :  { %216 = vst.msk [vmem:[%s410_s3 + $0x38] sm:$0xff] %vm208_vm1, %v173_v36  ;;  %224 = vst.msk [vmem:[%s410_s3 + $0x78] sm:$0xff] %vm208_vm1, %v205_v37 }
  0xe7   :  { %214 = vst.msk [vmem:[%s410_s3 + $0x28] sm:$0xff] %vm208_vm1, %v165_v40  ;;  %222 = vst.msk [vmem:[%s410_s3 + $0x68] sm:$0xff] %vm208_vm1, %v197_v41 }

// kernel: runet_forward.80
= control target key start
LH: loop header
LB: loop body
LE: loop exit
PB: predicated region body
PF: predicated region fallthrough
CT: control target
= control target key end

     0   :  { %vm311_vm0 = vcmask 261120   ;;  %vm551_vm1 = vcmask 122880   ;;  %v874_v42 = vmov 0.0   ;;  %vm530_vm2 = vcmask 130048   ;;  %s1164_s1 = inlined_call_operand.vmem [shape: bf16[288,16], index: 1, kind: input, shape index: {}]   ;;  %s1165_s0 = inlined_call_operand.vmem [shape: bf16[128,288], index: 0, kind: input, shape index: {}]   ;;  %s1166_s3 = inlined_call_operand.vmem [shape: f32[1,16], index: 3, kind: output, shape index: {1}]   ;;  %s1167_s4 = inlined_call_operand.vmem [shape: f32[1,16], index: 4, kind: output, shape index: {2}]   ;;  %s1168_s2 = inlined_call_operand.vmem [shape: f32[128,16], index: 2, kind: output, shape index: {0}]  }
   0x1   :  { %v824_v0 = vld [vmem:[%s1164_s1 + $0x40] sm:$0xff]   ;;  %v826_v2 = vld [vmem:[%s1164_s1 + $0x48] sm:$0xff]   ;;  %v828_v4 = vld [vmem:[%s1164_s1 + $0x50] sm:$0xff]   ;;  %552 = vst.msk [vmem:[%s1166_s3] sm:$0x1] %vm551_vm1, %v874_v42 }
   0x2   :  { %v825_v1 = vld [vmem:[%s1164_s1] sm:$0xff]   ;;  %713 = vmatprep.subr.bf16.mxu0 %v824_v0  ;;  %807 = vmatprep.subr.bf16.mxu1 %v824_v0  ;;  %v827_v3 = vld [vmem:[%s1164_s1 + $0x8] sm:$0xff]   ;;  %v829_v5 = vld [vmem:[%s1164_s1 + $0x10] sm:$0xff]   ;;  %553 = vst.msk [vmem:[%s1167_s4] sm:$0x1] %vm551_vm1, %v874_v42 }
   0x3   :  { %714 = vmatpush3.bf16.msra.mxu0 %v825_v1  ;;  %815 = vmatpush3.bf16.msra.mxu1 %v825_v1  ;;  %v830_v6 = vld [vmem:[%s1164_s1 + $0x58] sm:$0xff]   ;;  %v832_v8 = vld [vmem:[%s1164_s1 + $0x60] sm:$0xff]   ;;  %v834_v10 = vld [vmem:[%s1164_s1 + $0x68] sm:$0xff]  }
   0x4   :  { %715 = vmatprep.subr.bf16.mxu0 %v826_v2  ;;  %808 = vmatprep.subr.bf16.mxu1 %v826_v2  ;;  %v831_v7 = vld [vmem:[%s1164_s1 + $0x18] sm:$0xff]   ;;  %v833_v9 = vld [vmem:[%s1164_s1 + $0x20] sm:$0xff]   ;;  %v835_v13 = vld [vmem:[%s1164_s1 + $0x28] sm:$0xff]  }
   0x5   :  { %v842_v11 = vld [vmem:[%s1165_s0 + $0x4] ss:$12 sps:$4 sm:$0xff]   ;;  %v845_v12 = vld [vmem:[%s1165_s0 + $0x94] ss:$12 sps:$4 sm:$0xff]   ;;  %v838_v16 = vld [vmem:[%s1164_s1 + $0x78] sm:$0xff]  }
   0x6   :  { %v836_v14 = vld [vmem:[%s1164_s1 + $0x70] sm:$0xff]   ;;  %368 = vmatprep.mubr.bf16.mxu0 %v842_v11  ;;  %416 = vmatprep.mubr.bf16.mxu1 %v845_v12  ;;  %v839_v17 = vld [vmem:[%s1164_s1 + $0x38] sm:$0xff]   ;;  %v840_v18 = vld [vmem:[%s1165_s0] ss:$12 sps:$4 sm:$0xff]  }
   0x7   :  { %716 = vmatpush3.bf16.msra.mxu0 %v827_v3  ;;  %816 = vmatpush3.bf16.msra.mxu1 %v827_v3  ;;  %v837_v15 = vld [vmem:[%s1164_s1 + $0x30] sm:$0xff]   ;;  %v846_v19 = vld [vmem:[%s1164_s1 + $0x80] sm:$0xff]   ;;  %v847_v21 = vld [vmem:[%s1165_s0 + $0x1c] ss:$12 sps:$4 sm:$0xff]  }
   0x8   :  { %717 = vmatprep.subr.bf16.mxu0 %v828_v4  ;;  %809 = vmatprep.subr.bf16.mxu1 %v828_v4  ;;  %v843_v20 = vld [vmem:[%s1165_s0 + $0x90] ss:$12 sps:$4 sm:$0xff]   ;;  %v849_v22 = vld [vmem:[%s1165_s0 + $0xac] ss:$12 sps:$4 sm:$0xff]   ;;  %v852_v25 = vld [vmem:[%s1165_s0 + $0xa8] ss:$12 sps:$4 sm:$0xff]  }
   0x9   :  { %v853_v23 = vld [vmem:[%s1164_s1 + $0x88] sm:$0xff]   ;;  %v851_v24 = vld [vmem:[%s1165_s0 + $0x18] ss:$12 sps:$4 sm:$0xff]   ;;  %v854_v26 = vld [vmem:[%s1165_s0 + $0x34] ss:$12 sps:$4 sm:$0xff]  }
   0xa   :  { %v856_v27 = vld [vmem:[%s1165_s0 + $0x8] ss:$12 sps:$4 sm:$0xff]   ;;  %v857_v28 = vld [vmem:[%s1165_s0 + $0x30] ss:$12 sps:$4 sm:$0xff]   ;;  %v858_v29 = vld [vmem:[%s1165_s0 + $0x20] ss:$12 sps:$4 sm:$0xff]  }
   0xb   :  { %718 = vmatpush3.bf16.msra.mxu0 %v829_v5  ;;  %817 = vmatpush3.bf16.msra.mxu1 %v829_v5  ;;  %v859_v30 = vld [vmem:[%s1165_s0 + $0x4c] ss:$12 sps:$4 sm:$0xff]   ;;  %v862_v32 = vld [vmem:[%s1165_s0 + $0x48] ss:$12 sps:$4 sm:$0xff]   ;;  %v863_v33 = vld [vmem:[%s1165_s0 + $0x50] ss:$12 sps:$4 sm:$0xff]  }
   0xc   :  { %719 = vmatprep.subr.bf16.mxu0 %v830_v6  ;;  %810 = vmatprep.subr.bf16.mxu1 %v830_v6  ;;  %v861_v31 = vld [vmem:[%s1165_s0 + $0x38] ss:$12 sps:$4 sm:$0xff]   ;;  %v866_v35 = vld [vmem:[%s1165_s0 + $0x68] ss:$12 sps:$4 sm:$0xff]   ;;  %v867_v36 = vld [vmem:[%s1165_s0 + $0x60] ss:$12 sps:$4 sm:$0xff]  }
   0xd   :  { %v864_v34 = vld [vmem:[%s1165_s0 + $0x64] ss:$12 sps:$4 sm:$0xff]   ;;  %v868_v37 = vld [vmem:[%s1165_s0 + $0x80] ss:$12 sps:$4 sm:$0xff]   ;;  %v869_v38 = vld [vmem:[%s1165_s0 + $0x7c] ss:$12 sps:$4 sm:$0xff]  }
   0xe   :  { %v871_v39 = vld [vmem:[%s1165_s0 + $0x98] ss:$12 sps:$4 sm:$0xff]   ;;  %v873_v41 = vld [vmem:[%s1165_s0 + $0xb0] ss:$12 sps:$4 sm:$0xff]  }
   0xf   :  { %720 = vmatpush3.bf16.msra.mxu0 %v831_v7  ;;  %818 = vmatpush3.bf16.msra.mxu1 %v831_v7  ;;  %v872_v40 = vld [vmem:[%s1165_s0 + $0x78] ss:$12 sps:$4 sm:$0xff]  }
  0x10   :  { %721 = vmatprep.subr.bf16.mxu0 %v832_v8  ;;  %811 = vmatprep.subr.bf16.mxu1 %v832_v8 }
  0x13   :  { %722 = vmatpush3.bf16.msra.mxu0 %v833_v9  ;;  %819 = vmatpush3.bf16.msra.mxu1 %v833_v9 }
  0x14   :  { %723 = vmatprep.subr.bf16.mxu0 %v834_v10  ;;  %812 = vmatprep.subr.bf16.mxu1 %v834_v10 }
  0x17   :  { %724 = vmatpush3.bf16.msra.mxu0 %v835_v13  ;;  %820 = vmatpush3.bf16.msra.mxu1 %v835_v13 }
  0x18   :  { %725 = vmatprep.subr.bf16.mxu0 %v836_v14  ;;  %813 = vmatprep.subr.bf16.mxu1 %v836_v14 }
  0x1b   :  { %726 = vmatpush3.bf16.msra.mxu0 %v837_v15  ;;  %821 = vmatpush3.bf16.msra.mxu1 %v837_v15 }
  0x1c   :  { %727 = vmatprep.subr.bf16.mxu0 %v838_v16  ;;  %814 = vmatprep.subr.bf16.mxu1 %v838_v16 }
  0x1f   :  { %728 = vmatpush3.bf16.msra.mxu0 %v839_v17  ;;  %822 = vmatpush3.bf16.msra.mxu1 %v839_v17 }
  0x20   :  { %787 = vmatprep.subr.bf16.mxu1 %v846_v19 }
  0x22   :  { %369 = vmatmul.mubr.bf16.vlgmr.msra.gmra.mrb[0].mxu0 %v840_v18  ;;  %417 = vmatmul.mubr.bf16.vlgmr.msra.gmra.mrb[0].mxu1 %v843_v20 }
  0x23   :  { %788 = vmatpush3.bf16.msra.mxu1 %v846_v19  ;;  %376 = vmatprep.mubr.bf16.mxu0 %v847_v21 }
  0x24   :  { %424 = vmatprep.mubr.bf16.mxu1 %v849_v22  ;;  %789 = vmatprep.subr.bf16.mxu1 %v853_v23 }
  0x27   :  { %790 = vmatpush3.bf16.msra.mxu1 %v853_v23 }
  0x2a   :  { %377 = vmatmul.mubr.bf16.gmra.mrb[4].mxu0 %v851_v24  ;;  %425 = vmatmul.mubr.bf16.gmra.mrb[4].mxu1 %v852_v25 }
  0x2b   :  { %384 = vmatprep.mubr.bf16.mxu0 %v854_v26  ;;  %791 = vmatprep.mubr.msk.bf16.mxu1 %vm311_vm0, %v856_v27 }
  0x32   :  { %385 = vmatmul.mubr.bf16.gmra.mrb[8].mxu0 %v857_v28  ;;  %792 = vmatmul.mubr.msk.bf16.vlgmr.msra.gmra.mrb[8].mxu1 %vm311_vm0, %v858_v29 }
  0x33   :  { %392 = vmatprep.mubr.bf16.mxu0 %v859_v30  ;;  %795 = vmatprep.mubr.msk.bf16.mxu1 %vm311_vm0, %v861_v31 }
  0x3a   :  { %393 = vmatmul.mubr.bf16.gmra.mrb[12].mxu0 %v862_v32  ;;  %796 = vmatmul.mubr.msk.bf16.gmra.mrb[12].mxu1 %vm311_vm0, %v863_v33 }
  0x3b   :  { %400 = vmatprep.mubr.bf16.mxu0 %v864_v34  ;;  %799 = vmatprep.mubr.msk.bf16.mxu1 %vm311_vm0, %v866_v35 }
  0x42   :  { %401 = vmatmul.mubr.bf16.gmra.mrb[16].mxu0 %v867_v36  ;;  %800 = vmatmul.mubr.msk.bf16.gmra.mrb[16].mxu1 %vm311_vm0, %v868_v37 }
  0x43   :  { %408 = vmatprep.mubr.bf16.mxu0 %v869_v38  ;;  %803 = vmatprep.mubr.msk.bf16.mxu1 %vm311_vm0, %v871_v39 }
  0x4a   :  { %409 = vmatmul.mubr.bf16.gmra.mrb[20].mxu0 %v872_v40  ;;  %804 = vmatmul.mubr.msk.bf16.gmra.mrb[20].mxu1 %vm311_vm0, %v873_v41 }
  0xf5   :  { %v729_v43 = vpop.f32.mrb[0].mxu0  ;;  %v765_v44 = vpop.f32.mrb[0].mxu1 }
  0xf6   :  { %v730_v45 = vpop.f32.mrb[1].mxu0  ;;  %v766_v46 = vpop.f32.mrb[1].mxu1 }
  0xf7   :  { %v731_v47 = vadd.f32 %v730_v45, %v729_v43  ;;  %v732_v48 = vpop.f32.mrb[2].mxu0  ;;  %v1042_v49 = vadd.f32 %v766_v46, %v765_v44  ;;  %v768_v50 = vpop.f32.mrb[2].mxu1 }
  0xf8   :  { %v733_v51 = vpop.f32.mrb[3].mxu0  ;;  %v769_v52 = vpop.f32.mrb[3].mxu1 }
  0xf9   :  { %v734_v53 = vadd.f32 %v733_v51, %v732_v48  ;;  %v1044_v54 = vadd.f32 %v769_v52, %v768_v50 }
  0xfd   :  { %v735_v55 = vpop.f32.mrb[4].mxu0  ;;  %v771_v56 = vpop.f32.mrb[4].mxu1 }
  0xfe   :  { %v736_v57 = vpop.f32.mrb[5].mxu0  ;;  %v772_v58 = vpop.f32.mrb[5].mxu1 }
  0xff   :  { %v737_v59 = vadd.f32 %v736_v57, %v735_v55  ;;  %v738_v60 = vpop.f32.mrb[6].mxu0  ;;  %v1046_v61 = vadd.f32 %v772_v58, %v771_v56  ;;  %v774_v62 = vpop.f32.mrb[6].mxu1 }
 0x100   :  { %v739_v63 = vpop.f32.mrb[7].mxu0  ;;  %v775_v0 = vpop.f32.mrb[7].mxu1 }
 0x101   :  { %v740_v1 = vadd.f32 %v739_v63, %v738_v60  ;;  %v1048_v2 = vadd.f32 %v775_v0, %v774_v62 }
 0x105   :  { %v741_v3 = vpop.f32.mrb[8].mxu0  ;;  %v793_v4 = vpop.f32.mrb[8].mxu1 }
 0x106   :  { %v476_v5 = vadd.f32 %v793_v4, %v737_v59  ;;  %v742_v6 = vpop.f32.mrb[9].mxu0  ;;  %v467_v7 = vpop.f32.mrb[9].mxu1 }
 0x107   :  { %v743_v8 = vadd.f32 %v742_v6, %v741_v3  ;;  %v468_v9 = vadd.f32 %v731_v47, %v467_v7  ;;  %v744_v10 = vpop.f32.mrb[10].mxu0  ;;  %v794_v11 = vpop.f32.mrb[10].mxu1 }
 0x108   :  { %533 = vst.msk [vmem:[%s1168_s2 + $0x10] sm:$0xff] %vm530_vm2, %v476_v5  ;;  %v479_v12 = vadd.f32 %v794_v11, %v740_v1  ;;  %v745_v13 = vpop.f32.mrb[11].mxu0  ;;  %v470_v14 = vpop.f32.mrb[11].mxu1  ;;  %v598_v18 = vmul.f32 %v476_v5, %v476_v5  ;;  %v558_v24 = vsel %vm530_vm2, %v476_v5, 0.0 }
 0x109   :  { %531 = vst.msk [vmem:[%s1168_s2] sm:$0xff] %vm530_vm2, %v468_v9  ;;  %v596_v15 = vmul.f32 %v468_v9, %v468_v9  ;;  %v746_v16 = vadd.f32 %v745_v13, %v744_v10  ;;  %v471_v17 = vadd.f32 %v734_v53, %v470_v14  ;;  %v555_v19 = vsel %vm530_vm2, %v468_v9, 0.0 }
 0x10a   :  { %534 = vst.msk [vmem:[%s1168_s2 + $0x18] sm:$0xff] %vm530_vm2, %v479_v12  ;;  %v599_v22 = vmul.f32 %v479_v12, %v479_v12  ;;  %v615_v33 = vsel %vm530_vm2, %v598_v18, 0.0  ;;  %v560_v34 = vsel %vm530_vm2, %v479_v12, 0.0 }
 0x10b   :  { %532 = vst.msk [vmem:[%s1168_s2 + $0x8] sm:$0xff] %vm530_vm2, %v471_v17  ;;  %v556_v20 = vsel %vm530_vm2, %v471_v17, 0.0  ;;  %v597_v21 = vmul.f32 %v471_v17, %v471_v17  ;;  %v612_v25 = vsel %vm530_vm2, %v596_v15, 0.0 }
 0x10c   :  { %v557_v23 = vadd.f32 %v556_v20, %v555_v19  ;;  %v617_v39 = vsel %vm530_vm2, %v599_v22, 0.0 }
 0x10d   :  { %v613_v26 = vsel %vm530_vm2, %v597_v21, 0.0  ;;  %v747_v27 = vpop.f32.mrb[12].mxu0  ;;  %v797_v28 = vpop.f32.mrb[12].mxu1 }
 0x10e   :  { %v559_v29 = vadd.f32 %v558_v24, %v557_v23  ;;  %v614_v30 = vadd.f32 %v613_v26, %v612_v25  ;;  %v748_v31 = vpop.f32.mrb[13].mxu0  ;;  %v483_v32 = vpop.f32.mrb[13].mxu1 }
 0x10f   :  { %v749_v35 = vadd.f32 %v748_v31, %v747_v27  ;;  %v484_v36 = vadd.f32 %v743_v8, %v483_v32  ;;  %v750_v37 = vpop.f32.mrb[14].mxu0  ;;  %v798_v38 = vpop.f32.mrb[14].mxu1 }
 0x110   :  { %v616_v40 = vadd.f32 %v615_v33, %v614_v30  ;;  %v561_v41 = vadd.f32 %v560_v34, %v559_v29  ;;  %v751_v42 = vpop.f32.mrb[15].mxu0  ;;  %v486_v43 = vpop.f32.mrb[15].mxu1 }
 0x111   :  { %v492_v44 = vadd.f32 %v797_v28, %v749_v35  ;;  %535 = vst.msk [vmem:[%s1168_s2 + $0x20] sm:$0xff] %vm530_vm2, %v484_v36  ;;  %v562_v45 = vsel %vm530_vm2, %v484_v36, 0.0  ;;  %v600_v46 = vmul.f32 %v484_v36, %v484_v36  ;;  %v752_v47 = vadd.f32 %v751_v42, %v750_v37 }
 0x112   :  { %v563_v48 = vadd.f32 %v562_v45, %v561_v41  ;;  %v618_v50 = vadd.f32 %v617_v39, %v616_v40  ;;  %v487_v51 = vadd.f32 %v746_v16, %v486_v43 }
 0x113   :  { %537 = vst.msk [vmem:[%s1168_s2 + $0x30] sm:$0xff] %vm530_vm2, %v492_v44  ;;  %v619_v52 = vsel %vm530_vm2, %v600_v46, 0.0  ;;  %v495_v53 = vadd.f32 %v798_v38, %v752_v47  ;;  %v602_v55 = vmul.f32 %v492_v44, %v492_v44  ;;  %v566_v63 = vsel %vm530_vm2, %v492_v44, 0.0 }
 0x114   :  { %v620_v56 = vadd.f32 %v619_v52, %v618_v50  ;;  %536 = vst.msk [vmem:[%s1168_s2 + $0x28] sm:$0xff] %vm530_vm2, %v487_v51  ;;  %v564_v57 = vsel %vm530_vm2, %v487_v51, 0.0  ;;  %v601_v58 = vmul.f32 %v487_v51, %v487_v51 }
 0x115   :  { %538 = vst.msk [vmem:[%s1168_s2 + $0x38] sm:$0xff] %vm530_vm2, %v495_v53  ;;  %v565_v59 = vadd.f32 %v564_v57, %v563_v48  ;;  %v753_v60 = vpop.f32.mrb[16].mxu0  ;;  %v801_v62 = vpop.f32.mrb[16].mxu1  ;;  %v603_v0 = vmul.f32 %v495_v53, %v495_v53  ;;  %v623_v10 = vsel %vm530_vm2, %v602_v55, 0.0  ;;  %v568_v11 = vsel %vm530_vm2, %v495_v53, 0.0 }
 0x116   :  { %v621_v1 = vsel %vm530_vm2, %v601_v58, 0.0  ;;  %v754_v3 = vpop.f32.mrb[17].mxu0  ;;  %v499_v4 = vpop.f32.mrb[17].mxu1 }
 0x117   :  { %v567_v5 = vadd.f32 %v566_v63, %v565_v59  ;;  %v622_v6 = vadd.f32 %v621_v1, %v620_v56  ;;  %v755_v7 = vadd.f32 %v754_v3, %v753_v60  ;;  %v756_v8 = vpop.f32.mrb[18].mxu0  ;;  %v802_v9 = vpop.f32.mrb[18].mxu1  ;;  %v625_v18 = vsel %vm530_vm2, %v603_v0, 0.0 }
 0x118   :  { %v757_v12 = vpop.f32.mrb[19].mxu0  ;;  %v502_v13 = vpop.f32.mrb[19].mxu1 }
 0x119   :  { %v624_v14 = vadd.f32 %v623_v10, %v622_v6  ;;  %v758_v15 = vadd.f32 %v757_v12, %v756_v8  ;;  %v500_v16 = vadd.f32 %v755_v7, %v499_v4  ;;  %v569_v17 = vadd.f32 %v568_v11, %v567_v5 }
 0x11b   :  { %539 = vst.msk [vmem:[%s1168_s2 + $0x40] sm:$0xff] %vm530_vm2, %v500_v16  ;;  %v570_v19 = vsel %vm530_vm2, %v500_v16, 0.0  ;;  %v604_v20 = vmul.f32 %v500_v16, %v500_v16  ;;  %v626_v21 = vadd.f32 %v625_v18, %v624_v14  ;;  %v503_v22 = vadd.f32 %v758_v15, %v502_v13 }
 0x11c   :  { %v571_v23 = vadd.f32 %v570_v19, %v569_v17 }
 0x11d   :  { %v627_v24 = vsel %vm530_vm2, %v604_v20, 0.0  ;;  %540 = vst.msk [vmem:[%s1168_s2 + $0x48] sm:$0xff] %vm530_vm2, %v503_v22  ;;  %v572_v25 = vsel %vm530_vm2, %v503_v22, 0.0  ;;  %v605_v26 = vmul.f32 %v503_v22, %v503_v22  ;;  %v759_v27 = vpop.f32.mrb[20].mxu0  ;;  %v805_v28 = vpop.f32.mrb[20].mxu1 }
 0x11e   :  { %v628_v29 = vadd.f32 %v627_v24, %v626_v21  ;;  %v573_v30 = vadd.f32 %v572_v25, %v571_v23  ;;  %v524_v31 = vadd.f32 %v805_v28, %v1046_v61  ;;  %v760_v32 = vpop.f32.mrb[21].mxu0  ;;  %v515_v33 = vpop.f32.mrb[21].mxu1  ;;  %v554_v22 = vld [vmem:[%s1166_s3] sm:$0x1] }
 0x11f   :  { %v629_v34 = vsel %vm530_vm2, %v605_v26, 0.0  ;;  %v761_v35 = vadd.f32 %v760_v32, %v759_v27  ;;  %v516_v36 = vadd.f32 %v1042_v49, %v515_v33  ;;  %v762_v37 = vpop.f32.mrb[22].mxu0  ;;  %v806_v38 = vpop.f32.mrb[22].mxu1  ;;  %v595_v25 = vld [vmem:[%s1167_s4] sm:$0x1] }
 0x120   :  { %v630_v39 = vadd.f32 %v629_v34, %v628_v29  ;;  %545 = vst.msk [vmem:[%s1168_s2 + $0x70] sm:$0xff] %vm530_vm2, %v524_v31  ;;  %v527_v40 = vadd.f32 %v806_v38, %v1048_v2  ;;  %v763_v41 = vpop.f32.mrb[23].mxu0  ;;  %v518_v42 = vpop.f32.mrb[23].mxu1  ;;  %v610_v59 = vmul.f32 %v524_v31, %v524_v31  ;;  %v582_v1 = vsel %vm530_vm2, %v524_v31, 0.0 }
 0x121   :  { %v508_v61 = vadd.f32 %v801_v62, %v761_v35  ;;  %543 = vst.msk [vmem:[%s1168_s2 + $0x60] sm:$0xff] %vm530_vm2, %v516_v36  ;;  %v764_v43 = vadd.f32 %v763_v41, %v762_v37  ;;  %v519_v49 = vadd.f32 %v1044_v54, %v518_v42  ;;  %v608_v48 = vmul.f32 %v516_v36, %v516_v36 }
 0x122   :  { %546 = vst.msk [vmem:[%s1168_s2 + $0x78] sm:$0xff] %vm530_vm2, %v527_v40  ;;  %v578_v53 = vsel %vm530_vm2, %v516_v36, 0.0  ;;  %v611_v3 = vmul.f32 %v527_v40, %v527_v40  ;;  %v639_v7 = vsel %vm530_vm2, %v610_v59, 0.0  ;;  %v584_v8 = vsel %vm530_vm2, %v527_v40, 0.0 }
 0x123   :  { %541 = vst.msk [vmem:[%s1168_s2 + $0x50] sm:$0xff] %vm530_vm2, %v508_v61  ;;  %v574_v2 = vsel %vm530_vm2, %v508_v61, 0.0  ;;  %v606_v44 = vmul.f32 %v508_v61, %v508_v61  ;;  %v511_v45 = vadd.f32 %v802_v9, %v764_v43  ;;  %544 = vst.msk [vmem:[%s1168_s2 + $0x68] sm:$0xff] %vm530_vm2, %v519_v49  ;;  %v609_v56 = vmul.f32 %v519_v49, %v519_v49 }
 0x124   :  { %v575_v46 = vadd.f32 %v574_v2, %v573_v30  ;;  %v635_v60 = vsel %vm530_vm2, %v608_v48, 0.0  ;;  %v580_v62 = vsel %vm530_vm2, %v519_v49, 0.0  ;;  %v641_v11 = vsel %vm530_vm2, %v611_v3, 0.0 }
 0x125   :  { %v631_v47 = vsel %vm530_vm2, %v606_v44, 0.0  ;;  %542 = vst.msk [vmem:[%s1168_s2 + $0x58] sm:$0xff] %vm530_vm2, %v511_v45  ;;  %v576_v54 = vsel %vm530_vm2, %v511_v45, 0.0  ;;  %v607_v50 = vmul.f32 %v511_v45, %v511_v45  ;;  %v637_v4 = vsel %vm530_vm2, %v609_v56, 0.0 }
 0x126   :  { %v632_v51 = vadd.f32 %v631_v47, %v630_v39  ;;  %v577_v52 = vadd.f32 %v576_v54, %v575_v46 }
 0x127   :  { %v633_v55 = vsel %vm530_vm2, %v607_v50, 0.0 }
 0x128   :  { %v634_v57 = vadd.f32 %v633_v55, %v632_v51  ;;  %v579_v58 = vadd.f32 %v578_v53, %v577_v52 }
 0x12a   :  { %v581_v63 = vadd.f32 %v580_v62, %v579_v58  ;;  %v636_v0 = vadd.f32 %v635_v60, %v634_v57 }
 0x12c   :  { %v583_v5 = vadd.f32 %v582_v1, %v581_v63  ;;  %v638_v6 = vadd.f32 %v637_v4, %v636_v0 }
 0x12e   :  { %v585_v9 = vadd.f32 %v584_v8, %v583_v5  ;;  %v640_v10 = vadd.f32 %v639_v7, %v638_v6 }
 0x130   :  { %v586_v12 = vrot.slane %v585_v9, 4  ;;  %v642_v13 = vadd.f32 %v641_v11, %v640_v10 }
 0x132   :  { %v587_v14 = vadd.f32 %v586_v12, %v585_v9  ;;  %v643_v15 = vrot.slane %v642_v13, 4 }
 0x134   :  { %v588_v16 = vrot.slane %v587_v14, 2  ;;  %v644_v17 = vadd.f32 %v643_v15, %v642_v13 }
 0x136   :  { %v589_v18 = vadd.f32 %v588_v16, %v587_v14  ;;  %v645_v19 = vrot.slane %v644_v17, 2 }
 0x138   :  { %v590_v20 = vrot.slane %v589_v18, 1  ;;  %v646_v21 = vadd.f32 %v645_v19, %v644_v17 }
 0x13a   :  { %v591_v23 = vadd.f32 %v590_v20, %v589_v18  ;;  %v647_v24 = vrot.slane %v646_v21, 1 }
 0x13c   :  { %v592_v26 = vadd.f32 %v591_v23, %v554_v22  ;;  %v648_v27 = vadd.f32 %v647_v24, %v646_v21 }
 0x13e   :  { %594 = vst.msk [vmem:[%s1166_s3] sm:$0x1] %vm551_vm1, %v592_v26  ;;  %v649_v28 = vadd.f32 %v648_v27, %v595_v25 }
 0x140   :  { %650 = vst.msk [vmem:[%s1167_s4] sm:$0x1] %vm551_vm1, %v649_v28 }

// kernel: runet_forward.85
= control target key start
LH: loop header
LB: loop body
LE: loop exit
PB: predicated region body
PF: predicated region fallthrough
CT: control target
= control target key end

     0   :  { %s1134_s15 = smov 0   ;;  %s1581_s0 = inlined_call_operand.vmem [shape: bf16[512,144], index: 0, kind: input, shape index: {}]   ;;  %s1582_s1 = inlined_call_operand.vmem [shape: bf16[144,8], index: 1, kind: input, shape index: {}]   ;;  %s1583_s2 = inlined_call_operand.vmem [shape: f32[512,8], index: 2, kind: output, shape index: {0}]   ;;  %s1584_s3 = inlined_call_operand.vmem [shape: f32[1,8], index: 3, kind: output, shape index: {1}]   ;;  %s1585_s4 = inlined_call_operand.vmem [shape: f32[1,8], index: 4, kind: output, shape index: {2}]  }
   0x1 LB: > { %s943_s16 = sadd.s32 4294967295, %s1105_s15   ;;  %p947_p0 = scmp.ge.s32.totalorder %s1105_s15, 1  ;;  %s1105_s15 = sphi %s1134_s15, %s15_s15  }
   0x2   : > { %p159_p1 = scmp.lt.s32.totalorder %s1105_s15, 3 }
   0x4   : > { %p160_p2 = pnand %p947_p0, %p159_p1 }
   0x5   : > { %v1042_v0 = vld [vmem:[%s1582_s1] sm:$0xff] (!%p160_p2)   ;;  %v1107_v1 = vmov (!%p160_p2), 0   ;;  %s948_s19 = sshll.u32 (!%p160_p2), %s943_s16, 5  ;;  %v1043_v2 = vld [vmem:[%s1582_s1 + $0x8] sm:$0xff] (!%p160_p2)   ;;  %v1044_v3 = vld [vmem:[%s1582_s1 + $0x10] sm:$0xff] (!%p160_p2)   ;;  %vm448_vm0 = vcmask (!%p160_p2), 130048  }
   0x6   : > { %163 = sbr.rel (%p160_p2) target bundleno = 396 (0x18c), region = 28  ;;  %497 = vmatprep.subr.bf16.mxu0 (!%p160_p2), %v1107_v1  ;;  %1014 = vmatprep.subr.bf16.mxu1 (!%p160_p2), %v1107_v1  ;;  %p187_p3 = scmp.lt.s32.totalorder (!%p160_p2), %s948_s19, 63  ;;  %v1045_v4 = vld [vmem:[%s1582_s1 + $0x18] sm:$0xff] (!%p160_p2)   ;;  %v1046_v7 = vld [vmem:[%s1582_s1 + $0x20] sm:$0xff] (!%p160_p2)   ;;  %v1047_v8 = vld [vmem:[%s1582_s1 + $0x28] sm:$0xff] (!%p160_p2)   ;;  %vm658_vm1 = vcmask (!%p160_p2), 64512  }
   0x7   : > { %498 = vmatpush1.bf16.msra.mxu0 (!%p160_p2), %v1042_v0  ;;  %1023 = vmatpush1.bf16.msra.mxu1 (!%p160_p2), %v1042_v0  ;;  %v1048_v9 = vld [vmem:[%s1582_s1 + $0x30] sm:$0xff] (!%p160_p2)   ;;  %v1049_v10 = vld [vmem:[%s1582_s1 + $0x38] sm:$0xff] (!%p160_p2)   ;;  %v1050_v11 = vld [vmem:[%s1582_s1 + $0x40] sm:$0xff] (!%p160_p2)   ;;  %p1010_p4 = scmp.ne.s32.totalorder (!%p160_p2), %s943_s16, 0 }
   0x8   : > { %499 = vmatprep.subr.bf16.mxu0 (!%p160_p2), %v1107_v1  ;;  %1015 = vmatprep.subr.bf16.mxu1 (!%p160_p2), %v1107_v1 }
   0xb   : > { %500 = vmatpush1.bf16.msra.mxu0 (!%p160_p2), %v1043_v2  ;;  %1024 = vmatpush1.bf16.msra.mxu1 (!%p160_p2), %v1043_v2 }
   0xc   : > { %501 = vmatprep.subr.bf16.mxu0 (!%p160_p2), %v1107_v1  ;;  %1016 = vmatprep.subr.bf16.mxu1 (!%p160_p2), %v1107_v1 }
   0xd   : > { %s1587_s19 = smov (!%p187_p3, %s948_s19), 63  ;;  %vm695_vm2 = vcmask (!%p1010_p4), 57344  }
   0xe   : > { %s1013_s24 = sshll.u32 %s1587_s19, 3 }
   0xf   : > { %s1161_s27 = scalar_lea.vmem %s1581_s0, %s1013_s24  ;;  %502 = vmatpush1.bf16.msra.mxu0 %v1044_v3  ;;  %1025 = vmatpush1.bf16.msra.mxu1 %v1044_v3  ;;  %s1234_s18 = scalar_lea.vmem %s1583_s2, %s1013_s24 }
  0x10   : > { %v1053_v5 = vld [vmem:[%s1161_s27 + $0x4] ss:$8 sps:$4 sm:$0xff]   ;;  %503 = vmatprep.subr.bf16.mxu0 %v1107_v1  ;;  %1017 = vmatprep.subr.bf16.mxu1 %v1107_v1  ;;  %v1051_v12 = vld [vmem:[%s1161_s27] ss:$8 sps:$4 sm:$0xff]   ;;  %v1057_v14 = vld [vmem:[%s1161_s27 + $0x14] ss:$8 sps:$4 sm:$0xff]  }
  0x11   : > { %v1056_v6 = vld [vmem:[%s1161_s27 + $0x84] ss:$8 sps:$4 sm:$0xff]   ;;  %994 = vmatprep.mubr.msk.bf16.mxu0 %vm448_vm0, %v1053_v5  ;;  %v1054_v13 = vld [vmem:[%s1161_s27 + $0x80] ss:$8 sps:$4 sm:$0xff]   ;;  %v1059_v15 = vld [vmem:[%s1161_s27 + $0x94] ss:$8 sps:$4 sm:$0xff]  }
  0x12   : > { %1002 = vmatprep.mubr.msk.bf16.mxu1 %vm448_vm0, %v1056_v6  ;;  %v1061_v16 = vld [vmem:[%s1161_s27 + $0x10] ss:$8 sps:$4 sm:$0xff]   ;;  %v1063_v18 = vld [vmem:[%s1161_s27 + $0x24] ss:$8 sps:$4 sm:$0xff]   ;;  %v1067_v20 = vld [vmem:[%s1161_s27 + $0x20] ss:$8 sps:$4 sm:$0xff]  }
  0x13   : > { %504 = vmatpush1.bf16.msra.mxu0 %v1045_v4  ;;  %1026 = vmatpush1.bf16.msra.mxu1 %v1045_v4  ;;  %v1062_v17 = vld [vmem:[%s1161_s27 + $0x90] ss:$8 sps:$4 sm:$0xff]   ;;  %v1065_v19 = vld [vmem:[%s1161_s27 + $0xa4] ss:$8 sps:$4 sm:$0xff]   ;;  %v1068_v21 = vld [vmem:[%s1161_s27 + $0xa0] ss:$8 sps:$4 sm:$0xff]  }
  0x14   : > { %505 = vmatprep.subr.bf16.mxu0 %v1107_v1  ;;  %1018 = vmatprep.subr.bf16.mxu1 %v1107_v1  ;;  %v1069_v22 = vld [vmem:[%s1161_s27 + $0x34] ss:$8 sps:$4 sm:$0xff]   ;;  %v1073_v24 = vld [vmem:[%s1161_s27 + $0x30] ss:$8 sps:$4 sm:$0xff]   ;;  %v1075_v26 = vld [vmem:[%s1161_s27 + $0x44] ss:$8 sps:$4 sm:$0xff]  }
  0x15   : > { %v1071_v23 = vld [vmem:[%s1161_s27 + $0xb4] ss:$8 sps:$4 sm:$0xff]   ;;  %v1074_v25 = vld [vmem:[%s1161_s27 + $0xb0] ss:$8 sps:$4 sm:$0xff]   ;;  %v1077_v27 = vld [vmem:[%s1161_s27 + $0xc4] ss:$8 sps:$4 sm:$0xff]  }
  0x16   : > { %v1079_v28 = vld [vmem:[%s1161_s27 + $0x40] ss:$8 sps:$4 sm:$0xff]   ;;  %v1081_v30 = vld [vmem:[%s1161_s27 + $0x54] ss:$8 sps:$4 sm:$0xff]   ;;  %v1085_v32 = vld [vmem:[%s1161_s27 + $0x50] ss:$8 sps:$4 sm:$0xff]  }
  0x17   : > { %506 = vmatpush1.bf16.msra.mxu0 %v1046_v7  ;;  %1027 = vmatpush1.bf16.msra.mxu1 %v1046_v7  ;;  %v1080_v29 = vld [vmem:[%s1161_s27 + $0xc0] ss:$8 sps:$4 sm:$0xff]   ;;  %v1083_v31 = vld [vmem:[%s1161_s27 + $0xd4] ss:$8 sps:$4 sm:$0xff]   ;;  %v1086_v33 = vld [vmem:[%s1161_s27 + $0xd0] ss:$8 sps:$4 sm:$0xff]  }
  0x18   : > { %507 = vmatprep.subr.bf16.mxu0 %v1107_v1  ;;  %1019 = vmatprep.subr.bf16.mxu1 %v1107_v1  ;;  %v1087_v34 = vld [vmem:[%s1161_s27 + $0x64] ss:$8 sps:$4 sm:$0xff]   ;;  %v1091_v36 = vld [vmem:[%s1161_s27 + $0x60] ss:$8 sps:$4 sm:$0xff]   ;;  %v1093_v38 = vld [vmem:[%s1161_s27 + $0x74] ss:$8 sps:$4 sm:$0xff]  }
  0x19   : > { %v1089_v35 = vld [vmem:[%s1161_s27 + $0xe4] ss:$8 sps:$4 sm:$0xff]   ;;  %v1092_v37 = vld [vmem:[%s1161_s27 + $0xe0] ss:$8 sps:$4 sm:$0xff]   ;;  %v1095_v39 = vld [vmem:[%s1161_s27 + $0xf4] ss:$8 sps:$4 sm:$0xff]  }
  0x1a   : > { %v1097_v40 = vld [vmem:[%s1161_s27 + $0x70] ss:$8 sps:$4 sm:$0xff]  }
  0x1b   : > { %508 = vmatpush1.bf16.msra.mxu0 %v1047_v8  ;;  %1028 = vmatpush1.bf16.msra.mxu1 %v1047_v8  ;;  %v1098_v41 = vld [vmem:[%s1161_s27 + $0xf0] ss:$8 sps:$4 sm:$0xff]  }
  0x1c   : > { %509 = vmatprep.subr.bf16.mxu0 %v1107_v1  ;;  %1020 = vmatprep.subr.bf16.mxu1 %v1107_v1 }
  0x1f   : > { %510 = vmatpush1.bf16.msra.mxu0 %v1048_v9  ;;  %1029 = vmatpush1.bf16.msra.mxu1 %v1048_v9 }
  0x20   : > { %511 = vmatprep.subr.bf16.mxu0 %v1107_v1  ;;  %1021 = vmatprep.subr.bf16.mxu1 %v1107_v1 }
  0x23   : > { %512 = vmatpush1.bf16.msra.mxu0 %v1049_v10  ;;  %1030 = vmatpush1.bf16.msra.mxu1 %v1049_v10 }
  0x24   : > { %513 = vmatprep.subr.bf16.mxu0 %v1107_v1  ;;  %1022 = vmatprep.subr.bf16.mxu1 %v1107_v1 }
  0x27   : > { %514 = vmatpush1.bf16.msra.mxu0 %v1050_v11  ;;  %1031 = vmatpush1.bf16.msra.mxu1 %v1050_v11 }
  0x2a   : > { %530 = vmatmul.mubr.bf16.vlgmr.msra.gmra.mrb[0].mxu0 %v1051_v12  ;;  %594 = vmatmul.mubr.bf16.vlgmr.msra.gmra.mrb[0].mxu1 %v1054_v13 }
  0x2b   : > { %995 = vmatprep.mubr.msk.bf16.mxu0 %vm448_vm0, %v1057_v14  ;;  %1003 = vmatprep.mubr.msk.bf16.mxu1 %vm448_vm0, %v1059_v15 }
  0x32   : > { %538 = vmatmul.mubr.bf16.gmra.mrb[4].mxu0 %v1061_v16  ;;  %602 = vmatmul.mubr.bf16.gmra.mrb[4].mxu1 %v1062_v17 }
  0x33   : > { %996 = vmatprep.mubr.msk.bf16.mxu0 %vm448_vm0, %v1063_v18  ;;  %1004 = vmatprep.mubr.msk.bf16.mxu1 %vm448_vm0, %v1065_v19 }
  0x3a   : > { %546 = vmatmul.mubr.bf16.gmra.mrb[8].mxu0 %v1067_v20  ;;  %610 = vmatmul.mubr.bf16.gmra.mrb[8].mxu1 %v1068_v21 }
  0x3b   : > { %997 = vmatprep.mubr.msk.bf16.mxu0 %vm448_vm0, %v1069_v22  ;;  %1005 = vmatprep.mubr.msk.bf16.mxu1 %vm448_vm0, %v1071_v23 }
  0x42   : > { %554 = vmatmul.mubr.bf16.gmra.mrb[12].mxu0 %v1073_v24  ;;  %618 = vmatmul.mubr.bf16.gmra.mrb[12].mxu1 %v1074_v25 }
  0x43   : > { %998 = vmatprep.mubr.msk.bf16.mxu0 %vm448_vm0, %v1075_v26  ;;  %1006 = vmatprep.mubr.msk.bf16.mxu1 %vm448_vm0, %v1077_v27 }
  0x4a   : > { %562 = vmatmul.mubr.bf16.gmra.mrb[16].mxu0 %v1079_v28  ;;  %626 = vmatmul.mubr.bf16.gmra.mrb[16].mxu1 %v1080_v29 }
  0x4b   : > { %999 = vmatprep.mubr.msk.bf16.mxu0 %vm448_vm0, %v1081_v30  ;;  %1007 = vmatprep.mubr.msk.bf16.mxu1 %vm448_vm0, %v1083_v31 }
  0x52   : > { %570 = vmatmul.mubr.bf16.gmra.mrb[20].mxu0 %v1085_v32  ;;  %634 = vmatmul.mubr.bf16.gmra.mrb[20].mxu1 %v1086_v33 }
  0x53   : > { %1000 = vmatprep.mubr.msk.bf16.mxu0 %vm448_vm0, %v1087_v34  ;;  %1008 = vmatprep.mubr.msk.bf16.mxu1 %vm448_vm0, %v1089_v35 }
  0x5a   : > { %578 = vmatmul.mubr.bf16.gmra.mrb[24].mxu0 %v1091_v36  ;;  %642 = vmatmul.mubr.bf16.gmra.mrb[24].mxu1 %v1092_v37 }
  0x5b   : > { %1001 = vmatprep.mubr.msk.bf16.mxu0 %vm448_vm0, %v1093_v38  ;;  %1009 = vmatprep.mubr.msk.bf16.mxu1 %vm448_vm0, %v1095_v39 }
  0x62   : > { %586 = vmatmul.mubr.bf16.gmra.mrb[28].mxu0 %v1097_v40  ;;  %650 = vmatmul.mubr.bf16.gmra.mrb[28].mxu1 %v1098_v41 }
  0xfd   : > { %v1236_v42 = vpop.f32.mrb[0].mxu0  ;;  %v1238_v43 = vpop.f32.mrb[0].mxu1 }
  0xfe   : > { %659 = vst.msk [vmem:[%s1234_s18] sm:$0xff] %vm658_vm1, %v1236_v42  ;;  %675 = vst.msk [vmem:[%s1234_s18 + $0x80] sm:$0xff] %vm658_vm1, %v1238_v43  ;;  %v533_v44 = vpop.f32.mrb[1].mxu0  ;;  %v597_v45 = vpop.f32.mrb[1].mxu1 }
  0xff   : > { %v1246_v46 = vpop.f32.mrb[2].mxu0  ;;  %v1248_v47 = vpop.f32.mrb[2].mxu1  ;;  %v1108_v44 = vmov (!%p1010_p4), 0.0  }
 0x100   : > { %660 = vst.msk [vmem:[%s1234_s18 + $0x8] sm:$0xff] %vm658_vm1, %v1246_v46  ;;  %676 = vst.msk [vmem:[%s1234_s18 + $0x88] sm:$0xff] %vm658_vm1, %v1248_v47  ;;  %v536_v48 = vpop.f32.mrb[3].mxu0  ;;  %v600_v49 = vpop.f32.mrb[3].mxu1 }
 0x101   : > { %696 = vst.msk [vmem:[%s1584_s3] sm:$0x1] (!%p1010_p4), %vm695_vm2, %v1108_v44  ;;  %697 = vst.msk [vmem:[%s1585_s4] sm:$0x1] (!%p1010_p4), %vm695_vm2, %v1108_v44 }
 0x105   : > { %v1256_v50 = vpop.f32.mrb[4].mxu0  ;;  %v1258_v51 = vpop.f32.mrb[4].mxu1 }
 0x106   : > { %661 = vst.msk [vmem:[%s1234_s18 + $0x10] sm:$0xff] %vm658_vm1, %v1256_v50  ;;  %677 = vst.msk [vmem:[%s1234_s18 + $0x90] sm:$0xff] %vm658_vm1, %v1258_v51  ;;  %v541_v52 = vpop.f32.mrb[5].mxu0  ;;  %v605_v53 = vpop.f32.mrb[5].mxu1 }
 0x107   : > { %v1266_v54 = vpop.f32.mrb[6].mxu0  ;;  %v1268_v55 = vpop.f32.mrb[6].mxu1 }
 0x108   : > { %662 = vst.msk [vmem:[%s1234_s18 + $0x18] sm:$0xff] %vm658_vm1, %v1266_v54  ;;  %678 = vst.msk [vmem:[%s1234_s18 + $0x98] sm:$0xff] %vm658_vm1, %v1268_v55  ;;  %v544_v56 = vpop.f32.mrb[7].mxu0  ;;  %v608_v57 = vpop.f32.mrb[7].mxu1 }
 0x10d   : > { %v1276_v58 = vpop.f32.mrb[8].mxu0  ;;  %v1278_v59 = vpop.f32.mrb[8].mxu1 }
 0x10e   : > { %663 = vst.msk [vmem:[%s1234_s18 + $0x20] sm:$0xff] %vm658_vm1, %v1276_v58  ;;  %679 = vst.msk [vmem:[%s1234_s18 + $0xa0] sm:$0xff] %vm658_vm1, %v1278_v59  ;;  %v549_v60 = vpop.f32.mrb[9].mxu0  ;;  %v613_v61 = vpop.f32.mrb[9].mxu1 }
 0x10f   : > { %v1286_v62 = vpop.f32.mrb[10].mxu0  ;;  %v1288_v63 = vpop.f32.mrb[10].mxu1 }
 0x110   : > { %664 = vst.msk [vmem:[%s1234_s18 + $0x28] sm:$0xff] %vm658_vm1, %v1286_v62  ;;  %680 = vst.msk [vmem:[%s1234_s18 + $0xa8] sm:$0xff] %vm658_vm1, %v1288_v63  ;;  %v552_v0 = vpop.f32.mrb[11].mxu0  ;;  %v616_v1 = vpop.f32.mrb[11].mxu1 }
 0x115   : > { %v1296_v2 = vpop.f32.mrb[12].mxu0  ;;  %v1298_v3 = vpop.f32.mrb[12].mxu1 }
 0x116   : > { %665 = vst.msk [vmem:[%s1234_s18 + $0x30] sm:$0xff] %vm658_vm1, %v1296_v2  ;;  %681 = vst.msk [vmem:[%s1234_s18 + $0xb0] sm:$0xff] %vm658_vm1, %v1298_v3  ;;  %v557_v4 = vpop.f32.mrb[13].mxu0  ;;  %v621_v5 = vpop.f32.mrb[13].mxu1 }
 0x117   : > { %v1306_v6 = vpop.f32.mrb[14].mxu0  ;;  %v1308_v7 = vpop.f32.mrb[14].mxu1 }
 0x118   : > { %666 = vst.msk [vmem:[%s1234_s18 + $0x38] sm:$0xff] %vm658_vm1, %v1306_v6  ;;  %682 = vst.msk [vmem:[%s1234_s18 + $0xb8] sm:$0xff] %vm658_vm1, %v1308_v7  ;;  %v560_v8 = vpop.f32.mrb[15].mxu0  ;;  %v624_v9 = vpop.f32.mrb[15].mxu1 }
 0x11d   : > { %v1316_v10 = vpop.f32.mrb[16].mxu0  ;;  %v1318_v11 = vpop.f32.mrb[16].mxu1 }
 0x11e   : > { %667 = vst.msk [vmem:[%s1234_s18 + $0x40] sm:$0xff] %vm658_vm1, %v1316_v10  ;;  %683 = vst.msk [vmem:[%s1234_s18 + $0xc0] sm:$0xff] %vm658_vm1, %v1318_v11  ;;  %v565_v12 = vpop.f32.mrb[17].mxu0  ;;  %v629_v13 = vpop.f32.mrb[17].mxu1 }
 0x11f   : > { %v1326_v14 = vpop.f32.mrb[18].mxu0  ;;  %v1328_v15 = vpop.f32.mrb[18].mxu1 }
 0x120   : > { %668 = vst.msk [vmem:[%s1234_s18 + $0x48] sm:$0xff] %vm658_vm1, %v1326_v14  ;;  %684 = vst.msk [vmem:[%s1234_s18 + $0xc8] sm:$0xff] %vm658_vm1, %v1328_v15  ;;  %v568_v16 = vpop.f32.mrb[19].mxu0  ;;  %v632_v17 = vpop.f32.mrb[19].mxu1 }
 0x125   : > { %v1336_v18 = vpop.f32.mrb[20].mxu0  ;;  %v1338_v19 = vpop.f32.mrb[20].mxu1 }
 0x126   : > { %669 = vst.msk [vmem:[%s1234_s18 + $0x50] sm:$0xff] %vm658_vm1, %v1336_v18  ;;  %685 = vst.msk [vmem:[%s1234_s18 + $0xd0] sm:$0xff] %vm658_vm1, %v1338_v19  ;;  %v573_v20 = vpop.f32.mrb[21].mxu0  ;;  %v637_v21 = vpop.f32.mrb[21].mxu1 }
 0x127   : > { %v1346_v22 = vpop.f32.mrb[22].mxu0  ;;  %v1348_v23 = vpop.f32.mrb[22].mxu1 }
 0x128   : > { %670 = vst.msk [vmem:[%s1234_s18 + $0x58] sm:$0xff] %vm658_vm1, %v1346_v22  ;;  %686 = vst.msk [vmem:[%s1234_s18 + $0xd8] sm:$0xff] %vm658_vm1, %v1348_v23  ;;  %v576_v24 = vpop.f32.mrb[23].mxu0  ;;  %v640_v25 = vpop.f32.mrb[23].mxu1 }
 0x12d   : > { %v1356_v26 = vpop.f32.mrb[24].mxu0  ;;  %v1358_v27 = vpop.f32.mrb[24].mxu1 }
 0x12e   : > { %671 = vst.msk [vmem:[%s1234_s18 + $0x60] sm:$0xff] %vm658_vm1, %v1356_v26  ;;  %687 = vst.msk [vmem:[%s1234_s18 + $0xe0] sm:$0xff] %vm658_vm1, %v1358_v27  ;;  %v581_v28 = vpop.f32.mrb[25].mxu0  ;;  %v645_v29 = vpop.f32.mrb[25].mxu1 }
 0x12f   : > { %v1366_v30 = vpop.f32.mrb[26].mxu0  ;;  %v1368_v31 = vpop.f32.mrb[26].mxu1 }
 0x130   : > { %672 = vst.msk [vmem:[%s1234_s18 + $0x68] sm:$0xff] %vm658_vm1, %v1366_v30  ;;  %688 = vst.msk [vmem:[%s1234_s18 + $0xe8] sm:$0xff] %vm658_vm1, %v1368_v31  ;;  %v584_v32 = vpop.f32.mrb[27].mxu0  ;;  %v648_v33 = vpop.f32.mrb[27].mxu1 }
 0x132   : > { %694 = sbr.rel (%p1010_p4) target bundleno = 313 (0x139), region = 32 }
 0x135   : > { %v1376_v34 = vpop.f32.mrb[28].mxu0  ;;  %v1378_v35 = vpop.f32.mrb[28].mxu1 }
 0x136   : > { %673 = vst.msk [vmem:[%s1234_s18 + $0x70] sm:$0xff] %vm658_vm1, %v1376_v34  ;;  %689 = vst.msk [vmem:[%s1234_s18 + $0xf0] sm:$0xff] %vm658_vm1, %v1378_v35  ;;  %v589_v36 = vpop.f32.mrb[29].mxu0  ;;  %v653_v37 = vpop.f32.mrb[29].mxu1 }
 0x137   : > { %v1386_v38 = vpop.f32.mrb[30].mxu0  ;;  %v1388_v39 = vpop.f32.mrb[30].mxu1 }
 0x138   : > { %674 = vst.msk [vmem:[%s1234_s18 + $0x78] sm:$0xff] %vm658_vm1, %v1386_v38  ;;  %690 = vst.msk [vmem:[%s1234_s18 + $0xf8] sm:$0xff] %vm658_vm1, %v1388_v39  ;;  %v592_v40 = vpop.f32.mrb[31].mxu0  ;;  %v656_v41 = vpop.f32.mrb[31].mxu1 }
 0x139 PF: > { %v699_v45 = vsel %vm658_vm1, %v1236_v42, 0.0  ;;  %v700_v48 = vsel %vm658_vm1, %v1246_v46, 0.0  ;;  %v702_v49 = vsel %vm658_vm1, %v1256_v50, 0.0  ;;  %v704_v53 = vsel %vm658_vm1, %v1266_v54, 0.0 }
 0x13a   : > { %v701_v52 = vadd.f32 %v700_v48, %v699_v45  ;;  %v706_v57 = vsel %vm658_vm1, %v1276_v58, 0.0  ;;  %v708_v61 = vsel %vm658_vm1, %v1286_v62, 0.0  ;;  %v710_v1 = vsel %vm658_vm1, %v1296_v2, 0.0 }
 0x13b   : > { %v712_v5 = vsel %vm658_vm1, %v1306_v6, 0.0  ;;  %v714_v9 = vsel %vm658_vm1, %v1316_v10, 0.0  ;;  %v716_v13 = vsel %vm658_vm1, %v1326_v14, 0.0  ;;  %v772_v16 = vmul.f32 %v1236_v42, %v1236_v42 }
 0x13c   : > { %v703_v56 = vadd.f32 %v702_v49, %v701_v52  ;;  %v773_v17 = vmul.f32 %v1246_v46, %v1246_v46  ;;  %v774_v21 = vmul.f32 %v1256_v50, %v1256_v50  ;;  %v718_v24 = vsel %vm658_vm1, %v1336_v18, 0.0 }
 0x13d   : > { %v775_v25 = vmul.f32 %v1266_v54, %v1266_v54  ;;  %v720_v29 = vsel %vm658_vm1, %v1346_v22, 0.0  ;;  %v776_v42 = vmul.f32 %v1276_v58, %v1276_v58  ;;  %v804_v32 = vsel %vm658_vm1, %v772_v16, 0.0 }
 0x13e   : > { %v705_v60 = vadd.f32 %v704_v53, %v703_v56  ;;  %v805_v46 = vsel %vm658_vm1, %v773_v17, 0.0  ;;  %v807_v50 = vsel %vm658_vm1, %v774_v21, 0.0  ;;  %v722_v37 = vsel %vm658_vm1, %v1356_v26, 0.0 }
 0x13f   : > { %v806_v36 = vadd.f32 %v805_v46, %v804_v32  ;;  %v777_v54 = vmul.f32 %v1286_v62, %v1286_v62  ;;  %v809_v40 = vsel %vm658_vm1, %v775_v25, 0.0  ;;  %v724_v58 = vsel %vm658_vm1, %v1366_v30, 0.0 }
 0x140   : > { %v707_v0 = vadd.f32 %v706_v57, %v705_v60  ;;  %v778_v45 = vmul.f32 %v1296_v2, %v1296_v2  ;;  %v811_v48 = vsel %vm658_vm1, %v776_v42, 0.0  ;;  %v726_v53 = vsel %vm658_vm1, %v1376_v34, 0.0 }
 0x141   : > { %v808_v44 = vadd.f32 %v807_v50, %v806_v36  ;;  %v779_v62 = vmul.f32 %v1306_v6, %v1306_v6  ;;  %v813_v56 = vsel %vm658_vm1, %v777_v54, 0.0  ;;  %v780_v2 = vmul.f32 %v1316_v10, %v1316_v10 }
 0x142   : > { %v709_v4 = vadd.f32 %v708_v61, %v707_v0  ;;  %v728_v61 = vsel %vm658_vm1, %v1386_v38, 0.0  ;;  %v815_v0 = vsel %vm658_vm1, %v778_v45, 0.0  ;;  %v781_v6 = vmul.f32 %v1326_v14, %v1326_v14 }
 0x143   : > { %v810_v52 = vadd.f32 %v809_v40, %v808_v44  ;;  %v782_v10 = vmul.f32 %v1336_v18, %v1336_v18  ;;  %v819_v16 = vsel %vm658_vm1, %v780_v2, 0.0  ;;  %v734_v21 = vsel %vm658_vm1, %v1258_v51, 0.0 }
 0x144   : > { %v711_v8 = vadd.f32 %v710_v1, %v709_v4  ;;  %v783_v14 = vmul.f32 %v1346_v22, %v1346_v22  ;;  %v784_v18 = vmul.f32 %v1356_v26, %v1356_v26  ;;  %v785_v22 = vmul.f32 %v1366_v30, %v1366_v30 }
 0x145   : > { %v812_v60 = vadd.f32 %v811_v48, %v810_v52  ;;  %v823_v42 = vsel %vm658_vm1, %v782_v10, 0.0  ;;  %v740_v54 = vsel %vm658_vm1, %v1288_v63, 0.0  ;;  %v786_v26 = vmul.f32 %v1376_v34, %v1376_v34 }
 0x146   : > { %v713_v12 = vadd.f32 %v712_v5, %v711_v8  ;;  %v730_v5 = vsel %vm658_vm1, %v1238_v43, 0.0  ;;  %v817_v8 = vsel %vm658_vm1, %v779_v62, 0.0  ;;  %v825_v36 = vsel %vm658_vm1, %v783_v14, 0.0 }
 0x147   : > { %v814_v4 = vadd.f32 %v813_v56, %v812_v60  ;;  %v827_v40 = vsel %vm658_vm1, %v784_v18, 0.0  ;;  %v787_v30 = vmul.f32 %v1386_v38, %v1386_v38  ;;  %v829_v45 = vsel %vm658_vm1, %v785_v22, 0.0 }
 0x148   : > { %v715_v20 = vadd.f32 %v714_v9, %v713_v12  ;;  %v744_v52 = vsel %vm658_vm1, %v1308_v7, 0.0  ;;  %v788_v34 = vmul.f32 %v1238_v43, %v1238_v43  ;;  %v789_v38 = vmul.f32 %v1248_v47, %v1248_v47 }
 0x149   : > { %v816_v12 = vadd.f32 %v815_v0, %v814_v4  ;;  %v833_v60 = vsel %vm658_vm1, %v787_v30, 0.0  ;;  %v748_v0 = vsel %vm658_vm1, %v1328_v15, 0.0  ;;  %v790_v43 = vmul.f32 %v1258_v51, %v1258_v51 }
 0x14a   : > { %v717_v28 = vadd.f32 %v716_v13, %v715_v20  ;;  %v732_v13 = vsel %vm658_vm1, %v1248_v47, 0.0  ;;  %v791_v47 = vmul.f32 %v1268_v55, %v1268_v55  ;;  %v792_v51 = vmul.f32 %v1278_v59, %v1278_v59 }
 0x14b   : > { %v818_v20 = vadd.f32 %v817_v8, %v816_v12  ;;  %v837_v8 = vsel %vm658_vm1, %v789_v38, 0.0  ;;  %v839_v10 = vsel %vm658_vm1, %v790_v43, 0.0  ;;  %v760_v22 = vsel %vm658_vm1, %v1388_v39, 0.0 }
 0x14c   : > { %v719_v33 = vadd.f32 %v718_v24, %v717_v28  ;;  %v821_v24 = vsel %vm658_vm1, %v781_v6, 0.0  ;;  %v750_v6 = vsel %vm658_vm1, %v1338_v19, 0.0  ;;  %vm769_vm3 = vcmask 57344  }
 0x14d   : > { %v820_v28 = vadd.f32 %v819_v16, %v818_v20  ;;  %v754_v20 = vsel %vm658_vm1, %v1358_v27, 0.0 }
 0x14e   : > { %v721_v41 = vadd.f32 %v720_v29, %v719_v33  ;;  %v736_v29 = vsel %vm658_vm1, %v1268_v55, 0.0  ;;  %v738_v33 = vsel %vm658_vm1, %v1278_v59, 0.0  ;;  %v793_v55 = vmul.f32 %v1288_v63, %v1288_v63 }
 0x14f   : > { %v822_v46 = vadd.f32 %v821_v24, %v820_v28  ;;  %v794_v59 = vmul.f32 %v1298_v3, %v1298_v3  ;;  %v843_v28 = vsel %vm658_vm1, %v792_v51, 0.0  ;;  %v795_v63 = vmul.f32 %v1308_v7, %v1308_v7  ;;  %v771_v51 = vld [vmem:[%s1585_s4] sm:$0x1] }
 0x150   : > { %v723_v49 = vadd.f32 %v722_v37, %v721_v41 }
 0x151   : > { %v824_v37 = vadd.f32 %v823_v42, %v822_v46  ;;  %v758_v42 = vsel %vm658_vm1, %v1378_v35, 0.0 }
 0x152   : > { %v725_v57 = vadd.f32 %v724_v58, %v723_v49  ;;  %v742_v58 = vsel %vm658_vm1, %v1298_v3, 0.0  ;;  %v796_v3 = vmul.f32 %v1318_v11, %v1318_v11 }
 0x153   : > { %v826_v44 = vadd.f32 %v825_v36, %v824_v37  ;;  %v847_v36 = vsel %vm658_vm1, %v794_v59, 0.0 }
 0x154   : > { %v727_v1 = vadd.f32 %v726_v53, %v725_v57  ;;  %v831_v53 = vsel %vm658_vm1, %v786_v26, 0.0  ;;  %v746_v57 = vsel %vm658_vm1, %v1318_v11, 0.0  ;;  %v849_v26 = vsel %vm658_vm1, %v795_v63, 0.0 }
 0x155   : > { %v828_v49 = vadd.f32 %v827_v40, %v826_v44  ;;  %v851_v44 = vsel %vm658_vm1, %v796_v3, 0.0  ;;  %v799_v11 = vmul.f32 %v1348_v23, %v1348_v23 }
 0x156   : > { %v729_v9 = vadd.f32 %v728_v61, %v727_v1  ;;  %v835_v1 = vsel %vm658_vm1, %v788_v34, 0.0 }
 0x157   : > { %v830_v56 = vadd.f32 %v829_v45, %v828_v49 }
 0x158   : > { %v731_v17 = vadd.f32 %v730_v5, %v729_v9 }
 0x159   : > { %v832_v2 = vadd.f32 %v831_v53, %v830_v56 }
 0x15a   : > { %v733_v25 = vadd.f32 %v732_v13, %v731_v17  ;;  %v752_v13 = vsel %vm658_vm1, %v1348_v23, 0.0  ;;  %v802_v23 = vmul.f32 %v1378_v35, %v1378_v35 }
 0x15b   : > { %v834_v5 = vadd.f32 %v833_v60, %v832_v2  ;;  %v803_v2 = vmul.f32 %v1388_v39, %v1388_v39 }
 0x15c   : > { %v735_v32 = vadd.f32 %v734_v21, %v733_v25  ;;  %v841_v21 = vsel %vm658_vm1, %v791_v47, 0.0  ;;  %v756_v25 = vsel %vm658_vm1, %v1368_v31, 0.0 }
 0x15d   : > { %v836_v12 = vadd.f32 %v835_v1, %v834_v5  ;;  %v863_v1 = vsel %vm658_vm1, %v802_v23, 0.0  ;;  %v865_v5 = vsel %vm658_vm1, %v803_v2, 0.0 }
 0x15e   : > { %v737_v50 = vadd.f32 %v736_v29, %v735_v32  ;;  %v845_v32 = vsel %vm658_vm1, %v793_v55, 0.0 }
 0x15f   : > { %v838_v17 = vadd.f32 %v837_v8, %v836_v12 }
 0x160   : > { %v739_v41 = vadd.f32 %v738_v33, %v737_v50 }
 0x161   : > { %v840_v24 = vadd.f32 %v839_v10, %v838_v17 }
 0x162   : > { %v741_v48 = vadd.f32 %v740_v54, %v739_v41  ;;  %v797_v54 = vmul.f32 %v1328_v15, %v1328_v15  ;;  %v798_v41 = vmul.f32 %v1338_v19, %v1338_v19  ;;  %v800_v15 = vmul.f32 %v1358_v27, %v1358_v27  ;;  %v698_v27 = vld [vmem:[%s1584_s3] sm:$0x1] }
 0x163   : > { %v842_v18 = vadd.f32 %v841_v21, %v840_v24  ;;  %v801_v19 = vmul.f32 %v1368_v31, %v1368_v31 }
 0x164   : > { %v743_v62 = vadd.f32 %v742_v58, %v741_v48  ;;  %v853_v45 = vsel %vm658_vm1, %v797_v54, 0.0  ;;  %v859_v38 = vsel %vm658_vm1, %v800_v15, 0.0 }
 0x165   : > { %v844_v33 = vadd.f32 %v843_v28, %v842_v18  ;;  %v861_v31 = vsel %vm658_vm1, %v801_v19, 0.0 }
 0x166   : > { %v745_v61 = vadd.f32 %v744_v52, %v743_v62  ;;  %v855_v52 = vsel %vm658_vm1, %v798_v41, 0.0  ;;  %v857_v62 = vsel %vm658_vm1, %v799_v11, 0.0 }
 0x167   : > { %v846_v37 = vadd.f32 %v845_v32, %v844_v33 }
 0x168   : > { %v747_v4 = vadd.f32 %v746_v57, %v745_v61 }
 0x169   : > { %v848_v40 = vadd.f32 %v847_v36, %v846_v37 }
 0x16a   : > { %v749_v9 = vadd.f32 %v748_v0, %v747_v4 }
 0x16b   : > { %v850_v30 = vadd.f32 %v849_v26, %v848_v40 }
 0x16c   : > { %v751_v16 = vadd.f32 %v750_v6, %v749_v9 }
 0x16d   : > { %v852_v49 = vadd.f32 %v851_v44, %v850_v30 }
 0x16e   : > { %v753_v14 = vadd.f32 %v752_v13, %v751_v16 }
 0x16f   : > { %v854_v53 = vadd.f32 %v853_v45, %v852_v49 }
 0x170   : > { %v755_v29 = vadd.f32 %v754_v20, %v753_v14 }
 0x171   : > { %v856_v57 = vadd.f32 %v855_v52, %v854_v53 }
 0x172   : > { %v757_v46 = vadd.f32 %v756_v25, %v755_v29 }
 0x173   : > { %v858_v61 = vadd.f32 %v857_v62, %v856_v57 }
 0x174   : > { %v759_v50 = vadd.f32 %v758_v42, %v757_v46 }
 0x175   : > { %v860_v43 = vadd.f32 %v859_v38, %v858_v61 }
 0x176   : > { %v761_v7 = vadd.f32 %v760_v22, %v759_v50 }
 0x177   : > { %v862_v35 = vadd.f32 %v861_v31, %v860_v43 }
 0x178   : > { %v762_v58 = vrot.slane %v761_v7, 4 }
 0x179   : > { %v864_v6 = vadd.f32 %v863_v1, %v862_v35 }
 0x17a   : > { %v763_v48 = vadd.f32 %v762_v58, %v761_v7 }
 0x17b   : > { %v866_v47 = vadd.f32 %v865_v5, %v864_v6 }
 0x17c   : > { %v764_v34 = vrot.slane %v763_v48, 2 }
 0x17d   : > { %v867_v8 = vrot.slane %v866_v47, 4 }
 0x17e   : > { %v765_v56 = vadd.f32 %v764_v34, %v763_v48 }
 0x17f   : > { %v868_v39 = vadd.f32 %v867_v8, %v866_v47 }
 0x180   : > { %v766_v60 = vrot.slane %v765_v56, 1 }
 0x181   : > { %v869_v9 = vrot.slane %v868_v39, 2 }
 0x182   : > { %v767_v0 = vadd.f32 %v766_v60, %v765_v56 }
 0x183   : > { %v870_v12 = vadd.f32 %v869_v9, %v868_v39 }
 0x184   : > { %v768_v4 = vadd.f32 %v767_v0, %v698_v27 }
 0x185   : > { %v871_v13 = vrot.slane %v870_v12, 1 }
 0x186   : > { %770 = vst.msk [vmem:[%s1584_s3] sm:$0x1] %vm769_vm3, %v768_v4 }
 0x187   : > { %v872_v10 = vadd.f32 %v871_v13, %v870_v12 }
 0x189   : > { %v873_v16 = vadd.f32 %v872_v10, %v771_v51 }
 0x18b   : > { %874 = vst.msk [vmem:[%s1585_s4] sm:$0x1] %vm769_vm3, %v873_v16 }
 0x18c PF: > { %s15_s15 = sadd.s32 1, %s1105_s15  }
 0x18d   : > { %p12_p5 = scmp.ge.s32.totalorder %s15_s15, 4  }
 0x18f   :  { %14 = sbr.rel (!%p12_p5) target bundleno = 1 (0x1), region = 78 }

// kernel: runet_forward.89
= control target key start
LH: loop header
LB: loop body
LE: loop exit
PB: predicated region body
PF: predicated region fallthrough
CT: control target
= control target key end

     0   :  { %s749_s12 = smov 0   ;;  %s910_s0 = inlined_call_operand.vmem [shape: bf16[512,8], index: 0, kind: input, shape index: {}]   ;;  %s911_s1 = inlined_call_operand.vmem [shape: bf16[8,2], index: 1, kind: input, shape index: {}]   ;;  %s912_s2 = inlined_call_operand.vmem [shape: f32[1,2], index: 2, kind: input, shape index: {}]   ;;  %s913_s3 = inlined_call_operand.vmem [shape: f32[512,2], index: 3, kind: output, shape index: {}]  }
   0x1 LB: > { %s598_s13 = sadd.s32 4294967295, %s727_s12   ;;  %p602_p0 = scmp.ge.s32.totalorder %s727_s12, 1  ;;  %s727_s12 = sphi %s749_s12, %s13_s12  }
   0x2   : > { %p138_p1 = scmp.lt.s32.totalorder %s727_s12, 3 }
   0x4   : > { %p139_p2 = pnand %p602_p0, %p138_p1 }
   0x5   : > { %v207_v0 = vld [vmem:[%s911_s1] sm:$0xf] (!%p139_p2)  ;;  %vm344_vm0 = vcmask (!%p139_p2), 1043456   ;;  %s603_s16 = sshll.u32 (!%p139_p2), %s598_s13, 5  ;;  %vm295_vm1 = vcmask (!%p139_p2), 64512   ;;  %vm509_vm2 = vcmask (!%p139_p2), 15360  }
   0x6   : > { %142 = sbr.rel (%p139_p2) target bundleno = 261 (0x105), region = 32  ;;  %695 = vmatprep.subr.msk.bf16.mxu0 (!%p139_p2), %vm344_vm0, %v207_v0  ;;  %696 = vmatprep.subr.msk.bf16.mxu1 (!%p139_p2), %vm344_vm0, %v207_v0  ;;  %v346_v1 = vsel (!%p139_p2), %vm344_vm0, %v207_v0, 0  ;;  %p163_p3 = scmp.lt.s32.totalorder (!%p139_p2), %s603_s16, 63  ;;  %v804_v18 = vld [vmem:[%s912_s2] ss:$0 sm:$0xff] (!%p139_p2) }
   0x7   : > { %660 = vmatpush3.bf16.msra.mxu0 (!%p139_p2), %v346_v1  ;;  %694 = vmatpush3.bf16.msra.mxu1 (!%p139_p2), %v346_v1 }
   0xd   : > { %s915_s16 = smov (!%p163_p3, %s603_s16), 63 }
   0xe   : > { %s604_s17 = sshll.u32 %s915_s16, 2  ;;  %s606_s21 = sshll.u32 %s915_s16, 3 }
   0xf   : > { %s766_s20 = scalar_lea.vmem %s910_s0, %s604_s17  ;;  %s809_s26 = scalar_lea.vmem %s913_s3, %s606_s21 }
  0x10   : > { %v705_v2 = vld [vmem:[%s766_s20] sm:$0xff]   ;;  %v707_v4 = vld [vmem:[%s766_s20 + $0x8] sm:$0xff]   ;;  %v709_v6 = vld [vmem:[%s766_s20 + $0x10] sm:$0xff]  }
  0x11   : > { %v706_v3 = vld [vmem:[%s766_s20 + $0x40] sm:$0xff]   ;;  %661 = vmatprep.mubr.msk.bf16.mxu0 %vm295_vm1, %v705_v2  ;;  %v708_v5 = vld [vmem:[%s766_s20 + $0x48] sm:$0xff]   ;;  %v710_v7 = vld [vmem:[%s766_s20 + $0x50] sm:$0xff]  }
  0x12   : > { %677 = vmatprep.mubr.msk.bf16.mxu1 %vm295_vm1, %v706_v3  ;;  %662 = vmatmul.mubr.msk.bf16.vlgmr.msra.gmra.mrb[0].mxu0 %vm295_vm1, %v707_v4  ;;  %v711_v8 = vld [vmem:[%s766_s20 + $0x18] sm:$0xff]   ;;  %v713_v10 = vld [vmem:[%s766_s20 + $0x20] sm:$0xff]   ;;  %v715_v12 = vld [vmem:[%s766_s20 + $0x28] sm:$0xff]  }
  0x13   : > { %678 = vmatmul.mubr.msk.bf16.vlgmr.msra.gmra.mrb[0].mxu1 %vm295_vm1, %v708_v5  ;;  %665 = vmatprep.mubr.msk.bf16.mxu0 %vm295_vm1, %v709_v6  ;;  %v712_v9 = vld [vmem:[%s766_s20 + $0x58] sm:$0xff]   ;;  %v714_v11 = vld [vmem:[%s766_s20 + $0x60] sm:$0xff]   ;;  %v716_v13 = vld [vmem:[%s766_s20 + $0x68] sm:$0xff]  }
  0x14   : > { %681 = vmatprep.mubr.msk.bf16.mxu1 %vm295_vm1, %v710_v7  ;;  %v717_v14 = vld [vmem:[%s766_s20 + $0x30] sm:$0xff]   ;;  %v719_v16 = vld [vmem:[%s766_s20 + $0x38] sm:$0xff]  }
  0x15   : > { %v718_v15 = vld [vmem:[%s766_s20 + $0x70] sm:$0xff]   ;;  %v720_v17 = vld [vmem:[%s766_s20 + $0x78] sm:$0xff]  }
  0x1a   : > { %666 = vmatmul.mubr.msk.bf16.gmra.mrb[4].mxu0 %vm295_vm1, %v711_v8 }
  0x1b   : > { %682 = vmatmul.mubr.msk.bf16.gmra.mrb[4].mxu1 %vm295_vm1, %v712_v9  ;;  %669 = vmatprep.mubr.msk.bf16.mxu0 %vm295_vm1, %v713_v10 }
  0x1c   : > { %685 = vmatprep.mubr.msk.bf16.mxu1 %vm295_vm1, %v714_v11 }
  0x22   : > { %670 = vmatmul.mubr.msk.bf16.gmra.mrb[8].mxu0 %vm295_vm1, %v715_v12 }
  0x23   : > { %686 = vmatmul.mubr.msk.bf16.gmra.mrb[8].mxu1 %vm295_vm1, %v716_v13  ;;  %673 = vmatprep.mubr.msk.bf16.mxu0 %vm295_vm1, %v717_v14 }
  0x24   : > { %689 = vmatprep.mubr.msk.bf16.mxu1 %vm295_vm1, %v718_v15 }
  0x2a   : > { %674 = vmatmul.mubr.msk.bf16.gmra.mrb[12].mxu0 %vm295_vm1, %v719_v16 }
  0x2b   : > { %690 = vmatmul.mubr.msk.bf16.gmra.mrb[12].mxu1 %vm295_vm1, %v720_v17 }
  0xe5   : > { %v663_v19 = vpop.f32.mrb[0].mxu0 }
  0xe6   : > { %v391_v20 = vadd.f32 %v663_v19, %v804_v18  ;;  %v679_v21 = vpop.f32.mrb[0].mxu1  ;;  %v382_v22 = vpop.f32.mrb[1].mxu0 }
  0xe7   : > { %v455_v23 = vadd.f32 %v679_v21, %v804_v18  ;;  %v383_v24 = vadd.f32 %v804_v18, %v382_v22  ;;  %v446_v25 = vpop.f32.mrb[1].mxu1  ;;  %v664_v26 = vpop.f32.mrb[2].mxu0 }
  0xe8   : > { %512 = vst.msk [vmem:[%s809_s26 + $0x10] sm:$0xff] %vm509_vm2, %v391_v20  ;;  %v447_v27 = vadd.f32 %v804_v18, %v446_v25  ;;  %v394_v28 = vadd.f32 %v664_v26, %v804_v18  ;;  %v680_v29 = vpop.f32.mrb[2].mxu1  ;;  %v385_v30 = vpop.f32.mrb[3].mxu0 }
  0xe9   : > { %528 = vst.msk [vmem:[%s809_s26 + $0x90] sm:$0xff] %vm509_vm2, %v455_v23  ;;  %510 = vst.msk [vmem:[%s809_s26] sm:$0xff] %vm509_vm2, %v383_v24  ;;  %v458_v31 = vadd.f32 %v680_v29, %v804_v18  ;;  %v386_v32 = vadd.f32 %v804_v18, %v385_v30  ;;  %v449_v33 = vpop.f32.mrb[3].mxu1 }
  0xea   : > { %526 = vst.msk [vmem:[%s809_s26 + $0x80] sm:$0xff] %vm509_vm2, %v447_v27  ;;  %513 = vst.msk [vmem:[%s809_s26 + $0x18] sm:$0xff] %vm509_vm2, %v394_v28  ;;  %v450_v34 = vadd.f32 %v804_v18, %v449_v33 }
  0xeb   : > { %529 = vst.msk [vmem:[%s809_s26 + $0x98] sm:$0xff] %vm509_vm2, %v458_v31  ;;  %511 = vst.msk [vmem:[%s809_s26 + $0x8] sm:$0xff] %vm509_vm2, %v386_v32 }
  0xec   : > { %527 = vst.msk [vmem:[%s809_s26 + $0x88] sm:$0xff] %vm509_vm2, %v450_v34 }
  0xed   : > { %v667_v35 = vpop.f32.mrb[4].mxu0 }
  0xee   : > { %v407_v36 = vadd.f32 %v667_v35, %v804_v18  ;;  %v683_v37 = vpop.f32.mrb[4].mxu1  ;;  %v398_v38 = vpop.f32.mrb[5].mxu0 }
  0xef   : > { %v471_v39 = vadd.f32 %v683_v37, %v804_v18  ;;  %v399_v40 = vadd.f32 %v804_v18, %v398_v38  ;;  %v462_v41 = vpop.f32.mrb[5].mxu1  ;;  %v668_v42 = vpop.f32.mrb[6].mxu0 }
  0xf0   : > { %516 = vst.msk [vmem:[%s809_s26 + $0x30] sm:$0xff] %vm509_vm2, %v407_v36  ;;  %v463_v43 = vadd.f32 %v804_v18, %v462_v41  ;;  %v410_v44 = vadd.f32 %v668_v42, %v804_v18  ;;  %v684_v45 = vpop.f32.mrb[6].mxu1  ;;  %v401_v46 = vpop.f32.mrb[7].mxu0 }
  0xf1   : > { %532 = vst.msk [vmem:[%s809_s26 + $0xb0] sm:$0xff] %vm509_vm2, %v471_v39  ;;  %514 = vst.msk [vmem:[%s809_s26 + $0x20] sm:$0xff] %vm509_vm2, %v399_v40  ;;  %v474_v47 = vadd.f32 %v684_v45, %v804_v18  ;;  %v402_v48 = vadd.f32 %v804_v18, %v401_v46  ;;  %v465_v49 = vpop.f32.mrb[7].mxu1 }
  0xf2   : > { %530 = vst.msk [vmem:[%s809_s26 + $0xa0] sm:$0xff] %vm509_vm2, %v463_v43  ;;  %517 = vst.msk [vmem:[%s809_s26 + $0x38] sm:$0xff] %vm509_vm2, %v410_v44  ;;  %v466_v50 = vadd.f32 %v804_v18, %v465_v49 }
  0xf3   : > { %533 = vst.msk [vmem:[%s809_s26 + $0xb8] sm:$0xff] %vm509_vm2, %v474_v47  ;;  %515 = vst.msk [vmem:[%s809_s26 + $0x28] sm:$0xff] %vm509_vm2, %v402_v48 }
  0xf4   : > { %531 = vst.msk [vmem:[%s809_s26 + $0xa8] sm:$0xff] %vm509_vm2, %v466_v50 }
  0xf5   : > { %v671_v51 = vpop.f32.mrb[8].mxu0 }
  0xf6   : > { %v423_v52 = vadd.f32 %v671_v51, %v804_v18  ;;  %v687_v53 = vpop.f32.mrb[8].mxu1  ;;  %v414_v54 = vpop.f32.mrb[9].mxu0 }
  0xf7   : > { %v487_v55 = vadd.f32 %v687_v53, %v804_v18  ;;  %v415_v56 = vadd.f32 %v804_v18, %v414_v54  ;;  %v478_v57 = vpop.f32.mrb[9].mxu1  ;;  %v672_v58 = vpop.f32.mrb[10].mxu0 }
  0xf8   : > { %520 = vst.msk [vmem:[%s809_s26 + $0x50] sm:$0xff] %vm509_vm2, %v423_v52  ;;  %v479_v59 = vadd.f32 %v804_v18, %v478_v57  ;;  %v426_v60 = vadd.f32 %v672_v58, %v804_v18  ;;  %v688_v61 = vpop.f32.mrb[10].mxu1  ;;  %v417_v62 = vpop.f32.mrb[11].mxu0 }
  0xf9   : > { %536 = vst.msk [vmem:[%s809_s26 + $0xd0] sm:$0xff] %vm509_vm2, %v487_v55  ;;  %518 = vst.msk [vmem:[%s809_s26 + $0x40] sm:$0xff] %vm509_vm2, %v415_v56  ;;  %v490_v63 = vadd.f32 %v688_v61, %v804_v18  ;;  %v418_v0 = vadd.f32 %v804_v18, %v417_v62  ;;  %v481_v1 = vpop.f32.mrb[11].mxu1 }
  0xfa   : > { %534 = vst.msk [vmem:[%s809_s26 + $0xc0] sm:$0xff] %vm509_vm2, %v479_v59  ;;  %521 = vst.msk [vmem:[%s809_s26 + $0x58] sm:$0xff] %vm509_vm2, %v426_v60  ;;  %v482_v2 = vadd.f32 %v804_v18, %v481_v1 }
  0xfb   : > { %537 = vst.msk [vmem:[%s809_s26 + $0xd8] sm:$0xff] %vm509_vm2, %v490_v63  ;;  %519 = vst.msk [vmem:[%s809_s26 + $0x48] sm:$0xff] %vm509_vm2, %v418_v0 }
  0xfc   : > { %535 = vst.msk [vmem:[%s809_s26 + $0xc8] sm:$0xff] %vm509_vm2, %v482_v2 }
  0xfd   : > { %v675_v3 = vpop.f32.mrb[12].mxu0 }
  0xfe   : > { %v439_v4 = vadd.f32 %v675_v3, %v804_v18  ;;  %v691_v5 = vpop.f32.mrb[12].mxu1  ;;  %v430_v6 = vpop.f32.mrb[13].mxu0 }
  0xff   : > { %v503_v7 = vadd.f32 %v691_v5, %v804_v18  ;;  %v431_v8 = vadd.f32 %v804_v18, %v430_v6  ;;  %v494_v9 = vpop.f32.mrb[13].mxu1  ;;  %v676_v10 = vpop.f32.mrb[14].mxu0 }
 0x100   : > { %524 = vst.msk [vmem:[%s809_s26 + $0x70] sm:$0xff] %vm509_vm2, %v439_v4  ;;  %v495_v11 = vadd.f32 %v804_v18, %v494_v9  ;;  %v442_v12 = vadd.f32 %v676_v10, %v804_v18  ;;  %v692_v13 = vpop.f32.mrb[14].mxu1  ;;  %v433_v14 = vpop.f32.mrb[15].mxu0 }
 0x101   : > { %540 = vst.msk [vmem:[%s809_s26 + $0xf0] sm:$0xff] %vm509_vm2, %v503_v7  ;;  %522 = vst.msk [vmem:[%s809_s26 + $0x60] sm:$0xff] %vm509_vm2, %v431_v8  ;;  %v506_v15 = vadd.f32 %v692_v13, %v804_v18  ;;  %v434_v16 = vadd.f32 %v804_v18, %v433_v14  ;;  %v497_v17 = vpop.f32.mrb[15].mxu1 }
 0x102   : > { %538 = vst.msk [vmem:[%s809_s26 + $0xe0] sm:$0xff] %vm509_vm2, %v495_v11  ;;  %525 = vst.msk [vmem:[%s809_s26 + $0x78] sm:$0xff] %vm509_vm2, %v442_v12  ;;  %v498_v19 = vadd.f32 %v804_v18, %v497_v17 }
 0x103   : > { %541 = vst.msk [vmem:[%s809_s26 + $0xf8] sm:$0xff] %vm509_vm2, %v506_v15  ;;  %523 = vst.msk [vmem:[%s809_s26 + $0x68] sm:$0xff] %vm509_vm2, %v434_v16 }
 0x104   : > { %539 = vst.msk [vmem:[%s809_s26 + $0xe8] sm:$0xff] %vm509_vm2, %v498_v19 }
 0x105 PF: > { %s13_s12 = sadd.s32 1, %s727_s12  }
 0x106   : > { %p10_p4 = scmp.ge.s32.totalorder %s13_s12, 4  }
 0x108   :  { %12 = sbr.rel (!%p10_p4) target bundleno = 1 (0x1), region = 62 }

</bundles_post_ra>
